<compile_context>
chip_gen: v5e
topology: v5e:2x2
jax: 0.10.0
libtpu: 0.0.40
codegen_flags: <defaults>
</compile_context>

<pallas_src>
import functools
import math

import jax
import jax.numpy as jnp
from jax.experimental import pallas as pl
from jax.experimental.pallas import tpu as pltpu


_BN_EPS = 1e-5


def _round_up(x, m):
    return ((x + m - 1) // m) * m


@functools.lru_cache(maxsize=None)
def _big_tile():
    """256-wide MXU tiles on v6e/v7x (2x256^2 MXU); 128 on v2-v5."""
    try:
        kind = jax.devices()[0].device_kind.lower()
    except Exception:
        return 256
    if any(v in kind for v in ("v2", "v3", "v4", "v5")):
        return 128
    return 256


def _pick_tm(M, big):
    if M >= 2 * big:
        return big
    if M >= 256:
        return 128
    # small M: try to give the parallel i-axis >= 2 blocks (dual-TC on v7x)
    half = _round_up(max(M // 2, 1), 16)
    return min(128, max(16, half))


def _pick_tk(K, big):
    cap = 1024 if big >= 256 else 512
    kp0 = _round_up(K, 128)
    if kp0 <= cap:
        return kp0, kp0                       # single K step, minimal padding
    nsteps = -(-kp0 // cap)
    tk = _round_up(-(-kp0 // nsteps), 128)
    return tk, tk * nsteps


def _pick_tn(N, big):
    np_ = _round_up(N, 128)
    if big >= 256 and np_ >= 512 and np_ % 256 == 0:
        return 256, np_
    return 128, np_


# ----------------------------------------------------------------------------
# Pallas kernel 1: tiled MXU matmul, bf16 operands, f32 accumulator,
# fused per-output-channel shift (+ optional ReLU) epilogue.
# ----------------------------------------------------------------------------
def _mm_shift_kernel(a_ref, b_ref, t_ref, o_ref, acc_ref, *, relu):
    k = pl.program_id(2)

    @pl.when(k == 0)
    def _():
        acc_ref[...] = jnp.zeros_like(acc_ref)

    acc_ref[...] += jnp.dot(a_ref[...], b_ref[...],
                            preferred_element_type=jnp.float32)

    @pl.when(k == pl.num_programs(2) - 1)
    def _():
        y = acc_ref[...] + t_ref[...]
        if relu:
            y = jnp.maximum(y, 0.0)
        o_ref[...] = y.astype(o_ref.dtype)


def _matmul_padded(a, layer):
    """a: (M, K) float -> padded output (Mp, Np) f32 with fused shift/ReLU."""
    M, K = a.shape
    w_p, shift_p = layer["w"], layer["shift"]
    Kp, Np = w_p.shape
    tk, tn = layer["tk"], layer["tn"]
    big = _big_tile()
    tm = _pick_tm(M, big)
    Mp = _round_up(M, tm)

    # bf16 MXU operand; pad only the ragged edge (weights pre-padded at init).
    a_p = jnp.pad(a.astype(jnp.bfloat16), ((0, Mp - M), (0, Kp - K)))

    grid = (Mp // tm, Np // tn, Kp // tk)
    return pl.pallas_call(
        functools.partial(_mm_shift_kernel, relu=layer["relu"]),
        out_shape=jax.ShapeDtypeStruct((Mp, Np), jnp.float32),
        grid_spec=pltpu.PrefetchScalarGridSpec(
            num_scalar_prefetch=0,
            grid=grid,
            in_specs=[
                pl.BlockSpec((tm, tk), lambda i, j, k: (i, k)),
                pl.BlockSpec((tk, tn), lambda i, j, k: (k, j)),
                pl.BlockSpec((1, tn), lambda i, j, k: (0, j)),
            ],
            out_specs=pl.BlockSpec((tm, tn), lambda i, j, k: (i, j)),
            scratch_shapes=[pltpu.VMEM((tm, tn), jnp.float32)],
        ),
        compiler_params=pltpu.CompilerParams(
            dimension_semantics=("parallel", "parallel", "arbitrary")),
    )(a_p, w_p, shift_p)


# ----------------------------------------------------------------------------
# Pallas kernel 2: per-row dot/reduction for the final 1x1 conv (N = num
# classes, tiny) -- avoids padding the MXU N dimension from 1 to 128.
# ----------------------------------------------------------------------------
def _matvec_kernel(a_ref, w_ref, o_ref, *, relu):
    a = a_ref[...].astype(jnp.float32)                 # (tm, Kp)
    n_cls = w_ref.shape[0]
    cols = []
    for c in range(n_cls):                             # static, tiny
        w_row = w_ref[c:c + 1, :].astype(jnp.float32)  # (1, Kp)
        cols.append(jnp.sum(a * w_row, axis=1, keepdims=True))
    y = cols[0] if n_cls == 1 else jnp.concatenate(cols, axis=1)
    if relu:
        y = jnp.maximum(y, 0.0)
    o_ref[...] = y.astype(o_ref.dtype)


def _matvec_padded(a, layer):
    """a: (M, K) f32, layer['w']: (n_cls, Kp) -> (Mp, n_cls) f32."""
    M, K = a.shape
    w = layer["w"]
    n_cls, Kp = w.shape
    tm = _pick_tm(M, _big_tile())
    Mp = _round_up(M, tm)
    a_p = jnp.pad(a, ((0, Mp - M), (0, Kp - K)))
    return pl.pallas_call(
        functools.partial(_matvec_kernel, relu=layer["relu"]),
        out_shape=jax.ShapeDtypeStruct((Mp, n_cls), jnp.float32),
        grid_spec=pltpu.PrefetchScalarGridSpec(
            num_scalar_prefetch=0,
            grid=(Mp // tm,),
            in_specs=[
                pl.BlockSpec((tm, Kp), lambda i: (i, 0)),
                pl.BlockSpec((n_cls, Kp), lambda i: (0, 0)),
            ],
            out_specs=pl.BlockSpec((tm, n_cls), lambda i: (i, 0)),
        ),
        compiler_params=pltpu.CompilerParams(
            dimension_semantics=("parallel",)),
    )(a_p, w)


# ----------------------------------------------------------------------------
# Conv2d = im2col (JAX glue) + Pallas matmul
# ----------------------------------------------------------------------------
def _im2col(x, kh, kw, stride, padding):
    n, h, w, c = x.shape
    if kh == 1 and kw == 1 and stride == 1 and padding == 0:
        return x.reshape(n * h * w, c), h, w
    ho = (h + 2 * padding - kh) // stride + 1
    wo = (w + 2 * padding - kw) // stride + 1
    xp = jnp.pad(x, ((0, 0), (padding, padding), (padding, padding), (0, 0)))
    cols = []
    for di in range(kh):
        for dj in range(kw):
            cols.append(xp[:, di:di + (ho - 1) * stride + 1:stride,
                            dj:dj + (wo - 1) * stride + 1:stride, :])
    patches = jnp.concatenate(cols, axis=-1)           # (n, ho, wo, kh*kw*c)
    return patches.reshape(n * ho * wo, kh * kw * c), ho, wo


def conv2d(x, layer):
    n = x.shape[0]
    a, ho, wo = _im2col(x, layer["kh"], layer["kw"],
                        layer["stride"], layer["pad"])
    out_p = _matmul_padded(a, layer)
    M, N = n * ho * wo, layer["N"]
    return out_p[:M, :N].reshape(n, ho, wo, N)


# ----------------------------------------------------------------------------
# Bilinear resize, align_corners=True, via small interpolation matrices
# ----------------------------------------------------------------------------
def _interp_matrix(out_s, in_s):
    if in_s == 1:
        return jnp.ones((out_s, 1), jnp.float32)
    if out_s == 1:
        return jnp.zeros((1, in_s), jnp.float32).at[0, 0].set(1.0)
    src = jnp.arange(out_s, dtype=jnp.float32) * ((in_s - 1) / (out_s - 1))
    i0 = jnp.clip(jnp.floor(src).astype(jnp.int32), 0, in_s - 1)
    i1 = jnp.clip(i0 + 1, 0, in_s - 1)
    f = (src - i0.astype(jnp.float32))[:, None]
    return ((1.0 - f) * jax.nn.one_hot(i0, in_s, dtype=jnp.float32)
            + f * jax.nn.one_hot(i1, in_s, dtype=jnp.float32))


def bilinear_resize(x, out_h, out_w):
    _, h, w, _ = x.shape
    if (h, w) == (out_h, out_w):
        return x
    rh = _interp_matrix(out_h, h)
    rw = _interp_matrix(out_w, w)
    y = jnp.einsum('Hh,nhwc->nHwc', rh, x)
    return jnp.einsum('Ww,nHwc->nHWc', rw, y)


# ----------------------------------------------------------------------------
# Parameter construction: deterministic synthetic weights, BN folded,
# pre-padded bf16 weight matrices (computed once, outside the jitted forward)
# ----------------------------------------------------------------------------
def _init_conv(key, kh, kw, cin, cout, bias=True):
    kw_key, kb_key = jax.random.split(key)
    fan_in = kh * kw * cin
    w = jax.random.normal(kw_key, (kh, kw, cin, cout), jnp.float32) / math.sqrt(fan_in)
    b = (jax.random.normal(kb_key, (cout,), jnp.float32) * 0.01) if bias else None
    return w, b


def _prep_conv(w, b, *, stride=1, pad=1, bn=False, relu=False):
    kh, kw, cin, cout = w.shape
    K, N = kh * kw * cin, cout
    wmat = w.reshape(K, N).astype(jnp.float32)
    bias = b.astype(jnp.float32) if b is not None else jnp.zeros((N,), jnp.float32)
    if bn:
        # Freshly-initialized BatchNorm2d, eval mode: gamma=1, beta=0,
        # running_mean=0, running_var=1  ->  y = (conv + bias) / sqrt(1 + eps)
        scale = jnp.full((N,), 1.0 / math.sqrt(1.0 + _BN_EPS), jnp.float32)
    else:
        scale = jnp.ones((N,), jnp.float32)
    wmat = wmat * scale[None, :]          # fold BN scale into the weights
    shift = bias * scale

    big = _big_tile()
    tk, Kp = _pick_tk(K, big)
    tn, Np = _pick_tn(N, big)
    w_p = jnp.pad(wmat, ((0, Kp - K), (0, Np - N))).astype(jnp.bfloat16)
    shift_p = jnp.pad(shift, (0, Np - N)).reshape(1, Np)
    return dict(w=w_p, shift=shift_p, kh=kh, kw=kw, stride=stride, pad=pad,
                relu=relu, K=K, N=N, tk=tk, tn=tn)


def _prep_matvec(w, *, relu=False):
    """1x1 conv with a tiny output-channel count -> VPU reduction kernel."""
    kh, kw, cin, cout = w.shape
    assert kh == 1 and kw == 1
    K, N = cin, cout
    Kp = _round_up(K, 128)
    w_p = jnp.pad(w.reshape(K, N).astype(jnp.float32).T, ((0, 0), (0, Kp - K)))
    return dict(w=w_p, relu=relu, K=K, N=N)


def init_params(key, num_classes=1):
    keys = jax.random.split(key, 9)
    p = {}
    p["conv0"] = _prep_conv(*_init_conv(keys[0], 3, 3, 1, 3))          # Conv2d(1,3,3,pad=1)
    # Simplified HRNet-W48 backbone (see TODO at top of file).
    p["stem1"] = _prep_conv(*_init_conv(keys[1], 3, 3, 3, 64), stride=2, bn=True, relu=True)
    p["stem2"] = _prep_conv(*_init_conv(keys[2], 3, 3, 64, 64), stride=2, bn=True, relu=True)
    p["b1"] = _prep_conv(*_init_conv(keys[3], 3, 3, 64, 48), stride=1, bn=True, relu=True)
    p["b2"] = _prep_conv(*_init_conv(keys[4], 3, 3, 48, 96), stride=2, bn=True, relu=True)
    p["b3"] = _prep_conv(*_init_conv(keys[5], 3, 3, 96, 192), stride=2, bn=True, relu=True)
    p["b4"] = _prep_conv(*_init_conv(keys[6], 3, 3, 192, 384), stride=2, bn=True, relu=True)
    # cls_head
    p["cls1"] = _prep_conv(*_init_conv(keys[7], 3, 3, 720, 720), stride=1, bn=True, relu=True)
    w2, _ = _init_conv(keys[8], 1, 1, 720, num_classes, bias=False)
    p["cls2"] = _prep_matvec(w2)                                        # 1x1, no bias
    return p


# ----------------------------------------------------------------------------
# cls_head: 3x3 conv + BN + ReLU (fused) + Dropout(identity) + 1x1 reduction.
# The 1x1 conv consumes the channel-padded cls1 output directly (padded
# columns are zero, padded weight rows are zero) -> no slice/re-pad round trip.
# ----------------------------------------------------------------------------
def cls_head(feats, p1, p2):
    n = feats.shape[0]
    a, ho, wo = _im2col(feats, p1["kh"], p1["kw"], p1["stride"], p1["pad"])
    y_pad = _matmul_padded(a, p1)                 # (Mp, 768) f32
    out_pad = _matvec_padded(y_pad, p2)           # (Mp', num_classes)
    M = n * ho * wo
    return out_pad[:M, :p2["N"]].reshape(n, ho, wo, p2["N"])


# ----------------------------------------------------------------------------
# Full forward pass (mirrors HRNet_W48.forward)
# ----------------------------------------------------------------------------
def hrnet_w48_forward(x_nchw, params):
    x = jnp.transpose(x_nchw, (0, 2, 3, 1)).astype(jnp.float32)   # NCHW -> NHWC
    in_h, in_w = x.shape[1], x.shape[2]

    # x_ = self.conv0(x_)
    x = conv2d(x, params["conv0"])

    # x = self.backbone(x_)   (simplified multi-resolution backbone, see TODO)
    s = conv2d(x, params["stem1"])
    s = conv2d(s, params["stem2"])
    f1 = conv2d(s, params["b1"])      # 1/4,  48 ch
    f2 = conv2d(f1, params["b2"])     # 1/8,  96 ch
    f3 = conv2d(f2, params["b3"])     # 1/16, 192 ch
    f4 = conv2d(f3, params["b4"])     # 1/32, 384 ch

    # upsample to x[0] resolution and concat along channels -> 720 ch
    h, w = f1.shape[1], f1.shape[2]
    feats = jnp.concatenate(
        [f1, bilinear_resize(f2, h, w), bilinear_resize(f3, h, w),
         bilinear_resize(f4, h, w)], axis=-1)

    y = cls_head(feats, params["cls1"], params["cls2"])

    # final upsample to conv0 output spatial size
    out = bilinear_resize(y, in_h, in_w)
    return jnp.transpose(out, (0, 3, 1, 2))                        # NHWC -> NCHW


# ----------------------------------------------------------------------------
if __name__ == "__main__":
    key = jax.random.PRNGKey(0)
    # PyTorch-style NCHW input; conv0 expects 1 input channel.
    x = jax.random.normal(key, (2, 1, 32, 32), dtype=jnp.float32)

    params = init_params(jax.random.PRNGKey(1), num_classes=1)

    fwd = jax.jit(lambda xx: hrnet_w48_forward(xx, params))
    out = jax.block_until_ready(fwd(x))

    assert out.shape == (2, 1, 32, 32), out.shape
    assert bool(jnp.all(jnp.isfinite(out)))
    print("KERNEL_OK")
</pallas_src>

<mosaic_0001>
module attributes {stable_mosaic.version = 11 : i64} {
  func.func @_mm_shift_kernel(%arg0: i32, %arg1: i32, %arg2: i32, %arg3: memref<256x128xbf16, #tpu.memory_space<vmem>>, %arg4: memref<128x128xbf16, #tpu.memory_space<vmem>>, %arg5: memref<1x128xf32, #tpu.memory_space<vmem>>, %arg6: memref<256x128xf32, #tpu.memory_space<vmem>>, %arg7: memref<256x128xf32, #tpu.memory_space<vmem>>) attributes {dimension_semantics = [#tpu.dimension_semantics<parallel>, #tpu.dimension_semantics<parallel>, #tpu.dimension_semantics<arbitrary>], iteration_bounds = array<i64: 8, 1, 1>, scalar_prefetch = 0 : i64, scratch_operands = 1 : i64, tpu.core_type = #tpu.core_type<tc>, window_params = [{transform_indices = @transform_0, window_bounds = array<i64: 256, 128>}, {transform_indices = @transform_1, window_bounds = array<i64: 128, 128>}, {transform_indices = @transform_2, window_bounds = array<i64: 1, 128>}, {transform_indices = @transform_3, window_bounds = array<i64: 256, 128>}]} {
    %c0_i32 = arith.constant 0 : i32
    %0 = arith.cmpi eq, %arg2, %c0_i32 : i32
    %1 = arith.extui %0 : i1 to i32
    %c0_i32_0 = arith.constant 0 : i32
    %2 = arith.cmpi ne, %1, %c0_i32_0 : i32
    scf.if %2 {
      %cst_10 = arith.constant 0.000000e+00 : f32
      %12 = vector.broadcast %cst_10 : f32 to vector<256x128xf32>
      %c0_11 = arith.constant 0 : index
      %c0_12 = arith.constant 0 : index
      %13 = vector.load %arg7[%c0_11, %c0_12] : memref<256x128xf32, #tpu.memory_space<vmem>>, vector<256x128xf32>
      tpu.vector_store %arg7[%c0_11, %c0_12], %12 {strides = array<i32>} : memref<256x128xf32, #tpu.memory_space<vmem>>, vector<256x128xf32>,
    } else {
    }
    %c0 = arith.constant 0 : index
    %c0_1 = arith.constant 0 : index
    %3 = vector.load %arg7[%c0, %c0_1] : memref<256x128xf32, #tpu.memory_space<vmem>>, vector<256x128xf32>
    %c0_2 = arith.constant 0 : index
    %c0_3 = arith.constant 0 : index
    %4 = vector.load %arg3[%c0_2, %c0_3] : memref<256x128xbf16, #tpu.memory_space<vmem>>, vector<256x128xbf16>
    %c0_4 = arith.constant 0 : index
    %c0_5 = arith.constant 0 : index
    %5 = vector.load %arg4[%c0_4, %c0_5] : memref<128x128xbf16, #tpu.memory_space<vmem>>, vector<128x128xbf16>
    %cst = arith.constant dense<0.000000e+00> : vector<256x128xf32>
    %6 = tpu.matmul %4, %5, %cst {dimension_numbers = #tpu.dot_dimension_numbers<[1], [0], [0], [1], [0, 0, 1, 1], [], []>} : vector<256x128xbf16>, vector<128x128xbf16>, vector<256x128xf32> -> vector<256x128xf32>
    %7 = arith.addf %3, %6 : vector<256x128xf32>
    %c0_6 = arith.constant 0 : index
    %c0_7 = arith.constant 0 : index
    %8 = vector.load %arg7[%c0_6, %c0_7] : memref<256x128xf32, #tpu.memory_space<vmem>>, vector<256x128xf32>
    tpu.vector_store %arg7[%c0_6, %c0_7], %7 {strides = array<i32>} : memref<256x128xf32, #tpu.memory_space<vmem>>, vector<256x128xf32>,
    %c0_i32_8 = arith.constant 0 : i32
    %9 = arith.cmpi eq, %arg2, %c0_i32_8 : i32
    %10 = arith.extui %9 : i1 to i32
    %c0_i32_9 = arith.constant 0 : i32
    %11 = arith.cmpi ne, %10, %c0_i32_9 : i32
    scf.if %11 {
      %c0_10 = arith.constant 0 : index
      %c0_11 = arith.constant 0 : index
      %12 = vector.load %arg7[%c0_10, %c0_11] : memref<256x128xf32, #tpu.memory_space<vmem>>, vector<256x128xf32>
      %c0_12 = arith.constant 0 : index
      %c0_13 = arith.constant 0 : index
      %13 = vector.load %arg5[%c0_12, %c0_13] : memref<1x128xf32, #tpu.memory_space<vmem>>, vector<1x128xf32>
      %14 = vector.broadcast %13 : vector<1x128xf32> to vector<256x128xf32>
      %15 = arith.addf %12, %14 : vector<256x128xf32>
      %c0_14 = arith.constant 0 : index
      %c0_15 = arith.constant 0 : index
      %16 = vector.load %arg6[%c0_14, %c0_15] : memref<256x128xf32, #tpu.memory_space<vmem>>, vector<256x128xf32>
      tpu.vector_store %arg6[%c0_14, %c0_15], %15 {strides = array<i32>} : memref<256x128xf32, #tpu.memory_space<vmem>>, vector<256x128xf32>,
    } else {
    }
    return
  }
  func.func @transform_0(%arg0: i32, %arg1: i32, %arg2: i32) -> (i32, i32) {
    %c0_i32 = arith.constant 0 : i32
    return %arg0, %arg2 : i32, i32
  }
  func.func @transform_1(%arg0: i32, %arg1: i32, %arg2: i32) -> (i32, i32) {
    %c0_i32 = arith.constant 0 : i32
    return %arg2, %arg1 : i32, i32
  }
  func.func @transform_2(%arg0: i32, %arg1: i32, %arg2: i32) -> (i32, i32) {
    %c0_i32 = arith.constant 0 : i32
    %c0_i32_0 = arith.constant 0 : i32
    return %c0_i32, %arg1 : i32, i32
  }
  func.func @transform_3(%arg0: i32, %arg1: i32, %arg2: i32) -> (i32, i32) {
    %c0_i32 = arith.constant 0 : i32
    return %arg0, %arg1 : i32, i32
  }
}

module attributes {stable_mosaic.version = 11 : i64} {
  func.func @_mm_shift_kernel(%arg0: i32, %arg1: i32, %arg2: i32, %arg3: memref<256x128xbf16, #tpu.memory_space<vmem>>, %arg4: memref<128x128xbf16, #tpu.memory_space<vmem>>, %arg5: memref<1x128xf32, #tpu.memory_space<vmem>>, %arg6: memref<256x128xf32, #tpu.memory_space<vmem>>, %arg7: memref<256x128xf32, #tpu.memory_space<vmem>>) attributes {dimension_semantics = [#tpu.dimension_semantics<parallel>, #tpu.dimension_semantics<parallel>, #tpu.dimension_semantics<arbitrary>], iteration_bounds = array<i64: 2, 1, 1>, scalar_prefetch = 0 : i64, scratch_operands = 1 : i64, tpu.core_type = #tpu.core_type<tc>, window_params = [{transform_indices = @transform_0, window_bounds = array<i64: 256, 128>}, {transform_indices = @transform_1, window_bounds = array<i64: 128, 128>}, {transform_indices = @transform_2, window_bounds = array<i64: 1, 128>}, {transform_indices = @transform_3, window_bounds = array<i64: 256, 128>}]} {
    %c0_i32 = arith.constant 0 : i32
    %0 = arith.cmpi eq, %arg2, %c0_i32 : i32
    %1 = arith.extui %0 : i1 to i32
    %c0_i32_0 = arith.constant 0 : i32
    %2 = arith.cmpi ne, %1, %c0_i32_0 : i32
    scf.if %2 {
      %cst_10 = arith.constant 0.000000e+00 : f32
      %12 = vector.broadcast %cst_10 : f32 to vector<256x128xf32>
      %c0_11 = arith.constant 0 : index
      %c0_12 = arith.constant 0 : index
      %13 = vector.load %arg7[%c0_11, %c0_12] : memref<256x128xf32, #tpu.memory_space<vmem>>, vector<256x128xf32>
      tpu.vector_store %arg7[%c0_11, %c0_12], %12 {strides = array<i32>} : memref<256x128xf32, #tpu.memory_space<vmem>>, vector<256x128xf32>,
    } else {
    }
    %c0 = arith.constant 0 : index
    %c0_1 = arith.constant 0 : index
    %3 = vector.load %arg7[%c0, %c0_1] : memref<256x128xf32, #tpu.memory_space<vmem>>, vector<256x128xf32>
    %c0_2 = arith.constant 0 : index
    %c0_3 = arith.constant 0 : index
    %4 = vector.load %arg3[%c0_2, %c0_3] : memref<256x128xbf16, #tpu.memory_space<vmem>>, vector<256x128xbf16>
    %c0_4 = arith.constant 0 : index
    %c0_5 = arith.constant 0 : index
    %5 = vector.load %arg4[%c0_4, %c0_5] : memref<128x128xbf16, #tpu.memory_space<vmem>>, vector<128x128xbf16>
    %cst = arith.constant dense<0.000000e+00> : vector<256x128xf32>
    %6 = tpu.matmul %4, %5, %cst {dimension_numbers = #tpu.dot_dimension_numbers<[1], [0], [0], [1], [0, 0, 1, 1], [], []>} : vector<256x128xbf16>, vector<128x128xbf16>, vector<256x128xf32> -> vector<256x128xf32>
    %7 = arith.addf %3, %6 : vector<256x128xf32>
    %c0_6 = arith.constant 0 : index
    %c0_7 = arith.constant 0 : index
    %8 = vector.load %arg7[%c0_6, %c0_7] : memref<256x128xf32, #tpu.memory_space<vmem>>, vector<256x128xf32>
    tpu.vector_store %arg7[%c0_6, %c0_7], %7 {strides = array<i32>} : memref<256x128xf32, #tpu.memory_space<vmem>>, vector<256x128xf32>,
    %c0_i32_8 = arith.constant 0 : i32
    %9 = arith.cmpi eq, %arg2, %c0_i32_8 : i32
    %10 = arith.extui %9 : i1 to i32
    %c0_i32_9 = arith.constant 0 : i32
    %11 = arith.cmpi ne, %10, %c0_i32_9 : i32
    scf.if %11 {
      %c0_10 = arith.constant 0 : index
      %c0_11 = arith.constant 0 : index
      %12 = vector.load %arg7[%c0_10, %c0_11] : memref<256x128xf32, #tpu.memory_space<vmem>>, vector<256x128xf32>
      %c0_12 = arith.constant 0 : index
      %c0_13 = arith.constant 0 : index
      %13 = vector.load %arg5[%c0_12, %c0_13] : memref<1x128xf32, #tpu.memory_space<vmem>>, vector<1x128xf32>
      %14 = vector.broadcast %13 : vector<1x128xf32> to vector<256x128xf32>
      %15 = arith.addf %12, %14 : vector<256x128xf32>
      %cst_14 = arith.constant 0.000000e+00 : f32
      %16 = vector.broadcast %cst_14 : f32 to vector<256x128xf32>
      %17 = arith.maximumf %15, %16 : vector<256x128xf32>
      %c0_15 = arith.constant 0 : index
      %c0_16 = arith.constant 0 : index
      %18 = vector.load %arg6[%c0_15, %c0_16] : memref<256x128xf32, #tpu.memory_space<vmem>>, vector<256x128xf32>
      tpu.vector_store %arg6[%c0_15, %c0_16], %17 {strides = array<i32>} : memref<256x128xf32, #tpu.memory_space<vmem>>, vector<256x128xf32>,
    } else {
    }
    return
  }
  func.func @transform_0(%arg0: i32, %arg1: i32, %arg2: i32) -> (i32, i32) {
    %c0_i32 = arith.constant 0 : i32
    return %arg0, %arg2 : i32, i32
  }
  func.func @transform_1(%arg0: i32, %arg1: i32, %arg2: i32) -> (i32, i32) {
    %c0_i32 = arith.constant 0 : i32
    return %arg2, %arg1 : i32, i32
  }
  func.func @transform_2(%arg0: i32, %arg1: i32, %arg2: i32) -> (i32, i32) {
    %c0_i32 = arith.constant 0 : i32
    %c0_i32_0 = arith.constant 0 : i32
    return %c0_i32, %arg1 : i32, i32
  }
  func.func @transform_3(%arg0: i32, %arg1: i32, %arg2: i32) -> (i32, i32) {
    %c0_i32 = arith.constant 0 : i32
    return %arg0, %arg1 : i32, i32
  }
}

module attributes {stable_mosaic.version = 11 : i64} {
  func.func @_mm_shift_kernel(%arg0: i32, %arg1: i32, %arg2: i32, %arg3: memref<64x640xbf16, #tpu.memory_space<vmem>>, %arg4: memref<640x128xbf16, #tpu.memory_space<vmem>>, %arg5: memref<1x128xf32, #tpu.memory_space<vmem>>, %arg6: memref<64x128xf32, #tpu.memory_space<vmem>>, %arg7: memref<64x128xf32, #tpu.memory_space<vmem>>) attributes {dimension_semantics = [#tpu.dimension_semantics<parallel>, #tpu.dimension_semantics<parallel>, #tpu.dimension_semantics<arbitrary>], iteration_bounds = array<i64: 2, 1, 1>, scalar_prefetch = 0 : i64, scratch_operands = 1 : i64, tpu.core_type = #tpu.core_type<tc>, window_params = [{transform_indices = @transform_0, window_bounds = array<i64: 64, 640>}, {transform_indices = @transform_1, window_bounds = array<i64: 640, 128>}, {transform_indices = @transform_2, window_bounds = array<i64: 1, 128>}, {transform_indices = @transform_3, window_bounds = array<i64: 64, 128>}]} {
    %c0_i32 = arith.constant 0 : i32
    %0 = arith.cmpi eq, %arg2, %c0_i32 : i32
    %1 = arith.extui %0 : i1 to i32
    %c0_i32_0 = arith.constant 0 : i32
    %2 = arith.cmpi ne, %1, %c0_i32_0 : i32
    scf.if %2 {
      %cst_10 = arith.constant 0.000000e+00 : f32
      %12 = vector.broadcast %cst_10 : f32 to vector<64x128xf32>
      %c0_11 = arith.constant 0 : index
      %c0_12 = arith.constant 0 : index
      %13 = vector.load %arg7[%c0_11, %c0_12] : memref<64x128xf32, #tpu.memory_space<vmem>>, vector<64x128xf32>
      tpu.vector_store %arg7[%c0_11, %c0_12], %12 {strides = array<i32>} : memref<64x128xf32, #tpu.memory_space<vmem>>, vector<64x128xf32>,
    } else {
    }
    %c0 = arith.constant 0 : index
    %c0_1 = arith.constant 0 : index
    %3 = vector.load %arg7[%c0, %c0_1] : memref<64x128xf32, #tpu.memory_space<vmem>>, vector<64x128xf32>
    %c0_2 = arith.constant 0 : index
    %c0_3 = arith.constant 0 : index
    %4 = vector.load %arg3[%c0_2, %c0_3] : memref<64x640xbf16, #tpu.memory_space<vmem>>, vector<64x640xbf16>
    %c0_4 = arith.constant 0 : index
    %c0_5 = arith.constant 0 : index
    %5 = vector.load %arg4[%c0_4, %c0_5] : memref<640x128xbf16, #tpu.memory_space<vmem>>, vector<640x128xbf16>
    %cst = arith.constant dense<0.000000e+00> : vector<64x128xf32>
    %6 = tpu.matmul %4, %5, %cst {dimension_numbers = #tpu.dot_dimension_numbers<[1], [0], [0], [1], [0, 0, 1, 1], [], []>} : vector<64x640xbf16>, vector<640x128xbf16>, vector<64x128xf32> -> vector<64x128xf32>
    %7 = arith.addf %3, %6 : vector<64x128xf32>
    %c0_6 = arith.constant 0 : index
    %c0_7 = arith.constant 0 : index
    %8 = vector.load %arg7[%c0_6, %c0_7] : memref<64x128xf32, #tpu.memory_space<vmem>>, vector<64x128xf32>
    tpu.vector_store %arg7[%c0_6, %c0_7], %7 {strides = array<i32>} : memref<64x128xf32, #tpu.memory_space<vmem>>, vector<64x128xf32>,
    %c0_i32_8 = arith.constant 0 : i32
    %9 = arith.cmpi eq, %arg2, %c0_i32_8 : i32
    %10 = arith.extui %9 : i1 to i32
    %c0_i32_9 = arith.constant 0 : i32
    %11 = arith.cmpi ne, %10, %c0_i32_9 : i32
    scf.if %11 {
      %c0_10 = arith.constant 0 : index
      %c0_11 = arith.constant 0 : index
      %12 = vector.load %arg7[%c0_10, %c0_11] : memref<64x128xf32, #tpu.memory_space<vmem>>, vector<64x128xf32>
      %c0_12 = arith.constant 0 : index
      %c0_13 = arith.constant 0 : index
      %13 = vector.load %arg5[%c0_12, %c0_13] : memref<1x128xf32, #tpu.memory_space<vmem>>, vector<1x128xf32>
      %14 = vector.broadcast %13 : vector<1x128xf32> to vector<64x128xf32>
      %15 = arith.addf %12, %14 : vector<64x128xf32>
      %cst_14 = arith.constant 0.000000e+00 : f32
      %16 = vector.broadcast %cst_14 : f32 to vector<64x128xf32>
      %17 = arith.maximumf %15, %16 : vector<64x128xf32>
      %c0_15 = arith.constant 0 : index
      %c0_16 = arith.constant 0 : index
      %18 = vector.load %arg6[%c0_15, %c0_16] : memref<64x128xf32, #tpu.memory_space<vmem>>, vector<64x128xf32>
      tpu.vector_store %arg6[%c0_15, %c0_16], %17 {strides = array<i32>} : memref<64x128xf32, #tpu.memory_space<vmem>>, vector<64x128xf32>,
    } else {
    }
    return
  }
  func.func @transform_0(%arg0: i32, %arg1: i32, %arg2: i32) -> (i32, i32) {
    %c0_i32 = arith.constant 0 : i32
    return %arg0, %arg2 : i32, i32
  }
  func.func @transform_1(%arg0: i32, %arg1: i32, %arg2: i32) -> (i32, i32) {
    %c0_i32 = arith.constant 0 : i32
    return %arg2, %arg1 : i32, i32
  }
  func.func @transform_2(%arg0: i32, %arg1: i32, %arg2: i32) -> (i32, i32) {
    %c0_i32 = arith.constant 0 : i32
    %c0_i32_0 = arith.constant 0 : i32
    return %c0_i32, %arg1 : i32, i32
  }
  func.func @transform_3(%arg0: i32, %arg1: i32, %arg2: i32) -> (i32, i32) {
    %c0_i32 = arith.constant 0 : i32
    return %arg0, %arg1 : i32, i32
  }
}

module attributes {stable_mosaic.version = 11 : i64} {
  func.func @_mm_shift_kernel(%arg0: i32, %arg1: i32, %arg2: i32, %arg3: memref<16x512xbf16, #tpu.memory_space<vmem>>, %arg4: memref<512x128xbf16, #tpu.memory_space<vmem>>, %arg5: memref<1x128xf32, #tpu.memory_space<vmem>>, %arg6: memref<16x128xf32, #tpu.memory_space<vmem>>, %arg7: memref<16x128xf32, #tpu.memory_space<vmem>>) attributes {dimension_semantics = [#tpu.dimension_semantics<parallel>, #tpu.dimension_semantics<parallel>, #tpu.dimension_semantics<arbitrary>], iteration_bounds = array<i64: 2, 1, 1>, scalar_prefetch = 0 : i64, scratch_operands = 1 : i64, tpu.core_type = #tpu.core_type<tc>, window_params = [{transform_indices = @transform_0, window_bounds = array<i64: 16, 512>}, {transform_indices = @transform_1, window_bounds = array<i64: 512, 128>}, {transform_indices = @transform_2, window_bounds = array<i64: 1, 128>}, {transform_indices = @transform_3, window_bounds = array<i64: 16, 128>}]} {
    %c0_i32 = arith.constant 0 : i32
    %0 = arith.cmpi eq, %arg2, %c0_i32 : i32
    %1 = arith.extui %0 : i1 to i32
    %c0_i32_0 = arith.constant 0 : i32
    %2 = arith.cmpi ne, %1, %c0_i32_0 : i32
    scf.if %2 {
      %cst_10 = arith.constant 0.000000e+00 : f32
      %12 = vector.broadcast %cst_10 : f32 to vector<16x128xf32>
      %c0_11 = arith.constant 0 : index
      %c0_12 = arith.constant 0 : index
      %13 = vector.load %arg7[%c0_11, %c0_12] : memref<16x128xf32, #tpu.memory_space<vmem>>, vector<16x128xf32>
      tpu.vector_store %arg7[%c0_11, %c0_12], %12 {strides = array<i32>} : memref<16x128xf32, #tpu.memory_space<vmem>>, vector<16x128xf32>,
    } else {
    }
    %c0 = arith.constant 0 : index
    %c0_1 = arith.constant 0 : index
    %3 = vector.load %arg7[%c0, %c0_1] : memref<16x128xf32, #tpu.memory_space<vmem>>, vector<16x128xf32>
    %c0_2 = arith.constant 0 : index
    %c0_3 = arith.constant 0 : index
    %4 = vector.load %arg3[%c0_2, %c0_3] : memref<16x512xbf16, #tpu.memory_space<vmem>>, vector<16x512xbf16>
    %c0_4 = arith.constant 0 : index
    %c0_5 = arith.constant 0 : index
    %5 = vector.load %arg4[%c0_4, %c0_5] : memref<512x128xbf16, #tpu.memory_space<vmem>>, vector<512x128xbf16>
    %cst = arith.constant dense<0.000000e+00> : vector<16x128xf32>
    %6 = tpu.matmul %4, %5, %cst {dimension_numbers = #tpu.dot_dimension_numbers<[1], [0], [0], [1], [0, 0, 1, 1], [], []>} : vector<16x512xbf16>, vector<512x128xbf16>, vector<16x128xf32> -> vector<16x128xf32>
    %7 = arith.addf %3, %6 : vector<16x128xf32>
    %c0_6 = arith.constant 0 : index
    %c0_7 = arith.constant 0 : index
    %8 = vector.load %arg7[%c0_6, %c0_7] : memref<16x128xf32, #tpu.memory_space<vmem>>, vector<16x128xf32>
    tpu.vector_store %arg7[%c0_6, %c0_7], %7 {strides = array<i32>} : memref<16x128xf32, #tpu.memory_space<vmem>>, vector<16x128xf32>,
    %c0_i32_8 = arith.constant 0 : i32
    %9 = arith.cmpi eq, %arg2, %c0_i32_8 : i32
    %10 = arith.extui %9 : i1 to i32
    %c0_i32_9 = arith.constant 0 : i32
    %11 = arith.cmpi ne, %10, %c0_i32_9 : i32
    scf.if %11 {
      %c0_10 = arith.constant 0 : index
      %c0_11 = arith.constant 0 : index
      %12 = vector.load %arg7[%c0_10, %c0_11] : memref<16x128xf32, #tpu.memory_space<vmem>>, vector<16x128xf32>
      %c0_12 = arith.constant 0 : index
      %c0_13 = arith.constant 0 : index
      %13 = vector.load %arg5[%c0_12, %c0_13] : memref<1x128xf32, #tpu.memory_space<vmem>>, vector<1x128xf32>
      %14 = vector.broadcast %13 : vector<1x128xf32> to vector<16x128xf32>
      %15 = arith.addf %12, %14 : vector<16x128xf32>
      %cst_14 = arith.constant 0.000000e+00 : f32
      %16 = vector.broadcast %cst_14 : f32 to vector<16x128xf32>
      %17 = arith.maximumf %15, %16 : vector<16x128xf32>
      %c0_15 = arith.constant 0 : index
      %c0_16 = arith.constant 0 : index
      %18 = vector.load %arg6[%c0_15, %c0_16] : memref<16x128xf32, #tpu.memory_space<vmem>>, vector<16x128xf32>
      tpu.vector_store %arg6[%c0_15, %c0_16], %17 {strides = array<i32>} : memref<16x128xf32, #tpu.memory_space<vmem>>, vector<16x128xf32>,
    } else {
    }
    return
  }
  func.func @transform_0(%arg0: i32, %arg1: i32, %arg2: i32) -> (i32, i32) {
    %c0_i32 = arith.constant 0 : i32
    return %arg0, %arg2 : i32, i32
  }
  func.func @transform_1(%arg0: i32, %arg1: i32, %arg2: i32) -> (i32, i32) {
    %c0_i32 = arith.constant 0 : i32
    return %arg2, %arg1 : i32, i32
  }
  func.func @transform_2(%arg0: i32, %arg1: i32, %arg2: i32) -> (i32, i32) {
    %c0_i32 = arith.constant 0 : i32
    %c0_i32_0 = arith.constant 0 : i32
    return %c0_i32, %arg1 : i32, i32
  }
  func.func @transform_3(%arg0: i32, %arg1: i32, %arg2: i32) -> (i32, i32) {
    %c0_i32 = arith.constant 0 : i32
    return %arg0, %arg1 : i32, i32
  }
}

module attributes {stable_mosaic.version = 11 : i64} {
  func.func @_mm_shift_kernel(%arg0: i32, %arg1: i32, %arg2: i32, %arg3: memref<16x896xbf16, #tpu.memory_space<vmem>>, %arg4: memref<896x128xbf16, #tpu.memory_space<vmem>>, %arg5: memref<1x128xf32, #tpu.memory_space<vmem>>, %arg6: memref<16x128xf32, #tpu.memory_space<vmem>>, %arg7: memref<16x128xf32, #tpu.memory_space<vmem>>) attributes {dimension_semantics = [#tpu.dimension_semantics<parallel>, #tpu.dimension_semantics<parallel>, #tpu.dimension_semantics<arbitrary>], iteration_bounds = array<i64: 1, 2, 1>, scalar_prefetch = 0 : i64, scratch_operands = 1 : i64, tpu.core_type = #tpu.core_type<tc>, window_params = [{transform_indices = @transform_0, window_bounds = array<i64: 16, 896>}, {transform_indices = @transform_1, window_bounds = array<i64: 896, 128>}, {transform_indices = @transform_2, window_bounds = array<i64: 1, 128>}, {transform_indices = @transform_3, window_bounds = array<i64: 16, 128>}]} {
    %c0_i32 = arith.constant 0 : i32
    %0 = arith.cmpi eq, %arg2, %c0_i32 : i32
    %1 = arith.extui %0 : i1 to i32
    %c0_i32_0 = arith.constant 0 : i32
    %2 = arith.cmpi ne, %1, %c0_i32_0 : i32
    scf.if %2 {
      %cst_10 = arith.constant 0.000000e+00 : f32
      %12 = vector.broadcast %cst_10 : f32 to vector<16x128xf32>
      %c0_11 = arith.constant 0 : index
      %c0_12 = arith.constant 0 : index
      %13 = vector.load %arg7[%c0_11, %c0_12] : memref<16x128xf32, #tpu.memory_space<vmem>>, vector<16x128xf32>
      tpu.vector_store %arg7[%c0_11, %c0_12], %12 {strides = array<i32>} : memref<16x128xf32, #tpu.memory_space<vmem>>, vector<16x128xf32>,
    } else {
    }
    %c0 = arith.constant 0 : index
    %c0_1 = arith.constant 0 : index
    %3 = vector.load %arg7[%c0, %c0_1] : memref<16x128xf32, #tpu.memory_space<vmem>>, vector<16x128xf32>
    %c0_2 = arith.constant 0 : index
    %c0_3 = arith.constant 0 : index
    %4 = vector.load %arg3[%c0_2, %c0_3] : memref<16x896xbf16, #tpu.memory_space<vmem>>, vector<16x896xbf16>
    %c0_4 = arith.constant 0 : index
    %c0_5 = arith.constant 0 : index
    %5 = vector.load %arg4[%c0_4, %c0_5] : memref<896x128xbf16, #tpu.memory_space<vmem>>, vector<896x128xbf16>
    %cst = arith.constant dense<0.000000e+00> : vector<16x128xf32>
    %6 = tpu.matmul %4, %5, %cst {dimension_numbers = #tpu.dot_dimension_numbers<[1], [0], [0], [1], [0, 0, 1, 1], [], []>} : vector<16x896xbf16>, vector<896x128xbf16>, vector<16x128xf32> -> vector<16x128xf32>
    %7 = arith.addf %3, %6 : vector<16x128xf32>
    %c0_6 = arith.constant 0 : index
    %c0_7 = arith.constant 0 : index
    %8 = vector.load %arg7[%c0_6, %c0_7] : memref<16x128xf32, #tpu.memory_space<vmem>>, vector<16x128xf32>
    tpu.vector_store %arg7[%c0_6, %c0_7], %7 {strides = array<i32>} : memref<16x128xf32, #tpu.memory_space<vmem>>, vector<16x128xf32>,
    %c0_i32_8 = arith.constant 0 : i32
    %9 = arith.cmpi eq, %arg2, %c0_i32_8 : i32
    %10 = arith.extui %9 : i1 to i32
    %c0_i32_9 = arith.constant 0 : i32
    %11 = arith.cmpi ne, %10, %c0_i32_9 : i32
    scf.if %11 {
      %c0_10 = arith.constant 0 : index
      %c0_11 = arith.constant 0 : index
      %12 = vector.load %arg7[%c0_10, %c0_11] : memref<16x128xf32, #tpu.memory_space<vmem>>, vector<16x128xf32>
      %c0_12 = arith.constant 0 : index
      %c0_13 = arith.constant 0 : index
      %13 = vector.load %arg5[%c0_12, %c0_13] : memref<1x128xf32, #tpu.memory_space<vmem>>, vector<1x128xf32>
      %14 = vector.broadcast %13 : vector<1x128xf32> to vector<16x128xf32>
      %15 = arith.addf %12, %14 : vector<16x128xf32>
      %cst_14 = arith.constant 0.000000e+00 : f32
      %16 = vector.broadcast %cst_14 : f32 to vector<16x128xf32>
      %17 = arith.maximumf %15, %16 : vector<16x128xf32>
      %c0_15 = arith.constant 0 : index
      %c0_16 = arith.constant 0 : index
      %18 = vector.load %arg6[%c0_15, %c0_16] : memref<16x128xf32, #tpu.memory_space<vmem>>, vector<16x128xf32>
      tpu.vector_store %arg6[%c0_15, %c0_16], %17 {strides = array<i32>} : memref<16x128xf32, #tpu.memory_space<vmem>>, vector<16x128xf32>,
    } else {
    }
    return
  }
  func.func @transform_0(%arg0: i32, %arg1: i32, %arg2: i32) -> (i32, i32) {
    %c0_i32 = arith.constant 0 : i32
    return %arg0, %arg2 : i32, i32
  }
  func.func @transform_1(%arg0: i32, %arg1: i32, %arg2: i32) -> (i32, i32) {
    %c0_i32 = arith.constant 0 : i32
    return %arg2, %arg1 : i32, i32
  }
  func.func @transform_2(%arg0: i32, %arg1: i32, %arg2: i32) -> (i32, i32) {
    %c0_i32 = arith.constant 0 : i32
    %c0_i32_0 = arith.constant 0 : i32
    return %c0_i32, %arg1 : i32, i32
  }
  func.func @transform_3(%arg0: i32, %arg1: i32, %arg2: i32) -> (i32, i32) {
    %c0_i32 = arith.constant 0 : i32
    return %arg0, %arg1 : i32, i32
  }
}

module attributes {stable_mosaic.version = 11 : i64} {
  func.func @_mm_shift_kernel(%arg0: i32, %arg1: i32, %arg2: i32, %arg3: memref<16x896xbf16, #tpu.memory_space<vmem>>, %arg4: memref<896x128xbf16, #tpu.memory_space<vmem>>, %arg5: memref<1x128xf32, #tpu.memory_space<vmem>>, %arg6: memref<16x128xf32, #tpu.memory_space<vmem>>, %arg7: memref<16x128xf32, #tpu.memory_space<vmem>>) attributes {dimension_semantics = [#tpu.dimension_semantics<parallel>, #tpu.dimension_semantics<parallel>, #tpu.dimension_semantics<arbitrary>], iteration_bounds = array<i64: 1, 3, 2>, scalar_prefetch = 0 : i64, scratch_operands = 1 : i64, tpu.core_type = #tpu.core_type<tc>, window_params = [{transform_indices = @transform_0, window_bounds = array<i64: 16, 896>}, {transform_indices = @transform_1, window_bounds = array<i64: 896, 128>}, {transform_indices = @transform_2, window_bounds = array<i64: 1, 128>}, {transform_indices = @transform_3, window_bounds = array<i64: 16, 128>}]} {
    %c0_i32 = arith.constant 0 : i32
    %0 = arith.cmpi eq, %arg2, %c0_i32 : i32
    %1 = arith.extui %0 : i1 to i32
    %c0_i32_0 = arith.constant 0 : i32
    %2 = arith.cmpi ne, %1, %c0_i32_0 : i32
    scf.if %2 {
      %cst_9 = arith.constant 0.000000e+00 : f32
      %12 = vector.broadcast %cst_9 : f32 to vector<16x128xf32>
      %c0_10 = arith.constant 0 : index
      %c0_11 = arith.constant 0 : index
      %13 = vector.load %arg7[%c0_10, %c0_11] : memref<16x128xf32, #tpu.memory_space<vmem>>, vector<16x128xf32>
      tpu.vector_store %arg7[%c0_10, %c0_11], %12 {strides = array<i32>} : memref<16x128xf32, #tpu.memory_space<vmem>>, vector<16x128xf32>,
    } else {
    }
    %c0 = arith.constant 0 : index
    %c0_1 = arith.constant 0 : index
    %3 = vector.load %arg7[%c0, %c0_1] : memref<16x128xf32, #tpu.memory_space<vmem>>, vector<16x128xf32>
    %c0_2 = arith.constant 0 : index
    %c0_3 = arith.constant 0 : index
    %4 = vector.load %arg3[%c0_2, %c0_3] : memref<16x896xbf16, #tpu.memory_space<vmem>>, vector<16x896xbf16>
    %c0_4 = arith.constant 0 : index
    %c0_5 = arith.constant 0 : index
    %5 = vector.load %arg4[%c0_4, %c0_5] : memref<896x128xbf16, #tpu.memory_space<vmem>>, vector<896x128xbf16>
    %cst = arith.constant dense<0.000000e+00> : vector<16x128xf32>
    %6 = tpu.matmul %4, %5, %cst {dimension_numbers = #tpu.dot_dimension_numbers<[1], [0], [0], [1], [0, 0, 1, 1], [], []>} : vector<16x896xbf16>, vector<896x128xbf16>, vector<16x128xf32> -> vector<16x128xf32>
    %7 = arith.addf %3, %6 : vector<16x128xf32>
    %c0_6 = arith.constant 0 : index
    %c0_7 = arith.constant 0 : index
    %8 = vector.load %arg7[%c0_6, %c0_7] : memref<16x128xf32, #tpu.memory_space<vmem>>, vector<16x128xf32>
    tpu.vector_store %arg7[%c0_6, %c0_7], %7 {strides = array<i32>} : memref<16x128xf32, #tpu.memory_space<vmem>>, vector<16x128xf32>,
    %c1_i32 = arith.constant 1 : i32
    %9 = arith.cmpi eq, %arg2, %c1_i32 : i32
    %10 = arith.extui %9 : i1 to i32
    %c0_i32_8 = arith.constant 0 : i32
    %11 = arith.cmpi ne, %10, %c0_i32_8 : i32
    scf.if %11 {
      %c0_9 = arith.constant 0 : index
      %c0_10 = arith.constant 0 : index
      %12 = vector.load %arg7[%c0_9, %c0_10] : memref<16x128xf32, #tpu.memory_space<vmem>>, vector<16x128xf32>
      %c0_11 = arith.constant 0 : index
      %c0_12 = arith.constant 0 : index
      %13 = vector.load %arg5[%c0_11, %c0_12] : memref<1x128xf32, #tpu.memory_space<vmem>>, vector<1x128xf32>
      %14 = vector.broadcast %13 : vector<1x128xf32> to vector<16x128xf32>
      %15 = arith.addf %12, %14 : vector<16x128xf32>
      %cst_13 = arith.constant 0.000000e+00 : f32
      %16 = vector.broadcast %cst_13 : f32 to vector<16x128xf32>
      %17 = arith.maximumf %15, %16 : vector<16x128xf32>
      %c0_14 = arith.constant 0 : index
      %c0_15 = arith.constant 0 : index
      %18 = vector.load %arg6[%c0_14, %c0_15] : memref<16x128xf32, #tpu.memory_space<vmem>>, vector<16x128xf32>
      tpu.vector_store %arg6[%c0_14, %c0_15], %17 {strides = array<i32>} : memref<16x128xf32, #tpu.memory_space<vmem>>, vector<16x128xf32>,
    } else {
    }
    return
  }
  func.func @transform_0(%arg0: i32, %arg1: i32, %arg2: i32) -> (i32, i32) {
    %c0_i32 = arith.constant 0 : i32
    return %arg0, %arg2 : i32, i32
  }
  func.func @transform_1(%arg0: i32, %arg1: i32, %arg2: i32) -> (i32, i32) {
    %c0_i32 = arith.constant 0 : i32
    return %arg2, %arg1 : i32, i32
  }
  func.func @transform_2(%arg0: i32, %arg1: i32, %arg2: i32) -> (i32, i32) {
    %c0_i32 = arith.constant 0 : i32
    %c0_i32_0 = arith.constant 0 : i32
    return %c0_i32, %arg1 : i32, i32
  }
  func.func @transform_3(%arg0: i32, %arg1: i32, %arg2: i32) -> (i32, i32) {
    %c0_i32 = arith.constant 0 : i32
    return %arg0, %arg1 : i32, i32
  }
}

module attributes {stable_mosaic.version = 11 : i64} {
  func.func @_mm_shift_kernel(%arg0: i32, %arg1: i32, %arg2: i32, %arg3: memref<64x1024xbf16, #tpu.memory_space<vmem>>, %arg4: memref<1024x256xbf16, #tpu.memory_space<vmem>>, %arg5: memref<1x256xf32, #tpu.memory_space<vmem>>, %arg6: memref<64x256xf32, #tpu.memory_space<vmem>>, %arg7: memref<64x256xf32, #tpu.memory_space<vmem>>) attributes {dimension_semantics = [#tpu.dimension_semantics<parallel>, #tpu.dimension_semantics<parallel>, #tpu.dimension_semantics<arbitrary>], iteration_bounds = array<i64: 2, 3, 7>, scalar_prefetch = 0 : i64, scratch_operands = 1 : i64, tpu.core_type = #tpu.core_type<tc>, window_params = [{transform_indices = @transform_0, window_bounds = array<i64: 64, 1024>}, {transform_indices = @transform_1, window_bounds = array<i64: 1024, 256>}, {transform_indices = @transform_2, window_bounds = array<i64: 1, 256>}, {transform_indices = @transform_3, window_bounds = array<i64: 64, 256>}]} {
    %c0_i32 = arith.constant 0 : i32
    %0 = arith.cmpi eq, %arg2, %c0_i32 : i32
    %1 = arith.extui %0 : i1 to i32
    %c0_i32_0 = arith.constant 0 : i32
    %2 = arith.cmpi ne, %1, %c0_i32_0 : i32
    scf.if %2 {
      %cst_9 = arith.constant 0.000000e+00 : f32
      %12 = vector.broadcast %cst_9 : f32 to vector<64x256xf32>
      %c0_10 = arith.constant 0 : index
      %c0_11 = arith.constant 0 : index
      %13 = vector.load %arg7[%c0_10, %c0_11] : memref<64x256xf32, #tpu.memory_space<vmem>>, vector<64x256xf32>
      tpu.vector_store %arg7[%c0_10, %c0_11], %12 {strides = array<i32>} : memref<64x256xf32, #tpu.memory_space<vmem>>, vector<64x256xf32>,
    } else {
    }
    %c0 = arith.constant 0 : index
    %c0_1 = arith.constant 0 : index
    %3 = vector.load %arg7[%c0, %c0_1] : memref<64x256xf32, #tpu.memory_space<vmem>>, vector<64x256xf32>
    %c0_2 = arith.constant 0 : index
    %c0_3 = arith.constant 0 : index
    %4 = vector.load %arg3[%c0_2, %c0_3] : memref<64x1024xbf16, #tpu.memory_space<vmem>>, vector<64x1024xbf16>
    %c0_4 = arith.constant 0 : index
    %c0_5 = arith.constant 0 : index
    %5 = vector.load %arg4[%c0_4, %c0_5] : memref<1024x256xbf16, #tpu.memory_space<vmem>>, vector<1024x256xbf16>
    %cst = arith.constant dense<0.000000e+00> : vector<64x256xf32>
    %6 = tpu.matmul %4, %5, %cst {dimension_numbers = #tpu.dot_dimension_numbers<[1], [0], [0], [1], [0, 0, 1, 1], [], []>} : vector<64x1024xbf16>, vector<1024x256xbf16>, vector<64x256xf32> -> vector<64x256xf32>
    %7 = arith.addf %3, %6 : vector<64x256xf32>
    %c0_6 = arith.constant 0 : index
    %c0_7 = arith.constant 0 : index
    %8 = vector.load %arg7[%c0_6, %c0_7] : memref<64x256xf32, #tpu.memory_space<vmem>>, vector<64x256xf32>
    tpu.vector_store %arg7[%c0_6, %c0_7], %7 {strides = array<i32>} : memref<64x256xf32, #tpu.memory_space<vmem>>, vector<64x256xf32>,
    %c6_i32 = arith.constant 6 : i32
    %9 = arith.cmpi eq, %arg2, %c6_i32 : i32
    %10 = arith.extui %9 : i1 to i32
    %c0_i32_8 = arith.constant 0 : i32
    %11 = arith.cmpi ne, %10, %c0_i32_8 : i32
    scf.if %11 {
      %c0_9 = arith.constant 0 : index
      %c0_10 = arith.constant 0 : index
      %12 = vector.load %arg7[%c0_9, %c0_10] : memref<64x256xf32, #tpu.memory_space<vmem>>, vector<64x256xf32>
      %c0_11 = arith.constant 0 : index
      %c0_12 = arith.constant 0 : index
      %13 = vector.load %arg5[%c0_11, %c0_12] : memref<1x256xf32, #tpu.memory_space<vmem>>, vector<1x256xf32>
      %14 = vector.broadcast %13 : vector<1x256xf32> to vector<64x256xf32>
      %15 = arith.addf %12, %14 : vector<64x256xf32>
      %cst_13 = arith.constant 0.000000e+00 : f32
      %16 = vector.broadcast %cst_13 : f32 to vector<64x256xf32>
      %17 = arith.maximumf %15, %16 : vector<64x256xf32>
      %c0_14 = arith.constant 0 : index
      %c0_15 = arith.constant 0 : index
      %18 = vector.load %arg6[%c0_14, %c0_15] : memref<64x256xf32, #tpu.memory_space<vmem>>, vector<64x256xf32>
      tpu.vector_store %arg6[%c0_14, %c0_15], %17 {strides = array<i32>} : memref<64x256xf32, #tpu.memory_space<vmem>>, vector<64x256xf32>,
    } else {
    }
    return
  }
  func.func @transform_0(%arg0: i32, %arg1: i32, %arg2: i32) -> (i32, i32) {
    %c0_i32 = arith.constant 0 : i32
    return %arg0, %arg2 : i32, i32
  }
  func.func @transform_1(%arg0: i32, %arg1: i32, %arg2: i32) -> (i32, i32) {
    %c0_i32 = arith.constant 0 : i32
    return %arg2, %arg1 : i32, i32
  }
  func.func @transform_2(%arg0: i32, %arg1: i32, %arg2: i32) -> (i32, i32) {
    %c0_i32 = arith.constant 0 : i32
    %c0_i32_0 = arith.constant 0 : i32
    return %c0_i32, %arg1 : i32, i32
  }
  func.func @transform_3(%arg0: i32, %arg1: i32, %arg2: i32) -> (i32, i32) {
    %c0_i32 = arith.constant 0 : i32
    return %arg0, %arg1 : i32, i32
  }
}

module attributes {stable_mosaic.version = 11 : i64} {
  func.func @_matvec_kernel(%arg0: i32, %arg1: memref<64x768xf32, #tpu.memory_space<vmem>>, %arg2: memref<1x768xf32, #tpu.memory_space<vmem>>, %arg3: memref<64x1xf32, #tpu.memory_space<vmem>>) attributes {dimension_semantics = [#tpu.dimension_semantics<parallel>], iteration_bounds = array<i64: 2>, scalar_prefetch = 0 : i64, scratch_operands = 0 : i64, tpu.core_type = #tpu.core_type<tc>, window_params = [{transform_indices = @transform_0, window_bounds = array<i64: 64, 768>}, {pipeline_mode = #tpu.pipeline_mode<synchronous>, transform_indices = @transform_1, window_bounds = array<i64: 1, 768>}, {transform_indices = @transform_2, window_bounds = array<i64: 64, 1>}]} {
    %c0 = arith.constant 0 : index
    %c0_0 = arith.constant 0 : index
    %0 = vector.load %arg1[%c0, %c0_0] : memref<64x768xf32, #tpu.memory_space<vmem>>, vector<64x768xf32>
    %c0_1 = arith.constant 0 : index
    %c0_2 = arith.constant 0 : index
    %1 = vector.load %arg2[%c0_1, %c0_2] : memref<1x768xf32, #tpu.memory_space<vmem>>, vector<1x768xf32>
    %2 = vector.broadcast %1 : vector<1x768xf32> to vector<64x768xf32>
    %3 = arith.mulf %0, %2 : vector<64x768xf32>
    %cst = arith.constant dense<0.000000e+00> : vector<64xf32>
    %4 = vector.multi_reduction <add>, %3, %cst [1] : vector<64x768xf32> to vector<64xf32>
    %5 = vector.shape_cast %4 : vector<64xf32> to vector<64x1xf32>
    %c0_3 = arith.constant 0 : index
    %c0_4 = arith.constant 0 : index
    %6 = vector.load %arg3[%c0_3, %c0_4] : memref<64x1xf32, #tpu.memory_space<vmem>>, vector<64x1xf32>
    tpu.vector_store %arg3[%c0_3, %c0_4], %5 {strides = array<i32>} : memref<64x1xf32, #tpu.memory_space<vmem>>, vector<64x1xf32>,
    return
  }
  func.func @transform_0(%arg0: i32) -> (i32, i32) {
    %c0_i32 = arith.constant 0 : i32
    %c0_i32_0 = arith.constant 0 : i32
    return %arg0, %c0_i32 : i32, i32
  }
  func.func @transform_1(%arg0: i32) -> (i32, i32) {
    %c0_i32 = arith.constant 0 : i32
    %c0_i32_0 = arith.constant 0 : i32
    %c0_i32_1 = arith.constant 0 : i32
    return %c0_i32, %c0_i32_0 : i32, i32
  }
  func.func @transform_2(%arg0: i32) -> (i32, i32) {
    %c0_i32 = arith.constant 0 : i32
    %c0_i32_0 = arith.constant 0 : i32
    return %arg0, %c0_i32 : i32, i32
  }
}

</mosaic_0001>

<bundles_post_ra>
// kernel: _lambda_.9
= control target key start
LH: loop header
LB: loop body
LE: loop exit
PB: predicated region body
PF: predicated region fallthrough
CT: control target
= control target key end

     0   :  { %s1112_s12 = smov 0   ;;  %s1114_s13 = smov 0   ;;  %s1265_s0 = inlined_call_operand.vmem [shape: bf16[2048,128], index: 0, kind: input, shape index: {}]   ;;  %s1266_s1 = inlined_call_operand.vmem [shape: bf16[128,128], index: 1, kind: input, shape index: {}]   ;;  %s1267_s2 = inlined_call_operand.vmem [shape: f32[1,128], index: 2, kind: input, shape index: {}]   ;;  %s1268_s3 = inlined_call_operand.vmem [shape: f32[2048,128], index: 3, kind: output, shape index: {}]  }
   0x1   :  { %s1116_s14 = smov 0  }
   0x2 LB: > { %s32_s15 = sadd.s32 1, %s1086_s13  ;;  %p892_p0 = scmp.ge.s32.totalorder %s1090_s14, 1  ;;  %s1090_s14 = sphi %s1116_s14, %s13_s14   ;;  %s1086_s13 = sphi %s1114_s13, %s1270_s13   ;;  %s1082_s12 = sphi %s1112_s12, %s1269_s12  }
   0x3   : > { %p34_p1 = scmp.ge.s32.totalorder %s32_s15, 8  ;;  %p188_p2 = scmp.lt.s32.totalorder %s1090_s14, 9 }
   0x5   : > { %s1272_s15 = smov (%p34_p1, %s32_s15), 0  ;;  %p189_p3 = pnand %p892_p0, %p188_p2 }
   0x6   : > { %s893_s24 = sshll.u32 (!%p189_p3), %s1082_s12, 5 }
   0x7   : > { %192 = sbr.rel (%p189_p3) target bundleno = 237 (0xed), region = 32  ;;  %p230_p4 = scmp.lt.s32.totalorder (!%p189_p3), %s893_s24, 255 }
   0xc   : > { %v1018_v0 = vld [vmem:[%s1266_s1 + $0x38] sm:$0xff]  ;;  %v1017_v1 = vld [vmem:[%s1266_s1 + $0x30] sm:$0xff]  ;;  %v1016_v2 = vld [vmem:[%s1266_s1 + $0x28] sm:$0xff]  ;;  %s1274_s24 = smov (!%p230_p4, %s893_s24), 255 }
   0xd   : > { %519 = vmatpush.bf16.msra.mxu0 %v1018_v0  ;;  %1019 = vmatpush.bf16.msra.mxu1 %v1018_v0  ;;  %v1015_v3 = vld [vmem:[%s1266_s1 + $0x20] sm:$0xff]  ;;  %v1014_v4 = vld [vmem:[%s1266_s1 + $0x18] sm:$0xff]  ;;  %v1013_v5 = vld [vmem:[%s1266_s1 + $0x10] sm:$0xff]  ;;  %s894_s4 = sshll.u32 %s1274_s24, 2  ;;  %s896_s10 = sshll.u32 %s1274_s24, 3 }
   0xe   : > { %1020 = vmatpush.bf16.msra.mxu2 %v1018_v0  ;;  %1021 = vmatpush.bf16.msra.mxu3 %v1018_v0  ;;  %v1012_v6 = vld [vmem:[%s1266_s1 + $0x8] sm:$0xff]  ;;  %v1011_v7 = vld [vmem:[%s1266_s1] sm:$0xff]  ;;  %s1163_s9 = scalar_lea.vmem %s1265_s0, %s894_s4  ;;  %s1190_s18 = scalar_lea.vmem %s1268_s3, %s896_s10 }
   0xf   : > { %v995_v8 = vld [vmem:[%s1163_s9] sm:$0xff]  ;;  %v996_v12 = vld [vmem:[%s1163_s9 + $0x8] sm:$0xff]  ;;  %v997_v16 = vld [vmem:[%s1163_s9 + $0x10] sm:$0xff] }
  0x10   : > { %v999_v9 = vld [vmem:[%s1163_s9 + $0x20] sm:$0xff]  ;;  %v1000_v13 = vld [vmem:[%s1163_s9 + $0x28] sm:$0xff]  ;;  %v1001_v17 = vld [vmem:[%s1163_s9 + $0x30] sm:$0xff] }
  0x11   : > { %520 = vmatpush.bf16.msra.mxu0 %v1017_v1  ;;  %1022 = vmatpush.bf16.msra.mxu1 %v1017_v1  ;;  %v1003_v10 = vld [vmem:[%s1163_s9 + $0x40] sm:$0xff]  ;;  %v1004_v14 = vld [vmem:[%s1163_s9 + $0x48] sm:$0xff]  ;;  %v1005_v18 = vld [vmem:[%s1163_s9 + $0x50] sm:$0xff] }
  0x12   : > { %1023 = vmatpush.bf16.msra.mxu2 %v1017_v1  ;;  %1024 = vmatpush.bf16.msra.mxu3 %v1017_v1  ;;  %v1007_v11 = vld [vmem:[%s1163_s9 + $0x60] sm:$0xff]  ;;  %v1008_v15 = vld [vmem:[%s1163_s9 + $0x68] sm:$0xff]  ;;  %v1009_v19 = vld [vmem:[%s1163_s9 + $0x70] sm:$0xff] }
  0x13   : > { %v998_v20 = vld [vmem:[%s1163_s9 + $0x18] sm:$0xff]  ;;  %v1185_v24 = vld [vmem:[%s1267_s2] ss:$0 sm:$0xff] }
  0x14   : > { %v1002_v21 = vld [vmem:[%s1163_s9 + $0x38] sm:$0xff] }
  0x15   : > { %521 = vmatpush.bf16.msra.mxu0 %v1016_v2  ;;  %1025 = vmatpush.bf16.msra.mxu1 %v1016_v2  ;;  %v1006_v22 = vld [vmem:[%s1163_s9 + $0x58] sm:$0xff] }
  0x16   : > { %1026 = vmatpush.bf16.msra.mxu2 %v1016_v2  ;;  %1027 = vmatpush.bf16.msra.mxu3 %v1016_v2  ;;  %v1010_v23 = vld [vmem:[%s1163_s9 + $0x78] sm:$0xff] }
  0x19   : > { %522 = vmatpush.bf16.msra.mxu0 %v1015_v3  ;;  %1028 = vmatpush.bf16.msra.mxu1 %v1015_v3 }
  0x1a   : > { %1029 = vmatpush.bf16.msra.mxu2 %v1015_v3  ;;  %1030 = vmatpush.bf16.msra.mxu3 %v1015_v3 }
  0x1d   : > { %523 = vmatpush.bf16.msra.mxu0 %v1014_v4  ;;  %1031 = vmatpush.bf16.msra.mxu1 %v1014_v4 }
  0x1e   : > { %1032 = vmatpush.bf16.msra.mxu2 %v1014_v4  ;;  %1033 = vmatpush.bf16.msra.mxu3 %v1014_v4 }
  0x21   : > { %524 = vmatpush.bf16.msra.mxu0 %v1013_v5  ;;  %1034 = vmatpush.bf16.msra.mxu1 %v1013_v5 }
  0x22   : > { %1035 = vmatpush.bf16.msra.mxu2 %v1013_v5  ;;  %1036 = vmatpush.bf16.msra.mxu3 %v1013_v5 }
  0x25   : > { %525 = vmatpush.bf16.msra.mxu0 %v1012_v6  ;;  %1037 = vmatpush.bf16.msra.mxu1 %v1012_v6 }
  0x26   : > { %1038 = vmatpush.bf16.msra.mxu2 %v1012_v6  ;;  %1039 = vmatpush.bf16.msra.mxu3 %v1012_v6 }
  0x29   : > { %526 = vmatpush.bf16.msra.mxu0 %v1011_v7  ;;  %1040 = vmatpush.bf16.msra.mxu1 %v1011_v7 }
  0x2a   : > { %1041 = vmatpush.bf16.msra.mxu2 %v1011_v7  ;;  %1042 = vmatpush.bf16.msra.mxu3 %v1011_v7 }
  0x2c   : > { %527 = vmatmul.bf16.vlgmr.msra.gmra.mxu0 %v995_v8  ;;  %547 = vmatmul.bf16.vlgmr.msra.gmra.mxu1 %v999_v9 }
  0x2d   : > { %567 = vmatmul.bf16.vlgmr.msra.gmra.mxu2 %v1003_v10  ;;  %587 = vmatmul.bf16.vlgmr.msra.gmra.mxu3 %v1007_v11 }
  0x3c   : > { %532 = vmatmul.bf16.gmra.mxu0 %v996_v12  ;;  %552 = vmatmul.bf16.gmra.mxu1 %v1000_v13 }
  0x3d   : > { %572 = vmatmul.bf16.gmra.mxu2 %v1004_v14  ;;  %592 = vmatmul.bf16.gmra.mxu3 %v1008_v15 }
  0x4c   : > { %537 = vmatmul.bf16.gmra.mxu0 %v997_v16  ;;  %557 = vmatmul.bf16.gmra.mxu1 %v1001_v17 }
  0x4d   : > { %577 = vmatmul.bf16.gmra.mxu2 %v1005_v18  ;;  %597 = vmatmul.bf16.gmra.mxu3 %v1009_v19 }
  0x5c   : > { %542 = vmatmul.bf16.gmra.mxu0 %v998_v20  ;;  %562 = vmatmul.bf16.gmra.mxu1 %v1002_v21 }
  0x5d   : > { %582 = vmatmul.bf16.gmra.mxu2 %v1006_v22  ;;  %602 = vmatmul.bf16.gmra.mxu3 %v1010_v23 }
  0xa9   : > { %v528_v25 = vpop.f32.mrf.mxu0  ;;  %v548_v26 = vpop.f32.mrf.mxu1 }
  0xaa   : > { %v711_v27 = vadd.f32 %v1185_v24, %v528_v25  ;;  %v719_v28 = vadd.f32 %v1185_v24, %v548_v26 }
  0xac   : > { %743 = vst [vmem:[%s1190_s18] sm:$0xff] %v711_v27 }
  0xad   : > { %751 = vst [vmem:[%s1190_s18 + $0x40] sm:$0xff] %v719_v28 }
  0xb0   : > { %v568_v29 = vpop.f32.mrf.mxu2  ;;  %v588_v30 = vpop.f32.mrf.mxu3 }
  0xb1   : > { %v727_v31 = vadd.f32 %v1185_v24, %v568_v29  ;;  %v735_v32 = vadd.f32 %v1185_v24, %v588_v30  ;;  %v530_v33 = vpop.f32.mrf.mxu0  ;;  %v550_v34 = vpop.f32.mrf.mxu1 }
  0xb2   : > { %v712_v35 = vadd.f32 %v1185_v24, %v530_v33  ;;  %v720_v36 = vadd.f32 %v1185_v24, %v550_v34 }
  0xb3   : > { %759 = vst [vmem:[%s1190_s18 + $0x80] sm:$0xff] %v727_v31 }
  0xb4   : > { %767 = vst [vmem:[%s1190_s18 + $0xc0] sm:$0xff] %v735_v32 }
  0xb5   : > { %744 = vst [vmem:[%s1190_s18 + $0x8] sm:$0xff] %v712_v35 }
  0xb6   : > { %752 = vst [vmem:[%s1190_s18 + $0x48] sm:$0xff] %v720_v36 }
  0xb8   : > { %v570_v37 = vpop.f32.mrf.mxu2  ;;  %v590_v38 = vpop.f32.mrf.mxu3 }
  0xb9   : > { %v728_v39 = vadd.f32 %v1185_v24, %v570_v37  ;;  %v736_v40 = vadd.f32 %v1185_v24, %v590_v38  ;;  %v533_v41 = vpop.f32.mrf.mxu0  ;;  %v553_v42 = vpop.f32.mrf.mxu1 }
  0xba   : > { %v713_v43 = vadd.f32 %v1185_v24, %v533_v41  ;;  %v721_v44 = vadd.f32 %v1185_v24, %v553_v42 }
  0xbb   : > { %760 = vst [vmem:[%s1190_s18 + $0x88] sm:$0xff] %v728_v39 }
  0xbc   : > { %768 = vst [vmem:[%s1190_s18 + $0xc8] sm:$0xff] %v736_v40 }
  0xbd   : > { %745 = vst [vmem:[%s1190_s18 + $0x10] sm:$0xff] %v713_v43 }
  0xbe   : > { %753 = vst [vmem:[%s1190_s18 + $0x50] sm:$0xff] %v721_v44 }
  0xc0   : > { %v573_v45 = vpop.f32.mrf.mxu2  ;;  %v593_v46 = vpop.f32.mrf.mxu3 }
  0xc1   : > { %v729_v47 = vadd.f32 %v1185_v24, %v573_v45  ;;  %v737_v48 = vadd.f32 %v1185_v24, %v593_v46  ;;  %v535_v49 = vpop.f32.mrf.mxu0  ;;  %v555_v50 = vpop.f32.mrf.mxu1 }
  0xc2   : > { %v714_v51 = vadd.f32 %v1185_v24, %v535_v49  ;;  %v722_v52 = vadd.f32 %v1185_v24, %v555_v50 }
  0xc3   : > { %761 = vst [vmem:[%s1190_s18 + $0x90] sm:$0xff] %v729_v47 }
  0xc4   : > { %769 = vst [vmem:[%s1190_s18 + $0xd0] sm:$0xff] %v737_v48 }
  0xc5   : > { %746 = vst [vmem:[%s1190_s18 + $0x18] sm:$0xff] %v714_v51 }
  0xc6   : > { %754 = vst [vmem:[%s1190_s18 + $0x58] sm:$0xff] %v722_v52 }
  0xc8   : > { %v575_v53 = vpop.f32.mrf.mxu2  ;;  %v595_v54 = vpop.f32.mrf.mxu3 }
  0xc9   : > { %v730_v55 = vadd.f32 %v1185_v24, %v575_v53  ;;  %v738_v56 = vadd.f32 %v1185_v24, %v595_v54  ;;  %v538_v57 = vpop.f32.mrf.mxu0  ;;  %v558_v58 = vpop.f32.mrf.mxu1 }
  0xca   : > { %v715_v59 = vadd.f32 %v1185_v24, %v538_v57  ;;  %v723_v60 = vadd.f32 %v1185_v24, %v558_v58 }
  0xcb   : > { %762 = vst [vmem:[%s1190_s18 + $0x98] sm:$0xff] %v730_v55 }
  0xcc   : > { %770 = vst [vmem:[%s1190_s18 + $0xd8] sm:$0xff] %v738_v56 }
  0xcd   : > { %747 = vst [vmem:[%s1190_s18 + $0x20] sm:$0xff] %v715_v59 }
  0xce   : > { %755 = vst [vmem:[%s1190_s18 + $0x60] sm:$0xff] %v723_v60 }
  0xd0   : > { %v578_v61 = vpop.f32.mrf.mxu2  ;;  %v598_v62 = vpop.f32.mrf.mxu3 }
  0xd1   : > { %v731_v63 = vadd.f32 %v1185_v24, %v578_v61  ;;  %v739_v0 = vadd.f32 %v1185_v24, %v598_v62  ;;  %v540_v1 = vpop.f32.mrf.mxu0  ;;  %v560_v2 = vpop.f32.mrf.mxu1 }
  0xd2   : > { %v716_v3 = vadd.f32 %v1185_v24, %v540_v1  ;;  %v724_v4 = vadd.f32 %v1185_v24, %v560_v2 }
  0xd3   : > { %763 = vst [vmem:[%s1190_s18 + $0xa0] sm:$0xff] %v731_v63 }
  0xd4   : > { %771 = vst [vmem:[%s1190_s18 + $0xe0] sm:$0xff] %v739_v0 }
  0xd5   : > { %748 = vst [vmem:[%s1190_s18 + $0x28] sm:$0xff] %v716_v3 }
  0xd6   : > { %756 = vst [vmem:[%s1190_s18 + $0x68] sm:$0xff] %v724_v4 }
  0xd8   : > { %v580_v5 = vpop.f32.mrf.mxu2  ;;  %v600_v6 = vpop.f32.mrf.mxu3 }
  0xd9   : > { %v732_v7 = vadd.f32 %v1185_v24, %v580_v5  ;;  %v740_v8 = vadd.f32 %v1185_v24, %v600_v6  ;;  %v543_v9 = vpop.f32.mrf.mxu0  ;;  %v563_v10 = vpop.f32.mrf.mxu1 }
  0xda   : > { %v717_v11 = vadd.f32 %v1185_v24, %v543_v9  ;;  %v725_v12 = vadd.f32 %v1185_v24, %v563_v10 }
  0xdb   : > { %764 = vst [vmem:[%s1190_s18 + $0xa8] sm:$0xff] %v732_v7 }
  0xdc   : > { %772 = vst [vmem:[%s1190_s18 + $0xe8] sm:$0xff] %v740_v8 }
  0xdd   : > { %749 = vst [vmem:[%s1190_s18 + $0x30] sm:$0xff] %v717_v11 }
  0xde   : > { %757 = vst [vmem:[%s1190_s18 + $0x70] sm:$0xff] %v725_v12 }
  0xe0   : > { %v583_v13 = vpop.f32.mrf.mxu2  ;;  %v603_v14 = vpop.f32.mrf.mxu3 }
  0xe1   : > { %v733_v15 = vadd.f32 %v1185_v24, %v583_v13  ;;  %v741_v16 = vadd.f32 %v1185_v24, %v603_v14  ;;  %v545_v17 = vpop.f32.mrf.mxu0  ;;  %v565_v18 = vpop.f32.mrf.mxu1 }
  0xe2   : > { %v718_v19 = vadd.f32 %v1185_v24, %v545_v17  ;;  %v726_v20 = vadd.f32 %v1185_v24, %v565_v18 }
  0xe3   : > { %765 = vst [vmem:[%s1190_s18 + $0xb0] sm:$0xff] %v733_v15 }
  0xe4   : > { %773 = vst [vmem:[%s1190_s18 + $0xf0] sm:$0xff] %v741_v16 }
  0xe5   : > { %750 = vst [vmem:[%s1190_s18 + $0x38] sm:$0xff] %v718_v19 }
  0xe6   : > { %758 = vst [vmem:[%s1190_s18 + $0x78] sm:$0xff] %v726_v20 }
  0xe8   : > { %v585_v21 = vpop.f32.mrf.mxu2  ;;  %v605_v22 = vpop.f32.mrf.mxu3 }
  0xe9   : > { %v734_v23 = vadd.f32 %v1185_v24, %v585_v21  ;;  %v742_v25 = vadd.f32 %v1185_v24, %v605_v22 }
  0xeb   : > { %766 = vst [vmem:[%s1190_s18 + $0xb8] sm:$0xff] %v734_v23 }
  0xec   : > { %774 = vst [vmem:[%s1190_s18 + $0xf8] sm:$0xff] %v742_v25 }
  0xed PF: > { %s13_s14 = sadd.s32 1, %s1090_s14   ;;  %s1269_s12 = smov %s1086_s13 }
  0xee   : > { %p10_p5 = scmp.ge.s32.totalorder %s13_s14, 10   ;;  %s1270_s13 = smov %s1272_s15 }
  0xf0   :  { %12 = sbr.rel (!%p10_p5) target bundleno = 2 (0x2), region = 76 }

// kernel: _lambda_.10
= control target key start
LH: loop header
LB: loop body
LE: loop exit
PB: predicated region body
PF: predicated region fallthrough
CT: control target
= control target key end

     0   :  { %s1144_s12 = smov 0   ;;  %s1146_s13 = smov 0   ;;  %s1297_s0 = inlined_call_operand.vmem [shape: bf16[512,128], index: 0, kind: input, shape index: {}]   ;;  %s1298_s1 = inlined_call_operand.vmem [shape: bf16[128,128], index: 1, kind: input, shape index: {}]   ;;  %s1299_s2 = inlined_call_operand.vmem [shape: f32[1,128], index: 2, kind: input, shape index: {}]   ;;  %s1300_s3 = inlined_call_operand.vmem [shape: f32[512,128], index: 3, kind: output, shape index: {}]  }
   0x1   :  { %s1148_s14 = smov 0  }
   0x2 LB: > { %s32_s15 = sadd.s32 1, %s1118_s13  ;;  %p924_p0 = scmp.ge.s32.totalorder %s1122_s14, 1  ;;  %s1122_s14 = sphi %s1148_s14, %s13_s14   ;;  %s1118_s13 = sphi %s1146_s13, %s1302_s13   ;;  %s1114_s12 = sphi %s1144_s12, %s1301_s12  }
   0x3   : > { %p34_p1 = scmp.ge.s32.totalorder %s32_s15, 2  ;;  %p188_p2 = scmp.lt.s32.totalorder %s1122_s14, 3 }
   0x5   : > { %s1304_s15 = smov (%p34_p1, %s32_s15), 0  ;;  %p189_p3 = pnand %p924_p0, %p188_p2 }
   0x6   : > { %s925_s24 = sshll.u32 (!%p189_p3), %s1114_s12, 5 }
   0x7   : > { %192 = sbr.rel (%p189_p3) target bundleno = 239 (0xef), region = 32  ;;  %p230_p4 = scmp.lt.s32.totalorder (!%p189_p3), %s925_s24, 63 }
   0xc   : > { %v1050_v0 = vld [vmem:[%s1298_s1 + $0x38] sm:$0xff]  ;;  %v1049_v1 = vld [vmem:[%s1298_s1 + $0x30] sm:$0xff]  ;;  %v1048_v2 = vld [vmem:[%s1298_s1 + $0x28] sm:$0xff]  ;;  %s1306_s24 = smov (!%p230_p4, %s925_s24), 63 }
   0xd   : > { %519 = vmatpush.bf16.msra.mxu0 %v1050_v0  ;;  %1051 = vmatpush.bf16.msra.mxu1 %v1050_v0  ;;  %v1047_v3 = vld [vmem:[%s1298_s1 + $0x20] sm:$0xff]  ;;  %v1046_v4 = vld [vmem:[%s1298_s1 + $0x18] sm:$0xff]  ;;  %v1045_v5 = vld [vmem:[%s1298_s1 + $0x10] sm:$0xff]  ;;  %s926_s4 = sshll.u32 %s1306_s24, 2  ;;  %s928_s12 = sshll.u32 %s1306_s24, 3 }
   0xe   : > { %1052 = vmatpush.bf16.msra.mxu2 %v1050_v0  ;;  %1053 = vmatpush.bf16.msra.mxu3 %v1050_v0  ;;  %v1044_v6 = vld [vmem:[%s1298_s1 + $0x8] sm:$0xff]  ;;  %v1043_v7 = vld [vmem:[%s1298_s1] sm:$0xff]  ;;  %s1195_s9 = scalar_lea.vmem %s1297_s0, %s926_s4  ;;  %s1224_s18 = scalar_lea.vmem %s1300_s3, %s928_s12 }
   0xf   : > { %v1027_v8 = vld [vmem:[%s1195_s9] sm:$0xff]  ;;  %v1028_v12 = vld [vmem:[%s1195_s9 + $0x8] sm:$0xff]  ;;  %v1029_v16 = vld [vmem:[%s1195_s9 + $0x10] sm:$0xff] }
  0x10   : > { %v1031_v9 = vld [vmem:[%s1195_s9 + $0x20] sm:$0xff]  ;;  %v1032_v13 = vld [vmem:[%s1195_s9 + $0x28] sm:$0xff]  ;;  %v1033_v17 = vld [vmem:[%s1195_s9 + $0x30] sm:$0xff] }
  0x11   : > { %520 = vmatpush.bf16.msra.mxu0 %v1049_v1  ;;  %1054 = vmatpush.bf16.msra.mxu1 %v1049_v1  ;;  %v1035_v10 = vld [vmem:[%s1195_s9 + $0x40] sm:$0xff]  ;;  %v1036_v14 = vld [vmem:[%s1195_s9 + $0x48] sm:$0xff]  ;;  %v1037_v18 = vld [vmem:[%s1195_s9 + $0x50] sm:$0xff] }
  0x12   : > { %1055 = vmatpush.bf16.msra.mxu2 %v1049_v1  ;;  %1056 = vmatpush.bf16.msra.mxu3 %v1049_v1  ;;  %v1039_v11 = vld [vmem:[%s1195_s9 + $0x60] sm:$0xff]  ;;  %v1040_v15 = vld [vmem:[%s1195_s9 + $0x68] sm:$0xff]  ;;  %v1041_v19 = vld [vmem:[%s1195_s9 + $0x70] sm:$0xff] }
  0x13   : > { %v1030_v20 = vld [vmem:[%s1195_s9 + $0x18] sm:$0xff]  ;;  %v1216_v24 = vld [vmem:[%s1299_s2] ss:$0 sm:$0xff] }
  0x14   : > { %v1034_v21 = vld [vmem:[%s1195_s9 + $0x38] sm:$0xff] }
  0x15   : > { %521 = vmatpush.bf16.msra.mxu0 %v1048_v2  ;;  %1057 = vmatpush.bf16.msra.mxu1 %v1048_v2  ;;  %v1038_v22 = vld [vmem:[%s1195_s9 + $0x58] sm:$0xff] }
  0x16   : > { %1058 = vmatpush.bf16.msra.mxu2 %v1048_v2  ;;  %1059 = vmatpush.bf16.msra.mxu3 %v1048_v2  ;;  %v1042_v23 = vld [vmem:[%s1195_s9 + $0x78] sm:$0xff] }
  0x19   : > { %522 = vmatpush.bf16.msra.mxu0 %v1047_v3  ;;  %1060 = vmatpush.bf16.msra.mxu1 %v1047_v3 }
  0x1a   : > { %1061 = vmatpush.bf16.msra.mxu2 %v1047_v3  ;;  %1062 = vmatpush.bf16.msra.mxu3 %v1047_v3 }
  0x1d   : > { %523 = vmatpush.bf16.msra.mxu0 %v1046_v4  ;;  %1063 = vmatpush.bf16.msra.mxu1 %v1046_v4 }
  0x1e   : > { %1064 = vmatpush.bf16.msra.mxu2 %v1046_v4  ;;  %1065 = vmatpush.bf16.msra.mxu3 %v1046_v4 }
  0x21   : > { %524 = vmatpush.bf16.msra.mxu0 %v1045_v5  ;;  %1066 = vmatpush.bf16.msra.mxu1 %v1045_v5 }
  0x22   : > { %1067 = vmatpush.bf16.msra.mxu2 %v1045_v5  ;;  %1068 = vmatpush.bf16.msra.mxu3 %v1045_v5 }
  0x25   : > { %525 = vmatpush.bf16.msra.mxu0 %v1044_v6  ;;  %1069 = vmatpush.bf16.msra.mxu1 %v1044_v6 }
  0x26   : > { %1070 = vmatpush.bf16.msra.mxu2 %v1044_v6  ;;  %1071 = vmatpush.bf16.msra.mxu3 %v1044_v6 }
  0x29   : > { %526 = vmatpush.bf16.msra.mxu0 %v1043_v7  ;;  %1072 = vmatpush.bf16.msra.mxu1 %v1043_v7 }
  0x2a   : > { %1073 = vmatpush.bf16.msra.mxu2 %v1043_v7  ;;  %1074 = vmatpush.bf16.msra.mxu3 %v1043_v7 }
  0x2c   : > { %527 = vmatmul.bf16.vlgmr.msra.gmra.mxu0 %v1027_v8  ;;  %547 = vmatmul.bf16.vlgmr.msra.gmra.mxu1 %v1031_v9 }
  0x2d   : > { %567 = vmatmul.bf16.vlgmr.msra.gmra.mxu2 %v1035_v10  ;;  %587 = vmatmul.bf16.vlgmr.msra.gmra.mxu3 %v1039_v11 }
  0x3c   : > { %532 = vmatmul.bf16.gmra.mxu0 %v1028_v12  ;;  %552 = vmatmul.bf16.gmra.mxu1 %v1032_v13 }
  0x3d   : > { %572 = vmatmul.bf16.gmra.mxu2 %v1036_v14  ;;  %592 = vmatmul.bf16.gmra.mxu3 %v1040_v15 }
  0x4c   : > { %537 = vmatmul.bf16.gmra.mxu0 %v1029_v16  ;;  %557 = vmatmul.bf16.gmra.mxu1 %v1033_v17 }
  0x4d   : > { %577 = vmatmul.bf16.gmra.mxu2 %v1037_v18  ;;  %597 = vmatmul.bf16.gmra.mxu3 %v1041_v19 }
  0x5c   : > { %542 = vmatmul.bf16.gmra.mxu0 %v1030_v20  ;;  %562 = vmatmul.bf16.gmra.mxu1 %v1034_v21 }
  0x5d   : > { %582 = vmatmul.bf16.gmra.mxu2 %v1038_v22  ;;  %602 = vmatmul.bf16.gmra.mxu3 %v1042_v23 }
  0xa9   : > { %v528_v25 = vpop.f32.mrf.mxu0  ;;  %v548_v26 = vpop.f32.mrf.mxu1 }
  0xaa   : > { %v711_v27 = vadd.f32 %v1216_v24, %v528_v25  ;;  %v719_v28 = vadd.f32 %v1216_v24, %v548_v26 }
  0xac   : > { %v743_v29 = vmax.f32 %v711_v27, 0.0  ;;  %v751_v30 = vmax.f32 %v719_v28, 0.0 }
  0xae   : > { %775 = vst [vmem:[%s1224_s18] sm:$0xff] %v743_v29 }
  0xaf   : > { %783 = vst [vmem:[%s1224_s18 + $0x40] sm:$0xff] %v751_v30 }
  0xb0   : > { %v568_v31 = vpop.f32.mrf.mxu2  ;;  %v588_v32 = vpop.f32.mrf.mxu3 }
  0xb1   : > { %v727_v33 = vadd.f32 %v1216_v24, %v568_v31  ;;  %v735_v34 = vadd.f32 %v1216_v24, %v588_v32  ;;  %v530_v35 = vpop.f32.mrf.mxu0  ;;  %v550_v36 = vpop.f32.mrf.mxu1 }
  0xb2   : > { %v712_v37 = vadd.f32 %v1216_v24, %v530_v35  ;;  %v720_v38 = vadd.f32 %v1216_v24, %v550_v36 }
  0xb3   : > { %v759_v39 = vmax.f32 %v727_v33, 0.0  ;;  %v767_v40 = vmax.f32 %v735_v34, 0.0 }
  0xb4   : > { %v744_v41 = vmax.f32 %v712_v37, 0.0  ;;  %v752_v42 = vmax.f32 %v720_v38, 0.0 }
  0xb5   : > { %791 = vst [vmem:[%s1224_s18 + $0x80] sm:$0xff] %v759_v39 }
  0xb6   : > { %799 = vst [vmem:[%s1224_s18 + $0xc0] sm:$0xff] %v767_v40 }
  0xb7   : > { %776 = vst [vmem:[%s1224_s18 + $0x8] sm:$0xff] %v744_v41 }
  0xb8   : > { %784 = vst [vmem:[%s1224_s18 + $0x48] sm:$0xff] %v752_v42  ;;  %v570_v43 = vpop.f32.mrf.mxu2  ;;  %v590_v44 = vpop.f32.mrf.mxu3 }
  0xb9   : > { %v728_v45 = vadd.f32 %v1216_v24, %v570_v43  ;;  %v736_v46 = vadd.f32 %v1216_v24, %v590_v44  ;;  %v533_v47 = vpop.f32.mrf.mxu0  ;;  %v553_v48 = vpop.f32.mrf.mxu1 }
  0xba   : > { %v713_v49 = vadd.f32 %v1216_v24, %v533_v47  ;;  %v721_v50 = vadd.f32 %v1216_v24, %v553_v48 }
  0xbb   : > { %v760_v51 = vmax.f32 %v728_v45, 0.0  ;;  %v768_v52 = vmax.f32 %v736_v46, 0.0 }
  0xbc   : > { %v745_v53 = vmax.f32 %v713_v49, 0.0  ;;  %v753_v54 = vmax.f32 %v721_v50, 0.0 }
  0xbd   : > { %792 = vst [vmem:[%s1224_s18 + $0x88] sm:$0xff] %v760_v51 }
  0xbe   : > { %800 = vst [vmem:[%s1224_s18 + $0xc8] sm:$0xff] %v768_v52 }
  0xbf   : > { %777 = vst [vmem:[%s1224_s18 + $0x10] sm:$0xff] %v745_v53 }
  0xc0   : > { %785 = vst [vmem:[%s1224_s18 + $0x50] sm:$0xff] %v753_v54  ;;  %v573_v55 = vpop.f32.mrf.mxu2  ;;  %v593_v56 = vpop.f32.mrf.mxu3 }
  0xc1   : > { %v729_v57 = vadd.f32 %v1216_v24, %v573_v55  ;;  %v737_v58 = vadd.f32 %v1216_v24, %v593_v56  ;;  %v535_v59 = vpop.f32.mrf.mxu0  ;;  %v555_v60 = vpop.f32.mrf.mxu1 }
  0xc2   : > { %v714_v61 = vadd.f32 %v1216_v24, %v535_v59  ;;  %v722_v62 = vadd.f32 %v1216_v24, %v555_v60 }
  0xc3   : > { %v761_v63 = vmax.f32 %v729_v57, 0.0  ;;  %v769_v0 = vmax.f32 %v737_v58, 0.0 }
  0xc4   : > { %v746_v1 = vmax.f32 %v714_v61, 0.0  ;;  %v754_v2 = vmax.f32 %v722_v62, 0.0 }
  0xc5   : > { %793 = vst [vmem:[%s1224_s18 + $0x90] sm:$0xff] %v761_v63 }
  0xc6   : > { %801 = vst [vmem:[%s1224_s18 + $0xd0] sm:$0xff] %v769_v0 }
  0xc7   : > { %778 = vst [vmem:[%s1224_s18 + $0x18] sm:$0xff] %v746_v1 }
  0xc8   : > { %786 = vst [vmem:[%s1224_s18 + $0x58] sm:$0xff] %v754_v2  ;;  %v575_v3 = vpop.f32.mrf.mxu2  ;;  %v595_v4 = vpop.f32.mrf.mxu3 }
  0xc9   : > { %v730_v5 = vadd.f32 %v1216_v24, %v575_v3  ;;  %v738_v6 = vadd.f32 %v1216_v24, %v595_v4  ;;  %v538_v7 = vpop.f32.mrf.mxu0  ;;  %v558_v8 = vpop.f32.mrf.mxu1 }
  0xca   : > { %v715_v9 = vadd.f32 %v1216_v24, %v538_v7  ;;  %v723_v10 = vadd.f32 %v1216_v24, %v558_v8 }
  0xcb   : > { %v762_v11 = vmax.f32 %v730_v5, 0.0  ;;  %v770_v12 = vmax.f32 %v738_v6, 0.0 }
  0xcc   : > { %v747_v13 = vmax.f32 %v715_v9, 0.0  ;;  %v755_v14 = vmax.f32 %v723_v10, 0.0 }
  0xcd   : > { %794 = vst [vmem:[%s1224_s18 + $0x98] sm:$0xff] %v762_v11 }
  0xce   : > { %802 = vst [vmem:[%s1224_s18 + $0xd8] sm:$0xff] %v770_v12 }
  0xcf   : > { %779 = vst [vmem:[%s1224_s18 + $0x20] sm:$0xff] %v747_v13 }
  0xd0   : > { %787 = vst [vmem:[%s1224_s18 + $0x60] sm:$0xff] %v755_v14  ;;  %v578_v15 = vpop.f32.mrf.mxu2  ;;  %v598_v16 = vpop.f32.mrf.mxu3 }
  0xd1   : > { %v731_v17 = vadd.f32 %v1216_v24, %v578_v15  ;;  %v739_v18 = vadd.f32 %v1216_v24, %v598_v16  ;;  %v540_v19 = vpop.f32.mrf.mxu0  ;;  %v560_v20 = vpop.f32.mrf.mxu1 }
  0xd2   : > { %v716_v21 = vadd.f32 %v1216_v24, %v540_v19  ;;  %v724_v22 = vadd.f32 %v1216_v24, %v560_v20 }
  0xd3   : > { %v763_v23 = vmax.f32 %v731_v17, 0.0  ;;  %v771_v25 = vmax.f32 %v739_v18, 0.0 }
  0xd4   : > { %v748_v26 = vmax.f32 %v716_v21, 0.0  ;;  %v756_v27 = vmax.f32 %v724_v22, 0.0 }
  0xd5   : > { %795 = vst [vmem:[%s1224_s18 + $0xa0] sm:$0xff] %v763_v23 }
  0xd6   : > { %803 = vst [vmem:[%s1224_s18 + $0xe0] sm:$0xff] %v771_v25 }
  0xd7   : > { %780 = vst [vmem:[%s1224_s18 + $0x28] sm:$0xff] %v748_v26 }
  0xd8   : > { %788 = vst [vmem:[%s1224_s18 + $0x68] sm:$0xff] %v756_v27  ;;  %v580_v28 = vpop.f32.mrf.mxu2  ;;  %v600_v29 = vpop.f32.mrf.mxu3 }
  0xd9   : > { %v732_v30 = vadd.f32 %v1216_v24, %v580_v28  ;;  %v740_v31 = vadd.f32 %v1216_v24, %v600_v29  ;;  %v543_v32 = vpop.f32.mrf.mxu0  ;;  %v563_v33 = vpop.f32.mrf.mxu1 }
  0xda   : > { %v717_v34 = vadd.f32 %v1216_v24, %v543_v32  ;;  %v725_v35 = vadd.f32 %v1216_v24, %v563_v33 }
  0xdb   : > { %v764_v36 = vmax.f32 %v732_v30, 0.0  ;;  %v772_v37 = vmax.f32 %v740_v31, 0.0 }
  0xdc   : > { %v749_v38 = vmax.f32 %v717_v34, 0.0  ;;  %v757_v39 = vmax.f32 %v725_v35, 0.0 }
  0xdd   : > { %796 = vst [vmem:[%s1224_s18 + $0xa8] sm:$0xff] %v764_v36 }
  0xde   : > { %804 = vst [vmem:[%s1224_s18 + $0xe8] sm:$0xff] %v772_v37 }
  0xdf   : > { %781 = vst [vmem:[%s1224_s18 + $0x30] sm:$0xff] %v749_v38 }
  0xe0   : > { %789 = vst [vmem:[%s1224_s18 + $0x70] sm:$0xff] %v757_v39  ;;  %v583_v40 = vpop.f32.mrf.mxu2  ;;  %v603_v41 = vpop.f32.mrf.mxu3 }
  0xe1   : > { %v733_v42 = vadd.f32 %v1216_v24, %v583_v40  ;;  %v741_v43 = vadd.f32 %v1216_v24, %v603_v41  ;;  %v545_v44 = vpop.f32.mrf.mxu0  ;;  %v565_v45 = vpop.f32.mrf.mxu1 }
  0xe2   : > { %v718_v46 = vadd.f32 %v1216_v24, %v545_v44  ;;  %v726_v47 = vadd.f32 %v1216_v24, %v565_v45 }
  0xe3   : > { %v765_v48 = vmax.f32 %v733_v42, 0.0  ;;  %v773_v49 = vmax.f32 %v741_v43, 0.0 }
  0xe4   : > { %v750_v50 = vmax.f32 %v718_v46, 0.0  ;;  %v758_v51 = vmax.f32 %v726_v47, 0.0 }
  0xe5   : > { %797 = vst [vmem:[%s1224_s18 + $0xb0] sm:$0xff] %v765_v48 }
  0xe6   : > { %805 = vst [vmem:[%s1224_s18 + $0xf0] sm:$0xff] %v773_v49 }
  0xe7   : > { %782 = vst [vmem:[%s1224_s18 + $0x38] sm:$0xff] %v750_v50 }
  0xe8   : > { %790 = vst [vmem:[%s1224_s18 + $0x78] sm:$0xff] %v758_v51  ;;  %v585_v52 = vpop.f32.mrf.mxu2  ;;  %v605_v53 = vpop.f32.mrf.mxu3 }
  0xe9   : > { %v734_v54 = vadd.f32 %v1216_v24, %v585_v52  ;;  %v742_v55 = vadd.f32 %v1216_v24, %v605_v53 }
  0xeb   : > { %v766_v56 = vmax.f32 %v734_v54, 0.0  ;;  %v774_v57 = vmax.f32 %v742_v55, 0.0 }
  0xed   : > { %798 = vst [vmem:[%s1224_s18 + $0xb8] sm:$0xff] %v766_v56 }
  0xee   : > { %806 = vst [vmem:[%s1224_s18 + $0xf8] sm:$0xff] %v774_v57 }
  0xef PF: > { %s13_s14 = sadd.s32 1, %s1122_s14   ;;  %s1301_s12 = smov %s1118_s13 }
  0xf0   : > { %p10_p5 = scmp.ge.s32.totalorder %s13_s14, 4   ;;  %s1302_s13 = smov %s1304_s15 }
  0xf2   :  { %12 = sbr.rel (!%p10_p5) target bundleno = 2 (0x2), region = 76 }

// kernel: _lambda_.11
= control target key start
LH: loop header
LB: loop body
LE: loop exit
PB: predicated region body
PF: predicated region fallthrough
CT: control target
= control target key end

     0   :  { %s1448_s12 = smov 0   ;;  %s1450_s13 = smov 0   ;;  %s1682_s0 = inlined_call_operand.vmem [shape: bf16[128,640], index: 0, kind: input, shape index: {}]   ;;  %s1683_s1 = inlined_call_operand.vmem [shape: bf16[640,128], index: 1, kind: input, shape index: {}]   ;;  %s1684_s2 = inlined_call_operand.vmem [shape: f32[1,128], index: 2, kind: input, shape index: {}]   ;;  %s1685_s3 = inlined_call_operand.vmem [shape: f32[128,128], index: 3, kind: output, shape index: {}]  }
   0x1   :  { %s1452_s14 = smov 0  }
   0x2 LB: > { %s32_s15 = sadd.s32 1, %s1422_s13  ;;  %p1055_p0 = scmp.ge.s32.totalorder %s1426_s14, 1  ;;  %s1426_s14 = sphi %s1452_s14, %s13_s14   ;;  %s1422_s13 = sphi %s1450_s13, %s1687_s13   ;;  %s1418_s12 = sphi %s1448_s12, %s1686_s12  }
   0x3   : > { %p34_p1 = scmp.ge.s32.totalorder %s32_s15, 2  ;;  %p191_p2 = scmp.lt.s32.totalorder %s1426_s14, 3 }
   0x5   : > { %s1689_s15 = smov (%p34_p1, %s32_s15), 0  ;;  %p192_p3 = pnand %p1055_p0, %p191_p2 }
   0x6   : > { %s1056_s5 = sshll.u32 (!%p192_p3), %s1418_s12, 3 }
   0x7   : > { %195 = sbr.rel (%p192_p3) target bundleno = 271 (0x10f), region = 32  ;;  %p236_p4 = scmp.lt.s32.totalorder (!%p192_p3), %s1056_s5, 15 }
   0xc   : > { %v1329_v0 = vld [vmem:[%s1683_s1 + $0x38] sm:$0xff]  ;;  %v1328_v2 = vld [vmem:[%s1683_s1 + $0x30] sm:$0xff]  ;;  %v1327_v6 = vld [vmem:[%s1683_s1 + $0x28] sm:$0xff]  ;;  %s1691_s5 = smov (!%p236_p4, %s1056_s5), 15 }
   0xd   : > { %v1345_v1 = vld [vmem:[%s1683_s1 + $0xb8] sm:$0xff]  ;;  %1362 = vmatpush.bf16.msra.mxu1 %v1329_v0  ;;  %735 = vmatpush.bf16.msra.mxu0 %v1329_v0  ;;  %v1344_v3 = vld [vmem:[%s1683_s1 + $0xb0] sm:$0xff]  ;;  %v1343_v7 = vld [vmem:[%s1683_s1 + $0xa8] sm:$0xff]  ;;  %s1378_s25 = smul.u32 20, %s1691_s5  ;;  %s1059_s7 = sshll.u32 %s1691_s5, 3 }
   0xe   : > { %793 = vmatpush.bf16.msra.mxu2 %v1345_v1  ;;  %v1353_v4 = vld [vmem:[%s1683_s1 + $0xf8] sm:$0xff]  ;;  %v1352_v5 = vld [vmem:[%s1683_s1 + $0xf0] sm:$0xff]  ;;  %v1351_v8 = vld [vmem:[%s1683_s1 + $0xe8] sm:$0xff]  ;;  %s1653_s11 = scalar_lea.vmem %s1685_s3, %s1059_s7 }
   0xf   : > { %822 = vmatpush.bf16.msra.mxu3 %v1353_v4  ;;  %v1326_v9 = vld [vmem:[%s1683_s1 + $0x20] sm:$0xff]  ;;  %v1325_v12 = vld [vmem:[%s1683_s1 + $0x18] sm:$0xff]  ;;  %v1324_v15 = vld [vmem:[%s1683_s1 + $0x10] sm:$0xff]  ;;  %s1532_s8 = scalar_lea.vmem %s1682_s0, %s1378_s25 }
  0x10   : > { %v1342_v10 = vld [vmem:[%s1683_s1 + $0xa0] sm:$0xff]  ;;  %v1341_v13 = vld [vmem:[%s1683_s1 + $0x98] sm:$0xff]  ;;  %v1340_v16 = vld [vmem:[%s1683_s1 + $0x90] sm:$0xff] }
  0x11   : > { %1363 = vmatpush.bf16.msra.mxu1 %v1328_v2  ;;  %736 = vmatpush.bf16.msra.mxu0 %v1328_v2  ;;  %v1350_v11 = vld [vmem:[%s1683_s1 + $0xe0] sm:$0xff]  ;;  %v1349_v14 = vld [vmem:[%s1683_s1 + $0xd8] sm:$0xff]  ;;  %v1348_v17 = vld [vmem:[%s1683_s1 + $0xd0] sm:$0xff] }
  0x12   : > { %794 = vmatpush.bf16.msra.mxu2 %v1344_v3  ;;  %v1323_v18 = vld [vmem:[%s1683_s1 + $0x8] sm:$0xff]  ;;  %v1322_v20 = vld [vmem:[%s1683_s1] sm:$0xff]  ;;  %v1102_v21 = vld [vmem:[%s1532_s8 + $0x50] sm:$0xf] }
  0x13   : > { %823 = vmatpush.bf16.msra.mxu3 %v1352_v5  ;;  %v1339_v19 = vld [vmem:[%s1683_s1 + $0x88] sm:$0xff]  ;;  %v1337_v22 = vld [vmem:[%s1683_s1 + $0x78] sm:$0xff]  ;;  %v1314_v24 = vld [vmem:[%s1532_s8 + $0x60] sm:$0xf0] }
  0x14   : > { %v1347_v23 = vld [vmem:[%s1683_s1 + $0xc8] sm:$0xff]  ;;  %v1062_v25 = vld [vmem:[%s1532_s8] sm:$0xf]  ;;  %v1304_v26 = vld [vmem:[%s1532_s8 + $0x10] sm:$0xf0]  ;;  %v1103_v31 = vor.u32 %v1314_v24, %v1102_v21 }
  0x15   : > { %1364 = vmatpush.bf16.msra.mxu1 %v1327_v6  ;;  %737 = vmatpush.bf16.msra.mxu0 %v1327_v6  ;;  %v1338_v27 = vld [vmem:[%s1683_s1 + $0x80] sm:$0xff]  ;;  %v1070_v28 = vld [vmem:[%s1532_s8 + $0x8] sm:$0xf]  ;;  %v1305_v29 = vld [vmem:[%s1532_s8 + $0x18] sm:$0xf0]  ;;  %v1063_v32 = vor.u32 %v1304_v26, %v1062_v25 }
  0x16   : > { %795 = vmatpush.bf16.msra.mxu2 %v1343_v7  ;;  %v1361_v30 = vld [vmem:[%s1683_s1 + $0x138] sm:$0xff]  ;;  %v1071_v33 = vor.u32 %v1305_v29, %v1070_v28  ;;  %v1346_v34 = vld [vmem:[%s1683_s1 + $0xc0] sm:$0xff]  ;;  %v1303_v35 = vld [vmem:[%s1532_s8 + $0xc] sm:$0xf] }
  0x17   : > { %824 = vmatpush.bf16.msra.mxu3 %v1351_v8  ;;  %v1072_v36 = vld [vmem:[%s1532_s8 + $0x1c] sm:$0xf0]  ;;  %v1336_v37 = vld [vmem:[%s1683_s1 + $0x70] sm:$0xff]  ;;  %v1335_v40 = vld [vmem:[%s1683_s1 + $0x68] sm:$0xff] }
  0x18   : > { %v1360_v38 = vld [vmem:[%s1683_s1 + $0x130] sm:$0xff]  ;;  %v1075_v39 = vor.u32 %v1303_v35, %v1072_v36  ;;  %v1359_v41 = vld [vmem:[%s1683_s1 + $0x128] sm:$0xff]  ;;  %v1334_v42 = vld [vmem:[%s1683_s1 + $0x60] sm:$0xff] }
  0x19   : > { %1365 = vmatpush.bf16.msra.mxu1 %v1326_v9  ;;  %738 = vmatpush.bf16.msra.mxu0 %v1326_v9  ;;  %v1358_v43 = vld [vmem:[%s1683_s1 + $0x120] sm:$0xff]  ;;  %v1122_v44 = vld [vmem:[%s1532_s8 + $0x78] sm:$0xf]  ;;  %v1319_v45 = vld [vmem:[%s1532_s8 + $0x88] sm:$0xf0] }
  0x1a   : > { %796 = vmatpush.bf16.msra.mxu2 %v1342_v10  ;;  %v1082_v46 = vld [vmem:[%s1532_s8 + $0x28] sm:$0xf]  ;;  %v1309_v47 = vld [vmem:[%s1532_s8 + $0x38] sm:$0xf0]  ;;  %v1090_v49 = vld [vmem:[%s1532_s8 + $0x30] sm:$0xf]  ;;  %v1123_v52 = vor.u32 %v1319_v45, %v1122_v44 }
  0x1b   : > { %825 = vmatpush.bf16.msra.mxu3 %v1350_v11  ;;  %v1333_v48 = vld [vmem:[%s1683_s1 + $0x58] sm:$0xff]  ;;  %v1310_v50 = vld [vmem:[%s1532_s8 + $0x40] sm:$0xf0]  ;;  %v1083_v53 = vor.u32 %v1309_v47, %v1082_v46  ;;  %v1308_v55 = vld [vmem:[%s1532_s8 + $0x34] sm:$0xf] }
  0x1c   : > { %v1357_v51 = vld [vmem:[%s1683_s1 + $0x118] sm:$0xff]  ;;  %v1091_v54 = vor.u32 %v1310_v50, %v1090_v49  ;;  %v1092_v56 = vld [vmem:[%s1532_s8 + $0x44] sm:$0xf0]  ;;  %v1332_v57 = vld [vmem:[%s1683_s1 + $0x50] sm:$0xff] }
  0x1d   : > { %1366 = vmatpush.bf16.msra.mxu1 %v1325_v12  ;;  %739 = vmatpush.bf16.msra.mxu0 %v1325_v12  ;;  %v1356_v58 = vld [vmem:[%s1683_s1 + $0x110] sm:$0xff]  ;;  %v1095_v59 = vor.u32 %v1308_v55, %v1092_v56  ;;  %v1331_v60 = vld [vmem:[%s1683_s1 + $0x48] sm:$0xff]  ;;  %v1330_v62 = vld [vmem:[%s1683_s1 + $0x40] sm:$0xff] }
  0x1e   : > { %797 = vmatpush.bf16.msra.mxu2 %v1341_v13  ;;  %v1355_v61 = vld [vmem:[%s1683_s1 + $0x108] sm:$0xff]  ;;  %v1354_v63 = vld [vmem:[%s1683_s1 + $0x100] sm:$0xff]  ;;  %v1064_v1 = vld [vmem:[%s1532_s8 + $0x14] sm:$0xf0] }
  0x1f   : > { %826 = vmatpush.bf16.msra.mxu3 %v1349_v14  ;;  %v1302_v0 = vld [vmem:[%s1532_s8 + $0x4] sm:$0xf]  ;;  %v1078_v2 = vld [vmem:[%s1532_s8 + $0x10] sm:$0xf]  ;;  %v1110_v4 = vld [vmem:[%s1532_s8 + $0x58] sm:$0xf] }
  0x20   : > { %v1306_v3 = vld [vmem:[%s1532_s8 + $0x20] sm:$0xf0]  ;;  %v1315_v5 = vld [vmem:[%s1532_s8 + $0x68] sm:$0xf0]  ;;  %v1067_v6 = vor.u32 %v1302_v0, %v1064_v1  ;;  %v1313_v9 = vld [vmem:[%s1532_s8 + $0x5c] sm:$0xf] }
  0x21   : > { %1367 = vmatpush.bf16.msra.mxu1 %v1324_v15  ;;  %740 = vmatpush.bf16.msra.mxu0 %v1324_v15  ;;  %v1079_v7 = vor.u32 %v1306_v3, %v1078_v2  ;;  %v1111_v8 = vor.u32 %v1315_v5, %v1110_v4  ;;  %v1112_v10 = vld [vmem:[%s1532_s8 + $0x6c] sm:$0xf0]  ;;  %v1307_v12 = vld [vmem:[%s1532_s8 + $0x2c] sm:$0xf]  ;;  %v1084_v13 = vld [vmem:[%s1532_s8 + $0x3c] sm:$0xf0] }
  0x22   : > { %798 = vmatpush.bf16.msra.mxu2 %v1340_v16  ;;  %v1115_v11 = vor.u32 %v1313_v9, %v1112_v10  ;;  %v1098_v14 = vld [vmem:[%s1532_s8 + $0x38] sm:$0xf]  ;;  %v1311_v15 = vld [vmem:[%s1532_s8 + $0x48] sm:$0xf0]  ;;  %v1130_v16 = vld [vmem:[%s1532_s8 + $0x80] sm:$0xf] }
  0x23   : > { %827 = vmatpush.bf16.msra.mxu3 %v1348_v17  ;;  %v1320_v17 = vld [vmem:[%s1532_s8 + $0x90] sm:$0xf0]  ;;  %v1318_v21 = vld [vmem:[%s1532_s8 + $0x84] sm:$0xf]  ;;  %v1104_v25 = vld [vmem:[%s1532_s8 + $0x64] sm:$0xf0] }
  0x24   : > { %v1312_v24 = vld [vmem:[%s1532_s8 + $0x54] sm:$0xf]  ;;  %v1118_v26 = vld [vmem:[%s1532_s8 + $0x60] sm:$0xf]  ;;  %v1138_v28 = vld [vmem:[%s1532_s8 + $0x88] sm:$0xf] }
  0x25   : > { %1368 = vmatpush.bf16.msra.mxu1 %v1323_v18  ;;  %741 = vmatpush.bf16.msra.mxu0 %v1323_v18  ;;  %v1087_v18 = vor.u32 %v1307_v12, %v1084_v13  ;;  %v1321_v29 = vld [vmem:[%s1532_s8 + $0x98] sm:$0xf0]  ;;  %v1646_v55 = vld [vmem:[%s1684_s2] ss:$0 sm:$0xff] }
  0x26   : > { %799 = vmatpush.bf16.msra.mxu2 %v1339_v19  ;;  %v1099_v19 = vor.u32 %v1311_v15, %v1098_v14 }
  0x27   : > { %828 = vmatpush.bf16.msra.mxu3 %v1347_v23 }
  0x29   : > { %1369 = vmatpush.bf16.msra.mxu1 %v1322_v20  ;;  %742 = vmatpush.bf16.msra.mxu0 %v1322_v20  ;;  %v1131_v20 = vor.u32 %v1320_v17, %v1130_v16 }
  0x2a   : > { %800 = vmatpush.bf16.msra.mxu2 %v1338_v27  ;;  %v1316_v27 = vld [vmem:[%s1532_s8 + $0x70] sm:$0xf0] }
  0x2b   : > { %829 = vmatpush.bf16.msra.mxu3 %v1346_v34  ;;  %v1124_v34 = vld [vmem:[%s1532_s8 + $0x8c] sm:$0xf0] }
  0x2c   : > { %753 = vmatmul.bf16.vlgmr.msra.gmra.mxu1 %v1103_v31  ;;  %743 = vmatmul.bf16.vlgmr.msra.gmra.mxu0 %v1063_v32  ;;  %v1119_v31 = vor.u32 %v1316_v27, %v1118_v26  ;;  %v1139_v32 = vor.u32 %v1321_v29, %v1138_v28 }
  0x2d   : > { %764 = vmatpush.bf16.msrb.mxu1 %v1337_v22  ;;  %851 = vmatpush.bf16.msrb.mxu0 %v1361_v30  ;;  %v1132_v22 = vld [vmem:[%s1532_s8 + $0x94] sm:$0xf0] }
  0x2e   : > { %1370 = vmatpush.bf16.msrb.mxu2 %v1361_v30  ;;  %830 = vmatmul.bf16.vlgmr.msra.gmra.mxu3 %v1075_v39  ;;  %v1135_v23 = vor.u32 %v1318_v21, %v1132_v22  ;;  %v1107_v30 = vor.u32 %v1312_v24, %v1104_v25 }
  0x2f   : > { %801 = vmatmul.bf16.vlgmr.msra.gmra.mxu2 %v1071_v33  ;;  %v1317_v33 = vld [vmem:[%s1532_s8 + $0x7c] sm:$0xf] }
  0x30   : > { %v1127_v35 = vor.u32 %v1317_v33, %v1124_v34 }
  0x31   : > { %765 = vmatpush.bf16.msrb.mxu1 %v1336_v37  ;;  %852 = vmatpush.bf16.msrb.mxu0 %v1360_v38 }
  0x32   : > { %1371 = vmatpush.bf16.msrb.mxu2 %v1360_v38 }
  0x35   : > { %766 = vmatpush.bf16.msrb.mxu1 %v1335_v40  ;;  %853 = vmatpush.bf16.msrb.mxu0 %v1359_v41 }
  0x36   : > { %1372 = vmatpush.bf16.msrb.mxu2 %v1359_v41 }
  0x39   : > { %767 = vmatpush.bf16.msrb.mxu1 %v1334_v42  ;;  %854 = vmatpush.bf16.msrb.mxu0 %v1358_v43 }
  0x3a   : > { %1373 = vmatpush.bf16.msrb.mxu2 %v1358_v43 }
  0x3c   : > { %758 = vmatmul.bf16.gmra.mxu1 %v1123_v52  ;;  %748 = vmatmul.bf16.gmra.mxu0 %v1083_v53 }
  0x3d   : > { %768 = vmatpush.bf16.msrb.mxu1 %v1333_v48  ;;  %855 = vmatpush.bf16.msrb.mxu0 %v1357_v51 }
  0x3e   : > { %1374 = vmatpush.bf16.msrb.mxu2 %v1357_v51  ;;  %835 = vmatmul.bf16.gmra.mxu3 %v1095_v59 }
  0x3f   : > { %806 = vmatmul.bf16.gmra.mxu2 %v1091_v54 }
  0x41   : > { %769 = vmatpush.bf16.msrb.mxu1 %v1332_v57  ;;  %856 = vmatpush.bf16.msrb.mxu0 %v1356_v58 }
  0x42   : > { %1375 = vmatpush.bf16.msrb.mxu2 %v1356_v58 }
  0x45   : > { %770 = vmatpush.bf16.msrb.mxu1 %v1331_v60  ;;  %857 = vmatpush.bf16.msrb.mxu0 %v1355_v61 }
  0x46   : > { %1376 = vmatpush.bf16.msrb.mxu2 %v1355_v61 }
  0x49   : > { %771 = vmatpush.bf16.msrb.mxu1 %v1330_v62  ;;  %858 = vmatpush.bf16.msrb.mxu0 %v1354_v63 }
  0x4a   : > { %1377 = vmatpush.bf16.msrb.mxu2 %v1354_v63 }
  0x4c   : > { %772 = vmatmul.bf16.vlgmr.msrb.gmra.mxu1 %v1067_v6  ;;  %859 = vmatmul.bf16.vlgmr.msrb.gmra.mxu0 %v1079_v7 }
  0x4e   : > { %840 = vmatmul.bf16.gmra.mxu3 %v1115_v11 }
  0x4f   : > { %811 = vmatmul.bf16.gmra.mxu2 %v1111_v8 }
  0x5c   : > { %777 = vmatmul.bf16.gmra.mxu1 %v1087_v18  ;;  %864 = vmatmul.bf16.gmra.mxu0 %v1099_v19 }
  0x5e   : > { %845 = vmatmul.bf16.gmra.mxu3 %v1135_v23 }
  0x5f   : > { %816 = vmatmul.bf16.gmra.mxu2 %v1131_v20 }
  0x6c   : > { %782 = vmatmul.bf16.gmra.mxu1 %v1107_v30  ;;  %869 = vmatmul.bf16.gmra.mxu0 %v1119_v31 }
  0x6f   : > { %874 = vmatmul.bf16.vlgmr.msrb.gmra.mxu2 %v1139_v32 }
  0x7c   : > { %787 = vmatmul.bf16.gmra.mxu1 %v1127_v35 }
  0xa9   : > { %v754_v36 = vpop.f32.mrf.mxu1  ;;  %v744_v37 = vpop.f32.mrf.mxu0 }
  0xb1   : > { %v1637_v39 = vpop.f32.mrf.mxu1  ;;  %v746_v40 = vpop.f32.mrf.mxu0 }
  0xb2   : > { %v802_v38 = vpop.f32.mrf.mxu2  ;;  %v831_v44 = vpop.f32.mrf.mxu3 }
  0xb9   : > { %v1639_v42 = vpop.f32.mrf.mxu1  ;;  %v749_v43 = vpop.f32.mrf.mxu0 }
  0xba   : > { %v804_v41 = vpop.f32.mrf.mxu2  ;;  %v833_v48 = vpop.f32.mrf.mxu3 }
  0xc1   : > { %v1641_v46 = vpop.f32.mrf.mxu1  ;;  %v751_v47 = vpop.f32.mrf.mxu0 }
  0xc2   : > { %v807_v45 = vpop.f32.mrf.mxu2  ;;  %v836_v61 = vpop.f32.mrf.mxu3 }
  0xc9   : > { %v773_v49 = vpop.f32.mrf.mxu1  ;;  %v860_v50 = vpop.f32.mrf.mxu0 }
  0xca   : > { %v774_v51 = vadd.f32 %v773_v49, %v744_v37  ;;  %v809_v52 = vpop.f32.mrf.mxu2  ;;  %v838_v9 = vpop.f32.mrf.mxu3 }
  0xcc   : > { %v803_v53 = vadd.f32 %v802_v38, %v774_v51 }
  0xce   : > { %v832_v54 = vadd.f32 %v831_v44, %v803_v53 }
  0xd0   : > { %v861_v56 = vadd.f32 %v860_v50, %v832_v54 }
  0xd1   : > { %v775_v57 = vpop.f32.mrf.mxu1  ;;  %v862_v58 = vpop.f32.mrf.mxu0 }
  0xd2   : > { %v911_v59 = vadd.f32 %v1646_v55, %v861_v56  ;;  %v776_v60 = vadd.f32 %v775_v57, %v746_v40  ;;  %v812_v0 = vpop.f32.mrf.mxu2  ;;  %v841_v20 = vpop.f32.mrf.mxu3 }
  0xd4   : > { %v919_v62 = vmax.f32 %v911_v59, 0.0  ;;  %v805_v63 = vadd.f32 %v804_v41, %v776_v60 }
  0xd6   : > { %927 = vst [vmem:[%s1653_s11] sm:$0xff] %v919_v62  ;;  %v834_v1 = vadd.f32 %v833_v48, %v805_v63 }
  0xd8   : > { %v863_v2 = vadd.f32 %v862_v58, %v834_v1 }
  0xd9   : > { %v778_v3 = vpop.f32.mrf.mxu1  ;;  %v865_v4 = vpop.f32.mrf.mxu0 }
  0xda   : > { %v912_v5 = vadd.f32 %v1646_v55, %v863_v2  ;;  %v779_v6 = vadd.f32 %v778_v3, %v749_v43  ;;  %v814_v11 = vpop.f32.mrf.mxu2  ;;  %v843_v31 = vpop.f32.mrf.mxu3 }
  0xdc   : > { %v920_v7 = vmax.f32 %v912_v5, 0.0  ;;  %v808_v8 = vadd.f32 %v807_v45, %v779_v6 }
  0xde   : > { %928 = vst [vmem:[%s1653_s11 + $0x8] sm:$0xff] %v920_v7  ;;  %v837_v10 = vadd.f32 %v836_v61, %v808_v8 }
  0xe0   : > { %v866_v12 = vadd.f32 %v865_v4, %v837_v10 }
  0xe1   : > { %v780_v13 = vpop.f32.mrf.mxu1  ;;  %v867_v14 = vpop.f32.mrf.mxu0 }
  0xe2   : > { %v913_v15 = vadd.f32 %v1646_v55, %v866_v12  ;;  %v781_v16 = vadd.f32 %v780_v13, %v751_v47  ;;  %v817_v22 = vpop.f32.mrf.mxu2  ;;  %v846_v47 = vpop.f32.mrf.mxu3 }
  0xe4   : > { %v921_v17 = vmax.f32 %v913_v15, 0.0  ;;  %v810_v18 = vadd.f32 %v809_v52, %v781_v16 }
  0xe6   : > { %929 = vst [vmem:[%s1653_s11 + $0x10] sm:$0xff] %v921_v17  ;;  %v839_v19 = vadd.f32 %v838_v9, %v810_v18 }
  0xe8   : > { %v868_v21 = vadd.f32 %v867_v14, %v839_v19 }
  0xe9   : > { %v783_v23 = vpop.f32.mrf.mxu1  ;;  %v870_v26 = vpop.f32.mrf.mxu0 }
  0xea   : > { %v914_v24 = vadd.f32 %v1646_v55, %v868_v21  ;;  %v784_v25 = vadd.f32 %v783_v23, %v754_v36  ;;  %v819_v35 = vpop.f32.mrf.mxu2  ;;  %v848_v58 = vpop.f32.mrf.mxu3 }
  0xec   : > { %v922_v27 = vmax.f32 %v914_v24, 0.0  ;;  %v813_v28 = vadd.f32 %v812_v0, %v784_v25 }
  0xee   : > { %930 = vst [vmem:[%s1653_s11 + $0x18] sm:$0xff] %v922_v27  ;;  %v842_v29 = vadd.f32 %v841_v20, %v813_v28 }
  0xf0   : > { %v871_v30 = vadd.f32 %v870_v26, %v842_v29 }
  0xf1   : > { %v785_v32 = vpop.f32.mrf.mxu1  ;;  %v872_v40 = vpop.f32.mrf.mxu0 }
  0xf2   : > { %v915_v33 = vadd.f32 %v1646_v55, %v871_v30  ;;  %v786_v34 = vadd.f32 %v785_v32, %v1637_v39  ;;  %v875_v50 = vpop.f32.mrf.mxu2 }
  0xf4   : > { %v923_v37 = vmax.f32 %v915_v33, 0.0  ;;  %v815_v38 = vadd.f32 %v814_v11, %v786_v34 }
  0xf6   : > { %931 = vst [vmem:[%s1653_s11 + $0x20] sm:$0xff] %v923_v37  ;;  %v844_v41 = vadd.f32 %v843_v31, %v815_v38 }
  0xf8   : > { %v873_v36 = vadd.f32 %v872_v40, %v844_v41 }
  0xf9   : > { %v788_v43 = vpop.f32.mrf.mxu1 }
  0xfa   : > { %v916_v44 = vadd.f32 %v1646_v55, %v873_v36  ;;  %v789_v45 = vadd.f32 %v788_v43, %v1639_v42  ;;  %v877_v60 = vpop.f32.mrf.mxu2 }
  0xfc   : > { %v924_v48 = vmax.f32 %v916_v44, 0.0  ;;  %v818_v49 = vadd.f32 %v817_v22, %v789_v45 }
  0xfe   : > { %932 = vst [vmem:[%s1653_s11 + $0x28] sm:$0xff] %v924_v48  ;;  %v847_v39 = vadd.f32 %v846_v47, %v818_v49 }
 0x100   : > { %v876_v51 = vadd.f32 %v875_v50, %v847_v39 }
 0x101   : > { %v790_v52 = vpop.f32.mrf.mxu1 }
 0x102   : > { %v917_v53 = vadd.f32 %v1646_v55, %v876_v51  ;;  %v791_v54 = vadd.f32 %v790_v52, %v1641_v46 }
 0x104   : > { %v925_v56 = vmax.f32 %v917_v53, 0.0  ;;  %v820_v57 = vadd.f32 %v819_v35, %v791_v54 }
 0x106   : > { %933 = vst [vmem:[%s1653_s11 + $0x30] sm:$0xff] %v925_v56  ;;  %v849_v59 = vadd.f32 %v848_v58, %v820_v57 }
 0x108   : > { %v878_v42 = vadd.f32 %v877_v60, %v849_v59 }
 0x10a   : > { %v918_v61 = vadd.f32 %v1646_v55, %v878_v42 }
 0x10c   : > { %v926_v62 = vmax.f32 %v918_v61, 0.0 }
 0x10e   : > { %934 = vst [vmem:[%s1653_s11 + $0x38] sm:$0xff] %v926_v62 }
 0x10f PF: > { %s13_s14 = sadd.s32 1, %s1426_s14   ;;  %s1686_s12 = smov %s1422_s13 }
 0x110   : > { %p10_p5 = scmp.ge.s32.totalorder %s13_s14, 4   ;;  %s1687_s13 = smov %s1689_s15 }
 0x112   :  { %12 = sbr.rel (!%p10_p5) target bundleno = 2 (0x2), region = 76 }

// kernel: _lambda_.13
= control target key start
LH: loop header
LB: loop body
LE: loop exit
PB: predicated region body
PF: predicated region fallthrough
CT: control target
= control target key end

     0   :  { %s1008_s12 = smov 0   ;;  %s1010_s13 = smov 0   ;;  %s1147_s0 = inlined_call_operand.vmem [shape: bf16[32,512], index: 0, kind: input, shape index: {}]   ;;  %s1148_s1 = inlined_call_operand.vmem [shape: bf16[512,128], index: 1, kind: input, shape index: {}]   ;;  %s1149_s2 = inlined_call_operand.vmem [shape: f32[1,128], index: 2, kind: input, shape index: {}]   ;;  %s1150_s3 = inlined_call_operand.vmem [shape: f32[32,128], index: 3, kind: output, shape index: {}]  }
   0x1   :  { %s1012_s14 = smov 0  }
   0x2 LB: > { %s32_s15 = sadd.s32 1, %s982_s13  ;;  %p750_p0 = scmp.ge.s32.totalorder %s986_s14, 1  ;;  %s986_s14 = sphi %s1012_s14, %s13_s14   ;;  %s982_s13 = sphi %s1010_s13, %s1152_s13   ;;  %s978_s12 = sphi %s1008_s12, %s1151_s12  }
   0x3   : > { %p34_p1 = scmp.ge.s32.totalorder %s32_s15, 2  ;;  %p191_p2 = scmp.lt.s32.totalorder %s986_s14, 3 }
   0x5   : > { %s1154_s15 = smov (%p34_p1, %s32_s15), 0  ;;  %p192_p3 = pnand %p750_p0, %p191_p2 }
   0x6   : > { %s751_s17 = sshll.u32 (!%p192_p3), %s978_s12, 1 }
   0x7   : > { %195 = sbr.rel (%p192_p3) target bundleno = 195 (0xc3), region = 32  ;;  %p236_p4 = scmp.lt.s32.totalorder (!%p192_p3), %s751_s17, 3 }
   0xc   : > { %v914_v0 = vld [vmem:[%s1148_s1 + $0x38] sm:$0xff]  ;;  %v913_v4 = vld [vmem:[%s1148_s1 + $0x30] sm:$0xff]  ;;  %v912_v8 = vld [vmem:[%s1148_s1 + $0x28] sm:$0xff]  ;;  %s1156_s17 = smov (!%p236_p4, %s751_s17), 3 }
   0xd   : > { %v922_v1 = vld [vmem:[%s1148_s1 + $0x78] sm:$0xff]  ;;  %555 = vmatpush.bf16.msra.mxu0 %v914_v0  ;;  %v921_v5 = vld [vmem:[%s1148_s1 + $0x70] sm:$0xff]  ;;  %v920_v9 = vld [vmem:[%s1148_s1 + $0x68] sm:$0xff]  ;;  %s902_s19 = sshll.u32 %s1156_s17, 4  ;;  %s755_s18 = sshll.u32 %s1156_s17, 3 }
   0xe   : > { %v930_v2 = vld [vmem:[%s1148_s1 + $0xb8] sm:$0xff]  ;;  %569 = vmatpush.bf16.msra.mxu1 %v922_v1  ;;  %v929_v6 = vld [vmem:[%s1148_s1 + $0xb0] sm:$0xff]  ;;  %v928_v10 = vld [vmem:[%s1148_s1 + $0xa8] sm:$0xff]  ;;  %s243_s12 = scalar_lea.vmem %s1147_s0, %s902_s19  ;;  %s265_s21 = scalar_lea.vmem %s1150_s3, %s755_s18 }
   0xf   : > { %v938_v3 = vld [vmem:[%s1148_s1 + $0xf8] sm:$0xff]  ;;  %583 = vmatpush.bf16.msra.mxu2 %v930_v2  ;;  %v937_v7 = vld [vmem:[%s1148_s1 + $0xf0] sm:$0xff]  ;;  %v936_v11 = vld [vmem:[%s1148_s1 + $0xe8] sm:$0xff] }
  0x10   : > { %597 = vmatpush.bf16.msra.mxu3 %v938_v3  ;;  %v911_v12 = vld [vmem:[%s1148_s1 + $0x20] sm:$0xff]  ;;  %v910_v16 = vld [vmem:[%s1148_s1 + $0x18] sm:$0xff]  ;;  %v909_v20 = vld [vmem:[%s1148_s1 + $0x10] sm:$0xff] }
  0x11   : > { %556 = vmatpush.bf16.msra.mxu0 %v913_v4  ;;  %v919_v13 = vld [vmem:[%s1148_s1 + $0x60] sm:$0xff]  ;;  %v918_v17 = vld [vmem:[%s1148_s1 + $0x58] sm:$0xff]  ;;  %v917_v21 = vld [vmem:[%s1148_s1 + $0x50] sm:$0xff] }
  0x12   : > { %570 = vmatpush.bf16.msra.mxu1 %v921_v5  ;;  %v927_v14 = vld [vmem:[%s1148_s1 + $0xa0] sm:$0xff]  ;;  %v926_v18 = vld [vmem:[%s1148_s1 + $0x98] sm:$0xff]  ;;  %v925_v22 = vld [vmem:[%s1148_s1 + $0x90] sm:$0xff] }
  0x13   : > { %584 = vmatpush.bf16.msra.mxu2 %v929_v6  ;;  %v935_v15 = vld [vmem:[%s1148_s1 + $0xe0] sm:$0xff]  ;;  %v934_v19 = vld [vmem:[%s1148_s1 + $0xd8] sm:$0xff]  ;;  %v933_v23 = vld [vmem:[%s1148_s1 + $0xd0] sm:$0xff] }
  0x14   : > { %598 = vmatpush.bf16.msra.mxu3 %v937_v7  ;;  %v908_v24 = vld [vmem:[%s1148_s1 + $0x8] sm:$0xff]  ;;  %v907_v28 = vld [vmem:[%s1148_s1] sm:$0xff]  ;;  %v905_v33 = vld [vmem:[%s243_s12 + $0xc] sm:$0xf0] }
  0x15   : > { %557 = vmatpush.bf16.msra.mxu0 %v912_v8  ;;  %v916_v25 = vld [vmem:[%s1148_s1 + $0x48] sm:$0xff]  ;;  %v915_v29 = vld [vmem:[%s1148_s1 + $0x40] sm:$0xff]  ;;  %v760_v35 = vld [vmem:[%s243_s12 + $0x10] sm:$0xf0] }
  0x16   : > { %571 = vmatpush.bf16.msra.mxu1 %v920_v9  ;;  %v924_v26 = vld [vmem:[%s1148_s1 + $0x88] sm:$0xff]  ;;  %v923_v30 = vld [vmem:[%s1148_s1 + $0x80] sm:$0xff]  ;;  %v906_v37 = vld [vmem:[%s243_s12 + $0x14] sm:$0xf0] }
  0x17   : > { %585 = vmatpush.bf16.msra.mxu2 %v928_v10  ;;  %v932_v27 = vld [vmem:[%s1148_s1 + $0xc8] sm:$0xff]  ;;  %v931_v31 = vld [vmem:[%s1148_s1 + $0xc0] sm:$0xff]  ;;  %v768_v39 = vld [vmem:[%s243_s12 + $0x18] sm:$0xf0] }
  0x18   : > { %599 = vmatpush.bf16.msra.mxu3 %v936_v11  ;;  %v758_v32 = vld [vmem:[%s243_s12] sm:$0xf]  ;;  %v903_v34 = vld [vmem:[%s243_s12 + $0x4] sm:$0xf]  ;;  %v766_v36 = vld [vmem:[%s243_s12 + $0x8] sm:$0xf] }
  0x19   : > { %558 = vmatpush.bf16.msra.mxu0 %v911_v12  ;;  %v904_v38 = vld [vmem:[%s243_s12 + $0xc] sm:$0xf]  ;;  %v759_v40 = vor.u32 %v905_v33, %v758_v32  ;;  %v763_v41 = vor.u32 %v903_v34, %v760_v35  ;;  %v767_v42 = vor.u32 %v906_v37, %v766_v36  ;;  %v963_v50 = vld [vmem:[%s1149_s2] ss:$0 sm:$0xff] }
  0x1a   : > { %572 = vmatpush.bf16.msra.mxu1 %v919_v13  ;;  %v771_v43 = vor.u32 %v904_v38, %v768_v39 }
  0x1b   : > { %586 = vmatpush.bf16.msra.mxu2 %v927_v14 }
  0x1c   : > { %600 = vmatpush.bf16.msra.mxu3 %v935_v15 }
  0x1d   : > { %559 = vmatpush.bf16.msra.mxu0 %v910_v16 }
  0x1e   : > { %573 = vmatpush.bf16.msra.mxu1 %v918_v17 }
  0x1f   : > { %587 = vmatpush.bf16.msra.mxu2 %v926_v18 }
  0x20   : > { %601 = vmatpush.bf16.msra.mxu3 %v934_v19 }
  0x21   : > { %560 = vmatpush.bf16.msra.mxu0 %v909_v20 }
  0x22   : > { %574 = vmatpush.bf16.msra.mxu1 %v917_v21 }
  0x23   : > { %588 = vmatpush.bf16.msra.mxu2 %v925_v22 }
  0x24   : > { %602 = vmatpush.bf16.msra.mxu3 %v933_v23 }
  0x25   : > { %561 = vmatpush.bf16.msra.mxu0 %v908_v24 }
  0x26   : > { %575 = vmatpush.bf16.msra.mxu1 %v916_v25 }
  0x27   : > { %589 = vmatpush.bf16.msra.mxu2 %v924_v26 }
  0x28   : > { %603 = vmatpush.bf16.msra.mxu3 %v932_v27 }
  0x29   : > { %562 = vmatpush.bf16.msra.mxu0 %v907_v28 }
  0x2a   : > { %576 = vmatpush.bf16.msra.mxu1 %v915_v29 }
  0x2b   : > { %590 = vmatpush.bf16.msra.mxu2 %v923_v30 }
  0x2c   : > { %604 = vmatpush.bf16.msra.mxu3 %v931_v31  ;;  %563 = vmatmul.bf16.vlgmr.msra.gmra.mxu0 %v759_v40 }
  0x2d   : > { %577 = vmatmul.bf16.vlgmr.msra.gmra.mxu1 %v763_v41 }
  0x2e   : > { %591 = vmatmul.bf16.vlgmr.msra.gmra.mxu2 %v767_v42 }
  0x2f   : > { %605 = vmatmul.bf16.vlgmr.msra.gmra.mxu3 %v771_v43 }
  0xa9   : > { %v564_v44 = vpop.f32.mrf.mxu0 }
  0xaa   : > { %v578_v45 = vpop.f32.mrf.mxu1 }
  0xab   : > { %v579_v46 = vadd.f32 %v578_v45, %v564_v44 }
  0xb1   : > { %v592_v47 = vpop.f32.mrf.mxu2  ;;  %v566_v52 = vpop.f32.mrf.mxu0 }
  0xb2   : > { %v606_v48 = vpop.f32.mrf.mxu3  ;;  %v593_v49 = vadd.f32 %v592_v47, %v579_v46  ;;  %v580_v53 = vpop.f32.mrf.mxu1 }
  0xb3   : > { %v581_v56 = vadd.f32 %v580_v53, %v566_v52 }
  0xb4   : > { %v607_v51 = vadd.f32 %v606_v48, %v593_v49 }
  0xb6   : > { %v624_v54 = vadd.f32 %v963_v50, %v607_v51 }
  0xb8   : > { %v626_v55 = vmax.f32 %v624_v54, 0.0 }
  0xb9   : > { %v594_v57 = vpop.f32.mrf.mxu2 }
  0xba   : > { %628 = vst [vmem:[%s265_s21] sm:$0xff] %v626_v55  ;;  %v595_v58 = vadd.f32 %v594_v57, %v581_v56  ;;  %v608_v59 = vpop.f32.mrf.mxu3 }
  0xbc   : > { %v609_v60 = vadd.f32 %v608_v59, %v595_v58 }
  0xbe   : > { %v625_v61 = vadd.f32 %v963_v50, %v609_v60 }
  0xc0   : > { %v627_v62 = vmax.f32 %v625_v61, 0.0 }
  0xc2   : > { %629 = vst [vmem:[%s265_s21 + $0x8] sm:$0xff] %v627_v62 }
  0xc3 PF: > { %s13_s14 = sadd.s32 1, %s986_s14   ;;  %s1151_s12 = smov %s982_s13 }
  0xc4   : > { %p10_p5 = scmp.ge.s32.totalorder %s13_s14, 4   ;;  %s1152_s13 = smov %s1154_s15 }
  0xc6   :  { %12 = sbr.rel (!%p10_p5) target bundleno = 2 (0x2), region = 76 }

// kernel: _lambda_.14
= control target key start
LH: loop header
LB: loop body
LE: loop exit
PB: predicated region body
PF: predicated region fallthrough
CT: control target
= control target key end

     0   :  { %s1933_s12 = smov 0   ;;  %s1935_s13 = smov 0   ;;  %s2342_s0 = inlined_call_operand.vmem [shape: bf16[16,896], index: 0, kind: input, shape index: {}]   ;;  %s2343_s1 = inlined_call_operand.vmem [shape: bf16[896,256], index: 1, kind: input, shape index: {}]   ;;  %s2344_s2 = inlined_call_operand.vmem [shape: f32[1,256], index: 2, kind: input, shape index: {}]   ;;  %s2345_s3 = inlined_call_operand.vmem [shape: f32[16,256], index: 3, kind: output, shape index: {}]  }
   0x1   :  { %s1937_s14 = smov 0   ;;  %s1939_s15 = smov 0  }
   0x2   :  { %s1941_s16 = smov 0  }
   0x3 LB: > { %s28_s17 = sadd.s32 1, %s1907_s15  ;;  %s1503_s18 = sadd.s32 4294967295, %s1911_s16   ;;  %s1911_s16 = sphi %s1941_s16, %s13_s16   ;;  %s1907_s15 = sphi %s1939_s15, %s2350_s15   ;;  %s1903_s14 = sphi %s1937_s14, %s2349_s14   ;;  %s1899_s13 = sphi %s1935_s13, %s2348_s13   ;;  %s1895_s12 = sphi %s1933_s12, %s2347_s12  }
   0x4   : > { %p30_p0 = scmp.ge.s32.totalorder %s28_s17, 2  ;;  %p76_p1 = scmp.ne.s32.totalorder %s1899_s13, %s1895_s12 }
   0x5   : > { %p77_p2 = scmp.eq.s32.totalorder %s1911_s16, 0  ;;  %p134_p4 = scmp.eq.s32.totalorder %s1503_s18, 1 }
   0x6   : > { %s2352_s17 = smov (%p30_p0, %s28_s17), 0  ;;  %s69_s20 = sadd.s32 1, %s1899_s13 }
   0x7   : > { %p78_p3 = por %p77_p2, %p76_p1  ;;  %s65_s19 = ssub.s32 %s1907_s15, %s2352_s17 }
   0x8   : > { %p67_p5 = scmp.eq.s32.totalorder %s65_s19, 0  ;;  %p1968_p6 = por %p134_p4, %p76_p1 }
   0x9   : > { %p1507_p7 = scmp.ge.s32.totalorder %s1911_s16, 2 }
   0xa   : > { %s1973_s22 = scalar_select %p67_p5, %s1899_s13, %s69_s20  }
   0xb   : > { %171 = sbr.rel (%p1507_p7) target bundleno = 133 (0x85), region = 20 }
  0x10   : > { %174 = sbr.rel (!%p78_p3) target bundleno = 133 (0x85), region = 24  ;;  %s176_s23 = sand.u32 (%p78_p3), 1, %s1899_s13  }
  0x11   : > { %s1508_s24 = sshll.u32 (%p78_p3), %s1907_s15, 2  ;;  %s1830_s25 = smul.u32 (%p78_p3), 448, %s176_s23 }
  0x12   : > { %s1981_s28 = scalar_lea.vmem (%p78_p3), %s2343_s1, %s1508_s24 }
  0x13   : > { %v200_v0 = vld [vmem:[%s1981_s28] sm:$0xf] (%p78_p3)  ;;  %v202_v1 = vld [vmem:[%s1981_s28 + $0x8] sm:$0xf] (%p78_p3)  ;;  %v204_v2 = vld [vmem:[%s1981_s28 + $0x10] sm:$0xf] (%p78_p3) }
  0x14   : > { %s1986_s29 = scalar_lea.vmem (%p78_p3), [#allocation3], %s1830_s25  ;;  %v206_v3 = vld [vmem:[%s1981_s28 + $0x18] sm:$0xf] (%p78_p3)  ;;  %v208_v4 = vld [vmem:[%s1981_s28 + $0x20] sm:$0xf] (%p78_p3) }
  0x15   : > { %201 = vst [vmem:[%s1986_s29] sm:$0xf] %v200_v0  ;;  %v210_v5 = vld [vmem:[%s1981_s28 + $0x28] sm:$0xf]  ;;  %v212_v6 = vld [vmem:[%s1981_s28 + $0x30] sm:$0xf] }
  0x16   : > { %203 = vst [vmem:[%s1986_s29 + $0x4] sm:$0xf] %v202_v1  ;;  %v214_v7 = vld [vmem:[%s1981_s28 + $0x38] sm:$0xf]  ;;  %v216_v8 = vld [vmem:[%s1981_s28 + $0x40] sm:$0xf] }
  0x17   : > { %205 = vst [vmem:[%s1986_s29 + $0x8] sm:$0xf] %v204_v2  ;;  %v218_v9 = vld [vmem:[%s1981_s28 + $0x48] sm:$0xf]  ;;  %v220_v10 = vld [vmem:[%s1981_s28 + $0x50] sm:$0xf] }
  0x18   : > { %207 = vst [vmem:[%s1986_s29 + $0xc] sm:$0xf] %v206_v3  ;;  %v222_v11 = vld [vmem:[%s1981_s28 + $0x58] sm:$0xf]  ;;  %v224_v12 = vld [vmem:[%s1981_s28 + $0x60] sm:$0xf] }
  0x19   : > { %209 = vst [vmem:[%s1986_s29 + $0x10] sm:$0xf] %v208_v4  ;;  %v226_v13 = vld [vmem:[%s1981_s28 + $0x68] sm:$0xf]  ;;  %v228_v14 = vld [vmem:[%s1981_s28 + $0x70] sm:$0xf] }
  0x1a   : > { %211 = vst [vmem:[%s1986_s29 + $0x14] sm:$0xf] %v210_v5  ;;  %v230_v15 = vld [vmem:[%s1981_s28 + $0x78] sm:$0xf]  ;;  %v232_v16 = vld [vmem:[%s1981_s28 + $0x80] sm:$0xf] }
  0x1b   : > { %213 = vst [vmem:[%s1986_s29 + $0x18] sm:$0xf] %v212_v6  ;;  %v234_v17 = vld [vmem:[%s1981_s28 + $0x88] sm:$0xf]  ;;  %v236_v18 = vld [vmem:[%s1981_s28 + $0x90] sm:$0xf] }
  0x1c   : > { %215 = vst [vmem:[%s1986_s29 + $0x1c] sm:$0xf] %v214_v7  ;;  %v238_v19 = vld [vmem:[%s1981_s28 + $0x98] sm:$0xf]  ;;  %v240_v20 = vld [vmem:[%s1981_s28 + $0xa0] sm:$0xf] }
  0x1d   : > { %217 = vst [vmem:[%s1986_s29 + $0x20] sm:$0xf] %v216_v8  ;;  %v242_v21 = vld [vmem:[%s1981_s28 + $0xa8] sm:$0xf]  ;;  %v244_v22 = vld [vmem:[%s1981_s28 + $0xb0] sm:$0xf] }
  0x1e   : > { %219 = vst [vmem:[%s1986_s29 + $0x24] sm:$0xf] %v218_v9  ;;  %v246_v23 = vld [vmem:[%s1981_s28 + $0xb8] sm:$0xf]  ;;  %v248_v24 = vld [vmem:[%s1981_s28 + $0xc0] sm:$0xf] }
  0x1f   : > { %221 = vst [vmem:[%s1986_s29 + $0x28] sm:$0xf] %v220_v10  ;;  %v250_v25 = vld [vmem:[%s1981_s28 + $0xc8] sm:$0xf]  ;;  %v252_v26 = vld [vmem:[%s1981_s28 + $0xd0] sm:$0xf] }
  0x20   : > { %223 = vst [vmem:[%s1986_s29 + $0x2c] sm:$0xf] %v222_v11  ;;  %v254_v27 = vld [vmem:[%s1981_s28 + $0xd8] sm:$0xf]  ;;  %v256_v28 = vld [vmem:[%s1981_s28 + $0xe0] sm:$0xf] }
  0x21   : > { %225 = vst [vmem:[%s1986_s29 + $0x30] sm:$0xf] %v224_v12  ;;  %v258_v29 = vld [vmem:[%s1981_s28 + $0xe8] sm:$0xf]  ;;  %v260_v30 = vld [vmem:[%s1981_s28 + $0xf0] sm:$0xf] }
  0x22   : > { %227 = vst [vmem:[%s1986_s29 + $0x34] sm:$0xf] %v226_v13  ;;  %v262_v31 = vld [vmem:[%s1981_s28 + $0xf8] sm:$0xf]  ;;  %v264_v32 = vld [vmem:[%s1981_s28 + $0x100] sm:$0xf] }
  0x23   : > { %229 = vst [vmem:[%s1986_s29 + $0x38] sm:$0xf] %v228_v14  ;;  %v266_v33 = vld [vmem:[%s1981_s28 + $0x108] sm:$0xf]  ;;  %v268_v34 = vld [vmem:[%s1981_s28 + $0x110] sm:$0xf] }
  0x24   : > { %231 = vst [vmem:[%s1986_s29 + $0x3c] sm:$0xf] %v230_v15  ;;  %v270_v35 = vld [vmem:[%s1981_s28 + $0x118] sm:$0xf]  ;;  %v272_v36 = vld [vmem:[%s1981_s28 + $0x120] sm:$0xf] }
  0x25   : > { %233 = vst [vmem:[%s1986_s29 + $0x40] sm:$0xf] %v232_v16  ;;  %v274_v37 = vld [vmem:[%s1981_s28 + $0x128] sm:$0xf]  ;;  %v276_v38 = vld [vmem:[%s1981_s28 + $0x130] sm:$0xf] }
  0x26   : > { %235 = vst [vmem:[%s1986_s29 + $0x44] sm:$0xf] %v234_v17  ;;  %v278_v39 = vld [vmem:[%s1981_s28 + $0x138] sm:$0xf]  ;;  %v280_v40 = vld [vmem:[%s1981_s28 + $0x140] sm:$0xf] }
  0x27   : > { %237 = vst [vmem:[%s1986_s29 + $0x48] sm:$0xf] %v236_v18  ;;  %v282_v41 = vld [vmem:[%s1981_s28 + $0x148] sm:$0xf]  ;;  %v284_v42 = vld [vmem:[%s1981_s28 + $0x150] sm:$0xf] }
  0x28   : > { %239 = vst [vmem:[%s1986_s29 + $0x4c] sm:$0xf] %v238_v19  ;;  %v286_v43 = vld [vmem:[%s1981_s28 + $0x158] sm:$0xf]  ;;  %v288_v44 = vld [vmem:[%s1981_s28 + $0x160] sm:$0xf] }
  0x29   : > { %241 = vst [vmem:[%s1986_s29 + $0x50] sm:$0xf] %v240_v20  ;;  %v290_v45 = vld [vmem:[%s1981_s28 + $0x168] sm:$0xf]  ;;  %v292_v46 = vld [vmem:[%s1981_s28 + $0x170] sm:$0xf] }
  0x2a   : > { %243 = vst [vmem:[%s1986_s29 + $0x54] sm:$0xf] %v242_v21  ;;  %v294_v47 = vld [vmem:[%s1981_s28 + $0x178] sm:$0xf]  ;;  %v296_v48 = vld [vmem:[%s1981_s28 + $0x180] sm:$0xf] }
  0x2b   : > { %245 = vst [vmem:[%s1986_s29 + $0x58] sm:$0xf] %v244_v22  ;;  %v298_v49 = vld [vmem:[%s1981_s28 + $0x188] sm:$0xf]  ;;  %v300_v50 = vld [vmem:[%s1981_s28 + $0x190] sm:$0xf] }
  0x2c   : > { %247 = vst [vmem:[%s1986_s29 + $0x5c] sm:$0xf] %v246_v23  ;;  %v302_v51 = vld [vmem:[%s1981_s28 + $0x198] sm:$0xf]  ;;  %v304_v52 = vld [vmem:[%s1981_s28 + $0x1a0] sm:$0xf] }
  0x2d   : > { %249 = vst [vmem:[%s1986_s29 + $0x60] sm:$0xf] %v248_v24  ;;  %v306_v53 = vld [vmem:[%s1981_s28 + $0x1a8] sm:$0xf]  ;;  %v308_v54 = vld [vmem:[%s1981_s28 + $0x1b0] sm:$0xf] }
  0x2e   : > { %251 = vst [vmem:[%s1986_s29 + $0x64] sm:$0xf] %v250_v25  ;;  %v310_v55 = vld [vmem:[%s1981_s28 + $0x1b8] sm:$0xf]  ;;  %v312_v56 = vld [vmem:[%s1981_s28 + $0x1c0] sm:$0xf] }
  0x2f   : > { %253 = vst [vmem:[%s1986_s29 + $0x68] sm:$0xf] %v252_v26  ;;  %v314_v57 = vld [vmem:[%s1981_s28 + $0x1c8] sm:$0xf]  ;;  %v316_v58 = vld [vmem:[%s1981_s28 + $0x1d0] sm:$0xf] }
  0x30   : > { %255 = vst [vmem:[%s1986_s29 + $0x6c] sm:$0xf] %v254_v27  ;;  %v318_v59 = vld [vmem:[%s1981_s28 + $0x1d8] sm:$0xf]  ;;  %v320_v60 = vld [vmem:[%s1981_s28 + $0x1e0] sm:$0xf] }
  0x31   : > { %257 = vst [vmem:[%s1986_s29 + $0x70] sm:$0xf] %v256_v28  ;;  %v322_v61 = vld [vmem:[%s1981_s28 + $0x1e8] sm:$0xf]  ;;  %v324_v62 = vld [vmem:[%s1981_s28 + $0x1f0] sm:$0xf] }
  0x32   : > { %259 = vst [vmem:[%s1986_s29 + $0x74] sm:$0xf] %v258_v29  ;;  %v326_v63 = vld [vmem:[%s1981_s28 + $0x1f8] sm:$0xf]  ;;  %v328_v0 = vld [vmem:[%s1981_s28 + $0x200] sm:$0xf] }
  0x33   : > { %261 = vst [vmem:[%s1986_s29 + $0x78] sm:$0xf] %v260_v30  ;;  %v330_v1 = vld [vmem:[%s1981_s28 + $0x208] sm:$0xf]  ;;  %v332_v2 = vld [vmem:[%s1981_s28 + $0x210] sm:$0xf] }
  0x34   : > { %263 = vst [vmem:[%s1986_s29 + $0x7c] sm:$0xf] %v262_v31  ;;  %v334_v3 = vld [vmem:[%s1981_s28 + $0x218] sm:$0xf]  ;;  %v336_v4 = vld [vmem:[%s1981_s28 + $0x220] sm:$0xf] }
  0x35   : > { %265 = vst [vmem:[%s1986_s29 + $0x80] sm:$0xf] %v264_v32  ;;  %v338_v5 = vld [vmem:[%s1981_s28 + $0x228] sm:$0xf]  ;;  %v340_v6 = vld [vmem:[%s1981_s28 + $0x230] sm:$0xf] }
  0x36   : > { %267 = vst [vmem:[%s1986_s29 + $0x84] sm:$0xf] %v266_v33  ;;  %v342_v7 = vld [vmem:[%s1981_s28 + $0x238] sm:$0xf]  ;;  %v344_v8 = vld [vmem:[%s1981_s28 + $0x240] sm:$0xf] }
  0x37   : > { %269 = vst [vmem:[%s1986_s29 + $0x88] sm:$0xf] %v268_v34  ;;  %v346_v9 = vld [vmem:[%s1981_s28 + $0x248] sm:$0xf]  ;;  %v348_v10 = vld [vmem:[%s1981_s28 + $0x250] sm:$0xf] }
  0x38   : > { %271 = vst [vmem:[%s1986_s29 + $0x8c] sm:$0xf] %v270_v35  ;;  %v350_v11 = vld [vmem:[%s1981_s28 + $0x258] sm:$0xf]  ;;  %v352_v12 = vld [vmem:[%s1981_s28 + $0x260] sm:$0xf] }
  0x39   : > { %273 = vst [vmem:[%s1986_s29 + $0x90] sm:$0xf] %v272_v36  ;;  %v354_v13 = vld [vmem:[%s1981_s28 + $0x268] sm:$0xf]  ;;  %v356_v14 = vld [vmem:[%s1981_s28 + $0x270] sm:$0xf] }
  0x3a   : > { %275 = vst [vmem:[%s1986_s29 + $0x94] sm:$0xf] %v274_v37  ;;  %v358_v15 = vld [vmem:[%s1981_s28 + $0x278] sm:$0xf]  ;;  %v360_v16 = vld [vmem:[%s1981_s28 + $0x280] sm:$0xf] }
  0x3b   : > { %277 = vst [vmem:[%s1986_s29 + $0x98] sm:$0xf] %v276_v38  ;;  %v362_v17 = vld [vmem:[%s1981_s28 + $0x288] sm:$0xf]  ;;  %v364_v18 = vld [vmem:[%s1981_s28 + $0x290] sm:$0xf] }
  0x3c   : > { %279 = vst [vmem:[%s1986_s29 + $0x9c] sm:$0xf] %v278_v39  ;;  %v366_v19 = vld [vmem:[%s1981_s28 + $0x298] sm:$0xf]  ;;  %v368_v20 = vld [vmem:[%s1981_s28 + $0x2a0] sm:$0xf] }
  0x3d   : > { %281 = vst [vmem:[%s1986_s29 + $0xa0] sm:$0xf] %v280_v40  ;;  %v370_v21 = vld [vmem:[%s1981_s28 + $0x2a8] sm:$0xf]  ;;  %v372_v22 = vld [vmem:[%s1981_s28 + $0x2b0] sm:$0xf] }
  0x3e   : > { %283 = vst [vmem:[%s1986_s29 + $0xa4] sm:$0xf] %v282_v41  ;;  %v374_v23 = vld [vmem:[%s1981_s28 + $0x2b8] sm:$0xf]  ;;  %v376_v24 = vld [vmem:[%s1981_s28 + $0x2c0] sm:$0xf] }
  0x3f   : > { %285 = vst [vmem:[%s1986_s29 + $0xa8] sm:$0xf] %v284_v42  ;;  %v378_v25 = vld [vmem:[%s1981_s28 + $0x2c8] sm:$0xf]  ;;  %v380_v26 = vld [vmem:[%s1981_s28 + $0x2d0] sm:$0xf] }
  0x40   : > { %287 = vst [vmem:[%s1986_s29 + $0xac] sm:$0xf] %v286_v43  ;;  %v382_v27 = vld [vmem:[%s1981_s28 + $0x2d8] sm:$0xf]  ;;  %v384_v28 = vld [vmem:[%s1981_s28 + $0x2e0] sm:$0xf] }
  0x41   : > { %289 = vst [vmem:[%s1986_s29 + $0xb0] sm:$0xf] %v288_v44  ;;  %v386_v29 = vld [vmem:[%s1981_s28 + $0x2e8] sm:$0xf]  ;;  %v388_v30 = vld [vmem:[%s1981_s28 + $0x2f0] sm:$0xf] }
  0x42   : > { %291 = vst [vmem:[%s1986_s29 + $0xb4] sm:$0xf] %v290_v45  ;;  %v390_v31 = vld [vmem:[%s1981_s28 + $0x2f8] sm:$0xf]  ;;  %v392_v32 = vld [vmem:[%s1981_s28 + $0x300] sm:$0xf] }
  0x43   : > { %293 = vst [vmem:[%s1986_s29 + $0xb8] sm:$0xf] %v292_v46  ;;  %v394_v33 = vld [vmem:[%s1981_s28 + $0x308] sm:$0xf]  ;;  %v396_v34 = vld [vmem:[%s1981_s28 + $0x310] sm:$0xf] }
  0x44   : > { %295 = vst [vmem:[%s1986_s29 + $0xbc] sm:$0xf] %v294_v47  ;;  %v398_v35 = vld [vmem:[%s1981_s28 + $0x318] sm:$0xf]  ;;  %v400_v36 = vld [vmem:[%s1981_s28 + $0x320] sm:$0xf] }
  0x45   : > { %297 = vst [vmem:[%s1986_s29 + $0xc0] sm:$0xf] %v296_v48  ;;  %v402_v37 = vld [vmem:[%s1981_s28 + $0x328] sm:$0xf]  ;;  %v404_v38 = vld [vmem:[%s1981_s28 + $0x330] sm:$0xf] }
  0x46   : > { %299 = vst [vmem:[%s1986_s29 + $0xc4] sm:$0xf] %v298_v49  ;;  %v406_v39 = vld [vmem:[%s1981_s28 + $0x338] sm:$0xf]  ;;  %v408_v40 = vld [vmem:[%s1981_s28 + $0x340] sm:$0xf] }
  0x47   : > { %301 = vst [vmem:[%s1986_s29 + $0xc8] sm:$0xf] %v300_v50  ;;  %v410_v41 = vld [vmem:[%s1981_s28 + $0x348] sm:$0xf]  ;;  %v412_v42 = vld [vmem:[%s1981_s28 + $0x350] sm:$0xf] }
  0x48   : > { %303 = vst [vmem:[%s1986_s29 + $0xcc] sm:$0xf] %v302_v51  ;;  %v414_v43 = vld [vmem:[%s1981_s28 + $0x358] sm:$0xf]  ;;  %v416_v44 = vld [vmem:[%s1981_s28 + $0x360] sm:$0xf] }
  0x49   : > { %305 = vst [vmem:[%s1986_s29 + $0xd0] sm:$0xf] %v304_v52  ;;  %v418_v45 = vld [vmem:[%s1981_s28 + $0x368] sm:$0xf]  ;;  %v420_v46 = vld [vmem:[%s1981_s28 + $0x370] sm:$0xf] }
  0x4a   : > { %307 = vst [vmem:[%s1986_s29 + $0xd4] sm:$0xf] %v306_v53  ;;  %v422_v47 = vld [vmem:[%s1981_s28 + $0x378] sm:$0xf] }
  0x4b   : > { %309 = vst [vmem:[%s1986_s29 + $0xd8] sm:$0xf] %v308_v54 }
  0x4c   : > { %311 = vst [vmem:[%s1986_s29 + $0xdc] sm:$0xf] %v310_v55 }
  0x4d   : > { %313 = vst [vmem:[%s1986_s29 + $0xe0] sm:$0xf] %v312_v56 }
  0x4e   : > { %315 = vst [vmem:[%s1986_s29 + $0xe4] sm:$0xf] %v314_v57 }
  0x4f   : > { %317 = vst [vmem:[%s1986_s29 + $0xe8] sm:$0xf] %v316_v58 }
  0x50   : > { %319 = vst [vmem:[%s1986_s29 + $0xec] sm:$0xf] %v318_v59 }
  0x51   : > { %321 = vst [vmem:[%s1986_s29 + $0xf0] sm:$0xf] %v320_v60 }
  0x52   : > { %323 = vst [vmem:[%s1986_s29 + $0xf4] sm:$0xf] %v322_v61 }
  0x53   : > { %325 = vst [vmem:[%s1986_s29 + $0xf8] sm:$0xf] %v324_v62 }
  0x54   : > { %327 = vst [vmem:[%s1986_s29 + $0xfc] sm:$0xf] %v326_v63 }
  0x55   : > { %329 = vst [vmem:[%s1986_s29 + $0x100] sm:$0xf] %v328_v0 }
  0x56   : > { %331 = vst [vmem:[%s1986_s29 + $0x104] sm:$0xf] %v330_v1 }
  0x57   : > { %333 = vst [vmem:[%s1986_s29 + $0x108] sm:$0xf] %v332_v2 }
  0x58   : > { %335 = vst [vmem:[%s1986_s29 + $0x10c] sm:$0xf] %v334_v3 }
  0x59   : > { %337 = vst [vmem:[%s1986_s29 + $0x110] sm:$0xf] %v336_v4 }
  0x5a   : > { %339 = vst [vmem:[%s1986_s29 + $0x114] sm:$0xf] %v338_v5 }
  0x5b   : > { %341 = vst [vmem:[%s1986_s29 + $0x118] sm:$0xf] %v340_v6 }
  0x5c   : > { %343 = vst [vmem:[%s1986_s29 + $0x11c] sm:$0xf] %v342_v7 }
  0x5d   : > { %345 = vst [vmem:[%s1986_s29 + $0x120] sm:$0xf] %v344_v8 }
  0x5e   : > { %347 = vst [vmem:[%s1986_s29 + $0x124] sm:$0xf] %v346_v9 }
  0x5f   : > { %349 = vst [vmem:[%s1986_s29 + $0x128] sm:$0xf] %v348_v10 }
  0x60   : > { %351 = vst [vmem:[%s1986_s29 + $0x12c] sm:$0xf] %v350_v11 }
  0x61   : > { %353 = vst [vmem:[%s1986_s29 + $0x130] sm:$0xf] %v352_v12 }
  0x62   : > { %355 = vst [vmem:[%s1986_s29 + $0x134] sm:$0xf] %v354_v13 }
  0x63   : > { %357 = vst [vmem:[%s1986_s29 + $0x138] sm:$0xf] %v356_v14 }
  0x64   : > { %359 = vst [vmem:[%s1986_s29 + $0x13c] sm:$0xf] %v358_v15 }
  0x65   : > { %361 = vst [vmem:[%s1986_s29 + $0x140] sm:$0xf] %v360_v16 }
  0x66   : > { %363 = vst [vmem:[%s1986_s29 + $0x144] sm:$0xf] %v362_v17 }
  0x67   : > { %365 = vst [vmem:[%s1986_s29 + $0x148] sm:$0xf] %v364_v18 }
  0x68   : > { %367 = vst [vmem:[%s1986_s29 + $0x14c] sm:$0xf] %v366_v19 }
  0x69   : > { %369 = vst [vmem:[%s1986_s29 + $0x150] sm:$0xf] %v368_v20 }
  0x6a   : > { %371 = vst [vmem:[%s1986_s29 + $0x154] sm:$0xf] %v370_v21 }
  0x6b   : > { %373 = vst [vmem:[%s1986_s29 + $0x158] sm:$0xf] %v372_v22 }
  0x6c   : > { %375 = vst [vmem:[%s1986_s29 + $0x15c] sm:$0xf] %v374_v23 }
  0x6d   : > { %377 = vst [vmem:[%s1986_s29 + $0x160] sm:$0xf] %v376_v24 }
  0x6e   : > { %379 = vst [vmem:[%s1986_s29 + $0x164] sm:$0xf] %v378_v25 }
  0x6f   : > { %381 = vst [vmem:[%s1986_s29 + $0x168] sm:$0xf] %v380_v26 }
  0x70   : > { %383 = vst [vmem:[%s1986_s29 + $0x16c] sm:$0xf] %v382_v27 }
  0x71   : > { %385 = vst [vmem:[%s1986_s29 + $0x170] sm:$0xf] %v384_v28 }
  0x72   : > { %387 = vst [vmem:[%s1986_s29 + $0x174] sm:$0xf] %v386_v29 }
  0x73   : > { %389 = vst [vmem:[%s1986_s29 + $0x178] sm:$0xf] %v388_v30 }
  0x74   : > { %391 = vst [vmem:[%s1986_s29 + $0x17c] sm:$0xf] %v390_v31 }
  0x75   : > { %393 = vst [vmem:[%s1986_s29 + $0x180] sm:$0xf] %v392_v32 }
  0x76   : > { %395 = vst [vmem:[%s1986_s29 + $0x184] sm:$0xf] %v394_v33 }
  0x77   : > { %397 = vst [vmem:[%s1986_s29 + $0x188] sm:$0xf] %v396_v34 }
  0x78   : > { %399 = vst [vmem:[%s1986_s29 + $0x18c] sm:$0xf] %v398_v35 }
  0x79   : > { %401 = vst [vmem:[%s1986_s29 + $0x190] sm:$0xf] %v400_v36 }
  0x7a   : > { %403 = vst [vmem:[%s1986_s29 + $0x194] sm:$0xf] %v402_v37 }
  0x7b   : > { %405 = vst [vmem:[%s1986_s29 + $0x198] sm:$0xf] %v404_v38 }
  0x7c   : > { %407 = vst [vmem:[%s1986_s29 + $0x19c] sm:$0xf] %v406_v39 }
  0x7d   : > { %409 = vst [vmem:[%s1986_s29 + $0x1a0] sm:$0xf] %v408_v40 }
  0x7e   : > { %411 = vst [vmem:[%s1986_s29 + $0x1a4] sm:$0xf] %v410_v41 }
  0x7f   : > { %413 = vst [vmem:[%s1986_s29 + $0x1a8] sm:$0xf] %v412_v42 }
  0x80   : > { %415 = vst [vmem:[%s1986_s29 + $0x1ac] sm:$0xf] %v414_v43 }
  0x81   : > { %417 = vst [vmem:[%s1986_s29 + $0x1b0] sm:$0xf] %v416_v44 }
  0x82   : > { %419 = vst [vmem:[%s1986_s29 + $0x1b4] sm:$0xf] %v418_v45 }
  0x83   : > { %421 = vst [vmem:[%s1986_s29 + $0x1b8] sm:$0xf] %v420_v46 }
  0x84   : > { %423 = vst [vmem:[%s1986_s29 + $0x1bc] sm:$0xf] %v422_v47 }
  0x85 PF: > { %p1509_p8 = scmp.ge.s32.totalorder %s1911_s16, 1  ;;  %p676_p9 = scmp.lt.s32.totalorder %s1911_s16, 3 }
  0x87   : > { %p677_p10 = pnand %p1509_p8, %p676_p9 }
  0x88   : > { %s683_s30 = sand.u32 (!%p677_p10), 1, %s1895_s12   ;;  %p731_p11 = scmp.lt.s32.totalorder (!%p677_p10), %s1903_s14, 1 }
  0x89   : > { %680 = sbr.rel (%p677_p10) target bundleno = 363 (0x16b), region = 69  ;;  %s1510_s28 = sshll.u32 (!%p677_p10), %s683_s30, 4 }
  0x8a   : > { %s1831_s4 = smul.u32 (!%p677_p10), 448, %s683_s30  ;;  %s717_s29 = scalar_lea.vmem (!%p677_p10), [#allocation4], %s1510_s28 }
  0x8c   : > { %s2214_s5 = scalar_lea.vmem (!%p677_p10), [#allocation3], %s1831_s4 }
  0x8e   : > { %v1781_v48 = vld [vmem:[%s2214_s5 + $0x38] sm:$0xff]  ;;  %v1780_v51 = vld [vmem:[%s2214_s5 + $0x30] sm:$0xff]  ;;  %v1779_v56 = vld [vmem:[%s2214_s5 + $0x28] sm:$0xff]  ;;  %s732_s24 = scalar_select %p731_p11, %s1903_s14, 1 }
  0x8f   : > { %v1789_v49 = vld [vmem:[%s2214_s5 + $0x78] sm:$0xff]  ;;  %1235 = vmatpush.bf16.msra.mxu0 %v1781_v48  ;;  %v1788_v52 = vld [vmem:[%s2214_s5 + $0x70] sm:$0xff]  ;;  %v1787_v57 = vld [vmem:[%s2214_s5 + $0x68] sm:$0xff]  ;;  %s1764_s12 = sshll.u32 (%p1968_p6), %s1903_s14, 3 }
  0x90   : > { %v1797_v50 = vld [vmem:[%s2214_s5 + $0xb8] sm:$0xff]  ;;  %1249 = vmatpush.bf16.msra.mxu1 %v1789_v49  ;;  %v1796_v54 = vld [vmem:[%s2214_s5 + $0xb0] sm:$0xff]  ;;  %v1795_v58 = vld [vmem:[%s2214_s5 + $0xa8] sm:$0xff]  ;;  %s733_s27 = scalar_lea.vmem %s2344_s2, %s732_s24  ;;  %s1363_s6 = scalar_lea.vmem (%p1968_p6), %s2345_s3, %s1764_s12 }
  0x91   : > { %v1805_v53 = vld [vmem:[%s2214_s5 + $0xf8] sm:$0xff]  ;;  %1263 = vmatpush.bf16.msra.mxu2 %v1797_v50  ;;  %v1804_v55 = vld [vmem:[%s2214_s5 + $0xf0] sm:$0xff]  ;;  %v1803_v59 = vld [vmem:[%s2214_s5 + $0xe8] sm:$0xff] }
  0x92   : > { %1277 = vmatpush.bf16.msra.mxu3 %v1805_v53  ;;  %v1778_v60 = vld [vmem:[%s2214_s5 + $0x20] sm:$0xff]  ;;  %v1777_v0 = vld [vmem:[%s2214_s5 + $0x18] sm:$0xff]  ;;  %v1776_v4 = vld [vmem:[%s2214_s5 + $0x10] sm:$0xff] }
  0x93   : > { %1236 = vmatpush.bf16.msra.mxu0 %v1780_v51  ;;  %v1786_v61 = vld [vmem:[%s2214_s5 + $0x60] sm:$0xff]  ;;  %v1785_v1 = vld [vmem:[%s2214_s5 + $0x58] sm:$0xff]  ;;  %v1784_v5 = vld [vmem:[%s2214_s5 + $0x50] sm:$0xff] }
  0x94   : > { %1250 = vmatpush.bf16.msra.mxu1 %v1788_v52  ;;  %v1794_v62 = vld [vmem:[%s2214_s5 + $0xa0] sm:$0xff]  ;;  %v1793_v2 = vld [vmem:[%s2214_s5 + $0x98] sm:$0xff]  ;;  %v1792_v6 = vld [vmem:[%s2214_s5 + $0x90] sm:$0xff] }
  0x95   : > { %1264 = vmatpush.bf16.msra.mxu2 %v1796_v54  ;;  %v1802_v63 = vld [vmem:[%s2214_s5 + $0xe0] sm:$0xff]  ;;  %v1801_v3 = vld [vmem:[%s2214_s5 + $0xd8] sm:$0xff]  ;;  %v1800_v7 = vld [vmem:[%s2214_s5 + $0xd0] sm:$0xff] }
  0x96   : > { %1278 = vmatpush.bf16.msra.mxu3 %v1804_v55  ;;  %v1775_v8 = vld [vmem:[%s2214_s5 + $0x8] sm:$0xff]  ;;  %v1774_v11 = vld [vmem:[%s2214_s5] sm:$0xff]  ;;  %v1813_v15 = vld [vmem:[%s2214_s5 + $0x138] sm:$0xff] }
  0x97   : > { %1237 = vmatpush.bf16.msra.mxu0 %v1779_v56  ;;  %v1783_v9 = vld [vmem:[%s2214_s5 + $0x48] sm:$0xff]  ;;  %v1782_v13 = vld [vmem:[%s2214_s5 + $0x40] sm:$0xff]  ;;  %v1770_v18 = vld [vmem:[%s2342_s0 + $0x18] sm:$0xf0] }
  0x98   : > { %1251 = vmatpush.bf16.msra.mxu1 %v1787_v57  ;;  %v1791_v10 = vld [vmem:[%s2214_s5 + $0x88] sm:$0xff]  ;;  %v1790_v14 = vld [vmem:[%s2214_s5 + $0x80] sm:$0xff]  ;;  %v1821_v22 = vld [vmem:[%s2214_s5 + $0x178] sm:$0xff] }
  0x99   : > { %1265 = vmatpush.bf16.msra.mxu2 %v1795_v58  ;;  %v1799_v12 = vld [vmem:[%s2214_s5 + $0xc8] sm:$0xff]  ;;  %v1513_v17 = vld [vmem:[%s2342_s0] sm:$0xf]  ;;  %v1771_v19 = vld [vmem:[%s2342_s0 + $0x20] sm:$0xf0] }
  0x9a   : > { %1279 = vmatpush.bf16.msra.mxu3 %v1803_v59  ;;  %v1521_v16 = vld [vmem:[%s2342_s0 + $0x8] sm:$0xf]  ;;  %v1767_v20 = vld [vmem:[%s2342_s0 + $0x4] sm:$0xf]  ;;  %v1515_v21 = vld [vmem:[%s2342_s0 + $0x1c] sm:$0xf0]  ;;  %v1514_v25 = vor.u32 %v1770_v18, %v1513_v17 }
  0x9b   : > { %1238 = vmatpush.bf16.msra.mxu0 %v1778_v60  ;;  %v1829_v23 = vld [vmem:[%s2214_s5 + $0x1b8] sm:$0xff]  ;;  %v1798_v24 = vld [vmem:[%s2214_s5 + $0xc0] sm:$0xff]  ;;  %v1522_v26 = vor.u32 %v1771_v19, %v1521_v16  ;;  %v1768_v27 = vld [vmem:[%s2342_s0 + $0xc] sm:$0xf]  ;;  %v1518_v29 = vor.u32 %v1767_v20, %v1515_v21 }
  0x9c   : > { %1252 = vmatpush.bf16.msra.mxu1 %v1786_v61  ;;  %v1523_v28 = vld [vmem:[%s2342_s0 + $0x24] sm:$0xf0]  ;;  %v1812_v30 = vld [vmem:[%s2214_s5 + $0x130] sm:$0xff]  ;;  %v1810_v37 = vld [vmem:[%s2214_s5 + $0x120] sm:$0xff] }
  0x9d   : > { %1266 = vmatpush.bf16.msra.mxu2 %v1794_v62  ;;  %v1820_v31 = vld [vmem:[%s2214_s5 + $0x170] sm:$0xff]  ;;  %v1526_v33 = vor.u32 %v1768_v27, %v1523_v28  ;;  %v1811_v34 = vld [vmem:[%s2214_s5 + $0x128] sm:$0xff]  ;;  %v1818_v38 = vld [vmem:[%s2214_s5 + $0x160] sm:$0xff] }
  0x9e   : > { %1280 = vmatpush.bf16.msra.mxu3 %v1802_v63  ;;  %v1828_v32 = vld [vmem:[%s2214_s5 + $0x1b0] sm:$0xff]  ;;  %v1819_v35 = vld [vmem:[%s2214_s5 + $0x168] sm:$0xff]  ;;  %v1826_v39 = vld [vmem:[%s2214_s5 + $0x1a0] sm:$0xff] }
  0x9f   : > { %1239 = vmatpush.bf16.msra.mxu0 %v1777_v0  ;;  %v1827_v36 = vld [vmem:[%s2214_s5 + $0x1a8] sm:$0xff]  ;;  %v1809_v40 = vld [vmem:[%s2214_s5 + $0x118] sm:$0xff]  ;;  %v1808_v43 = vld [vmem:[%s2214_s5 + $0x110] sm:$0xff] }
  0xa0   : > { %1253 = vmatpush.bf16.msra.mxu1 %v1785_v1  ;;  %v1817_v41 = vld [vmem:[%s2214_s5 + $0x158] sm:$0xff]  ;;  %v1816_v44 = vld [vmem:[%s2214_s5 + $0x150] sm:$0xff]  ;;  %v1807_v46 = vld [vmem:[%s2214_s5 + $0x108] sm:$0xff] }
  0xa1   : > { %1267 = vmatpush.bf16.msra.mxu2 %v1793_v2  ;;  %v1825_v42 = vld [vmem:[%s2214_s5 + $0x198] sm:$0xff]  ;;  %v1824_v45 = vld [vmem:[%s2214_s5 + $0x190] sm:$0xff]  ;;  %v1815_v47 = vld [vmem:[%s2214_s5 + $0x148] sm:$0xff] }
  0xa2   : > { %1281 = vmatpush.bf16.msra.mxu3 %v1801_v3  ;;  %v1823_v48 = vld [vmem:[%s2214_s5 + $0x188] sm:$0xff]  ;;  %v1806_v49 = vld [vmem:[%s2214_s5 + $0x100] sm:$0xff]  ;;  %v1529_v52 = vld [vmem:[%s2342_s0 + $0x10] sm:$0xf] }
  0xa3   : > { %1240 = vmatpush.bf16.msra.mxu0 %v1776_v4  ;;  %v1814_v50 = vld [vmem:[%s2214_s5 + $0x140] sm:$0xff]  ;;  %v1772_v53 = vld [vmem:[%s2342_s0 + $0x28] sm:$0xf0]  ;;  %v1769_v54 = vld [vmem:[%s2342_s0 + $0x14] sm:$0xf] }
  0xa4   : > { %1254 = vmatpush.bf16.msra.mxu1 %v1784_v5  ;;  %v1822_v51 = vld [vmem:[%s2214_s5 + $0x180] sm:$0xff]  ;;  %v1531_v55 = vld [vmem:[%s2342_s0 + $0x2c] sm:$0xf0]  ;;  %v1537_v56 = vld [vmem:[%s2342_s0 + $0x18] sm:$0xf]  ;;  %v1530_v58 = vor.u32 %v1772_v53, %v1529_v52 }
  0xa5   : > { %1268 = vmatpush.bf16.msra.mxu2 %v1792_v6  ;;  %v1773_v57 = vld [vmem:[%s2342_s0 + $0x30] sm:$0xf0]  ;;  %v1534_v59 = vor.u32 %v1769_v54, %v1531_v55 }
  0xa6   : > { %1282 = vmatpush.bf16.msra.mxu3 %v1800_v7  ;;  %v1538_v60 = vor.u32 %v1773_v57, %v1537_v56 }
  0xa7   : > { %1241 = vmatpush.bf16.msra.mxu0 %v1775_v8 }
  0xa8   : > { %1255 = vmatpush.bf16.msra.mxu1 %v1783_v9 }
  0xa9   : > { %1269 = vmatpush.bf16.msra.mxu2 %v1791_v10 }
  0xaa   : > { %1283 = vmatpush.bf16.msra.mxu3 %v1799_v12 }
  0xab   : > { %1242 = vmatpush.bf16.msra.mxu0 %v1774_v11 }
  0xac   : > { %1256 = vmatpush.bf16.msra.mxu1 %v1782_v13 }
  0xad   : > { %1270 = vmatpush.bf16.msra.mxu2 %v1790_v14  ;;  %v1872_v14 = vld [vmem:[%s733_s27] ss:$0 sm:$0xff] }
  0xae   : > { %1284 = vmatpush.bf16.msra.mxu3 %v1798_v24  ;;  %1243 = vmatmul.bf16.vlgmr.msra.gmra.mxu0 %v1514_v25 }
  0xaf   : > { %1291 = vmatpush.bf16.msrb.mxu0 %v1813_v15  ;;  %1257 = vmatmul.bf16.vlgmr.msra.gmra.mxu1 %v1518_v29 }
  0xb0   : > { %1305 = vmatpush.bf16.msrb.mxu1 %v1821_v22  ;;  %1271 = vmatmul.bf16.vlgmr.msra.gmra.mxu2 %v1522_v26 }
  0xb1   : > { %1319 = vmatpush.bf16.msrb.mxu2 %v1829_v23  ;;  %1285 = vmatmul.bf16.vlgmr.msra.gmra.mxu3 %v1526_v33 }
  0xb3   : > { %1292 = vmatpush.bf16.msrb.mxu0 %v1812_v30 }
  0xb4   : > { %1306 = vmatpush.bf16.msrb.mxu1 %v1820_v31 }
  0xb5   : > { %1320 = vmatpush.bf16.msrb.mxu2 %v1828_v32 }
  0xb7   : > { %1293 = vmatpush.bf16.msrb.mxu0 %v1811_v34 }
  0xb8   : > { %1307 = vmatpush.bf16.msrb.mxu1 %v1819_v35 }
  0xb9   : > { %1321 = vmatpush.bf16.msrb.mxu2 %v1827_v36 }
  0xbb   : > { %1294 = vmatpush.bf16.msrb.mxu0 %v1810_v37 }
  0xbc   : > { %1308 = vmatpush.bf16.msrb.mxu1 %v1818_v38 }
  0xbd   : > { %1322 = vmatpush.bf16.msrb.mxu2 %v1826_v39 }
  0xbf   : > { %1295 = vmatpush.bf16.msrb.mxu0 %v1809_v40 }
  0xc0   : > { %1309 = vmatpush.bf16.msrb.mxu1 %v1817_v41 }
  0xc1   : > { %1323 = vmatpush.bf16.msrb.mxu2 %v1825_v42 }
  0xc3   : > { %1296 = vmatpush.bf16.msrb.mxu0 %v1808_v43 }
  0xc4   : > { %1310 = vmatpush.bf16.msrb.mxu1 %v1816_v44 }
  0xc5   : > { %1324 = vmatpush.bf16.msrb.mxu2 %v1824_v45 }
  0xc7   : > { %1297 = vmatpush.bf16.msrb.mxu0 %v1807_v46 }
  0xc8   : > { %1311 = vmatpush.bf16.msrb.mxu1 %v1815_v47 }
  0xc9   : > { %1325 = vmatpush.bf16.msrb.mxu2 %v1823_v48 }
  0xcb   : > { %1298 = vmatpush.bf16.msrb.mxu0 %v1806_v49 }
  0xcc   : > { %1312 = vmatpush.bf16.msrb.mxu1 %v1814_v50 }
  0xcd   : > { %1326 = vmatpush.bf16.msrb.mxu2 %v1822_v51 }
  0xce   : > { %1299 = vmatmul.bf16.vlgmr.msrb.gmra.mxu0 %v1530_v58 }
  0xcf   : > { %1313 = vmatmul.bf16.vlgmr.msrb.gmra.mxu1 %v1534_v59 }
  0xd0   : > { %1327 = vmatmul.bf16.vlgmr.msrb.gmra.mxu2 %v1538_v60 }
 0x12b   : > { %v1244_v61 = vpop.f32.mrf.mxu0 }
 0x12c   : > { %v1258_v62 = vpop.f32.mrf.mxu1 }
 0x12d   : > { %v1259_v0 = vadd.f32 %v1258_v62, %v1244_v61 }
 0x133   : > { %v1272_v63 = vpop.f32.mrf.mxu2  ;;  %v1246_v1 = vpop.f32.mrf.mxu0 }
 0x134   : > { %v1286_v2 = vpop.f32.mrf.mxu3  ;;  %v1260_v3 = vpop.f32.mrf.mxu1  ;;  %v1273_v4 = vadd.f32 %v1272_v63, %v1259_v0 }
 0x135   : > { %v1261_v7 = vadd.f32 %v1260_v3, %v1246_v1 }
 0x136   : > { %v1287_v6 = vadd.f32 %v1286_v2, %v1273_v4 }
 0x13b   : > { %v1274_v5 = vpop.f32.mrf.mxu2 }
 0x13c   : > { %v1275_v11 = vadd.f32 %v1274_v5, %v1261_v7  ;;  %v1288_v12 = vpop.f32.mrf.mxu3 }
 0x13e   : > { %v1289_v16 = vadd.f32 %v1288_v12, %v1275_v11 }
 0x14b   : > { %v1300_v8 = vpop.f32.mrf.mxu0 }
 0x14c   : > { %v1301_v9 = vadd.f32 %v1300_v8, %v1287_v6  ;;  %v1314_v10 = vpop.f32.mrf.mxu1 }
 0x14e   : > { %v1315_v13 = vadd.f32 %v1314_v10, %v1301_v9 }
 0x153   : > { %v1328_v15 = vpop.f32.mrf.mxu2  ;;  %v1302_v18 = vpop.f32.mrf.mxu0 }
 0x154   : > { %v1329_v17 = vadd.f32 %v1328_v15, %v1315_v13  ;;  %v1303_v20 = vadd.f32 %v1302_v18, %v1289_v16  ;;  %v1316_v22 = vpop.f32.mrf.mxu1 }
 0x156   : > { %v1346_v19 = vadd.f32 %v1872_v14, %v1329_v17  ;;  %v1317_v23 = vadd.f32 %v1316_v22, %v1303_v20 }
 0x158   : > { %v1348_v21 = vmax.f32 %v1346_v19, 0.0 }
 0x15a   : > { %1350 = vst [vmem:[%s717_s29] sm:$0xff] %v1348_v21 }
 0x15b   : > { %v1330_v24 = vpop.f32.mrf.mxu2 }
 0x15c   : > { %v1331_v25 = vadd.f32 %v1330_v24, %v1317_v23 }
 0x15e   : > { %v1347_v26 = vadd.f32 %v1872_v14, %v1331_v25  ;;  %1358 = sbr.rel (!%p1968_p6) target bundleno = 363 (0x16b), region = 85 }
 0x160   : > { %v1349_v27 = vmax.f32 %v1347_v26, 0.0 }
 0x161   : > { %v1394_v28 = vld [vmem:[%s717_s29] sm:$0xff] (%p1968_p6) }
 0x162   : > { %1351 = vst [vmem:[%s717_s29 + $0x8] sm:$0xff] %v1349_v27 }
 0x163   : > { %1395 = vst [vmem:[%s1363_s6] sm:$0xff] %v1394_v28 }
 0x169   : > { %v1396_v29 = vld [vmem:[%s717_s29 + $0x8] sm:$0xff] }
 0x16a   : > { %1397 = vst [vmem:[%s1363_s6 + $0x10] sm:$0xff] %v1396_v29 }
 0x16b PF: > { %s13_s16 = sadd.s32 1, %s1911_s16   ;;  %s2347_s12 = smov %s1899_s13 }
 0x16c   : > { %p10_p12 = scmp.ge.s32.totalorder %s13_s16, 4   ;;  %s2348_s13 = smov %s1973_s22 }
 0x16d   : > { %s2349_s14 = smov %s1907_s15  ;;  %s2350_s15 = smov %s2352_s17 }
 0x16e   :  { %12 = sbr.rel (!%p10_p12) target bundleno = 3 (0x3), region = 160 }

// kernel: _lambda_.15
= control target key start
LH: loop header
LB: loop body
LE: loop exit
PB: predicated region body
PF: predicated region fallthrough
CT: control target
= control target key end

     0   :  { %s2561_s0 = inlined_call_operand.vmem [shape: bf16[16,1792], index: 0, kind: input, shape index: {}]   ;;  %s2562_s1 = inlined_call_operand.vmem [shape: bf16[1792,384], index: 1, kind: input, shape index: {}]   ;;  %s2563_s2 = inlined_call_operand.vmem [shape: f32[1,384], index: 2, kind: input, shape index: {}]   ;;  %s2564_s3 = inlined_call_operand.vmem [shape: f32[16,384], index: 3, kind: output, shape index: {}]  }
   0x1   :  { %2566 = sst [smem:[#allocation7_spill]] %s2561_s0 }
   0x2   :  { %2567 = sst [smem:[#allocation8_spill]] %s2562_s1 }
   0x3   :  { %s2080_s12 = smov 0   ;;  %s2082_s13 = smov 0  }
   0x4   :  { %s2084_s14 = smov 0   ;;  %s2086_s15 = smov 0  }
   0x5   :  { %s2088_s16 = smov 0   ;;  %s2090_s17 = smov 0  }
   0x6   :  { %s2092_s18 = smov 0   ;;  %s2094_s19 = smov 0  }
   0x7   :  { %s2096_s20 = smov 0   ;;  %s2098_s21 = smov 0  }
   0x8   :  { %s2100_s22 = smov 0  }
   0x9 LB: > { %s1541_s23 = sadd.s32 4294967295, %s2057_s22   ;;  %s25_s24 = sadd.s32 1, %s2049_s20  ;;  %s2057_s22 = sphi %s2100_s22, %s13_s22   ;;  %s2053_s21 = sphi %s2098_s21, %s2584_s21   ;;  %s2049_s20 = sphi %s2096_s20, %s2583_s20   ;;  %s2045_s19 = sphi %s2094_s19, %s2582_s19   ;;  %s2041_s18 = sphi %s2092_s18, %s2581_s18   ;;  %s2037_s17 = sphi %s2090_s17, %s2580_s17   ;;  %s2033_s16 = sphi %s2088_s16, %s2579_s16   ;;  %s2029_s15 = sphi %s2086_s15, %s2578_s15   ;;  %s2025_s14 = sphi %s2084_s14, %s2577_s14   ;;  %s2021_s13 = sphi %s2082_s13, %s2576_s13   ;;  %s2017_s12 = sphi %s2080_s12, %s2575_s12  }
   0xa   : > { %p26_p0 = scmp.ge.s32.totalorder %s25_s24, 2  ;;  %s28_s25 = sadd.s32 1, %s2053_s21 }
   0xb   : > { %s41_s26 = sadd.s32 1, %s2037_s17  ;;  %p48_p1 = scmp.ne.s32.totalorder %s2037_s17, %s2033_s16 }
   0xc   : > { %s2586_s24 = smov (%p26_p0, %s25_s24), 0  ;;  %s2588_s25 = smov (!%p26_p0, %s28_s25), %s2053_s21 }
   0xd   : > { %s37_s27 = ssub.s32 %s2049_s20, %s2586_s24  ;;  %p49_p2 = scmp.eq.s32.totalorder %s2057_s22, 0 }
   0xe   : > { %p30_p3 = scmp.ge.s32.totalorder %s2588_s25, 3  ;;  %p39_p4 = scmp.eq.s32.totalorder %s37_s27, 0 }
   0xf   : > { %p2147_p5 = por %p49_p2, %p48_p1  ;;  %s69_s29 = sadd.s32 1, %s2029_s15 }
  0x10   : > { %s2590_s25 = smov (%p30_p3, %s2588_s25), 0  ;;  %p76_p6 = scmp.ne.s32.totalorder %s2029_s15, %s2025_s14 }
  0x11   : > { %2569 = sst [smem:[#allocation6_spill]] %s2590_s25  ;;  %s65_s4 = ssub.s32 %s2053_s21, %s2590_s25 }
  0x12   : > { %s2155_s30 = scalar_select %p39_p4, %s2037_s17, %s41_s26  }
  0x13   : > { %s66_s5 = sor.u32 %s65_s4, %s37_s27  ;;  %p121_p7 = scmp.eq.s32.totalorder %s65_s4, 0 }
  0x14   : > { %p67_p8 = scmp.eq.s32.totalorder %s66_s5, 0  ;;  %p2161_p9 = por %p76_p6, %p49_p2 }
  0x15   : > { %s123_s7 = sadd.s32 1, %s2021_s13  ;;  %p133_p10 = scmp.ne.s32.totalorder %s2021_s13, %s2017_s12 }
  0x16   : > { %s2169_s8 = scalar_select %p67_p8, %s2029_s15, %s69_s29  }
  0x17   : > { %s2172_s9 = scalar_select %p121_p7, %s2021_s13, %s123_s7  }
  0x18   : > { %p134_p11 = scmp.eq.s32.totalorder %s1541_s23, 5  ;;  %p1544_p13 = scmp.ge.s32.totalorder %s2057_s22, 6 }
  0x1a   : > { %p2174_p12 = por %p134_p11, %p133_p10  ;;  %156 = sbr.rel (%p1544_p13) target bundleno = 169 (0xa9), region = 16 }
  0x1f   : > { %159 = sbr.rel (!%p2147_p5) target bundleno = 48 (0x30), region = 20  ;;  %s161_s11 = sand.u32 (%p2147_p5), 1, %s2037_s17  }
  0x20   : > { %s1811_s26 = smul.u32 (%p2147_p5), 28, %s2049_s20  ;;  %s2572_s0 = sld [smem:[#allocation7_spill]] (%p2147_p5) }
  0x21   : > { %s1875_s27 = smul.u32 (%p2147_p5), 56, %s161_s11 }
  0x23   : > { %s163_s23 = scalar_lea.vmem (%p2147_p5), [#allocation3], %s1875_s27 }
  0x26   : > { %s169_s5 = scalar_lea.vmem %s2572_s0, %s1811_s26 }
  0x27   : > { %v184_v0 = vld [vmem:[%s169_s5] sm:$0xff]  ;;  %v186_v1 = vld [vmem:[%s169_s5 + $0x8] sm:$0xff]  ;;  %v188_v2 = vld [vmem:[%s169_s5 + $0x10] sm:$0xff] }
  0x28   : > { %185 = vst [vmem:[%s163_s23] sm:$0xff] %v184_v0  ;;  %v190_v3 = vld [vmem:[%s169_s5 + $0x38] sm:$0xff]  ;;  %v192_v4 = vld [vmem:[%s169_s5 + $0x40] sm:$0xff]  ;;  %v194_v5 = vld [vmem:[%s169_s5 + $0x48] sm:$0xff] }
  0x29   : > { %187 = vst [vmem:[%s163_s23 + $0x8] sm:$0xff] %v186_v1  ;;  %v1546_v6 = vld [vmem:[%s169_s5 + $0x18] sm:$0xf]  ;;  %v1548_v7 = vld [vmem:[%s169_s5 + $0x50] sm:$0xf] }
  0x2a   : > { %189 = vst [vmem:[%s163_s23 + $0x10] sm:$0xff] %v188_v2 }
  0x2b   : > { %191 = vst [vmem:[%s163_s23 + $0x1c] sm:$0xff] %v190_v3 }
  0x2c   : > { %193 = vst [vmem:[%s163_s23 + $0x24] sm:$0xff] %v192_v4 }
  0x2d   : > { %195 = vst [vmem:[%s163_s23 + $0x2c] sm:$0xff] %v194_v5 }
  0x2e   : > { %1547 = vst [vmem:[%s163_s23 + $0x18] sm:$0xf] %v1546_v6 }
  0x2f   : > { %1549 = vst [vmem:[%s163_s23 + $0x34] sm:$0xf] %v1548_v7 }
  0x30 PF: > { %213 = sbr.rel (!%p2161_p9) target bundleno = 169 (0xa9), region = 46  ;;  %s215_s28 = sand.u32 (%p2161_p9), 1, %s2029_s15  }
  0x31   : > { %s1876_s7 = smul.u32 (%p2161_p9), 448, %s215_s28  ;;  %s2573_s1 = sld [smem:[#allocation8_spill]] (%p2161_p9) }
  0x32   : > { %s1880_s11 = smul.u32 (%p2161_p9), 336, %s2049_s20 }
  0x33   : > { %s2199_s6 = scalar_lea.vmem (%p2161_p9), [#allocation4], %s1876_s7 }
  0x34   : > { %s220_s26 = sadd.s32 (%p2161_p9), %s2053_s21, %s1880_s11 }
  0x35   : > { %s1550_s27 = sshll.u32 %s220_s26, 2 }
  0x37   : > { %s2194_s0 = scalar_lea.vmem %s2573_s1, %s1550_s27 }
  0x38   : > { %v239_v8 = vld [vmem:[%s2194_s0] sm:$0xf]  ;;  %v241_v9 = vld [vmem:[%s2194_s0 + $0xc] sm:$0xf]  ;;  %v243_v10 = vld [vmem:[%s2194_s0 + $0x18] sm:$0xf] }
  0x39   : > { %240 = vst [vmem:[%s2199_s6] sm:$0xf] %v239_v8  ;;  %v245_v11 = vld [vmem:[%s2194_s0 + $0x24] sm:$0xf]  ;;  %v247_v12 = vld [vmem:[%s2194_s0 + $0x30] sm:$0xf] }
  0x3a   : > { %242 = vst [vmem:[%s2199_s6 + $0x4] sm:$0xf] %v241_v9  ;;  %v249_v13 = vld [vmem:[%s2194_s0 + $0x3c] sm:$0xf]  ;;  %v251_v14 = vld [vmem:[%s2194_s0 + $0x48] sm:$0xf] }
  0x3b   : > { %244 = vst [vmem:[%s2199_s6 + $0x8] sm:$0xf] %v243_v10  ;;  %v253_v15 = vld [vmem:[%s2194_s0 + $0x54] sm:$0xf]  ;;  %v255_v16 = vld [vmem:[%s2194_s0 + $0x60] sm:$0xf] }
  0x3c   : > { %246 = vst [vmem:[%s2199_s6 + $0xc] sm:$0xf] %v245_v11  ;;  %v257_v17 = vld [vmem:[%s2194_s0 + $0x6c] sm:$0xf]  ;;  %v259_v18 = vld [vmem:[%s2194_s0 + $0x78] sm:$0xf] }
  0x3d   : > { %248 = vst [vmem:[%s2199_s6 + $0x10] sm:$0xf] %v247_v12  ;;  %v261_v19 = vld [vmem:[%s2194_s0 + $0x84] sm:$0xf]  ;;  %v263_v20 = vld [vmem:[%s2194_s0 + $0x90] sm:$0xf] }
  0x3e   : > { %250 = vst [vmem:[%s2199_s6 + $0x14] sm:$0xf] %v249_v13  ;;  %v265_v21 = vld [vmem:[%s2194_s0 + $0x9c] sm:$0xf]  ;;  %v267_v22 = vld [vmem:[%s2194_s0 + $0xa8] sm:$0xf] }
  0x3f   : > { %252 = vst [vmem:[%s2199_s6 + $0x18] sm:$0xf] %v251_v14  ;;  %v269_v23 = vld [vmem:[%s2194_s0 + $0xb4] sm:$0xf]  ;;  %v271_v24 = vld [vmem:[%s2194_s0 + $0xc0] sm:$0xf] }
  0x40   : > { %254 = vst [vmem:[%s2199_s6 + $0x1c] sm:$0xf] %v253_v15  ;;  %v273_v25 = vld [vmem:[%s2194_s0 + $0xcc] sm:$0xf]  ;;  %v275_v26 = vld [vmem:[%s2194_s0 + $0xd8] sm:$0xf] }
  0x41   : > { %256 = vst [vmem:[%s2199_s6 + $0x20] sm:$0xf] %v255_v16  ;;  %v277_v27 = vld [vmem:[%s2194_s0 + $0xe4] sm:$0xf]  ;;  %v279_v28 = vld [vmem:[%s2194_s0 + $0xf0] sm:$0xf] }
  0x42   : > { %258 = vst [vmem:[%s2199_s6 + $0x24] sm:$0xf] %v257_v17  ;;  %v281_v29 = vld [vmem:[%s2194_s0 + $0xfc] sm:$0xf]  ;;  %v283_v30 = vld [vmem:[%s2194_s0 + $0x108] sm:$0xf] }
  0x43   : > { %260 = vst [vmem:[%s2199_s6 + $0x28] sm:$0xf] %v259_v18  ;;  %v285_v31 = vld [vmem:[%s2194_s0 + $0x114] sm:$0xf]  ;;  %v287_v32 = vld [vmem:[%s2194_s0 + $0x120] sm:$0xf] }
  0x44   : > { %262 = vst [vmem:[%s2199_s6 + $0x2c] sm:$0xf] %v261_v19  ;;  %v289_v33 = vld [vmem:[%s2194_s0 + $0x12c] sm:$0xf]  ;;  %v291_v34 = vld [vmem:[%s2194_s0 + $0x138] sm:$0xf] }
  0x45   : > { %264 = vst [vmem:[%s2199_s6 + $0x30] sm:$0xf] %v263_v20  ;;  %v293_v35 = vld [vmem:[%s2194_s0 + $0x144] sm:$0xf]  ;;  %v295_v36 = vld [vmem:[%s2194_s0 + $0x150] sm:$0xf] }
  0x46   : > { %266 = vst [vmem:[%s2199_s6 + $0x34] sm:$0xf] %v265_v21  ;;  %v297_v37 = vld [vmem:[%s2194_s0 + $0x15c] sm:$0xf]  ;;  %v299_v38 = vld [vmem:[%s2194_s0 + $0x168] sm:$0xf] }
  0x47   : > { %268 = vst [vmem:[%s2199_s6 + $0x38] sm:$0xf] %v267_v22  ;;  %v301_v39 = vld [vmem:[%s2194_s0 + $0x174] sm:$0xf]  ;;  %v303_v40 = vld [vmem:[%s2194_s0 + $0x180] sm:$0xf] }
  0x48   : > { %270 = vst [vmem:[%s2199_s6 + $0x3c] sm:$0xf] %v269_v23  ;;  %v305_v41 = vld [vmem:[%s2194_s0 + $0x18c] sm:$0xf]  ;;  %v307_v42 = vld [vmem:[%s2194_s0 + $0x198] sm:$0xf] }
  0x49   : > { %272 = vst [vmem:[%s2199_s6 + $0x40] sm:$0xf] %v271_v24  ;;  %v309_v43 = vld [vmem:[%s2194_s0 + $0x1a4] sm:$0xf]  ;;  %v311_v44 = vld [vmem:[%s2194_s0 + $0x1b0] sm:$0xf] }
  0x4a   : > { %274 = vst [vmem:[%s2199_s6 + $0x44] sm:$0xf] %v273_v25  ;;  %v313_v45 = vld [vmem:[%s2194_s0 + $0x1bc] sm:$0xf]  ;;  %v315_v46 = vld [vmem:[%s2194_s0 + $0x1c8] sm:$0xf] }
  0x4b   : > { %276 = vst [vmem:[%s2199_s6 + $0x48] sm:$0xf] %v275_v26  ;;  %v317_v47 = vld [vmem:[%s2194_s0 + $0x1d4] sm:$0xf]  ;;  %v319_v48 = vld [vmem:[%s2194_s0 + $0x1e0] sm:$0xf] }
  0x4c   : > { %278 = vst [vmem:[%s2199_s6 + $0x4c] sm:$0xf] %v277_v27  ;;  %v321_v49 = vld [vmem:[%s2194_s0 + $0x1ec] sm:$0xf]  ;;  %v323_v50 = vld [vmem:[%s2194_s0 + $0x1f8] sm:$0xf] }
  0x4d   : > { %280 = vst [vmem:[%s2199_s6 + $0x50] sm:$0xf] %v279_v28  ;;  %v325_v51 = vld [vmem:[%s2194_s0 + $0x204] sm:$0xf]  ;;  %v327_v52 = vld [vmem:[%s2194_s0 + $0x210] sm:$0xf] }
  0x4e   : > { %282 = vst [vmem:[%s2199_s6 + $0x54] sm:$0xf] %v281_v29  ;;  %v329_v53 = vld [vmem:[%s2194_s0 + $0x21c] sm:$0xf]  ;;  %v331_v54 = vld [vmem:[%s2194_s0 + $0x228] sm:$0xf] }
  0x4f   : > { %284 = vst [vmem:[%s2199_s6 + $0x58] sm:$0xf] %v283_v30  ;;  %v333_v55 = vld [vmem:[%s2194_s0 + $0x234] sm:$0xf]  ;;  %v335_v56 = vld [vmem:[%s2194_s0 + $0x240] sm:$0xf] }
  0x50   : > { %286 = vst [vmem:[%s2199_s6 + $0x5c] sm:$0xf] %v285_v31  ;;  %v337_v57 = vld [vmem:[%s2194_s0 + $0x24c] sm:$0xf]  ;;  %v339_v58 = vld [vmem:[%s2194_s0 + $0x258] sm:$0xf] }
  0x51   : > { %288 = vst [vmem:[%s2199_s6 + $0x60] sm:$0xf] %v287_v32  ;;  %v341_v59 = vld [vmem:[%s2194_s0 + $0x264] sm:$0xf]  ;;  %v343_v60 = vld [vmem:[%s2194_s0 + $0x270] sm:$0xf] }
  0x52   : > { %290 = vst [vmem:[%s2199_s6 + $0x64] sm:$0xf] %v289_v33  ;;  %v345_v61 = vld [vmem:[%s2194_s0 + $0x27c] sm:$0xf]  ;;  %v347_v62 = vld [vmem:[%s2194_s0 + $0x288] sm:$0xf] }
  0x53   : > { %292 = vst [vmem:[%s2199_s6 + $0x68] sm:$0xf] %v291_v34  ;;  %v349_v63 = vld [vmem:[%s2194_s0 + $0x294] sm:$0xf]  ;;  %v351_v0 = vld [vmem:[%s2194_s0 + $0x2a0] sm:$0xf] }
  0x54   : > { %294 = vst [vmem:[%s2199_s6 + $0x6c] sm:$0xf] %v293_v35  ;;  %v353_v1 = vld [vmem:[%s2194_s0 + $0x2ac] sm:$0xf]  ;;  %v355_v2 = vld [vmem:[%s2194_s0 + $0x2b8] sm:$0xf] }
  0x55   : > { %296 = vst [vmem:[%s2199_s6 + $0x70] sm:$0xf] %v295_v36  ;;  %v357_v3 = vld [vmem:[%s2194_s0 + $0x2c4] sm:$0xf]  ;;  %v359_v4 = vld [vmem:[%s2194_s0 + $0x2d0] sm:$0xf] }
  0x56   : > { %298 = vst [vmem:[%s2199_s6 + $0x74] sm:$0xf] %v297_v37  ;;  %v361_v5 = vld [vmem:[%s2194_s0 + $0x2dc] sm:$0xf]  ;;  %v363_v6 = vld [vmem:[%s2194_s0 + $0x2e8] sm:$0xf] }
  0x57   : > { %300 = vst [vmem:[%s2199_s6 + $0x78] sm:$0xf] %v299_v38  ;;  %v365_v7 = vld [vmem:[%s2194_s0 + $0x2f4] sm:$0xf]  ;;  %v367_v8 = vld [vmem:[%s2194_s0 + $0x300] sm:$0xf] }
  0x58   : > { %302 = vst [vmem:[%s2199_s6 + $0x7c] sm:$0xf] %v301_v39  ;;  %v369_v9 = vld [vmem:[%s2194_s0 + $0x30c] sm:$0xf]  ;;  %v371_v10 = vld [vmem:[%s2194_s0 + $0x318] sm:$0xf] }
  0x59   : > { %304 = vst [vmem:[%s2199_s6 + $0x80] sm:$0xf] %v303_v40  ;;  %v373_v11 = vld [vmem:[%s2194_s0 + $0x324] sm:$0xf]  ;;  %v375_v12 = vld [vmem:[%s2194_s0 + $0x330] sm:$0xf] }
  0x5a   : > { %306 = vst [vmem:[%s2199_s6 + $0x84] sm:$0xf] %v305_v41  ;;  %v377_v13 = vld [vmem:[%s2194_s0 + $0x33c] sm:$0xf]  ;;  %v379_v14 = vld [vmem:[%s2194_s0 + $0x348] sm:$0xf] }
  0x5b   : > { %308 = vst [vmem:[%s2199_s6 + $0x88] sm:$0xf] %v307_v42  ;;  %v381_v15 = vld [vmem:[%s2194_s0 + $0x354] sm:$0xf]  ;;  %v383_v16 = vld [vmem:[%s2194_s0 + $0x360] sm:$0xf] }
  0x5c   : > { %310 = vst [vmem:[%s2199_s6 + $0x8c] sm:$0xf] %v309_v43  ;;  %v385_v17 = vld [vmem:[%s2194_s0 + $0x36c] sm:$0xf]  ;;  %v387_v18 = vld [vmem:[%s2194_s0 + $0x378] sm:$0xf] }
  0x5d   : > { %312 = vst [vmem:[%s2199_s6 + $0x90] sm:$0xf] %v311_v44  ;;  %v389_v19 = vld [vmem:[%s2194_s0 + $0x384] sm:$0xf]  ;;  %v391_v20 = vld [vmem:[%s2194_s0 + $0x390] sm:$0xf] }
  0x5e   : > { %314 = vst [vmem:[%s2199_s6 + $0x94] sm:$0xf] %v313_v45  ;;  %v393_v21 = vld [vmem:[%s2194_s0 + $0x39c] sm:$0xf]  ;;  %v395_v22 = vld [vmem:[%s2194_s0 + $0x3a8] sm:$0xf] }
  0x5f   : > { %316 = vst [vmem:[%s2199_s6 + $0x98] sm:$0xf] %v315_v46  ;;  %v397_v23 = vld [vmem:[%s2194_s0 + $0x3b4] sm:$0xf]  ;;  %v399_v24 = vld [vmem:[%s2194_s0 + $0x3c0] sm:$0xf] }
  0x60   : > { %318 = vst [vmem:[%s2199_s6 + $0x9c] sm:$0xf] %v317_v47  ;;  %v401_v25 = vld [vmem:[%s2194_s0 + $0x3cc] sm:$0xf]  ;;  %v403_v26 = vld [vmem:[%s2194_s0 + $0x3d8] sm:$0xf] }
  0x61   : > { %320 = vst [vmem:[%s2199_s6 + $0xa0] sm:$0xf] %v319_v48  ;;  %v405_v27 = vld [vmem:[%s2194_s0 + $0x3e4] sm:$0xf]  ;;  %v407_v28 = vld [vmem:[%s2194_s0 + $0x3f0] sm:$0xf] }
  0x62   : > { %322 = vst [vmem:[%s2199_s6 + $0xa4] sm:$0xf] %v321_v49  ;;  %v409_v29 = vld [vmem:[%s2194_s0 + $0x3fc] sm:$0xf]  ;;  %v411_v30 = vld [vmem:[%s2194_s0 + $0x408] sm:$0xf] }
  0x63   : > { %324 = vst [vmem:[%s2199_s6 + $0xa8] sm:$0xf] %v323_v50  ;;  %v413_v31 = vld [vmem:[%s2194_s0 + $0x414] sm:$0xf]  ;;  %v415_v32 = vld [vmem:[%s2194_s0 + $0x420] sm:$0xf] }
  0x64   : > { %326 = vst [vmem:[%s2199_s6 + $0xac] sm:$0xf] %v325_v51  ;;  %v417_v33 = vld [vmem:[%s2194_s0 + $0x42c] sm:$0xf]  ;;  %v419_v34 = vld [vmem:[%s2194_s0 + $0x438] sm:$0xf] }
  0x65   : > { %328 = vst [vmem:[%s2199_s6 + $0xb0] sm:$0xf] %v327_v52  ;;  %v421_v35 = vld [vmem:[%s2194_s0 + $0x444] sm:$0xf]  ;;  %v423_v36 = vld [vmem:[%s2194_s0 + $0x450] sm:$0xf] }
  0x66   : > { %330 = vst [vmem:[%s2199_s6 + $0xb4] sm:$0xf] %v329_v53  ;;  %v425_v37 = vld [vmem:[%s2194_s0 + $0x45c] sm:$0xf]  ;;  %v427_v38 = vld [vmem:[%s2194_s0 + $0x468] sm:$0xf] }
  0x67   : > { %332 = vst [vmem:[%s2199_s6 + $0xb8] sm:$0xf] %v331_v54  ;;  %v429_v39 = vld [vmem:[%s2194_s0 + $0x474] sm:$0xf]  ;;  %v431_v40 = vld [vmem:[%s2194_s0 + $0x480] sm:$0xf] }
  0x68   : > { %334 = vst [vmem:[%s2199_s6 + $0xbc] sm:$0xf] %v333_v55  ;;  %v433_v41 = vld [vmem:[%s2194_s0 + $0x48c] sm:$0xf]  ;;  %v435_v42 = vld [vmem:[%s2194_s0 + $0x498] sm:$0xf] }
  0x69   : > { %336 = vst [vmem:[%s2199_s6 + $0xc0] sm:$0xf] %v335_v56  ;;  %v437_v43 = vld [vmem:[%s2194_s0 + $0x4a4] sm:$0xf]  ;;  %v439_v44 = vld [vmem:[%s2194_s0 + $0x4b0] sm:$0xf] }
  0x6a   : > { %338 = vst [vmem:[%s2199_s6 + $0xc4] sm:$0xf] %v337_v57  ;;  %v441_v45 = vld [vmem:[%s2194_s0 + $0x4bc] sm:$0xf]  ;;  %v443_v46 = vld [vmem:[%s2194_s0 + $0x4c8] sm:$0xf] }
  0x6b   : > { %340 = vst [vmem:[%s2199_s6 + $0xc8] sm:$0xf] %v339_v58  ;;  %v445_v47 = vld [vmem:[%s2194_s0 + $0x4d4] sm:$0xf]  ;;  %v447_v48 = vld [vmem:[%s2194_s0 + $0x4e0] sm:$0xf] }
  0x6c   : > { %342 = vst [vmem:[%s2199_s6 + $0xcc] sm:$0xf] %v341_v59  ;;  %v449_v49 = vld [vmem:[%s2194_s0 + $0x4ec] sm:$0xf]  ;;  %v451_v50 = vld [vmem:[%s2194_s0 + $0x4f8] sm:$0xf] }
  0x6d   : > { %344 = vst [vmem:[%s2199_s6 + $0xd0] sm:$0xf] %v343_v60  ;;  %v453_v51 = vld [vmem:[%s2194_s0 + $0x504] sm:$0xf]  ;;  %v455_v52 = vld [vmem:[%s2194_s0 + $0x510] sm:$0xf] }
  0x6e   : > { %346 = vst [vmem:[%s2199_s6 + $0xd4] sm:$0xf] %v345_v61  ;;  %v457_v53 = vld [vmem:[%s2194_s0 + $0x51c] sm:$0xf]  ;;  %v459_v54 = vld [vmem:[%s2194_s0 + $0x528] sm:$0xf] }
  0x6f   : > { %348 = vst [vmem:[%s2199_s6 + $0xd8] sm:$0xf] %v347_v62  ;;  %v461_v55 = vld [vmem:[%s2194_s0 + $0x534] sm:$0xf] }
  0x70   : > { %350 = vst [vmem:[%s2199_s6 + $0xdc] sm:$0xf] %v349_v63 }
  0x71   : > { %352 = vst [vmem:[%s2199_s6 + $0xe0] sm:$0xf] %v351_v0 }
  0x72   : > { %354 = vst [vmem:[%s2199_s6 + $0xe4] sm:$0xf] %v353_v1 }
  0x73   : > { %356 = vst [vmem:[%s2199_s6 + $0xe8] sm:$0xf] %v355_v2 }
  0x74   : > { %358 = vst [vmem:[%s2199_s6 + $0xec] sm:$0xf] %v357_v3 }
  0x75   : > { %360 = vst [vmem:[%s2199_s6 + $0xf0] sm:$0xf] %v359_v4 }
  0x76   : > { %362 = vst [vmem:[%s2199_s6 + $0xf4] sm:$0xf] %v361_v5 }
  0x77   : > { %364 = vst [vmem:[%s2199_s6 + $0xf8] sm:$0xf] %v363_v6 }
  0x78   : > { %366 = vst [vmem:[%s2199_s6 + $0xfc] sm:$0xf] %v365_v7 }
  0x79   : > { %368 = vst [vmem:[%s2199_s6 + $0x100] sm:$0xf] %v367_v8 }
  0x7a   : > { %370 = vst [vmem:[%s2199_s6 + $0x104] sm:$0xf] %v369_v9 }
  0x7b   : > { %372 = vst [vmem:[%s2199_s6 + $0x108] sm:$0xf] %v371_v10 }
  0x7c   : > { %374 = vst [vmem:[%s2199_s6 + $0x10c] sm:$0xf] %v373_v11 }
  0x7d   : > { %376 = vst [vmem:[%s2199_s6 + $0x110] sm:$0xf] %v375_v12 }
  0x7e   : > { %378 = vst [vmem:[%s2199_s6 + $0x114] sm:$0xf] %v377_v13 }
  0x7f   : > { %380 = vst [vmem:[%s2199_s6 + $0x118] sm:$0xf] %v379_v14 }
  0x80   : > { %382 = vst [vmem:[%s2199_s6 + $0x11c] sm:$0xf] %v381_v15 }
  0x81   : > { %384 = vst [vmem:[%s2199_s6 + $0x120] sm:$0xf] %v383_v16 }
  0x82   : > { %386 = vst [vmem:[%s2199_s6 + $0x124] sm:$0xf] %v385_v17 }
  0x83   : > { %388 = vst [vmem:[%s2199_s6 + $0x128] sm:$0xf] %v387_v18 }
  0x84   : > { %390 = vst [vmem:[%s2199_s6 + $0x12c] sm:$0xf] %v389_v19 }
  0x85   : > { %392 = vst [vmem:[%s2199_s6 + $0x130] sm:$0xf] %v391_v20 }
  0x86   : > { %394 = vst [vmem:[%s2199_s6 + $0x134] sm:$0xf] %v393_v21 }
  0x87   : > { %396 = vst [vmem:[%s2199_s6 + $0x138] sm:$0xf] %v395_v22 }
  0x88   : > { %398 = vst [vmem:[%s2199_s6 + $0x13c] sm:$0xf] %v397_v23 }
  0x89   : > { %400 = vst [vmem:[%s2199_s6 + $0x140] sm:$0xf] %v399_v24 }
  0x8a   : > { %402 = vst [vmem:[%s2199_s6 + $0x144] sm:$0xf] %v401_v25 }
  0x8b   : > { %404 = vst [vmem:[%s2199_s6 + $0x148] sm:$0xf] %v403_v26 }
  0x8c   : > { %406 = vst [vmem:[%s2199_s6 + $0x14c] sm:$0xf] %v405_v27 }
  0x8d   : > { %408 = vst [vmem:[%s2199_s6 + $0x150] sm:$0xf] %v407_v28 }
  0x8e   : > { %410 = vst [vmem:[%s2199_s6 + $0x154] sm:$0xf] %v409_v29 }
  0x8f   : > { %412 = vst [vmem:[%s2199_s6 + $0x158] sm:$0xf] %v411_v30 }
  0x90   : > { %414 = vst [vmem:[%s2199_s6 + $0x15c] sm:$0xf] %v413_v31 }
  0x91   : > { %416 = vst [vmem:[%s2199_s6 + $0x160] sm:$0xf] %v415_v32 }
  0x92   : > { %418 = vst [vmem:[%s2199_s6 + $0x164] sm:$0xf] %v417_v33 }
  0x93   : > { %420 = vst [vmem:[%s2199_s6 + $0x168] sm:$0xf] %v419_v34 }
  0x94   : > { %422 = vst [vmem:[%s2199_s6 + $0x16c] sm:$0xf] %v421_v35 }
  0x95   : > { %424 = vst [vmem:[%s2199_s6 + $0x170] sm:$0xf] %v423_v36 }
  0x96   : > { %426 = vst [vmem:[%s2199_s6 + $0x174] sm:$0xf] %v425_v37 }
  0x97   : > { %428 = vst [vmem:[%s2199_s6 + $0x178] sm:$0xf] %v427_v38 }
  0x98   : > { %430 = vst [vmem:[%s2199_s6 + $0x17c] sm:$0xf] %v429_v39 }
  0x99   : > { %432 = vst [vmem:[%s2199_s6 + $0x180] sm:$0xf] %v431_v40 }
  0x9a   : > { %434 = vst [vmem:[%s2199_s6 + $0x184] sm:$0xf] %v433_v41 }
  0x9b   : > { %436 = vst [vmem:[%s2199_s6 + $0x188] sm:$0xf] %v435_v42 }
  0x9c   : > { %438 = vst [vmem:[%s2199_s6 + $0x18c] sm:$0xf] %v437_v43 }
  0x9d   : > { %440 = vst [vmem:[%s2199_s6 + $0x190] sm:$0xf] %v439_v44 }
  0x9e   : > { %442 = vst [vmem:[%s2199_s6 + $0x194] sm:$0xf] %v441_v45 }
  0x9f   : > { %444 = vst [vmem:[%s2199_s6 + $0x198] sm:$0xf] %v443_v46 }
  0xa0   : > { %446 = vst [vmem:[%s2199_s6 + $0x19c] sm:$0xf] %v445_v47 }
  0xa1   : > { %448 = vst [vmem:[%s2199_s6 + $0x1a0] sm:$0xf] %v447_v48 }
  0xa2   : > { %450 = vst [vmem:[%s2199_s6 + $0x1a4] sm:$0xf] %v449_v49 }
  0xa3   : > { %452 = vst [vmem:[%s2199_s6 + $0x1a8] sm:$0xf] %v451_v50 }
  0xa4   : > { %454 = vst [vmem:[%s2199_s6 + $0x1ac] sm:$0xf] %v453_v51 }
  0xa5   : > { %456 = vst [vmem:[%s2199_s6 + $0x1b0] sm:$0xf] %v455_v52 }
  0xa6   : > { %458 = vst [vmem:[%s2199_s6 + $0x1b4] sm:$0xf] %v457_v53 }
  0xa7   : > { %460 = vst [vmem:[%s2199_s6 + $0x1b8] sm:$0xf] %v459_v54 }
  0xa8   : > { %462 = vst [vmem:[%s2199_s6 + $0x1bc] sm:$0xf] %v461_v55 }
  0xa9 PF: > { %p1551_p0 = scmp.ge.s32.totalorder %s2057_s22, 1  ;;  %p715_p1 = scmp.lt.s32.totalorder %s2057_s22, 7 }
  0xab   : > { %p716_p2 = pnand %p1551_p0, %p715_p1 }
  0xac   : > { %s722_s5 = sand.u32 (!%p716_p2), 1, %s2033_s16   ;;  %s729_s23 = sand.u32 (!%p716_p2), 1, %s2025_s14  }
  0xad   : > { %719 = sbr.rel (%p716_p2) target bundleno = 418 (0x1a2), region = 91  ;;  %s755_s0 = sand.u32 (!%p716_p2), 1, %s2017_s12  }
  0xae   : > { %s1878_s28 = smul.u32 (!%p716_p2), 56, %s722_s5  ;;  %s1552_s11 = sshll.u32 (!%p716_p2), %s755_s0, 4 }
  0xaf   : > { %s1879_s7 = smul.u32 (!%p716_p2), 448, %s729_s23  ;;  %p761_p3 = scmp.lt.s32.totalorder (!%p716_p2), %s2045_s19, 2 }
  0xb0   : > { %s2435_s6 = scalar_lea.vmem (!%p716_p2), [#allocation3], %s1878_s28  ;;  %s2439_s25 = scalar_lea.vmem (!%p716_p2), [#allocation5], %s1552_s11 }
  0xb1   : > { %s2437_s1 = scalar_lea.vmem (!%p716_p2), [#allocation4], %s1879_s7  ;;  %p1553_p4 = scmp.ne.s32.totalorder (!%p716_p2), %s2041_s18, 0 }
  0xb2   : > { %s2429_s26 = scalar_select %p761_p3, %s2045_s19, 2 }
  0xb3   : > { %768 = sbr.rel (%p1553_p4) target bundleno = 187 (0xbb), region = 103 }
  0xb4   : > { %s763_s4 = scalar_lea.vmem %s2563_s2, %s2429_s26 }
  0xb8   : > { %v2059_v56 = vmov 0.0  }
  0xb9   : > { %769 = vst [vmem:[#allocation2] sm:$0xff] %v2059_v56 }
  0xba   : > { %770 = vst [vmem:[#allocation2 + $0x8] sm:$0xff] %v2059_v56 }
  0xbb PF: > { %v1826_v57 = vld [vmem:[%s2437_s1 + $0x38] sm:$0xff]  ;;  %v1825_v60 = vld [vmem:[%s2437_s1 + $0x30] sm:$0xff]  ;;  %v1824_v1 = vld [vmem:[%s2437_s1 + $0x28] sm:$0xff]  ;;  %p1806_p5 = scmp.ne.s32.totalorder %s2041_s18, 1 }
  0xbc   : > { %v1834_v58 = vld [vmem:[%s2437_s1 + $0x78] sm:$0xff]  ;;  %1265 = vmatpush.bf16.msra.mxu0 %v1826_v57  ;;  %v1833_v61 = vld [vmem:[%s2437_s1 + $0x70] sm:$0xff]  ;;  %v1832_v2 = vld [vmem:[%s2437_s1 + $0x68] sm:$0xff] }
  0xbd   : > { %v1842_v59 = vld [vmem:[%s2437_s1 + $0xb8] sm:$0xff]  ;;  %1279 = vmatpush.bf16.msra.mxu1 %v1834_v58  ;;  %v1841_v63 = vld [vmem:[%s2437_s1 + $0xb0] sm:$0xff]  ;;  %v1840_v3 = vld [vmem:[%s2437_s1 + $0xa8] sm:$0xff] }
  0xbe   : > { %v1850_v62 = vld [vmem:[%s2437_s1 + $0xf8] sm:$0xff]  ;;  %1293 = vmatpush.bf16.msra.mxu2 %v1842_v59  ;;  %v1849_v0 = vld [vmem:[%s2437_s1 + $0xf0] sm:$0xff]  ;;  %v1848_v4 = vld [vmem:[%s2437_s1 + $0xe8] sm:$0xff] }
  0xbf   : > { %1307 = vmatpush.bf16.msra.mxu3 %v1850_v62  ;;  %v1823_v5 = vld [vmem:[%s2437_s1 + $0x20] sm:$0xff]  ;;  %v1822_v9 = vld [vmem:[%s2437_s1 + $0x18] sm:$0xff]  ;;  %v1821_v13 = vld [vmem:[%s2437_s1 + $0x10] sm:$0xff] }
  0xc0   : > { %1266 = vmatpush.bf16.msra.mxu0 %v1825_v60  ;;  %v1831_v6 = vld [vmem:[%s2437_s1 + $0x60] sm:$0xff]  ;;  %v1830_v10 = vld [vmem:[%s2437_s1 + $0x58] sm:$0xff]  ;;  %v1829_v14 = vld [vmem:[%s2437_s1 + $0x50] sm:$0xff] }
  0xc1   : > { %1280 = vmatpush.bf16.msra.mxu1 %v1833_v61  ;;  %v1839_v7 = vld [vmem:[%s2437_s1 + $0xa0] sm:$0xff]  ;;  %v1838_v11 = vld [vmem:[%s2437_s1 + $0x98] sm:$0xff]  ;;  %v1837_v15 = vld [vmem:[%s2437_s1 + $0x90] sm:$0xff] }
  0xc2   : > { %1294 = vmatpush.bf16.msra.mxu2 %v1841_v63  ;;  %v1847_v8 = vld [vmem:[%s2437_s1 + $0xe0] sm:$0xff]  ;;  %v1846_v12 = vld [vmem:[%s2437_s1 + $0xd8] sm:$0xff]  ;;  %v1845_v16 = vld [vmem:[%s2437_s1 + $0xd0] sm:$0xff] }
  0xc3   : > { %1308 = vmatpush.bf16.msra.mxu3 %v1849_v0  ;;  %v1820_v17 = vld [vmem:[%s2437_s1 + $0x8] sm:$0xff]  ;;  %v1819_v20 = vld [vmem:[%s2437_s1] sm:$0xff]  ;;  %v1858_v24 = vld [vmem:[%s2437_s1 + $0x138] sm:$0xff] }
  0xc4   : > { %1267 = vmatpush.bf16.msra.mxu0 %v1824_v1  ;;  %v1828_v18 = vld [vmem:[%s2437_s1 + $0x48] sm:$0xff]  ;;  %v1827_v22 = vld [vmem:[%s2437_s1 + $0x40] sm:$0xff]  ;;  %v1564_v25 = vld [vmem:[%s2435_s6 + $0x8] sm:$0xf] }
  0xc5   : > { %1281 = vmatpush.bf16.msra.mxu1 %v1832_v2  ;;  %v1836_v19 = vld [vmem:[%s2437_s1 + $0x88] sm:$0xff]  ;;  %v1835_v23 = vld [vmem:[%s2437_s1 + $0x80] sm:$0xff]  ;;  %v1866_v31 = vld [vmem:[%s2437_s1 + $0x178] sm:$0xff] }
  0xc6   : > { %1295 = vmatpush.bf16.msra.mxu2 %v1840_v3  ;;  %v1844_v21 = vld [vmem:[%s2437_s1 + $0xc8] sm:$0xff]  ;;  %v1874_v32 = vld [vmem:[%s2437_s1 + $0x1b8] sm:$0xff]  ;;  %v1843_v33 = vld [vmem:[%s2437_s1 + $0xc0] sm:$0xff] }
  0xc7   : > { %1309 = vmatpush.bf16.msra.mxu3 %v1848_v4  ;;  %v1556_v26 = vld [vmem:[%s2435_s6] sm:$0xf]  ;;  %v1815_v27 = vld [vmem:[%s2435_s6 + $0x18] sm:$0xf0]  ;;  %v1816_v28 = vld [vmem:[%s2435_s6 + $0x20] sm:$0xf0] }
  0xc8   : > { %1268 = vmatpush.bf16.msra.mxu0 %v1823_v5  ;;  %v1812_v29 = vld [vmem:[%s2435_s6 + $0x4] sm:$0xf]  ;;  %v1558_v30 = vld [vmem:[%s2435_s6 + $0x1c] sm:$0xf0]  ;;  %v1557_v34 = vor.u32 %v1815_v27, %v1556_v26  ;;  %v1565_v35 = vor.u32 %v1816_v28, %v1564_v25  ;;  %v1813_v36 = vld [vmem:[%s2435_s6 + $0xc] sm:$0xf] }
  0xc9   : > { %1282 = vmatpush.bf16.msra.mxu1 %v1831_v6  ;;  %v1566_v37 = vld [vmem:[%s2435_s6 + $0x24] sm:$0xf0]  ;;  %v1561_v38 = vor.u32 %v1812_v29, %v1558_v30  ;;  %v1856_v43 = vld [vmem:[%s2437_s1 + $0x128] sm:$0xff]  ;;  %v1855_v46 = vld [vmem:[%s2437_s1 + $0x120] sm:$0xff] }
  0xca   : > { %1296 = vmatpush.bf16.msra.mxu2 %v1839_v7  ;;  %v1857_v39 = vld [vmem:[%s2437_s1 + $0x130] sm:$0xff]  ;;  %v1569_v42 = vor.u32 %v1813_v36, %v1566_v37  ;;  %v1864_v44 = vld [vmem:[%s2437_s1 + $0x168] sm:$0xff]  ;;  %v1863_v47 = vld [vmem:[%s2437_s1 + $0x160] sm:$0xff] }
  0xcb   : > { %1310 = vmatpush.bf16.msra.mxu3 %v1847_v8  ;;  %v1865_v40 = vld [vmem:[%s2437_s1 + $0x170] sm:$0xff]  ;;  %v1872_v45 = vld [vmem:[%s2437_s1 + $0x1a8] sm:$0xff]  ;;  %v1871_v48 = vld [vmem:[%s2437_s1 + $0x1a0] sm:$0xff] }
  0xcc   : > { %1269 = vmatpush.bf16.msra.mxu0 %v1822_v9  ;;  %v1873_v41 = vld [vmem:[%s2437_s1 + $0x1b0] sm:$0xff]  ;;  %v1854_v49 = vld [vmem:[%s2437_s1 + $0x118] sm:$0xff]  ;;  %v1852_v55 = vld [vmem:[%s2437_s1 + $0x108] sm:$0xff] }
  0xcd   : > { %1283 = vmatpush.bf16.msra.mxu1 %v1830_v10  ;;  %v1862_v50 = vld [vmem:[%s2437_s1 + $0x158] sm:$0xff]  ;;  %v1853_v52 = vld [vmem:[%s2437_s1 + $0x110] sm:$0xff]  ;;  %v1860_v56 = vld [vmem:[%s2437_s1 + $0x148] sm:$0xff] }
  0xce   : > { %1297 = vmatpush.bf16.msra.mxu2 %v1838_v11  ;;  %v1870_v51 = vld [vmem:[%s2437_s1 + $0x198] sm:$0xff]  ;;  %v1861_v53 = vld [vmem:[%s2437_s1 + $0x150] sm:$0xff]  ;;  %v1868_v57 = vld [vmem:[%s2437_s1 + $0x188] sm:$0xff] }
  0xcf   : > { %1311 = vmatpush.bf16.msra.mxu3 %v1846_v12  ;;  %v1869_v54 = vld [vmem:[%s2437_s1 + $0x190] sm:$0xff]  ;;  %v1851_v58 = vld [vmem:[%s2437_s1 + $0x100] sm:$0xff] }
  0xd0   : > { %1270 = vmatpush.bf16.msra.mxu0 %v1821_v13  ;;  %v1859_v59 = vld [vmem:[%s2437_s1 + $0x140] sm:$0xff]  ;;  %v1817_v62 = vld [vmem:[%s2435_s6 + $0x28] sm:$0xf0] }
  0xd1   : > { %1284 = vmatpush.bf16.msra.mxu1 %v1829_v14  ;;  %v1867_v60 = vld [vmem:[%s2437_s1 + $0x180] sm:$0xff] }
  0xd2   : > { %1298 = vmatpush.bf16.msra.mxu2 %v1837_v15  ;;  %v1572_v61 = vld [vmem:[%s2435_s6 + $0x10] sm:$0xf]  ;;  %v1814_v63 = vld [vmem:[%s2435_s6 + $0x14] sm:$0xf]  ;;  %v1580_v1 = vld [vmem:[%s2435_s6 + $0x18] sm:$0xf] }
  0xd3   : > { %1312 = vmatpush.bf16.msra.mxu3 %v1845_v16  ;;  %v1574_v0 = vld [vmem:[%s2435_s6 + $0x2c] sm:$0xf0]  ;;  %v1818_v2 = vld [vmem:[%s2435_s6 + $0x30] sm:$0xf0]  ;;  %v1573_v3 = vor.u32 %v1817_v62, %v1572_v61 }
  0xd4   : > { %1271 = vmatpush.bf16.msra.mxu0 %v1820_v17  ;;  %v1577_v4 = vor.u32 %v1814_v63, %v1574_v0  ;;  %v1581_v5 = vor.u32 %v1818_v2, %v1580_v1 }
  0xd5   : > { %1285 = vmatpush.bf16.msra.mxu1 %v1828_v18 }
  0xd6   : > { %1299 = vmatpush.bf16.msra.mxu2 %v1836_v19 }
  0xd7   : > { %1313 = vmatpush.bf16.msra.mxu3 %v1844_v21 }
  0xd8   : > { %1272 = vmatpush.bf16.msra.mxu0 %v1819_v20 }
  0xd9   : > { %1286 = vmatpush.bf16.msra.mxu1 %v1827_v22 }
  0xda   : > { %1300 = vmatpush.bf16.msra.mxu2 %v1835_v23  ;;  %v771_v23 = vld [vmem:[#allocation2] sm:$0xff] }
  0xdb   : > { %1314 = vmatpush.bf16.msra.mxu3 %v1843_v33  ;;  %1273 = vmatmul.bf16.vlgmr.msra.gmra.mxu0 %v1557_v34 }
  0xdc   : > { %1321 = vmatpush.bf16.msrb.mxu0 %v1858_v24  ;;  %1287 = vmatmul.bf16.vlgmr.msra.gmra.mxu1 %v1561_v38 }
  0xdd   : > { %1335 = vmatpush.bf16.msrb.mxu1 %v1866_v31  ;;  %1301 = vmatmul.bf16.vlgmr.msra.gmra.mxu2 %v1565_v35 }
  0xde   : > { %1349 = vmatpush.bf16.msrb.mxu2 %v1874_v32  ;;  %1315 = vmatmul.bf16.vlgmr.msra.gmra.mxu3 %v1569_v42  ;;  %v772_v32 = vld [vmem:[#allocation2 + $0x8] sm:$0xff] }
  0xe0   : > { %1322 = vmatpush.bf16.msrb.mxu0 %v1857_v39 }
  0xe1   : > { %1336 = vmatpush.bf16.msrb.mxu1 %v1865_v40 }
  0xe2   : > { %1350 = vmatpush.bf16.msrb.mxu2 %v1873_v41 }
  0xe4   : > { %1323 = vmatpush.bf16.msrb.mxu0 %v1856_v43 }
  0xe5   : > { %1337 = vmatpush.bf16.msrb.mxu1 %v1864_v44 }
  0xe6   : > { %1351 = vmatpush.bf16.msrb.mxu2 %v1872_v45 }
  0xe8   : > { %1324 = vmatpush.bf16.msrb.mxu0 %v1855_v46 }
  0xe9   : > { %1338 = vmatpush.bf16.msrb.mxu1 %v1863_v47 }
  0xea   : > { %1352 = vmatpush.bf16.msrb.mxu2 %v1871_v48 }
  0xec   : > { %1325 = vmatpush.bf16.msrb.mxu0 %v1854_v49 }
  0xed   : > { %1339 = vmatpush.bf16.msrb.mxu1 %v1862_v50 }
  0xee   : > { %1353 = vmatpush.bf16.msrb.mxu2 %v1870_v51 }
  0xf0   : > { %1326 = vmatpush.bf16.msrb.mxu0 %v1853_v52 }
  0xf1   : > { %1340 = vmatpush.bf16.msrb.mxu1 %v1861_v53 }
  0xf2   : > { %1354 = vmatpush.bf16.msrb.mxu2 %v1869_v54 }
  0xf4   : > { %1327 = vmatpush.bf16.msrb.mxu0 %v1852_v55 }
  0xf5   : > { %1341 = vmatpush.bf16.msrb.mxu1 %v1860_v56 }
  0xf6   : > { %1355 = vmatpush.bf16.msrb.mxu2 %v1868_v57 }
  0xf8   : > { %1328 = vmatpush.bf16.msrb.mxu0 %v1851_v58 }
  0xf9   : > { %1342 = vmatpush.bf16.msrb.mxu1 %v1859_v59 }
  0xfa   : > { %1356 = vmatpush.bf16.msrb.mxu2 %v1867_v60 }
  0xfb   : > { %1329 = vmatmul.bf16.vlgmr.msrb.gmra.mxu0 %v1573_v3 }
  0xfc   : > { %1343 = vmatmul.bf16.vlgmr.msrb.gmra.mxu1 %v1577_v4 }
  0xfd   : > { %1357 = vmatmul.bf16.vlgmr.msrb.gmra.mxu2 %v1581_v5 }
 0x158   : > { %v1274_v6 = vpop.f32.mrf.mxu0 }
 0x159   : > { %v1288_v7 = vpop.f32.mrf.mxu1 }
 0x15a   : > { %v1289_v9 = vadd.f32 %v1288_v7, %v1274_v6 }
 0x160   : > { %v1302_v8 = vpop.f32.mrf.mxu2  ;;  %v1276_v10 = vpop.f32.mrf.mxu0 }
 0x161   : > { %v1316_v11 = vpop.f32.mrf.mxu3  ;;  %v1290_v12 = vpop.f32.mrf.mxu1  ;;  %v1303_v13 = vadd.f32 %v1302_v8, %v1289_v9 }
 0x162   : > { %v1291_v16 = vadd.f32 %v1290_v12, %v1276_v10 }
 0x163   : > { %v1317_v15 = vadd.f32 %v1316_v11, %v1303_v13 }
 0x168   : > { %v1304_v14 = vpop.f32.mrf.mxu2 }
 0x169   : > { %v1305_v20 = vadd.f32 %v1304_v14, %v1291_v16  ;;  %v1318_v21 = vpop.f32.mrf.mxu3 }
 0x16b   : > { %v1319_v25 = vadd.f32 %v1318_v21, %v1305_v20 }
 0x178   : > { %v1330_v17 = vpop.f32.mrf.mxu0 }
 0x179   : > { %v1331_v18 = vadd.f32 %v1330_v17, %v1317_v15  ;;  %v1344_v19 = vpop.f32.mrf.mxu1 }
 0x17b   : > { %v1345_v22 = vadd.f32 %v1344_v19, %v1331_v18 }
 0x180   : > { %v1358_v24 = vpop.f32.mrf.mxu2  ;;  %v1332_v27 = vpop.f32.mrf.mxu0 }
 0x181   : > { %v1359_v26 = vadd.f32 %v1358_v24, %v1345_v22  ;;  %v1333_v29 = vadd.f32 %v1332_v27, %v1319_v25  ;;  %v1346_v30 = vpop.f32.mrf.mxu1 }
 0x183   : > { %v1363_v28 = vadd.f32 %v1359_v26, %v771_v23  ;;  %v1347_v31 = vadd.f32 %v1346_v30, %v1333_v29 }
 0x185   : > { %1365 = vst [vmem:[#allocation2] sm:$0xff] %v1363_v28 }
 0x188   : > { %v1360_v33 = vpop.f32.mrf.mxu2 }
 0x189   : > { %v1361_v34 = vadd.f32 %v1360_v33, %v1347_v31  ;;  %1370 = sbr.rel (%p1806_p5) target bundleno = 410 (0x19a), region = 107 }
 0x18b   : > { %v1364_v35 = vadd.f32 %v1361_v34, %v772_v32 }
 0x18d   : > { %1366 = vst [vmem:[#allocation2 + $0x8] sm:$0xff] %v1364_v35 }
 0x18e   : > { %v1371_v36 = vld [vmem:[#allocation2] sm:$0xff] }
 0x18f   : > { %v1970_v37 = vld [vmem:[%s763_s4] ss:$0 sm:$0xff] }
 0x190   : > { %v1377_v39 = vadd.f32 %v1970_v37, %v1371_v36 }
 0x192   : > { %v1379_v41 = vmax.f32 %v1377_v39, 0.0 }
 0x194   : > { %v1372_v38 = vld [vmem:[#allocation2 + $0x8] sm:$0xff]  ;;  %1381 = vst [vmem:[%s2439_s25] sm:$0xff] %v1379_v41 }
 0x195   : > { %v1378_v40 = vadd.f32 %v1970_v37, %v1372_v38 }
 0x197   : > { %v1380_v42 = vmax.f32 %v1378_v40, 0.0 }
 0x199   : > { %1382 = vst [vmem:[%s2439_s25 + $0x8] sm:$0xff] %v1380_v42 }
 0x19a PF: > { %1389 = sbr.rel (!%p2174_p12) target bundleno = 418 (0x1a2), region = 111  ;;  %s1808_s14 = sshll.u32 (%p2174_p12), %s2045_s19, 3 }
 0x19b   : > { %v1425_v43 = vld [vmem:[%s2439_s25] sm:$0xff] (%p2174_p12)  ;;  %s1394_s5 = scalar_lea.vmem (%p2174_p12), %s2564_s3, %s1808_s14 }
 0x19c   : > { %1426 = vst [vmem:[%s1394_s5] sm:$0xff] (%p2174_p12), %v1425_v43 }
 0x1a0   : > { %v1427_v44 = vld [vmem:[%s2439_s25 + $0x8] sm:$0xff] }
 0x1a1   : > { %1428 = vst [vmem:[%s1394_s5 + $0x18] sm:$0xff] %v1427_v44 }
 0x1a2 PF: > { %s13_s22 = sadd.s32 1, %s2057_s22   ;;  %s2574_s25 = sld [smem:[#allocation6_spill]] }
 0x1a3   : > { %p10_p6 = scmp.ge.s32.totalorder %s13_s22, 8   ;;  %s2575_s12 = smov %s2021_s13 }
 0x1a4   : > { %s2576_s13 = smov %s2172_s9  ;;  %s2577_s14 = smov %s2029_s15 }
 0x1a5   : > { %s2578_s15 = smov %s2169_s8  ;;  %s2579_s16 = smov %s2037_s17 }
 0x1a6   : > { %s2580_s17 = smov %s2155_s30  ;;  %s2581_s18 = smov %s2049_s20 }
 0x1a7   : > { %s2582_s19 = smov %s2053_s21  ;;  %s2583_s20 = smov %s2586_s24 }
 0x1a8   : > { %s2584_s21 = smov %s2574_s25  ;;  %12 = sbr.rel (!%p10_p6) target bundleno = 9 (0x9), region = 197 }

// kernel: _lambda_.17
= control target key start
LH: loop header
LB: loop body
LE: loop exit
PB: predicated region body
PF: predicated region fallthrough
CT: control target
= control target key end

     0   :  { %s424_s9 = smov 0   ;;  %s566_s0 = inlined_call_operand.vmem [shape: f32[128,768], index: 0, kind: input, shape index: {}]   ;;  %s567_s1 = inlined_call_operand.vmem [shape: f32[1,768], index: 1, kind: input, shape index: {}]   ;;  %s568_s2 = inlined_call_operand.vmem [shape: f32[128,1], index: 2, kind: output, shape index: {}]  }
   0x1 LB: > { %s381_s10 = sadd.s32 4294967295, %s407_s9   ;;  %p385_p0 = scmp.ge.s32.totalorder %s407_s9, 1  ;;  %s407_s9 = sphi %s424_s9, %s12_s9  }
   0x2   : > { %p114_p1 = scmp.lt.s32.totalorder %s407_s9, 3 }
   0x4   : > { %p115_p2 = pnand %p385_p0, %p114_p1 }
   0x5   : > { %s386_s11 = sshll.u32 (!%p115_p2), %s381_s10, 3 }
   0x6   : > { %118 = sbr.rel (%p115_p2) target bundleno = 163 (0xa3), region = 28  ;;  %p138_p3 = scmp.lt.s32.totalorder (!%p115_p2), %s386_s11, 15 }
   0xb   : > { %v198_v0 = vld [vmem:[%s567_s1] sm:$0x3f]  ;;  %s570_s11 = smov (!%p138_p3, %s386_s11), 15  ;;  %vm316_vm0 = vcmask 7168  }
   0xc   : > { %s392_s14 = smul.u32 48, %s570_s11  ;;  %v438_v1 = vperm.slane %v198_v0, 0  ;;  %v440_v2 = vperm.slane %v198_v0, 1  ;;  %v442_v3 = vperm.slane %v198_v0, 2  ;;  %v444_v4 = vperm.slane %v198_v0, 3  ;;  %s389_s18 = sshll.u32 %s570_s11, 3 }
   0xd   : > { %v454_v8 = vperm.slane %v198_v0, 4  ;;  %v456_v9 = vperm.slane %v198_v0, 5  ;;  %s148_s21 = scalar_lea.vmem %s568_s2, %s389_s18 }
   0xe   : > { %s449_s17 = scalar_lea.vmem %s566_s0, %s392_s14 }
   0xf   : > { %v162_v5 = vld [vmem:[%s449_s17 + $0x60] sm:$0xff]  ;;  %v163_v6 = vld [vmem:[%s449_s17 + $0x68] sm:$0xff]  ;;  %v164_v7 = vld [vmem:[%s449_s17 + $0x70] sm:$0xff] }
  0x10   : > { %v165_v10 = vld [vmem:[%s449_s17 + $0x78] sm:$0xff]  ;;  %v166_v11 = vld [vmem:[%s449_s17 + $0x80] sm:$0xff]  ;;  %v167_v12 = vld [vmem:[%s449_s17 + $0x88] sm:$0xff]  ;;  %v224_v13 = vmul.f32 %v438_v1, %v162_v5  ;;  %v225_v14 = vmul.f32 %v440_v2, %v163_v6  ;;  %v226_v15 = vmul.f32 %v442_v3, %v164_v7 }
  0x11   : > { %v227_v16 = vmul.f32 %v444_v4, %v165_v10  ;;  %v150_v17 = vld [vmem:[%s449_s17] sm:$0xff]  ;;  %v151_v18 = vld [vmem:[%s449_s17 + $0x8] sm:$0xff]  ;;  %v152_v19 = vld [vmem:[%s449_s17 + $0x10] sm:$0xff]  ;;  %v228_v27 = vmul.f32 %v454_v8, %v166_v11  ;;  %v229_v28 = vmul.f32 %v456_v9, %v167_v12 }
  0x12   : > { %v274_v20 = vadd.f32 %v225_v14, %v224_v13  ;;  %v153_v21 = vld [vmem:[%s449_s17 + $0x18] sm:$0xff]  ;;  %v154_v22 = vld [vmem:[%s449_s17 + $0x20] sm:$0xff]  ;;  %v155_v23 = vld [vmem:[%s449_s17 + $0x28] sm:$0xff]  ;;  %v212_v24 = vmul.f32 %v438_v1, %v150_v17  ;;  %v213_v25 = vmul.f32 %v440_v2, %v151_v18  ;;  %v214_v26 = vmul.f32 %v442_v3, %v152_v19 }
  0x13   : > { %v215_v29 = vmul.f32 %v444_v4, %v153_v21  ;;  %v174_v30 = vld [vmem:[%s449_s17 + $0xc0] sm:$0xff]  ;;  %v175_v31 = vld [vmem:[%s449_s17 + $0xc8] sm:$0xff]  ;;  %v176_v32 = vld [vmem:[%s449_s17 + $0xd0] sm:$0xff]  ;;  %v216_v40 = vmul.f32 %v454_v8, %v154_v22  ;;  %v217_v41 = vmul.f32 %v456_v9, %v155_v23 }
  0x14   : > { %v275_v33 = vadd.f32 %v274_v20, %v226_v15  ;;  %v260_v34 = vadd.f32 %v213_v25, %v212_v24  ;;  %v177_v35 = vld [vmem:[%s449_s17 + $0xd8] sm:$0xff]  ;;  %v178_v36 = vld [vmem:[%s449_s17 + $0xe0] sm:$0xff]  ;;  %v179_v37 = vld [vmem:[%s449_s17 + $0xe8] sm:$0xff]  ;;  %v236_v38 = vmul.f32 %v438_v1, %v174_v30  ;;  %v237_v39 = vmul.f32 %v440_v2, %v175_v31 }
  0x15   : > { %v238_v42 = vmul.f32 %v442_v3, %v176_v32  ;;  %v239_v43 = vmul.f32 %v444_v4, %v177_v35  ;;  %v168_v44 = vld [vmem:[%s449_s17 + $0x90] sm:$0xff]  ;;  %v169_v45 = vld [vmem:[%s449_s17 + $0x98] sm:$0xff]  ;;  %v170_v46 = vld [vmem:[%s449_s17 + $0xa0] sm:$0xff]  ;;  %v240_v53 = vmul.f32 %v454_v8, %v178_v36  ;;  %v241_v54 = vmul.f32 %v456_v9, %v179_v37 }
  0x16   : > { %v276_v47 = vadd.f32 %v275_v33, %v227_v16  ;;  %v261_v48 = vadd.f32 %v260_v34, %v214_v26  ;;  %v288_v49 = vadd.f32 %v237_v39, %v236_v38  ;;  %v171_v50 = vld [vmem:[%s449_s17 + $0xa8] sm:$0xff]  ;;  %v172_v51 = vld [vmem:[%s449_s17 + $0xb0] sm:$0xff]  ;;  %v230_v52 = vmul.f32 %v438_v1, %v168_v44  ;;  %v157_v58 = vld [vmem:[%s449_s17 + $0x38] sm:$0xff] }
  0x17   : > { %v231_v55 = vmul.f32 %v440_v2, %v169_v45  ;;  %v232_v56 = vmul.f32 %v442_v3, %v170_v46  ;;  %v156_v57 = vld [vmem:[%s449_s17 + $0x30] sm:$0xff]  ;;  %v158_v59 = vld [vmem:[%s449_s17 + $0x40] sm:$0xff]  ;;  %v173_v63 = vld [vmem:[%s449_s17 + $0xb8] sm:$0xff]  ;;  %v233_v0 = vmul.f32 %v444_v4, %v171_v50  ;;  %v219_v10 = vmul.f32 %v440_v2, %v157_v58 }
  0x18   : > { %v277_v60 = vadd.f32 %v276_v47, %v228_v27  ;;  %v262_v61 = vadd.f32 %v261_v48, %v215_v29  ;;  %v289_v62 = vadd.f32 %v288_v49, %v238_v42  ;;  %v159_v5 = vld [vmem:[%s449_s17 + $0x48] sm:$0xff]  ;;  %v218_v7 = vmul.f32 %v438_v1, %v156_v57  ;;  %v180_v12 = vld [vmem:[%s449_s17 + $0xf0] sm:$0xff]  ;;  %v181_v13 = vld [vmem:[%s449_s17 + $0xf8] sm:$0xff] }
  0x19   : > { %v281_v6 = vadd.f32 %v231_v55, %v230_v52  ;;  %v220_v11 = vmul.f32 %v442_v3, %v158_v59  ;;  %v234_v17 = vmul.f32 %v454_v8, %v172_v51  ;;  %v160_v18 = vld [vmem:[%s449_s17 + $0x50] sm:$0xff]  ;;  %v182_v19 = vld [vmem:[%s449_s17 + $0x100] sm:$0xff]  ;;  %v235_v20 = vmul.f32 %v456_v9, %v173_v63  ;;  %v161_v22 = vld [vmem:[%s449_s17 + $0x58] sm:$0xff] }
  0x1a   : > { %v278_v14 = vadd.f32 %v277_v60, %v229_v28  ;;  %v263_v15 = vadd.f32 %v262_v61, %v216_v40  ;;  %v290_v16 = vadd.f32 %v289_v62, %v239_v43  ;;  %v221_v23 = vmul.f32 %v444_v4, %v159_v5  ;;  %v183_v25 = vld [vmem:[%s449_s17 + $0x108] sm:$0xff]  ;;  %v192_v30 = vld [vmem:[%s449_s17 + $0x150] sm:$0xff]  ;;  %v193_v31 = vld [vmem:[%s449_s17 + $0x158] sm:$0xff] }
  0x1b   : > { %v282_v21 = vadd.f32 %v281_v6, %v232_v56  ;;  %v267_v24 = vadd.f32 %v219_v10, %v218_v7  ;;  %v242_v28 = vmul.f32 %v438_v1, %v180_v12  ;;  %v243_v29 = vmul.f32 %v440_v2, %v181_v13  ;;  %v184_v35 = vld [vmem:[%s449_s17 + $0x110] sm:$0xff]  ;;  %v185_v36 = vld [vmem:[%s449_s17 + $0x118] sm:$0xff]  ;;  %v194_v38 = vld [vmem:[%s449_s17 + $0x160] sm:$0xff] }
  0x1c   : > { %279 = vadd.xlane.f32.xlu1 %v278_v14  ;;  %v264_v26 = vadd.f32 %v263_v15, %v217_v41  ;;  %v291_v27 = vadd.f32 %v290_v16, %v240_v53  ;;  %v222_v33 = vmul.f32 %v454_v8, %v160_v18  ;;  %v244_v37 = vmul.f32 %v442_v3, %v182_v19  ;;  %v195_v43 = vld [vmem:[%s449_s17 + $0x168] sm:$0xff]  ;;  %v186_v48 = vld [vmem:[%s449_s17 + $0x120] sm:$0xff]  ;;  %v188_v50 = vld [vmem:[%s449_s17 + $0x130] sm:$0xff] }
  0x1d   : > { %v283_v32 = vadd.f32 %v282_v21, %v233_v0  ;;  %v268_v34 = vadd.f32 %v267_v24, %v220_v11  ;;  %v223_v40 = vmul.f32 %v456_v9, %v161_v22  ;;  %v245_v41 = vmul.f32 %v444_v4, %v183_v25  ;;  %v187_v49 = vld [vmem:[%s449_s17 + $0x128] sm:$0xff]  ;;  %v189_v60 = vld [vmem:[%s449_s17 + $0x138] sm:$0xff]  ;;  %v190_v11 = vld [vmem:[%s449_s17 + $0x140] sm:$0xff] }
  0x1e   : > { %265 = vadd.xlane.f32.xlu0 %v264_v26  ;;  %v292_v39 = vadd.f32 %v291_v27, %v241_v54  ;;  %v295_v42 = vadd.f32 %v243_v29, %v242_v28  ;;  %v254_v46 = vmul.f32 %v438_v1, %v192_v30  ;;  %v255_v47 = vmul.f32 %v440_v2, %v193_v31  ;;  %v196_v54 = vld [vmem:[%s449_s17 + $0x170] sm:$0xff]  ;;  %v197_v62 = vld [vmem:[%s449_s17 + $0x178] sm:$0xff] }
  0x1f   : > { %v284_v44 = vadd.f32 %v283_v32, %v234_v17  ;;  %v269_v45 = vadd.f32 %v268_v34, %v221_v23  ;;  %v246_v51 = vmul.f32 %v454_v8, %v184_v35  ;;  %v247_v52 = vmul.f32 %v456_v9, %v185_v36  ;;  %v191_v17 = vld [vmem:[%s449_s17 + $0x148] sm:$0xff] }
  0x20   : > { %293 = vadd.xlane.f32.xlu2 %v292_v39  ;;  %v296_v53 = vadd.f32 %v295_v42, %v244_v37  ;;  %v256_v55 = vmul.f32 %v442_v3, %v194_v38  ;;  %v257_v58 = vmul.f32 %v444_v4, %v195_v43  ;;  %v309_v59 = vadd.f32 %v255_v47, %v254_v46 }
  0x21   : > { %v285_v56 = vadd.f32 %v284_v44, %v235_v20  ;;  %v270_v57 = vadd.f32 %v269_v45, %v222_v33  ;;  %v248_v63 = vmul.f32 %v438_v1, %v186_v48  ;;  %v249_v0 = vmul.f32 %v440_v2, %v187_v49 }
  0x22   : > { %v297_v61 = vadd.f32 %v296_v53, %v245_v41  ;;  %v250_v5 = vmul.f32 %v442_v3, %v188_v50  ;;  %v258_v7 = vmul.f32 %v454_v8, %v196_v54  ;;  %v310_v10 = vadd.f32 %v309_v59, %v256_v55 }
  0x23   : > { %v271_v6 = vadd.f32 %v270_v57, %v223_v40  ;;  %v251_v13 = vmul.f32 %v444_v4, %v189_v60  ;;  %v302_v14 = vadd.f32 %v249_v0, %v248_v63  ;;  %v259_v15 = vmul.f32 %v456_v9, %v197_v62 }
  0x24   : > { %286 = vadd.xlane.f32.xlu1 %v285_v56  ;;  %v298_v12 = vadd.f32 %v297_v61, %v246_v51  ;;  %v311_v16 = vadd.f32 %v310_v10, %v257_v58  ;;  %v252_v2 = vmul.f32 %v454_v8, %v190_v11  ;;  %v253_v19 = vmul.f32 %v456_v9, %v191_v17 }
  0x25   : > { %v303_v3 = vadd.f32 %v302_v14, %v250_v5 }
  0x26   : > { %272 = vadd.xlane.f32.xlu0 %v271_v6  ;;  %v299_v1 = vadd.f32 %v298_v12, %v247_v52  ;;  %v312_v18 = vadd.f32 %v311_v16, %v258_v7 }
  0x27   : > { %v304_v20 = vadd.f32 %v303_v3, %v251_v13 }
  0x28   : > { %300 = vadd.xlane.f32.xlu2 %v299_v1  ;;  %v313_v21 = vadd.f32 %v312_v18, %v259_v15 }
  0x29   : > { %v305_v22 = vadd.f32 %v304_v20, %v252_v2 }
  0x2b   : > { %v306_v4 = vadd.f32 %v305_v22, %v253_v19 }
  0x2c   : > { %314 = vadd.xlane.f32.xlu1 %v313_v21 }
  0x2e   : > { %307 = vadd.xlane.f32.xlu0 %v306_v4 }
  0x8f   : > { %v280_v23 = vpop.xlane.xlu1 %279 }
  0x90   : > { %319 = vst.msk [vmem:[%s148_s21 + $0x10] sm:$0xff] %vm316_vm0, %v280_v23 }
  0x91   : > { %v266_v8 = vpop.xlane.xlu0 %265 }
  0x92   : > { %317 = vst.msk [vmem:[%s148_s21] sm:$0xff] %vm316_vm0, %v266_v8 }
  0x93   : > { %v294_v24 = vpop.xlane.xlu2 %293 }
  0x94   : > { %321 = vst.msk [vmem:[%s148_s21 + $0x20] sm:$0xff] %vm316_vm0, %v294_v24 }
  0x97   : > { %v287_v9 = vpop.xlane.xlu1 %286 }
  0x98   : > { %320 = vst.msk [vmem:[%s148_s21 + $0x18] sm:$0xff] %vm316_vm0, %v287_v9 }
  0x99   : > { %v273_v25 = vpop.xlane.xlu0 %272 }
  0x9a   : > { %318 = vst.msk [vmem:[%s148_s21 + $0x8] sm:$0xff] %vm316_vm0, %v273_v25 }
  0x9b   : > { %v301_v26 = vpop.xlane.xlu2 %300 }
  0x9c   : > { %322 = vst.msk [vmem:[%s148_s21 + $0x28] sm:$0xff] %vm316_vm0, %v301_v26 }
  0x9f   : > { %v315_v27 = vpop.xlane.xlu1 %314 }
  0xa0   : > { %324 = vst.msk [vmem:[%s148_s21 + $0x38] sm:$0xff] %vm316_vm0, %v315_v27 }
  0xa1   : > { %v308_v28 = vpop.xlane.xlu0 %307 }
  0xa2   : > { %323 = vst.msk [vmem:[%s148_s21 + $0x30] sm:$0xff] %vm316_vm0, %v308_v28 }
  0xa3 PF: > { %s12_s9 = sadd.s32 1, %s407_s9  }
  0xa4   : > { %p9_p4 = scmp.ge.s32.totalorder %s12_s9, 4  }
  0xa6   :  { %11 = sbr.rel (!%p9_p4) target bundleno = 1 (0x1), region = 58 }

// kernel: _lambda_.16
= control target key start
LH: loop header
LB: loop body
LE: loop exit
PB: predicated region body
PF: predicated region fallthrough
CT: control target
= control target key end

     0   :  { %s4821_s0 = inlined_call_operand.vmem [shape: bf16[128,7168], index: 0, kind: input, shape index: {}]   ;;  %s4822_s1 = inlined_call_operand.vmem [shape: bf16[7168,768], index: 1, kind: input, shape index: {}]   ;;  %s4823_s2 = inlined_call_operand.vmem [shape: f32[1,768], index: 2, kind: input, shape index: {}]   ;;  %s4824_s3 = inlined_call_operand.vmem [shape: f32[128,768], index: 3, kind: output, shape index: {}]  }
   0x1   :  { %4827 = sst [smem:[#allocation9_spill]] %s4821_s0 }
   0x2   :  { %4828 = sst [smem:[#allocation10_spill]] %s4824_s3 }
   0x3   :  { %s3664_s12 = smov 0   ;;  %s3666_s13 = smov 0  }
   0x4   :  { %s3668_s14 = smov 0   ;;  %s3670_s15 = smov 0  }
   0x5   :  { %s3672_s16 = smov 0   ;;  %s3674_s17 = smov 0  }
   0x6   :  { %s3676_s18 = smov 0   ;;  %s3678_s19 = smov 0  }
   0x7   :  { %s3680_s20 = smov 0   ;;  %s3682_s21 = smov 0  }
   0x8   :  { %s3684_s22 = smov 0   ;;  %s3686_s23 = smov 0  }
   0x9   :  { %s3688_s24 = smov 0  }
   0xa LB: > { %4829 = sst [smem:[#allocation6_spill]] %s3625_s20  ;;  %s25_s26 = sadd.s32 1, %s3629_s21  ;;  %s3641_s24 = sphi %s3688_s24, %s13_s24   ;;  %s3637_s23 = sphi %s3686_s23, %s4853_s23   ;;  %s3633_s22 = sphi %s3684_s22, %s4852_s22   ;;  %s3629_s21 = sphi %s3682_s21, %s4851_s21   ;;  %s3625_s20 = sphi %s3680_s20, %s4850_s20   ;;  %s3621_s19 = sphi %s3678_s19, %s4849_s19   ;;  %s3617_s18 = sphi %s3676_s18, %s4848_s18   ;;  %s3613_s17 = sphi %s3674_s17, %s4847_s17   ;;  %s3609_s16 = sphi %s3672_s16, %s4846_s16   ;;  %s3605_s15 = sphi %s3670_s15, %s4845_s15   ;;  %s3601_s14 = sphi %s3668_s14, %s4844_s14   ;;  %s3597_s13 = sphi %s3666_s13, %s4843_s13   ;;  %s3593_s12 = sphi %s3664_s12, %s4842_s12  }
   0xb   : > { %p26_p0 = scmp.ge.s32.totalorder %s25_s26, 7  ;;  %s28_s27 = sadd.s32 1, %s3633_s22 }
   0xc   : > { %s32_s28 = sadd.s32 1, %s3637_s23  ;;  %s41_s29 = sadd.s32 1, %s3613_s17 }
   0xd   : > { %s4855_s26 = smov (%p26_p0, %s25_s26), 0  ;;  %s4857_s27 = smov (!%p26_p0, %s28_s27), %s3633_s22 }
   0xe   : > { %4830 = sst [smem:[#allocation7_spill]] %s4855_s26  ;;  %s37_s30 = ssub.s32 %s3629_s21, %s4855_s26 }
   0xf   : > { %p48_p1 = scmp.ne.s32.totalorder %s3613_s17, %s3609_s16  ;;  %p30_p2 = scmp.ge.s32.totalorder %s4857_s27, 3 }
  0x10   : > { %p49_p3 = scmp.eq.s32.totalorder %s3641_s24, 0  ;;  %s69_s4 = sadd.s32 1, %s3605_s15 }
  0x11   : > { %p76_p4 = scmp.ne.s32.totalorder %s3605_s15, %s3601_s14  ;;  %s4859_s27 = smov (%p30_p2, %s4857_s27), 0 }
  0x12   : > { %4831 = sst [smem:[#allocation8_spill]] %s4859_s27  ;;  %s4861_s28 = smov (!%p30_p2, %s32_s28), %s3637_s23 }
  0x13   : > { %p3748_p5 = por %p49_p3, %p48_p1  ;;  %s65_s6 = ssub.s32 %s3633_s22, %s4859_s27 }
  0x14   : > { %p34_p6 = scmp.ge.s32.totalorder %s4861_s28, 2  ;;  %s66_s7 = sor.u32 %s65_s6, %s37_s30 }
  0x15   : > { %p67_p7 = scmp.eq.s32.totalorder %s66_s7, 0  ;;  %p3754_p8 = por %p76_p4, %p49_p3 }
  0x16   : > { %s4863_s28 = smov (%p34_p6, %s4861_s28), 0  ;;  %s123_s11 = sadd.s32 1, %s3597_s13 }
  0x17   : > { %s3761_s9 = scalar_select %p67_p7, %s3605_s15, %s69_s4  }
  0x18   : > { %s36_s10 = ssub.s32 %s3637_s23, %s4863_s28  ;;  %p133_p11 = scmp.ne.s32.totalorder %s3597_s13, %s3593_s12 }
  0x19   : > { %s38_s25 = sor.u32 %s37_s30, %s36_s10  ;;  %s120_s26 = sor.u32 %s65_s6, %s36_s10 }
  0x1a   : > { %p39_p9 = scmp.eq.s32.totalorder %s38_s25, 0  ;;  %p121_p10 = scmp.eq.s32.totalorder %s120_s26, 0 }
  0x1b   : > { %s4834_s27 = sadd.s32 4294967295, %s3641_s24   ;;  %p2606_p0 = scmp.ge.s32.totalorder %s3641_s24, 42 }
  0x1c   : > { %p134_p12 = scmp.eq.s32.totalorder %s4834_s27, 41 }
  0x1d   : > { %s3771_s3 = scalar_select %p39_p9, %s3613_s17, %s41_s29  }
  0x1e   : > { %s3774_s7 = scalar_select %p121_p10, %s3597_s13, %s123_s11  }
  0x1f   : > { %p3776_p13 = por %p134_p12, %p133_p11  ;;  %156 = sbr.rel (%p2606_p0) target bundleno = 214 (0xd6), region = 16 }
  0x24   : > { %159 = sbr.rel (!%p3748_p5) target bundleno = 78 (0x4e), region = 20  ;;  %s161_s25 = sand.u32 (%p3748_p5), 1, %s3613_s17  }
  0x25   : > { %s2609_s26 = sshll.u32 (%p3748_p5), %s3629_s21, 3  ;;  %s2607_s27 = sshll.u32 (%p3748_p5), %s161_s25, 8 }
  0x26   : > { %s3431_s29 = smul.u32 (%p3748_p5), 448, %s3637_s23  ;;  %s4836_s0 = sld [smem:[#allocation9_spill]] (%p3748_p5) }
  0x27   : > { %s3794_s5 = scalar_lea.vmem (%p3748_p5), [#allocation3], %s2607_s27 }
  0x28   : > { %s167_s30 = sadd.s32 (%p3748_p5), %s3431_s29, %s2609_s26 }
  0x29   : > { %s2611_s4 = sshll.u32 %s167_s30, 2 }
  0x2c   : > { %s3789_s11 = scalar_lea.vmem %s4836_s0, %s2611_s4 }
  0x2d   : > { %v182_v0 = vld [vmem:[%s3789_s11] sm:$0xff]  ;;  %v184_v1 = vld [vmem:[%s3789_s11 + $0x8] sm:$0xff]  ;;  %v186_v2 = vld [vmem:[%s3789_s11 + $0x10] sm:$0xff] }
  0x2e   : > { %183 = vst [vmem:[%s3794_s5] sm:$0xff] %v182_v0  ;;  %v188_v3 = vld [vmem:[%s3789_s11 + $0x18] sm:$0xff]  ;;  %v190_v4 = vld [vmem:[%s3789_s11 + $0xe0] sm:$0xff]  ;;  %v192_v5 = vld [vmem:[%s3789_s11 + $0xe8] sm:$0xff] }
  0x2f   : > { %185 = vst [vmem:[%s3794_s5 + $0x8] sm:$0xff] %v184_v1  ;;  %v194_v6 = vld [vmem:[%s3789_s11 + $0xf0] sm:$0xff]  ;;  %v196_v7 = vld [vmem:[%s3789_s11 + $0xf8] sm:$0xff]  ;;  %v198_v8 = vld [vmem:[%s3789_s11 + $0x1c0] sm:$0xff] }
  0x30   : > { %187 = vst [vmem:[%s3794_s5 + $0x10] sm:$0xff] %v186_v2  ;;  %v200_v9 = vld [vmem:[%s3789_s11 + $0x1c8] sm:$0xff]  ;;  %v202_v10 = vld [vmem:[%s3789_s11 + $0x1d0] sm:$0xff]  ;;  %v204_v11 = vld [vmem:[%s3789_s11 + $0x1d8] sm:$0xff] }
  0x31   : > { %189 = vst [vmem:[%s3794_s5 + $0x18] sm:$0xff] %v188_v3  ;;  %v206_v12 = vld [vmem:[%s3789_s11 + $0x2a0] sm:$0xff]  ;;  %v208_v13 = vld [vmem:[%s3789_s11 + $0x2a8] sm:$0xff]  ;;  %v210_v14 = vld [vmem:[%s3789_s11 + $0x2b0] sm:$0xff] }
  0x32   : > { %191 = vst [vmem:[%s3794_s5 + $0x20] sm:$0xff] %v190_v4  ;;  %v212_v15 = vld [vmem:[%s3789_s11 + $0x2b8] sm:$0xff]  ;;  %v214_v16 = vld [vmem:[%s3789_s11 + $0x380] sm:$0xff]  ;;  %v216_v17 = vld [vmem:[%s3789_s11 + $0x388] sm:$0xff] }
  0x33   : > { %193 = vst [vmem:[%s3794_s5 + $0x28] sm:$0xff] %v192_v5  ;;  %v218_v18 = vld [vmem:[%s3789_s11 + $0x390] sm:$0xff]  ;;  %v220_v19 = vld [vmem:[%s3789_s11 + $0x398] sm:$0xff]  ;;  %v222_v20 = vld [vmem:[%s3789_s11 + $0x460] sm:$0xff] }
  0x34   : > { %195 = vst [vmem:[%s3794_s5 + $0x30] sm:$0xff] %v194_v6  ;;  %v224_v21 = vld [vmem:[%s3789_s11 + $0x468] sm:$0xff]  ;;  %v226_v22 = vld [vmem:[%s3789_s11 + $0x470] sm:$0xff]  ;;  %v228_v23 = vld [vmem:[%s3789_s11 + $0x478] sm:$0xff] }
  0x35   : > { %197 = vst [vmem:[%s3794_s5 + $0x38] sm:$0xff] %v196_v7  ;;  %v230_v24 = vld [vmem:[%s3789_s11 + $0x540] sm:$0xff]  ;;  %v232_v25 = vld [vmem:[%s3789_s11 + $0x548] sm:$0xff]  ;;  %v234_v26 = vld [vmem:[%s3789_s11 + $0x550] sm:$0xff] }
  0x36   : > { %199 = vst [vmem:[%s3794_s5 + $0x40] sm:$0xff] %v198_v8  ;;  %v236_v27 = vld [vmem:[%s3789_s11 + $0x558] sm:$0xff]  ;;  %v238_v28 = vld [vmem:[%s3789_s11 + $0x620] sm:$0xff]  ;;  %v240_v29 = vld [vmem:[%s3789_s11 + $0x628] sm:$0xff] }
  0x37   : > { %201 = vst [vmem:[%s3794_s5 + $0x48] sm:$0xff] %v200_v9  ;;  %v242_v30 = vld [vmem:[%s3789_s11 + $0x630] sm:$0xff]  ;;  %v244_v31 = vld [vmem:[%s3789_s11 + $0x638] sm:$0xff] }
  0x38   : > { %203 = vst [vmem:[%s3794_s5 + $0x50] sm:$0xff] %v202_v10 }
  0x39   : > { %205 = vst [vmem:[%s3794_s5 + $0x58] sm:$0xff] %v204_v11 }
  0x3a   : > { %207 = vst [vmem:[%s3794_s5 + $0x60] sm:$0xff] %v206_v12 }
  0x3b   : > { %209 = vst [vmem:[%s3794_s5 + $0x68] sm:$0xff] %v208_v13 }
  0x3c   : > { %211 = vst [vmem:[%s3794_s5 + $0x70] sm:$0xff] %v210_v14 }
  0x3d   : > { %213 = vst [vmem:[%s3794_s5 + $0x78] sm:$0xff] %v212_v15 }
  0x3e   : > { %215 = vst [vmem:[%s3794_s5 + $0x80] sm:$0xff] %v214_v16 }
  0x3f   : > { %217 = vst [vmem:[%s3794_s5 + $0x88] sm:$0xff] %v216_v17 }
  0x40   : > { %219 = vst [vmem:[%s3794_s5 + $0x90] sm:$0xff] %v218_v18 }
  0x41   : > { %221 = vst [vmem:[%s3794_s5 + $0x98] sm:$0xff] %v220_v19 }
  0x42   : > { %223 = vst [vmem:[%s3794_s5 + $0xa0] sm:$0xff] %v222_v20 }
  0x43   : > { %225 = vst [vmem:[%s3794_s5 + $0xa8] sm:$0xff] %v224_v21 }
  0x44   : > { %227 = vst [vmem:[%s3794_s5 + $0xb0] sm:$0xff] %v226_v22 }
  0x45   : > { %229 = vst [vmem:[%s3794_s5 + $0xb8] sm:$0xff] %v228_v23 }
  0x46   : > { %231 = vst [vmem:[%s3794_s5 + $0xc0] sm:$0xff] %v230_v24 }
  0x47   : > { %233 = vst [vmem:[%s3794_s5 + $0xc8] sm:$0xff] %v232_v25 }
  0x48   : > { %235 = vst [vmem:[%s3794_s5 + $0xd0] sm:$0xff] %v234_v26 }
  0x49   : > { %237 = vst [vmem:[%s3794_s5 + $0xd8] sm:$0xff] %v236_v27 }
  0x4a   : > { %239 = vst [vmem:[%s3794_s5 + $0xe0] sm:$0xff] %v238_v28 }
  0x4b   : > { %241 = vst [vmem:[%s3794_s5 + $0xe8] sm:$0xff] %v240_v29 }
  0x4c   : > { %243 = vst [vmem:[%s3794_s5 + $0xf0] sm:$0xff] %v242_v30 }
  0x4d   : > { %245 = vst [vmem:[%s3794_s5 + $0xf8] sm:$0xff] %v244_v31 }
  0x4e PF: > { %251 = sbr.rel (!%p3754_p8) target bundleno = 214 (0xd6), region = 43  ;;  %s253_s25 = sand.u32 (%p3754_p8), 1, %s3605_s15  }
  0x4f   : > { %s2614_s26 = sshll.u32 (%p3754_p8), %s3633_s22, 1  ;;  %s2612_s27 = sshll.u32 (%p3754_p8), %s253_s25, 10 }
  0x50   : > { %s3432_s29 = smul.u32 (%p3754_p8), 768, %s3629_s21  ;;  %s3870_s8 = scalar_lea.vmem (%p3754_p8), [#allocation4], %s2612_s27 }
  0x52   : > { %s259_s30 = sadd.s32 (%p3754_p8), %s3432_s29, %s2614_s26 }
  0x53   : > { %s2616_s4 = sshll.u32 %s259_s30, 2 }
  0x54   : > { %s3865_s11 = scalar_lea.vmem %s4822_s1, %s2616_s4 }
  0x55   : > { %v544_v32 = vld [vmem:[%s3865_s11] sm:$0xff]  ;;  %v546_v33 = vld [vmem:[%s3865_s11 + $0x18] sm:$0xff]  ;;  %v548_v34 = vld [vmem:[%s3865_s11 + $0x30] sm:$0xff] }
  0x56   : > { %545 = vst [vmem:[%s3870_s8] sm:$0xff] %v544_v32  ;;  %v550_v35 = vld [vmem:[%s3865_s11 + $0x48] sm:$0xff]  ;;  %v552_v36 = vld [vmem:[%s3865_s11 + $0x60] sm:$0xff]  ;;  %v554_v37 = vld [vmem:[%s3865_s11 + $0x78] sm:$0xff] }
  0x57   : > { %547 = vst [vmem:[%s3870_s8 + $0x8] sm:$0xff] %v546_v33  ;;  %v556_v38 = vld [vmem:[%s3865_s11 + $0x90] sm:$0xff]  ;;  %v558_v39 = vld [vmem:[%s3865_s11 + $0xa8] sm:$0xff]  ;;  %v560_v40 = vld [vmem:[%s3865_s11 + $0xc0] sm:$0xff] }
  0x58   : > { %549 = vst [vmem:[%s3870_s8 + $0x10] sm:$0xff] %v548_v34  ;;  %v562_v41 = vld [vmem:[%s3865_s11 + $0xd8] sm:$0xff]  ;;  %v564_v42 = vld [vmem:[%s3865_s11 + $0xf0] sm:$0xff]  ;;  %v566_v43 = vld [vmem:[%s3865_s11 + $0x108] sm:$0xff] }
  0x59   : > { %551 = vst [vmem:[%s3870_s8 + $0x18] sm:$0xff] %v550_v35  ;;  %v568_v44 = vld [vmem:[%s3865_s11 + $0x120] sm:$0xff]  ;;  %v570_v45 = vld [vmem:[%s3865_s11 + $0x138] sm:$0xff]  ;;  %v572_v46 = vld [vmem:[%s3865_s11 + $0x150] sm:$0xff] }
  0x5a   : > { %553 = vst [vmem:[%s3870_s8 + $0x20] sm:$0xff] %v552_v36  ;;  %v574_v47 = vld [vmem:[%s3865_s11 + $0x168] sm:$0xff]  ;;  %v576_v48 = vld [vmem:[%s3865_s11 + $0x180] sm:$0xff]  ;;  %v578_v49 = vld [vmem:[%s3865_s11 + $0x198] sm:$0xff] }
  0x5b   : > { %555 = vst [vmem:[%s3870_s8 + $0x28] sm:$0xff] %v554_v37  ;;  %v580_v50 = vld [vmem:[%s3865_s11 + $0x1b0] sm:$0xff]  ;;  %v582_v51 = vld [vmem:[%s3865_s11 + $0x1c8] sm:$0xff]  ;;  %v584_v52 = vld [vmem:[%s3865_s11 + $0x1e0] sm:$0xff] }
  0x5c   : > { %557 = vst [vmem:[%s3870_s8 + $0x30] sm:$0xff] %v556_v38  ;;  %v586_v53 = vld [vmem:[%s3865_s11 + $0x1f8] sm:$0xff]  ;;  %v588_v54 = vld [vmem:[%s3865_s11 + $0x210] sm:$0xff]  ;;  %v590_v55 = vld [vmem:[%s3865_s11 + $0x228] sm:$0xff] }
  0x5d   : > { %559 = vst [vmem:[%s3870_s8 + $0x38] sm:$0xff] %v558_v39  ;;  %v592_v56 = vld [vmem:[%s3865_s11 + $0x240] sm:$0xff]  ;;  %v594_v57 = vld [vmem:[%s3865_s11 + $0x258] sm:$0xff]  ;;  %v596_v58 = vld [vmem:[%s3865_s11 + $0x270] sm:$0xff] }
  0x5e   : > { %561 = vst [vmem:[%s3870_s8 + $0x40] sm:$0xff] %v560_v40  ;;  %v598_v59 = vld [vmem:[%s3865_s11 + $0x288] sm:$0xff]  ;;  %v600_v60 = vld [vmem:[%s3865_s11 + $0x2a0] sm:$0xff]  ;;  %v602_v61 = vld [vmem:[%s3865_s11 + $0x2b8] sm:$0xff] }
  0x5f   : > { %563 = vst [vmem:[%s3870_s8 + $0x48] sm:$0xff] %v562_v41  ;;  %v604_v62 = vld [vmem:[%s3865_s11 + $0x2d0] sm:$0xff]  ;;  %v606_v63 = vld [vmem:[%s3865_s11 + $0x2e8] sm:$0xff]  ;;  %v608_v0 = vld [vmem:[%s3865_s11 + $0x300] sm:$0xff] }
  0x60   : > { %565 = vst [vmem:[%s3870_s8 + $0x50] sm:$0xff] %v564_v42  ;;  %v610_v1 = vld [vmem:[%s3865_s11 + $0x318] sm:$0xff]  ;;  %v612_v2 = vld [vmem:[%s3865_s11 + $0x330] sm:$0xff]  ;;  %v614_v3 = vld [vmem:[%s3865_s11 + $0x348] sm:$0xff] }
  0x61   : > { %567 = vst [vmem:[%s3870_s8 + $0x58] sm:$0xff] %v566_v43  ;;  %v616_v4 = vld [vmem:[%s3865_s11 + $0x360] sm:$0xff]  ;;  %v618_v5 = vld [vmem:[%s3865_s11 + $0x378] sm:$0xff]  ;;  %v620_v6 = vld [vmem:[%s3865_s11 + $0x390] sm:$0xff] }
  0x62   : > { %569 = vst [vmem:[%s3870_s8 + $0x60] sm:$0xff] %v568_v44  ;;  %v622_v7 = vld [vmem:[%s3865_s11 + $0x3a8] sm:$0xff]  ;;  %v624_v8 = vld [vmem:[%s3865_s11 + $0x3c0] sm:$0xff]  ;;  %v626_v9 = vld [vmem:[%s3865_s11 + $0x3d8] sm:$0xff] }
  0x63   : > { %571 = vst [vmem:[%s3870_s8 + $0x68] sm:$0xff] %v570_v45  ;;  %v628_v10 = vld [vmem:[%s3865_s11 + $0x3f0] sm:$0xff]  ;;  %v630_v11 = vld [vmem:[%s3865_s11 + $0x408] sm:$0xff]  ;;  %v632_v12 = vld [vmem:[%s3865_s11 + $0x420] sm:$0xff] }
  0x64   : > { %573 = vst [vmem:[%s3870_s8 + $0x70] sm:$0xff] %v572_v46  ;;  %v634_v13 = vld [vmem:[%s3865_s11 + $0x438] sm:$0xff]  ;;  %v636_v14 = vld [vmem:[%s3865_s11 + $0x450] sm:$0xff]  ;;  %v638_v15 = vld [vmem:[%s3865_s11 + $0x468] sm:$0xff] }
  0x65   : > { %575 = vst [vmem:[%s3870_s8 + $0x78] sm:$0xff] %v574_v47  ;;  %v640_v16 = vld [vmem:[%s3865_s11 + $0x480] sm:$0xff]  ;;  %v642_v17 = vld [vmem:[%s3865_s11 + $0x498] sm:$0xff]  ;;  %v644_v18 = vld [vmem:[%s3865_s11 + $0x4b0] sm:$0xff] }
  0x66   : > { %577 = vst [vmem:[%s3870_s8 + $0x80] sm:$0xff] %v576_v48  ;;  %v646_v19 = vld [vmem:[%s3865_s11 + $0x4c8] sm:$0xff]  ;;  %v648_v20 = vld [vmem:[%s3865_s11 + $0x4e0] sm:$0xff]  ;;  %v650_v21 = vld [vmem:[%s3865_s11 + $0x4f8] sm:$0xff] }
  0x67   : > { %579 = vst [vmem:[%s3870_s8 + $0x88] sm:$0xff] %v578_v49  ;;  %v652_v22 = vld [vmem:[%s3865_s11 + $0x510] sm:$0xff]  ;;  %v654_v23 = vld [vmem:[%s3865_s11 + $0x528] sm:$0xff]  ;;  %v656_v24 = vld [vmem:[%s3865_s11 + $0x540] sm:$0xff] }
  0x68   : > { %581 = vst [vmem:[%s3870_s8 + $0x90] sm:$0xff] %v580_v50  ;;  %v658_v25 = vld [vmem:[%s3865_s11 + $0x558] sm:$0xff]  ;;  %v660_v26 = vld [vmem:[%s3865_s11 + $0x570] sm:$0xff]  ;;  %v662_v27 = vld [vmem:[%s3865_s11 + $0x588] sm:$0xff] }
  0x69   : > { %583 = vst [vmem:[%s3870_s8 + $0x98] sm:$0xff] %v582_v51  ;;  %v664_v28 = vld [vmem:[%s3865_s11 + $0x5a0] sm:$0xff]  ;;  %v666_v29 = vld [vmem:[%s3865_s11 + $0x5b8] sm:$0xff]  ;;  %v668_v30 = vld [vmem:[%s3865_s11 + $0x5d0] sm:$0xff] }
  0x6a   : > { %585 = vst [vmem:[%s3870_s8 + $0xa0] sm:$0xff] %v584_v52  ;;  %v670_v31 = vld [vmem:[%s3865_s11 + $0x5e8] sm:$0xff]  ;;  %v672_v32 = vld [vmem:[%s3865_s11 + $0x600] sm:$0xff]  ;;  %v674_v33 = vld [vmem:[%s3865_s11 + $0x618] sm:$0xff] }
  0x6b   : > { %587 = vst [vmem:[%s3870_s8 + $0xa8] sm:$0xff] %v586_v53  ;;  %v676_v34 = vld [vmem:[%s3865_s11 + $0x630] sm:$0xff]  ;;  %v678_v35 = vld [vmem:[%s3865_s11 + $0x648] sm:$0xff]  ;;  %v680_v36 = vld [vmem:[%s3865_s11 + $0x660] sm:$0xff] }
  0x6c   : > { %589 = vst [vmem:[%s3870_s8 + $0xb0] sm:$0xff] %v588_v54  ;;  %v682_v37 = vld [vmem:[%s3865_s11 + $0x678] sm:$0xff]  ;;  %v684_v38 = vld [vmem:[%s3865_s11 + $0x690] sm:$0xff]  ;;  %v686_v39 = vld [vmem:[%s3865_s11 + $0x6a8] sm:$0xff] }
  0x6d   : > { %591 = vst [vmem:[%s3870_s8 + $0xb8] sm:$0xff] %v590_v55  ;;  %v688_v40 = vld [vmem:[%s3865_s11 + $0x6c0] sm:$0xff]  ;;  %v690_v41 = vld [vmem:[%s3865_s11 + $0x6d8] sm:$0xff]  ;;  %v692_v42 = vld [vmem:[%s3865_s11 + $0x6f0] sm:$0xff] }
  0x6e   : > { %593 = vst [vmem:[%s3870_s8 + $0xc0] sm:$0xff] %v592_v56  ;;  %v694_v43 = vld [vmem:[%s3865_s11 + $0x708] sm:$0xff]  ;;  %v696_v44 = vld [vmem:[%s3865_s11 + $0x720] sm:$0xff]  ;;  %v698_v45 = vld [vmem:[%s3865_s11 + $0x738] sm:$0xff] }
  0x6f   : > { %595 = vst [vmem:[%s3870_s8 + $0xc8] sm:$0xff] %v594_v57  ;;  %v700_v46 = vld [vmem:[%s3865_s11 + $0x750] sm:$0xff]  ;;  %v702_v47 = vld [vmem:[%s3865_s11 + $0x768] sm:$0xff]  ;;  %v704_v48 = vld [vmem:[%s3865_s11 + $0x780] sm:$0xff] }
  0x70   : > { %597 = vst [vmem:[%s3870_s8 + $0xd0] sm:$0xff] %v596_v58  ;;  %v706_v49 = vld [vmem:[%s3865_s11 + $0x798] sm:$0xff]  ;;  %v708_v50 = vld [vmem:[%s3865_s11 + $0x7b0] sm:$0xff]  ;;  %v710_v51 = vld [vmem:[%s3865_s11 + $0x7c8] sm:$0xff] }
  0x71   : > { %599 = vst [vmem:[%s3870_s8 + $0xd8] sm:$0xff] %v598_v59  ;;  %v712_v52 = vld [vmem:[%s3865_s11 + $0x7e0] sm:$0xff]  ;;  %v714_v53 = vld [vmem:[%s3865_s11 + $0x7f8] sm:$0xff]  ;;  %v716_v54 = vld [vmem:[%s3865_s11 + $0x810] sm:$0xff] }
  0x72   : > { %601 = vst [vmem:[%s3870_s8 + $0xe0] sm:$0xff] %v600_v60  ;;  %v718_v55 = vld [vmem:[%s3865_s11 + $0x828] sm:$0xff]  ;;  %v720_v56 = vld [vmem:[%s3865_s11 + $0x840] sm:$0xff]  ;;  %v722_v57 = vld [vmem:[%s3865_s11 + $0x858] sm:$0xff] }
  0x73   : > { %603 = vst [vmem:[%s3870_s8 + $0xe8] sm:$0xff] %v602_v61  ;;  %v724_v58 = vld [vmem:[%s3865_s11 + $0x870] sm:$0xff]  ;;  %v726_v59 = vld [vmem:[%s3865_s11 + $0x888] sm:$0xff]  ;;  %v728_v60 = vld [vmem:[%s3865_s11 + $0x8a0] sm:$0xff] }
  0x74   : > { %605 = vst [vmem:[%s3870_s8 + $0xf0] sm:$0xff] %v604_v62  ;;  %v730_v61 = vld [vmem:[%s3865_s11 + $0x8b8] sm:$0xff]  ;;  %v732_v62 = vld [vmem:[%s3865_s11 + $0x8d0] sm:$0xff] }
  0x75   : > { %607 = vst [vmem:[%s3870_s8 + $0xf8] sm:$0xff] %v606_v63  ;;  %v734_v63 = vld [vmem:[%s3865_s11 + $0x8e8] sm:$0xff] }
  0x76   : > { %609 = vst [vmem:[%s3870_s8 + $0x100] sm:$0xff] %v608_v0  ;;  %v736_v0 = vld [vmem:[%s3865_s11 + $0x900] sm:$0xff] }
  0x77   : > { %611 = vst [vmem:[%s3870_s8 + $0x108] sm:$0xff] %v610_v1  ;;  %v738_v1 = vld [vmem:[%s3865_s11 + $0x918] sm:$0xff] }
  0x78   : > { %613 = vst [vmem:[%s3870_s8 + $0x110] sm:$0xff] %v612_v2  ;;  %v740_v2 = vld [vmem:[%s3865_s11 + $0x930] sm:$0xff] }
  0x79   : > { %615 = vst [vmem:[%s3870_s8 + $0x118] sm:$0xff] %v614_v3  ;;  %v742_v3 = vld [vmem:[%s3865_s11 + $0x948] sm:$0xff] }
  0x7a   : > { %617 = vst [vmem:[%s3870_s8 + $0x120] sm:$0xff] %v616_v4  ;;  %v744_v4 = vld [vmem:[%s3865_s11 + $0x960] sm:$0xff] }
  0x7b   : > { %619 = vst [vmem:[%s3870_s8 + $0x128] sm:$0xff] %v618_v5  ;;  %v746_v5 = vld [vmem:[%s3865_s11 + $0x978] sm:$0xff] }
  0x7c   : > { %621 = vst [vmem:[%s3870_s8 + $0x130] sm:$0xff] %v620_v6  ;;  %v748_v6 = vld [vmem:[%s3865_s11 + $0x990] sm:$0xff] }
  0x7d   : > { %623 = vst [vmem:[%s3870_s8 + $0x138] sm:$0xff] %v622_v7  ;;  %v750_v7 = vld [vmem:[%s3865_s11 + $0x9a8] sm:$0xff] }
  0x7e   : > { %625 = vst [vmem:[%s3870_s8 + $0x140] sm:$0xff] %v624_v8  ;;  %v752_v8 = vld [vmem:[%s3865_s11 + $0x9c0] sm:$0xff] }
  0x7f   : > { %627 = vst [vmem:[%s3870_s8 + $0x148] sm:$0xff] %v626_v9  ;;  %v754_v9 = vld [vmem:[%s3865_s11 + $0x9d8] sm:$0xff] }
  0x80   : > { %629 = vst [vmem:[%s3870_s8 + $0x150] sm:$0xff] %v628_v10  ;;  %v756_v10 = vld [vmem:[%s3865_s11 + $0x9f0] sm:$0xff] }
  0x81   : > { %631 = vst [vmem:[%s3870_s8 + $0x158] sm:$0xff] %v630_v11  ;;  %v758_v11 = vld [vmem:[%s3865_s11 + $0xa08] sm:$0xff] }
  0x82   : > { %633 = vst [vmem:[%s3870_s8 + $0x160] sm:$0xff] %v632_v12  ;;  %v760_v12 = vld [vmem:[%s3865_s11 + $0xa20] sm:$0xff] }
  0x83   : > { %635 = vst [vmem:[%s3870_s8 + $0x168] sm:$0xff] %v634_v13  ;;  %v762_v13 = vld [vmem:[%s3865_s11 + $0xa38] sm:$0xff] }
  0x84   : > { %637 = vst [vmem:[%s3870_s8 + $0x170] sm:$0xff] %v636_v14  ;;  %v764_v14 = vld [vmem:[%s3865_s11 + $0xa50] sm:$0xff] }
  0x85   : > { %639 = vst [vmem:[%s3870_s8 + $0x178] sm:$0xff] %v638_v15  ;;  %v766_v15 = vld [vmem:[%s3865_s11 + $0xa68] sm:$0xff] }
  0x86   : > { %641 = vst [vmem:[%s3870_s8 + $0x180] sm:$0xff] %v640_v16  ;;  %v768_v16 = vld [vmem:[%s3865_s11 + $0xa80] sm:$0xff] }
  0x87   : > { %643 = vst [vmem:[%s3870_s8 + $0x188] sm:$0xff] %v642_v17  ;;  %v770_v17 = vld [vmem:[%s3865_s11 + $0xa98] sm:$0xff] }
  0x88   : > { %645 = vst [vmem:[%s3870_s8 + $0x190] sm:$0xff] %v644_v18  ;;  %v772_v18 = vld [vmem:[%s3865_s11 + $0xab0] sm:$0xff] }
  0x89   : > { %647 = vst [vmem:[%s3870_s8 + $0x198] sm:$0xff] %v646_v19  ;;  %v774_v19 = vld [vmem:[%s3865_s11 + $0xac8] sm:$0xff] }
  0x8a   : > { %649 = vst [vmem:[%s3870_s8 + $0x1a0] sm:$0xff] %v648_v20  ;;  %v776_v20 = vld [vmem:[%s3865_s11 + $0xae0] sm:$0xff] }
  0x8b   : > { %651 = vst [vmem:[%s3870_s8 + $0x1a8] sm:$0xff] %v650_v21  ;;  %v778_v21 = vld [vmem:[%s3865_s11 + $0xaf8] sm:$0xff] }
  0x8c   : > { %653 = vst [vmem:[%s3870_s8 + $0x1b0] sm:$0xff] %v652_v22  ;;  %v780_v22 = vld [vmem:[%s3865_s11 + $0xb10] sm:$0xff] }
  0x8d   : > { %655 = vst [vmem:[%s3870_s8 + $0x1b8] sm:$0xff] %v654_v23  ;;  %v782_v23 = vld [vmem:[%s3865_s11 + $0xb28] sm:$0xff] }
  0x8e   : > { %657 = vst [vmem:[%s3870_s8 + $0x1c0] sm:$0xff] %v656_v24  ;;  %v784_v24 = vld [vmem:[%s3865_s11 + $0xb40] sm:$0xff] }
  0x8f   : > { %659 = vst [vmem:[%s3870_s8 + $0x1c8] sm:$0xff] %v658_v25  ;;  %v786_v25 = vld [vmem:[%s3865_s11 + $0xb58] sm:$0xff] }
  0x90   : > { %661 = vst [vmem:[%s3870_s8 + $0x1d0] sm:$0xff] %v660_v26  ;;  %v788_v26 = vld [vmem:[%s3865_s11 + $0xb70] sm:$0xff] }
  0x91   : > { %663 = vst [vmem:[%s3870_s8 + $0x1d8] sm:$0xff] %v662_v27  ;;  %v790_v27 = vld [vmem:[%s3865_s11 + $0xb88] sm:$0xff] }
  0x92   : > { %665 = vst [vmem:[%s3870_s8 + $0x1e0] sm:$0xff] %v664_v28  ;;  %v792_v28 = vld [vmem:[%s3865_s11 + $0xba0] sm:$0xff] }
  0x93   : > { %667 = vst [vmem:[%s3870_s8 + $0x1e8] sm:$0xff] %v666_v29  ;;  %v794_v29 = vld [vmem:[%s3865_s11 + $0xbb8] sm:$0xff] }
  0x94   : > { %669 = vst [vmem:[%s3870_s8 + $0x1f0] sm:$0xff] %v668_v30  ;;  %v796_v30 = vld [vmem:[%s3865_s11 + $0xbd0] sm:$0xff] }
  0x95   : > { %671 = vst [vmem:[%s3870_s8 + $0x1f8] sm:$0xff] %v670_v31  ;;  %v798_v31 = vld [vmem:[%s3865_s11 + $0xbe8] sm:$0xff] }
  0x96   : > { %673 = vst [vmem:[%s3870_s8 + $0x200] sm:$0xff] %v672_v32 }
  0x97   : > { %675 = vst [vmem:[%s3870_s8 + $0x208] sm:$0xff] %v674_v33 }
  0x98   : > { %677 = vst [vmem:[%s3870_s8 + $0x210] sm:$0xff] %v676_v34 }
  0x99   : > { %679 = vst [vmem:[%s3870_s8 + $0x218] sm:$0xff] %v678_v35 }
  0x9a   : > { %681 = vst [vmem:[%s3870_s8 + $0x220] sm:$0xff] %v680_v36 }
  0x9b   : > { %683 = vst [vmem:[%s3870_s8 + $0x228] sm:$0xff] %v682_v37 }
  0x9c   : > { %685 = vst [vmem:[%s3870_s8 + $0x230] sm:$0xff] %v684_v38 }
  0x9d   : > { %687 = vst [vmem:[%s3870_s8 + $0x238] sm:$0xff] %v686_v39 }
  0x9e   : > { %689 = vst [vmem:[%s3870_s8 + $0x240] sm:$0xff] %v688_v40 }
  0x9f   : > { %691 = vst [vmem:[%s3870_s8 + $0x248] sm:$0xff] %v690_v41 }
  0xa0   : > { %693 = vst [vmem:[%s3870_s8 + $0x250] sm:$0xff] %v692_v42 }
  0xa1   : > { %695 = vst [vmem:[%s3870_s8 + $0x258] sm:$0xff] %v694_v43 }
  0xa2   : > { %697 = vst [vmem:[%s3870_s8 + $0x260] sm:$0xff] %v696_v44 }
  0xa3   : > { %699 = vst [vmem:[%s3870_s8 + $0x268] sm:$0xff] %v698_v45 }
  0xa4   : > { %701 = vst [vmem:[%s3870_s8 + $0x270] sm:$0xff] %v700_v46 }
  0xa5   : > { %703 = vst [vmem:[%s3870_s8 + $0x278] sm:$0xff] %v702_v47 }
  0xa6   : > { %705 = vst [vmem:[%s3870_s8 + $0x280] sm:$0xff] %v704_v48 }
  0xa7   : > { %707 = vst [vmem:[%s3870_s8 + $0x288] sm:$0xff] %v706_v49 }
  0xa8   : > { %709 = vst [vmem:[%s3870_s8 + $0x290] sm:$0xff] %v708_v50 }
  0xa9   : > { %711 = vst [vmem:[%s3870_s8 + $0x298] sm:$0xff] %v710_v51 }
  0xaa   : > { %713 = vst [vmem:[%s3870_s8 + $0x2a0] sm:$0xff] %v712_v52 }
  0xab   : > { %715 = vst [vmem:[%s3870_s8 + $0x2a8] sm:$0xff] %v714_v53 }
  0xac   : > { %717 = vst [vmem:[%s3870_s8 + $0x2b0] sm:$0xff] %v716_v54 }
  0xad   : > { %719 = vst [vmem:[%s3870_s8 + $0x2b8] sm:$0xff] %v718_v55 }
  0xae   : > { %721 = vst [vmem:[%s3870_s8 + $0x2c0] sm:$0xff] %v720_v56 }
  0xaf   : > { %723 = vst [vmem:[%s3870_s8 + $0x2c8] sm:$0xff] %v722_v57 }
  0xb0   : > { %725 = vst [vmem:[%s3870_s8 + $0x2d0] sm:$0xff] %v724_v58 }
  0xb1   : > { %727 = vst [vmem:[%s3870_s8 + $0x2d8] sm:$0xff] %v726_v59 }
  0xb2   : > { %729 = vst [vmem:[%s3870_s8 + $0x2e0] sm:$0xff] %v728_v60 }
  0xb3   : > { %731 = vst [vmem:[%s3870_s8 + $0x2e8] sm:$0xff] %v730_v61 }
  0xb4   : > { %733 = vst [vmem:[%s3870_s8 + $0x2f0] sm:$0xff] %v732_v62 }
  0xb5   : > { %735 = vst [vmem:[%s3870_s8 + $0x2f8] sm:$0xff] %v734_v63 }
  0xb6   : > { %737 = vst [vmem:[%s3870_s8 + $0x300] sm:$0xff] %v736_v0 }
  0xb7   : > { %739 = vst [vmem:[%s3870_s8 + $0x308] sm:$0xff] %v738_v1 }
  0xb8   : > { %741 = vst [vmem:[%s3870_s8 + $0x310] sm:$0xff] %v740_v2 }
  0xb9   : > { %743 = vst [vmem:[%s3870_s8 + $0x318] sm:$0xff] %v742_v3 }
  0xba   : > { %745 = vst [vmem:[%s3870_s8 + $0x320] sm:$0xff] %v744_v4 }
  0xbb   : > { %747 = vst [vmem:[%s3870_s8 + $0x328] sm:$0xff] %v746_v5 }
  0xbc   : > { %749 = vst [vmem:[%s3870_s8 + $0x330] sm:$0xff] %v748_v6 }
  0xbd   : > { %751 = vst [vmem:[%s3870_s8 + $0x338] sm:$0xff] %v750_v7 }
  0xbe   : > { %753 = vst [vmem:[%s3870_s8 + $0x340] sm:$0xff] %v752_v8 }
  0xbf   : > { %755 = vst [vmem:[%s3870_s8 + $0x348] sm:$0xff] %v754_v9 }
  0xc0   : > { %757 = vst [vmem:[%s3870_s8 + $0x350] sm:$0xff] %v756_v10 }
  0xc1   : > { %759 = vst [vmem:[%s3870_s8 + $0x358] sm:$0xff] %v758_v11 }
  0xc2   : > { %761 = vst [vmem:[%s3870_s8 + $0x360] sm:$0xff] %v760_v12 }
  0xc3   : > { %763 = vst [vmem:[%s3870_s8 + $0x368] sm:$0xff] %v762_v13 }
  0xc4   : > { %765 = vst [vmem:[%s3870_s8 + $0x370] sm:$0xff] %v764_v14 }
  0xc5   : > { %767 = vst [vmem:[%s3870_s8 + $0x378] sm:$0xff] %v766_v15 }
  0xc6   : > { %769 = vst [vmem:[%s3870_s8 + $0x380] sm:$0xff] %v768_v16 }
  0xc7   : > { %771 = vst [vmem:[%s3870_s8 + $0x388] sm:$0xff] %v770_v17 }
  0xc8   : > { %773 = vst [vmem:[%s3870_s8 + $0x390] sm:$0xff] %v772_v18 }
  0xc9   : > { %775 = vst [vmem:[%s3870_s8 + $0x398] sm:$0xff] %v774_v19 }
  0xca   : > { %777 = vst [vmem:[%s3870_s8 + $0x3a0] sm:$0xff] %v776_v20 }
  0xcb   : > { %779 = vst [vmem:[%s3870_s8 + $0x3a8] sm:$0xff] %v778_v21 }
  0xcc   : > { %781 = vst [vmem:[%s3870_s8 + $0x3b0] sm:$0xff] %v780_v22 }
  0xcd   : > { %783 = vst [vmem:[%s3870_s8 + $0x3b8] sm:$0xff] %v782_v23 }
  0xce   : > { %785 = vst [vmem:[%s3870_s8 + $0x3c0] sm:$0xff] %v784_v24 }
  0xcf   : > { %787 = vst [vmem:[%s3870_s8 + $0x3c8] sm:$0xff] %v786_v25 }
  0xd0   : > { %789 = vst [vmem:[%s3870_s8 + $0x3d0] sm:$0xff] %v788_v26 }
  0xd1   : > { %791 = vst [vmem:[%s3870_s8 + $0x3d8] sm:$0xff] %v790_v27 }
  0xd2   : > { %793 = vst [vmem:[%s3870_s8 + $0x3e0] sm:$0xff] %v792_v28 }
  0xd3   : > { %795 = vst [vmem:[%s3870_s8 + $0x3e8] sm:$0xff] %v794_v29 }
  0xd4   : > { %797 = vst [vmem:[%s3870_s8 + $0x3f0] sm:$0xff] %v796_v30 }
  0xd5   : > { %799 = vst [vmem:[%s3870_s8 + $0x3f8] sm:$0xff] %v798_v31 }
  0xd6 PF: > { %p2617_p1 = scmp.ge.s32.totalorder %s3641_s24, 1  ;;  %p812_p2 = scmp.lt.s32.totalorder %s3641_s24, 43 }
  0xd8   : > { %p813_p3 = pnand %p2617_p1, %p812_p2 }
  0xd9   : > { %s819_s5 = sand.u32 (!%p813_p3), 1, %s3609_s16   ;;  %s826_s25 = sand.u32 (!%p813_p3), 1, %s3601_s14  }
  0xda   : > { %816 = sbr.rel (%p813_p3) target bundleno = 721 (0x2d1), region = 85  ;;  %s2618_s26 = sshll.u32 (!%p813_p3), %s819_s5, 8 }
  0xdb   : > { %s2619_s27 = sshll.u32 (!%p813_p3), %s826_s25, 10  ;;  %s853_s29 = sand.u32 (!%p813_p3), 1, %s3593_s12  }
  0xdc   : > { %s4131_s30 = sshll.u32 (!%p813_p3), %s3621_s19, 1  ;;  %s2620_s4 = sshll.u32 (!%p813_p3), %s853_s29, 7 }
  0xdd   : > { %p861_p4 = scmp.lt.s32.totalorder (!%p813_p3), %s4131_s30, 5  ;;  %s4141_s0 = scalar_lea.vmem (!%p813_p3), [#allocation3], %s2618_s26 }
  0xde   : > { %s4143_s16 = scalar_lea.vmem (!%p813_p3), [#allocation4], %s2619_s27  ;;  %s4145_s14 = scalar_lea.vmem (!%p813_p3), [#allocation5], %s2620_s4 }
  0xdf   : > { %s4135_s6 = scalar_select %p861_p4, %s4131_s30, 5 }
  0xe0   : > { %p2622_p5 = scmp.ne.s32.totalorder %s3617_s18, 0 }
  0xe1   : > { %s863_s8 = scalar_lea.vmem %s4823_s2, %s4135_s6 }
  0xe2   : > { %870 = sbr.rel (%p2622_p5) target bundleno = 248 (0xf8), region = 97 }
  0xe7   : > { %v3643_v32 = vmov 0.0  }
  0xe8   : > { %871 = vst [vmem:[#allocation2 + $0x30] sm:$0xff] %v3643_v32 }
  0xe9   : > { %872 = vst [vmem:[#allocation2] sm:$0xff] %v3643_v32 }
  0xea   : > { %873 = vst [vmem:[#allocation2 + $0x58] sm:$0xff] %v3643_v32 }
  0xeb   : > { %874 = vst [vmem:[#allocation2 + $0x18] sm:$0xff] %v3643_v32 }
  0xec   : > { %875 = vst [vmem:[#allocation2 + $0x50] sm:$0xff] %v3643_v32 }
  0xed   : > { %876 = vst [vmem:[#allocation2 + $0x68] sm:$0xff] %v3643_v32 }
  0xee   : > { %877 = vst [vmem:[#allocation2 + $0x8] sm:$0xff] %v3643_v32 }
  0xef   : > { %878 = vst [vmem:[#allocation2 + $0x48] sm:$0xff] %v3643_v32 }
  0xf0   : > { %879 = vst [vmem:[#allocation2 + $0x40] sm:$0xff] %v3643_v32 }
  0xf1   : > { %880 = vst [vmem:[#allocation2 + $0x20] sm:$0xff] %v3643_v32 }
  0xf2   : > { %881 = vst [vmem:[#allocation2 + $0x10] sm:$0xff] %v3643_v32 }
  0xf3   : > { %882 = vst [vmem:[#allocation2 + $0x38] sm:$0xff] %v3643_v32 }
  0xf4   : > { %883 = vst [vmem:[#allocation2 + $0x60] sm:$0xff] %v3643_v32 }
  0xf5   : > { %884 = vst [vmem:[#allocation2 + $0x70] sm:$0xff] %v3643_v32 }
  0xf6   : > { %885 = vst [vmem:[#allocation2 + $0x78] sm:$0xff] %v3643_v32 }
  0xf7   : > { %886 = vst [vmem:[#allocation2 + $0x28] sm:$0xff] %v3643_v32 }
  0xf8 PF: > { %v2809_v33 = vld [vmem:[%s4143_s16 + $0x70] sm:$0xf]  ;;  %v3318_v34 = vld [vmem:[%s4143_s16 + $0x74] sm:$0xf0]  ;;  %v2801_v44 = vld [vmem:[%s4143_s16 + $0x60] sm:$0xf] }
  0xf9   : > { %v2873_v35 = vld [vmem:[%s4143_s16 + $0xf0] sm:$0xf]  ;;  %v2810_v36 = vor.u32 %v3318_v34, %v2809_v33  ;;  %v3334_v37 = vld [vmem:[%s4143_s16 + $0xf4] sm:$0xf0]  ;;  %v3316_v46 = vld [vmem:[%s4143_s16 + $0x64] sm:$0xf0] }
  0xfa   : > { %v2937_v38 = vld [vmem:[%s4143_s16 + $0x170] sm:$0xf]  ;;  %v3350_v39 = vld [vmem:[%s4143_s16 + $0x174] sm:$0xf0]  ;;  %v2874_v40 = vor.u32 %v3334_v37, %v2873_v35  ;;  %v2865_v47 = vld [vmem:[%s4143_s16 + $0xe0] sm:$0xf]  ;;  %v2802_v49 = vor.u32 %v3316_v46, %v2801_v44 }
  0xfb   : > { %v2938_v41 = vor.u32 %v3350_v39, %v2937_v38  ;;  %v3001_v42 = vld [vmem:[%s4143_s16 + $0x1f0] sm:$0xf]  ;;  %v3366_v43 = vld [vmem:[%s4143_s16 + $0x1f4] sm:$0xf0]  ;;  %1863 = vmatpush.bf16.msra.mxu0 %v2810_v36  ;;  %v3332_v48 = vld [vmem:[%s4143_s16 + $0xe4] sm:$0xf0] }
  0xfc   : > { %v3002_v45 = vor.u32 %v3366_v43, %v3001_v42  ;;  %1892 = vmatpush.bf16.msra.mxu1 %v2874_v40  ;;  %v2866_v50 = vor.u32 %v3332_v48, %v2865_v47  ;;  %v2929_v51 = vld [vmem:[%s4143_s16 + $0x160] sm:$0xf]  ;;  %v3348_v52 = vld [vmem:[%s4143_s16 + $0x164] sm:$0xf0]  ;;  %v2793_v56 = vld [vmem:[%s4143_s16 + $0x50] sm:$0xf] }
  0xfd   : > { %1921 = vmatpush.bf16.msra.mxu2 %v2938_v41  ;;  %v2993_v53 = vld [vmem:[%s4143_s16 + $0x1e0] sm:$0xf]  ;;  %v2930_v54 = vor.u32 %v3348_v52, %v2929_v51  ;;  %v3364_v55 = vld [vmem:[%s4143_s16 + $0x1e4] sm:$0xf0]  ;;  %v3314_v57 = vld [vmem:[%s4143_s16 + $0x54] sm:$0xf0] }
  0xfe   : > { %1950 = vmatpush.bf16.msra.mxu3 %v3002_v45  ;;  %v2994_v58 = vor.u32 %v3364_v55, %v2993_v53  ;;  %v2857_v59 = vld [vmem:[%s4143_s16 + $0xd0] sm:$0xf]  ;;  %v3330_v60 = vld [vmem:[%s4143_s16 + $0xd4] sm:$0xf0]  ;;  %v2794_v62 = vor.u32 %v3314_v57, %v2793_v56  ;;  %v2785_v4 = vld [vmem:[%s4143_s16 + $0x40] sm:$0xf] }
  0xff   : > { %v2921_v61 = vld [vmem:[%s4143_s16 + $0x150] sm:$0xf]  ;;  %1864 = vmatpush.bf16.msra.mxu0 %v2802_v49  ;;  %v3346_v63 = vld [vmem:[%s4143_s16 + $0x154] sm:$0xf0]  ;;  %v2858_v2 = vor.u32 %v3330_v60, %v2857_v59  ;;  %v3312_v5 = vld [vmem:[%s4143_s16 + $0x44] sm:$0xf0] }
 0x100   : > { %v2985_v0 = vld [vmem:[%s4143_s16 + $0x1d0] sm:$0xf]  ;;  %v3362_v1 = vld [vmem:[%s4143_s16 + $0x1d4] sm:$0xf0]  ;;  %1893 = vmatpush.bf16.msra.mxu1 %v2866_v50  ;;  %v2922_v3 = vor.u32 %v3346_v63, %v2921_v61  ;;  %v2849_v6 = vld [vmem:[%s4143_s16 + $0xc0] sm:$0xf]  ;;  %v2786_v13 = vor.u32 %v3312_v5, %v2785_v4 }
 0x101   : > { %1922 = vmatpush.bf16.msra.mxu2 %v2930_v54  ;;  %v2986_v7 = vor.u32 %v3362_v1, %v2985_v0  ;;  %v3328_v8 = vld [vmem:[%s4143_s16 + $0xc4] sm:$0xf0]  ;;  %v2913_v9 = vld [vmem:[%s4143_s16 + $0x140] sm:$0xf]  ;;  %v2777_v16 = vld [vmem:[%s4143_s16 + $0x30] sm:$0xf] }
 0x102   : > { %1951 = vmatpush.bf16.msra.mxu3 %v2994_v58  ;;  %v3344_v10 = vld [vmem:[%s4143_s16 + $0x144] sm:$0xf0]  ;;  %v2977_v11 = vld [vmem:[%s4143_s16 + $0x1c0] sm:$0xf]  ;;  %v2850_v14 = vor.u32 %v3328_v8, %v2849_v6  ;;  %v3310_v17 = vld [vmem:[%s4143_s16 + $0x34] sm:$0xf0] }
 0x103   : > { %v3360_v12 = vld [vmem:[%s4143_s16 + $0x1c4] sm:$0xf0]  ;;  %1865 = vmatpush.bf16.msra.mxu0 %v2794_v62  ;;  %v2914_v15 = vor.u32 %v3344_v10, %v2913_v9  ;;  %v2841_v18 = vld [vmem:[%s4143_s16 + $0xb0] sm:$0xf]  ;;  %v3326_v20 = vld [vmem:[%s4143_s16 + $0xb4] sm:$0xf0]  ;;  %v2778_v25 = vor.u32 %v3310_v17, %v2777_v16 }
 0x104   : > { %1894 = vmatpush.bf16.msra.mxu1 %v2858_v2  ;;  %v2978_v19 = vor.u32 %v3360_v12, %v2977_v11  ;;  %v2905_v21 = vld [vmem:[%s4143_s16 + $0x130] sm:$0xf]  ;;  %v3342_v22 = vld [vmem:[%s4143_s16 + $0x134] sm:$0xf0]  ;;  %v2842_v26 = vor.u32 %v3326_v20, %v2841_v18  ;;  %v2769_v28 = vld [vmem:[%s4143_s16 + $0x20] sm:$0xf] }
 0x105   : > { %1923 = vmatpush.bf16.msra.mxu2 %v2922_v3  ;;  %v2969_v23 = vld [vmem:[%s4143_s16 + $0x1b0] sm:$0xf]  ;;  %v3358_v24 = vld [vmem:[%s4143_s16 + $0x1b4] sm:$0xf0]  ;;  %v2906_v27 = vor.u32 %v3342_v22, %v2905_v21  ;;  %v3308_v29 = vld [vmem:[%s4143_s16 + $0x24] sm:$0xf0] }
 0x106   : > { %1952 = vmatpush.bf16.msra.mxu3 %v2986_v7  ;;  %v2833_v30 = vld [vmem:[%s4143_s16 + $0xa0] sm:$0xf]  ;;  %v2970_v31 = vor.u32 %v3358_v24, %v2969_v23  ;;  %v3324_v32 = vld [vmem:[%s4143_s16 + $0xa4] sm:$0xf0]  ;;  %v2770_v37 = vor.u32 %v3308_v29, %v2769_v28  ;;  %v2761_v40 = vld [vmem:[%s4143_s16 + $0x10] sm:$0xf] }
 0x107   : > { %1866 = vmatpush.bf16.msra.mxu0 %v2786_v13  ;;  %v2897_v33 = vld [vmem:[%s4143_s16 + $0x120] sm:$0xf]  ;;  %v3340_v34 = vld [vmem:[%s4143_s16 + $0x124] sm:$0xf0]  ;;  %v2834_v38 = vor.u32 %v3324_v32, %v2833_v30  ;;  %v3306_v41 = vld [vmem:[%s4143_s16 + $0x14] sm:$0xf0] }
 0x108   : > { %1895 = vmatpush.bf16.msra.mxu1 %v2850_v14  ;;  %v2961_v35 = vld [vmem:[%s4143_s16 + $0x1a0] sm:$0xf]  ;;  %v3356_v36 = vld [vmem:[%s4143_s16 + $0x1a4] sm:$0xf0]  ;;  %v2898_v39 = vor.u32 %v3340_v34, %v2897_v33  ;;  %v2825_v42 = vld [vmem:[%s4143_s16 + $0x90] sm:$0xf]  ;;  %v2762_v50 = vor.u32 %v3306_v41, %v2761_v40 }
 0x109   : > { %1924 = vmatpush.bf16.msra.mxu2 %v2914_v15  ;;  %v2962_v43 = vor.u32 %v3356_v36, %v2961_v35  ;;  %v3322_v44 = vld [vmem:[%s4143_s16 + $0x94] sm:$0xf0]  ;;  %v2889_v45 = vld [vmem:[%s4143_s16 + $0x110] sm:$0xf]  ;;  %v2753_v49 = vld [vmem:[%s4143_s16] sm:$0xf] }
 0x10a   : > { %1953 = vmatpush.bf16.msra.mxu3 %v2978_v19  ;;  %v3338_v46 = vld [vmem:[%s4143_s16 + $0x114] sm:$0xf0]  ;;  %v2953_v47 = vld [vmem:[%s4143_s16 + $0x190] sm:$0xf]  ;;  %v3304_v51 = vld [vmem:[%s4143_s16 + $0x4] sm:$0xf0]  ;;  %v2826_v54 = vor.u32 %v3322_v44, %v2825_v42 }
 0x10b   : > { %1867 = vmatpush.bf16.msra.mxu0 %v2778_v25  ;;  %v3354_v48 = vld [vmem:[%s4143_s16 + $0x194] sm:$0xf0]  ;;  %v2817_v52 = vld [vmem:[%s4143_s16 + $0x80] sm:$0xf]  ;;  %v3320_v53 = vld [vmem:[%s4143_s16 + $0x84] sm:$0xf0]  ;;  %v2890_v55 = vor.u32 %v3338_v46, %v2889_v45  ;;  %v2754_v3 = vor.u32 %v3304_v51, %v2753_v49 }
 0x10c   : > { %1896 = vmatpush.bf16.msra.mxu1 %v2842_v26  ;;  %v2881_v56 = vld [vmem:[%s4143_s16 + $0x100] sm:$0xf]  ;;  %v3336_v57 = vld [vmem:[%s4143_s16 + $0x104] sm:$0xf0]  ;;  %v2954_v59 = vor.u32 %v3354_v48, %v2953_v47  ;;  %v3271_v63 = vld [vmem:[%s4141_s0 + $0x4] sm:$0xf]  ;;  %v2818_v7 = vor.u32 %v3320_v53, %v2817_v52 }
 0x10d   : > { %1925 = vmatpush.bf16.msra.mxu2 %v2906_v27  ;;  %v2945_v58 = vld [vmem:[%s4143_s16 + $0x180] sm:$0xf]  ;;  %v3352_v60 = vld [vmem:[%s4143_s16 + $0x184] sm:$0xf0]  ;;  %v2627_v0 = vld [vmem:[%s4141_s0 + $0x20] sm:$0xf0]  ;;  %v2882_v8 = vor.u32 %v3336_v57, %v2881_v56 }
 0x10e   : > { %1954 = vmatpush.bf16.msra.mxu3 %v2970_v31  ;;  %v2625_v61 = vld [vmem:[%s4141_s0] sm:$0xf]  ;;  %v3193_v1 = vld [vmem:[%s4143_s16 + $0x370] sm:$0xf]  ;;  %v3414_v2 = vld [vmem:[%s4143_s16 + $0x374] sm:$0xf0]  ;;  %v2946_v12 = vor.u32 %v3352_v60, %v2945_v58  ;;  %v4232_v22 = vor.u32 %v3271_v63, %v2627_v0 }
 0x10f   : > { %1868 = vmatpush.bf16.msra.mxu0 %v2770_v37  ;;  %v3275_v62 = vld [vmem:[%s4141_s0 + $0x1c] sm:$0xf0]  ;;  %v2633_v4 = vld [vmem:[%s4141_s0 + $0x8] sm:$0xf]  ;;  %v3257_v5 = vld [vmem:[%s4143_s16 + $0x3f0] sm:$0xf]  ;;  %v3194_v13 = vor.u32 %v3414_v2, %v3193_v1 }
 0x110   : > { %1897 = vmatpush.bf16.msra.mxu1 %v2834_v38  ;;  %v3430_v6 = vld [vmem:[%s4143_s16 + $0x3f4] sm:$0xf0]  ;;  %v3276_v9 = vld [vmem:[%s4141_s0 + $0x24] sm:$0xf0]  ;;  %v3272_v10 = vld [vmem:[%s4141_s0 + $0xc] sm:$0xf]  ;;  %v4227_v17 = vor.u32 %v3275_v62, %v2625_v61 }
 0x111   : > { %1926 = vmatpush.bf16.msra.mxu2 %v2898_v39  ;;  %v2635_v11 = vld [vmem:[%s4141_s0 + $0x28] sm:$0xf0]  ;;  %v3065_v14 = vld [vmem:[%s4143_s16 + $0x270] sm:$0xf]  ;;  %v3382_v15 = vld [vmem:[%s4143_s16 + $0x274] sm:$0xf0]  ;;  %v3258_v18 = vor.u32 %v3430_v6, %v3257_v5  ;;  %v4234_v23 = vor.u32 %v3276_v9, %v2633_v4 }
 0x112   : > { %1955 = vmatpush.bf16.msra.mxu3 %v2962_v43  ;;  %v3129_v16 = vld [vmem:[%s4143_s16 + $0x2f0] sm:$0xf]  ;;  %v3398_v19 = vld [vmem:[%s4143_s16 + $0x2f4] sm:$0xf0]  ;;  %v3185_v20 = vld [vmem:[%s4143_s16 + $0x360] sm:$0xf]  ;;  %v4238_v26 = vor.u32 %v3272_v10, %v2635_v11  ;;  %v3066_v27 = vor.u32 %v3382_v15, %v3065_v14 }
 0x113   : > { %1869 = vmatpush.bf16.msra.mxu0 %v2762_v50  ;;  %v3412_v21 = vld [vmem:[%s4143_s16 + $0x364] sm:$0xf0]  ;;  %v3249_v24 = vld [vmem:[%s4143_s16 + $0x3e0] sm:$0xf]  ;;  %v3130_v28 = vor.u32 %v3398_v19, %v3129_v16  ;;  %v3177_v35 = vld [vmem:[%s4143_s16 + $0x350] sm:$0xf] }
 0x114   : > { %1898 = vmatpush.bf16.msra.mxu1 %v2826_v54  ;;  %v3428_v25 = vld [vmem:[%s4143_s16 + $0x3e4] sm:$0xf0]  ;;  %v3186_v29 = vor.u32 %v3412_v21, %v3185_v20  ;;  %v3057_v30 = vld [vmem:[%s4143_s16 + $0x260] sm:$0xf]  ;;  %v3410_v36 = vld [vmem:[%s4143_s16 + $0x354] sm:$0xf0] }
 0x115   : > { %1927 = vmatpush.bf16.msra.mxu2 %v2890_v55  ;;  %v3380_v31 = vld [vmem:[%s4143_s16 + $0x264] sm:$0xf0]  ;;  %v3121_v32 = vld [vmem:[%s4143_s16 + $0x2e0] sm:$0xf]  ;;  %v3250_v33 = vor.u32 %v3428_v25, %v3249_v24  ;;  %v3241_v37 = vld [vmem:[%s4143_s16 + $0x3d0] sm:$0xf]  ;;  %v3178_v41 = vor.u32 %v3410_v36, %v3177_v35 }
 0x116   : > { %1956 = vmatpush.bf16.msra.mxu3 %v2954_v59  ;;  %v3396_v34 = vld [vmem:[%s4143_s16 + $0x2e4] sm:$0xf0]  ;;  %v3426_v38 = vld [vmem:[%s4143_s16 + $0x3d4] sm:$0xf0]  ;;  %v3058_v39 = vor.u32 %v3380_v31, %v3057_v30  ;;  %v3049_v42 = vld [vmem:[%s4143_s16 + $0x250] sm:$0xf] }
 0x117   : > { %1870 = vmatpush.bf16.msra.mxu0 %v2754_v3  ;;  %v3122_v40 = vor.u32 %v3396_v34, %v3121_v32  ;;  %v3378_v43 = vld [vmem:[%s4143_s16 + $0x254] sm:$0xf0]  ;;  %v3113_v44 = vld [vmem:[%s4143_s16 + $0x2d0] sm:$0xf]  ;;  %v3242_v45 = vor.u32 %v3426_v38, %v3241_v37  ;;  %v3169_v47 = vld [vmem:[%s4143_s16 + $0x340] sm:$0xf] }
 0x118   : > { %1899 = vmatpush.bf16.msra.mxu1 %v2818_v7  ;;  %v3394_v46 = vld [vmem:[%s4143_s16 + $0x2d4] sm:$0xf0]  ;;  %v3408_v48 = vld [vmem:[%s4143_s16 + $0x344] sm:$0xf0]  ;;  %v3233_v49 = vld [vmem:[%s4143_s16 + $0x3c0] sm:$0xf]  ;;  %v3050_v51 = vor.u32 %v3378_v43, %v3049_v42 }
 0x119   : > { %1928 = vmatpush.bf16.msra.mxu2 %v2882_v8  ;;  %v3424_v50 = vld [vmem:[%s4143_s16 + $0x3c4] sm:$0xf0]  ;;  %v2657_v52 = vld [vmem:[%s4141_s0 + $0x40] sm:$0xf]  ;;  %v3114_v54 = vor.u32 %v3394_v46, %v3113_v44  ;;  %v3170_v55 = vor.u32 %v3408_v48, %v3169_v47  ;;  %v3279_v59 = vld [vmem:[%s4141_s0 + $0x44] sm:$0xf] }
 0x11a   : > { %1957 = vmatpush.bf16.msra.mxu3 %v2946_v12  ;;  %1871 = vmatmul.bf16.vlgmr.msra.gmra.mxu0 %v4227_v17  ;;  %v3283_v53 = vld [vmem:[%s4141_s0 + $0x5c] sm:$0xf0]  ;;  %v3376_v57 = vld [vmem:[%s4143_s16 + $0x244] sm:$0xf0]  ;;  %v2659_v60 = vld [vmem:[%s4141_s0 + $0x60] sm:$0xf0]  ;;  %v3234_v61 = vor.u32 %v3424_v50, %v3233_v49 }
 0x11b   : > { %1900 = vmatmul.bf16.vlgmr.msra.gmra.mxu1 %v4232_v22  ;;  %1979 = vmatpush.bf16.msrb.mxu0 %v3066_v27  ;;  %v3041_v56 = vld [vmem:[%s4143_s16 + $0x240] sm:$0xf]  ;;  %v3392_v62 = vld [vmem:[%s4143_s16 + $0x2c4] sm:$0xf0]  ;;  %v3161_v63 = vld [vmem:[%s4143_s16 + $0x330] sm:$0xf]  ;;  %v4284_v19 = vor.u32 %v3279_v59, %v2659_v60 }
 0x11c   : > { %1929 = vmatmul.bf16.vlgmr.msra.gmra.mxu2 %v4234_v23  ;;  %2008 = vmatpush.bf16.msrb.mxu1 %v3130_v28  ;;  %v3105_v58 = vld [vmem:[%s4143_s16 + $0x2c0] sm:$0xf]  ;;  %v3406_v0 = vld [vmem:[%s4143_s16 + $0x334] sm:$0xf0]  ;;  %v2665_v1 = vld [vmem:[%s4141_s0 + $0x48] sm:$0xf]  ;;  %v3042_v7 = vor.u32 %v3376_v57, %v3041_v56 }
 0x11d   : > { %2037 = vmatpush.bf16.msrb.mxu2 %v3194_v13  ;;  %1958 = vmatmul.bf16.vlgmr.msra.gmra.mxu3 %v4238_v26  ;;  %v3225_v2 = vld [vmem:[%s4143_s16 + $0x3b0] sm:$0xf]  ;;  %v3422_v3 = vld [vmem:[%s4143_s16 + $0x3b4] sm:$0xf0]  ;;  %v3284_v4 = vld [vmem:[%s4141_s0 + $0x64] sm:$0xf0]  ;;  %v3106_v8 = vor.u32 %v3392_v62, %v3105_v58  ;;  %v3162_v9 = vor.u32 %v3406_v0, %v3161_v63  ;;  %v4279_v13 = vor.u32 %v3283_v53, %v2657_v52 }
 0x11e   : > { %2066 = vmatpush.bf16.msrb.mxu3 %v3258_v18  ;;  %v3280_v5 = vld [vmem:[%s4141_s0 + $0x4c] sm:$0xf]  ;;  %v3033_v10 = vld [vmem:[%s4143_s16 + $0x230] sm:$0xf]  ;;  %v3374_v11 = vld [vmem:[%s4143_s16 + $0x234] sm:$0xf0]  ;;  %v3226_v14 = vor.u32 %v3422_v3, %v3225_v2  ;;  %v4286_v20 = vor.u32 %v3284_v4, %v2665_v1 }
 0x11f   : > { %1980 = vmatpush.bf16.msrb.mxu0 %v3058_v39  ;;  %v2667_v6 = vld [vmem:[%s4141_s0 + $0x68] sm:$0xf0]  ;;  %v3097_v12 = vld [vmem:[%s4143_s16 + $0x2b0] sm:$0xf]  ;;  %v3390_v15 = vld [vmem:[%s4143_s16 + $0x2b4] sm:$0xf0]  ;;  %v3034_v27 = vor.u32 %v3374_v11, %v3033_v10 }
 0x120   : > { %2009 = vmatpush.bf16.msrb.mxu1 %v3122_v40  ;;  %v3153_v16 = vld [vmem:[%s4143_s16 + $0x320] sm:$0xf]  ;;  %v3404_v18 = vld [vmem:[%s4143_s16 + $0x324] sm:$0xf0]  ;;  %v4290_v25 = vor.u32 %v3280_v5, %v2667_v6  ;;  %v3098_v28 = vor.u32 %v3390_v15, %v3097_v12  ;;  %v3145_v36 = vld [vmem:[%s4143_s16 + $0x310] sm:$0xf] }
 0x121   : > { %2038 = vmatpush.bf16.msrb.mxu2 %v3186_v29  ;;  %v3217_v21 = vld [vmem:[%s4143_s16 + $0x3a0] sm:$0xf]  ;;  %v3420_v24 = vld [vmem:[%s4143_s16 + $0x3a4] sm:$0xf0]  ;;  %v3154_v29 = vor.u32 %v3404_v18, %v3153_v16  ;;  %v3402_v37 = vld [vmem:[%s4143_s16 + $0x314] sm:$0xf0] }
 0x122   : > { %2067 = vmatpush.bf16.msrb.mxu3 %v3250_v33  ;;  %v3025_v30 = vld [vmem:[%s4143_s16 + $0x220] sm:$0xf]  ;;  %v3372_v31 = vld [vmem:[%s4143_s16 + $0x224] sm:$0xf0]  ;;  %v3218_v32 = vor.u32 %v3420_v24, %v3217_v21  ;;  %v3017_v38 = vld [vmem:[%s4143_s16 + $0x210] sm:$0xf]  ;;  %v3146_v40 = vor.u32 %v3402_v37, %v3145_v36 }
 0x123   : > { %1981 = vmatpush.bf16.msrb.mxu0 %v3050_v51  ;;  %v3089_v33 = vld [vmem:[%s4143_s16 + $0x2a0] sm:$0xf]  ;;  %v3388_v34 = vld [vmem:[%s4143_s16 + $0x2a4] sm:$0xf0]  ;;  %v3026_v35 = vor.u32 %v3372_v31, %v3025_v30  ;;  %v3209_v42 = vld [vmem:[%s4143_s16 + $0x390] sm:$0xf] }
 0x124   : > { %2010 = vmatpush.bf16.msrb.mxu1 %v3114_v54  ;;  %v3090_v39 = vor.u32 %v3388_v34, %v3089_v33  ;;  %v3418_v43 = vld [vmem:[%s4143_s16 + $0x394] sm:$0xf0]  ;;  %v3137_v47 = vld [vmem:[%s4143_s16 + $0x300] sm:$0xf]  ;;  %v3400_v48 = vld [vmem:[%s4143_s16 + $0x304] sm:$0xf0] }
 0x125   : > { %2039 = vmatpush.bf16.msrb.mxu2 %v3178_v41  ;;  %v3370_v41 = vld [vmem:[%s4143_s16 + $0x214] sm:$0xf0]  ;;  %v3210_v44 = vor.u32 %v3418_v43, %v3209_v42  ;;  %v3201_v50 = vld [vmem:[%s4143_s16 + $0x380] sm:$0xf]  ;;  %v3416_v51 = vld [vmem:[%s4143_s16 + $0x384] sm:$0xf0]  ;;  %v3138_v53 = vor.u32 %v3400_v48, %v3137_v47 }
 0x126   : > { %2068 = vmatpush.bf16.msrb.mxu3 %v3242_v45  ;;  %v3081_v45 = vld [vmem:[%s4143_s16 + $0x290] sm:$0xf]  ;;  %v3386_v46 = vld [vmem:[%s4143_s16 + $0x294] sm:$0xf0]  ;;  %v3018_v49 = vor.u32 %v3370_v41, %v3017_v38  ;;  %v3009_v54 = vld [vmem:[%s4143_s16 + $0x200] sm:$0xf]  ;;  %v3202_v56 = vor.u32 %v3416_v51, %v3201_v50 }
 0x127   : > { %1982 = vmatpush.bf16.msrb.mxu0 %v3042_v7  ;;  %v3082_v52 = vor.u32 %v3386_v46, %v3081_v45  ;;  %v3073_v57 = vld [vmem:[%s4143_s16 + $0x280] sm:$0xf]  ;;  %v3384_v58 = vld [vmem:[%s4143_s16 + $0x284] sm:$0xf0]  ;;  %v2691_v62 = vld [vmem:[%s4141_s0 + $0xa0] sm:$0xf0] }
 0x128   : > { %2011 = vmatpush.bf16.msrb.mxu1 %v3106_v8  ;;  %v2689_v59 = vld [vmem:[%s4141_s0 + $0x80] sm:$0xf]  ;;  %v2697_v63 = vld [vmem:[%s4141_s0 + $0x88] sm:$0xf]  ;;  %v3288_v2 = vld [vmem:[%s4141_s0 + $0x8c] sm:$0xf]  ;;  %v3074_v4 = vor.u32 %v3384_v58, %v3073_v57 }
 0x129   : > { %2040 = vmatpush.bf16.msrb.mxu2 %v3170_v55  ;;  %v3368_v55 = vld [vmem:[%s4143_s16 + $0x204] sm:$0xf0]  ;;  %v3291_v60 = vld [vmem:[%s4141_s0 + $0x9c] sm:$0xf0]  ;;  %v2699_v3 = vld [vmem:[%s4141_s0 + $0xa8] sm:$0xf0] }
 0x12a   : > { %2069 = vmatpush.bf16.msrb.mxu3 %v3234_v61  ;;  %1876 = vmatmul.bf16.gmra.mxu0 %v4279_v13  ;;  %v3287_v61 = vld [vmem:[%s4141_s0 + $0x84] sm:$0xf]  ;;  %v3292_v0 = vld [vmem:[%s4141_s0 + $0xa4] sm:$0xf0]  ;;  %v3010_v1 = vor.u32 %v3368_v55, %v3009_v54  ;;  %v4324_v5 = vor.u32 %v3291_v60, %v2689_v59  ;;  %v4330_v8 = vor.u32 %v3288_v2, %v2699_v3  ;;  %v2939_v10 = vld [vmem:[%s4143_s16 + $0x178] sm:$0xf0] }
 0x12b   : > { %1905 = vmatmul.bf16.gmra.mxu1 %v4284_v19  ;;  %1983 = vmatpush.bf16.msrb.mxu0 %v3034_v27  ;;  %v4326_v6 = vor.u32 %v3287_v61, %v2691_v62  ;;  %v4328_v7 = vor.u32 %v3292_v0, %v2697_v63  ;;  %v3317_v11 = vld [vmem:[%s4143_s16 + $0x74] sm:$0xf]  ;;  %v3003_v16 = vld [vmem:[%s4143_s16 + $0x1f8] sm:$0xf0]  ;;  %v2931_v30 = vld [vmem:[%s4143_s16 + $0x168] sm:$0xf0] }
 0x12c   : > { %1934 = vmatmul.bf16.gmra.mxu2 %v4286_v20  ;;  %2012 = vmatpush.bf16.msrb.mxu1 %v3098_v28  ;;  %v3365_v15 = vld [vmem:[%s4143_s16 + $0x1f4] sm:$0xf]  ;;  %v2875_v27 = vld [vmem:[%s4143_s16 + $0xf8] sm:$0xf0]  ;;  %v3347_v28 = vld [vmem:[%s4143_s16 + $0x164] sm:$0xf] }
 0x12d   : > { %2041 = vmatpush.bf16.msrb.mxu2 %v3162_v9  ;;  %1963 = vmatmul.bf16.gmra.mxu3 %v4290_v25  ;;  %v3349_v9 = vld [vmem:[%s4143_s16 + $0x174] sm:$0xf]  ;;  %v3006_v21 = vor.u32 %v3365_v15, %v3003_v16  ;;  %v3315_v31 = vld [vmem:[%s4143_s16 + $0x64] sm:$0xf]  ;;  %v2934_v33 = vor.u32 %v3347_v28, %v2931_v30  ;;  %v2995_v36 = vld [vmem:[%s4143_s16 + $0x1e8] sm:$0xf0] }
 0x12e   : > { %2070 = vmatpush.bf16.msrb.mxu3 %v3226_v14  ;;  %v2942_v12 = vor.u32 %v3349_v9, %v2939_v10  ;;  %v2811_v14 = vld [vmem:[%s4143_s16 + $0x78] sm:$0xf0]  ;;  %v3333_v24 = vld [vmem:[%s4143_s16 + $0xf4] sm:$0xf]  ;;  %v3331_v37 = vld [vmem:[%s4143_s16 + $0xe4] sm:$0xf] }
 0x12f   : > { %1984 = vmatpush.bf16.msrb.mxu0 %v3026_v35  ;;  %v2814_v18 = vor.u32 %v3317_v11, %v2811_v14  ;;  %v3363_v35 = vld [vmem:[%s4143_s16 + $0x1e4] sm:$0xf]  ;;  %v2721_v41 = vld [vmem:[%s4141_s0 + $0xc0] sm:$0xf]  ;;  %v2729_v45 = vld [vmem:[%s4141_s0 + $0xc8] sm:$0xf] }
 0x130   : > { %2013 = vmatpush.bf16.msrb.mxu1 %v3090_v39  ;;  %v2998_v38 = vor.u32 %v3363_v35, %v2995_v36  ;;  %v2867_v39 = vld [vmem:[%s4143_s16 + $0xe8] sm:$0xf0]  ;;  %v3299_v42 = vld [vmem:[%s4141_s0 + $0xdc] sm:$0xf0]  ;;  %v3295_v43 = vld [vmem:[%s4141_s0 + $0xc4] sm:$0xf] }
 0x131   : > { %2042 = vmatpush.bf16.msrb.mxu2 %v3154_v29  ;;  %v2878_v29 = vor.u32 %v3333_v24, %v2875_v27  ;;  %v3300_v46 = vld [vmem:[%s4141_s0 + $0xe4] sm:$0xf0]  ;;  %v3296_v47 = vld [vmem:[%s4141_s0 + $0xcc] sm:$0xf]  ;;  %v2923_v54 = vld [vmem:[%s4143_s16 + $0x158] sm:$0xf0] }
 0x132   : > { %2071 = vmatpush.bf16.msrb.mxu3 %v3218_v32  ;;  %v2803_v32 = vld [vmem:[%s4143_s16 + $0x68] sm:$0xf0]  ;;  %v4364_v51 = vor.u32 %v3300_v46, %v2729_v45  ;;  %v3313_v55 = vld [vmem:[%s4143_s16 + $0x54] sm:$0xf]  ;;  %v2795_v57 = vld [vmem:[%s4143_s16 + $0x58] sm:$0xf0] }
 0x133   : > { %1985 = vmatpush.bf16.msrb.mxu0 %v3018_v49  ;;  %v2806_v34 = vor.u32 %v3315_v31, %v2803_v32  ;;  %v2731_v48 = vld [vmem:[%s4141_s0 + $0xe8] sm:$0xf0]  ;;  %v4360_v49 = vor.u32 %v3299_v42, %v2721_v41  ;;  %v3361_v58 = vld [vmem:[%s4143_s16 + $0x1d4] sm:$0xf]  ;;  %v2987_v59 = vld [vmem:[%s4143_s16 + $0x1d8] sm:$0xf0]  ;;  %v2798_v60 = vor.u32 %v3313_v55, %v2795_v57 }
 0x134   : > { %2014 = vmatpush.bf16.msrb.mxu1 %v3082_v52  ;;  %v4366_v52 = vor.u32 %v3296_v47, %v2731_v48  ;;  %v2990_v61 = vor.u32 %v3361_v58, %v2987_v59  ;;  %v3329_v62 = vld [vmem:[%s4143_s16 + $0xd4] sm:$0xf]  ;;  %v2859_v63 = vld [vmem:[%s4143_s16 + $0xd8] sm:$0xf0]  ;;  %v3343_v0 = vld [vmem:[%s4143_s16 + $0x144] sm:$0xf] }
 0x135   : > { %2043 = vmatpush.bf16.msrb.mxu2 %v3146_v40  ;;  %v2870_v40 = vor.u32 %v3331_v37, %v2867_v39  ;;  %v2915_v2 = vld [vmem:[%s4143_s16 + $0x148] sm:$0xf0]  ;;  %v3311_v3 = vld [vmem:[%s4143_s16 + $0x44] sm:$0xf]  ;;  %v3277_v24 = vld [vmem:[%s4141_s0 + $0x2c] sm:$0xf0] }
 0x136   : > { %2072 = vmatpush.bf16.msrb.mxu3 %v3210_v44  ;;  %v2723_v44 = vld [vmem:[%s4141_s0 + $0xe0] sm:$0xf0]  ;;  %v2918_v9 = vor.u32 %v3343_v0, %v2915_v2  ;;  %v2851_v16 = vld [vmem:[%s4143_s16 + $0xc8] sm:$0xf0]  ;;  %v3273_v27 = vld [vmem:[%s4141_s0 + $0x14] sm:$0xf] }
 0x137   : > { %1986 = vmatpush.bf16.msrb.mxu0 %v3010_v1  ;;  %v4362_v50 = vor.u32 %v3295_v43, %v2723_v44  ;;  %v2862_v1 = vor.u32 %v3329_v62, %v2859_v63  ;;  %v3359_v11 = vld [vmem:[%s4143_s16 + $0x1c4] sm:$0xf]  ;;  %v2643_v28 = vld [vmem:[%s4141_s0 + $0x30] sm:$0xf0]  ;;  %v3278_v30 = vld [vmem:[%s4141_s0 + $0x34] sm:$0xf0] }
 0x138   : > { %2015 = vmatpush.bf16.msrb.mxu1 %v3074_v4  ;;  %v2787_v4 = vld [vmem:[%s4143_s16 + $0x48] sm:$0xf0]  ;;  %v3327_v14 = vld [vmem:[%s4143_s16 + $0xc4] sm:$0xf]  ;;  %v3274_v31 = vld [vmem:[%s4141_s0 + $0x1c] sm:$0xf] }
 0x139   : > { %2044 = vmatpush.bf16.msrb.mxu2 %v3138_v53  ;;  %v3345_v53 = vld [vmem:[%s4143_s16 + $0x154] sm:$0xf]  ;;  %v2790_v10 = vor.u32 %v3311_v3, %v2787_v4  ;;  %v2651_v32 = vld [vmem:[%s4141_s0 + $0x38] sm:$0xf0]  ;;  %v3339_v48 = vld [vmem:[%s4143_s16 + $0x124] sm:$0xf] }
 0x13a   : > { %2073 = vmatpush.bf16.msrb.mxu3 %v3202_v56  ;;  %1881 = vmatmul.bf16.gmra.mxu0 %v4324_v5  ;;  %v2926_v56 = vor.u32 %v3345_v53, %v2923_v54  ;;  %v4402_v36 = vor.u32 %v3274_v31, %v2651_v32  ;;  %v3341_v37 = vld [vmem:[%s4143_s16 + $0x134] sm:$0xf]  ;;  %v2779_v41 = vld [vmem:[%s4143_s16 + $0x38] sm:$0xf0]  ;;  %v2899_v54 = vld [vmem:[%s4143_s16 + $0x128] sm:$0xf0] }
 0x13b   : > { %1910 = vmatmul.bf16.gmra.mxu1 %v4326_v6  ;;  %2095 = vmatpush.bf16.msra.mxu0 %v2814_v18  ;;  %v2854_v18 = vor.u32 %v3327_v14, %v2851_v16  ;;  %v3309_v39 = vld [vmem:[%s4143_s16 + $0x34] sm:$0xf]  ;;  %v2971_v43 = vld [vmem:[%s4143_s16 + $0x1b8] sm:$0xf0]  ;;  %v3307_v55 = vld [vmem:[%s4143_s16 + $0x24] sm:$0xf]  ;;  %v2902_v57 = vor.u32 %v3339_v48, %v2899_v54 }
 0x13c   : > { %1939 = vmatmul.bf16.gmra.mxu2 %v4328_v7  ;;  %2124 = vmatpush.bf16.msra.mxu1 %v2878_v29  ;;  %v2649_v29 = vld [vmem:[%s4141_s0 + $0x18] sm:$0xf]  ;;  %v3357_v42 = vld [vmem:[%s4143_s16 + $0x1b4] sm:$0xf]  ;;  %v2782_v44 = vor.u32 %v3309_v39, %v2779_v41  ;;  %v2843_v47 = vld [vmem:[%s4143_s16 + $0xb8] sm:$0xf0] }
 0x13d   : > { %1968 = vmatmul.bf16.gmra.mxu3 %v4330_v8  ;;  %2153 = vmatpush.bf16.msra.mxu2 %v2942_v12  ;;  %v2979_v12 = vld [vmem:[%s4143_s16 + $0x1c8] sm:$0xf0]  ;;  %v4400_v35 = vor.u32 %v3278_v30, %v2649_v29  ;;  %v2974_v45 = vor.u32 %v3357_v42, %v2971_v43  ;;  %v3325_v46 = vld [vmem:[%s4143_s16 + $0xb4] sm:$0xf]  ;;  %v3355_v59 = vld [vmem:[%s4143_s16 + $0x1a4] sm:$0xf] }
 0x13e   : > { %2182 = vmatpush.bf16.msra.mxu3 %v3006_v21  ;;  %v2982_v15 = vor.u32 %v3359_v11, %v2979_v12  ;;  %v2641_v21 = vld [vmem:[%s4141_s0 + $0x10] sm:$0xf]  ;;  %v2846_v53 = vor.u32 %v3325_v46, %v2843_v47  ;;  %v2835_v63 = vld [vmem:[%s4143_s16 + $0xa8] sm:$0xf0]  ;;  %v3281_v3 = vld [vmem:[%s4141_s0 + $0x54] sm:$0xf] }
 0x13f   : > { %2096 = vmatpush.bf16.msra.mxu0 %v2806_v34  ;;  %v4398_v34 = vor.u32 %v3273_v27, %v2643_v28  ;;  %v3285_v2 = vld [vmem:[%s4141_s0 + $0x6c] sm:$0xf0]  ;;  %v2675_v4 = vld [vmem:[%s4141_s0 + $0x70] sm:$0xf0]  ;;  %v3282_v11 = vld [vmem:[%s4141_s0 + $0x5c] sm:$0xf] }
 0x140   : > { %2125 = vmatpush.bf16.msra.mxu1 %v2870_v40  ;;  %v2683_v12 = vld [vmem:[%s4141_s0 + $0x78] sm:$0xf0]  ;;  %v3305_v27 = vld [vmem:[%s4143_s16 + $0x14] sm:$0xf]  ;;  %v2883_v42 = vld [vmem:[%s4143_s16 + $0x108] sm:$0xf0] }
 0x141   : > { %2154 = vmatpush.bf16.msra.mxu2 %v2934_v33  ;;  %v4396_v33 = vor.u32 %v3277_v24, %v2641_v21  ;;  %v3337_v21 = vld [vmem:[%s4143_s16 + $0x114] sm:$0xf]  ;;  %v2891_v24 = vld [vmem:[%s4143_s16 + $0x118] sm:$0xf0]  ;;  %v3303_v43 = vld [vmem:[%s4143_s16 + $0x4] sm:$0xf] }
 0x142   : > { %2183 = vmatpush.bf16.msra.mxu3 %v2998_v38  ;;  %v2907_v38 = vld [vmem:[%s4143_s16 + $0x138] sm:$0xf0]  ;;  %v2894_v28 = vor.u32 %v3337_v21, %v2891_v24  ;;  %v3353_v30 = vld [vmem:[%s4143_s16 + $0x194] sm:$0xf]  ;;  %v3351_v47 = vld [vmem:[%s4143_s16 + $0x184] sm:$0xf] }
 0x143   : > { %2097 = vmatpush.bf16.msra.mxu0 %v2798_v60  ;;  %v2910_v40 = vor.u32 %v3341_v37, %v2907_v38  ;;  %v2963_v60 = vld [vmem:[%s4143_s16 + $0x1a8] sm:$0xf0]  ;;  %v2763_v29 = vld [vmem:[%s4143_s16 + $0x18] sm:$0xf0]  ;;  %v3321_v38 = vld [vmem:[%s4143_s16 + $0x94] sm:$0xf] }
 0x144   : > { %2126 = vmatpush.bf16.msra.mxu1 %v2862_v1  ;;  %v2966_v62 = vor.u32 %v3355_v59, %v2963_v60  ;;  %v2673_v1 = vld [vmem:[%s4141_s0 + $0x50] sm:$0xf]  ;;  %v2955_v31 = vld [vmem:[%s4143_s16 + $0x198] sm:$0xf0]  ;;  %v2766_v32 = vor.u32 %v3305_v27, %v2763_v29  ;;  %v2947_v48 = vld [vmem:[%s4143_s16 + $0x188] sm:$0xf0] }
 0x145   : > { %2155 = vmatpush.bf16.msra.mxu2 %v2926_v56  ;;  %v2771_v56 = vld [vmem:[%s4143_s16 + $0x28] sm:$0xf0]  ;;  %v4432_v14 = vor.u32 %v3285_v2, %v2673_v1  ;;  %v2958_v37 = vor.u32 %v3353_v30, %v2955_v31  ;;  %v2827_v39 = vld [vmem:[%s4143_s16 + $0x98] sm:$0xf0]  ;;  %v2950_v54 = vor.u32 %v3351_v47, %v2947_v48  ;;  %v3289_v59 = vld [vmem:[%s4141_s0 + $0x94] sm:$0xf] }
 0x146   : > { %2184 = vmatpush.bf16.msra.mxu3 %v2990_v61  ;;  %v2774_v58 = vor.u32 %v3307_v55, %v2771_v56  ;;  %v3323_v61 = vld [vmem:[%s4143_s16 + $0xa4] sm:$0xf]  ;;  %v2830_v41 = vor.u32 %v3321_v38, %v2827_v39  ;;  %v2819_v55 = vld [vmem:[%s4143_s16 + $0x88] sm:$0xf0]  ;;  %v2707_v60 = vld [vmem:[%s4141_s0 + $0xb0] sm:$0xf0] }
 0x147   : > { %2098 = vmatpush.bf16.msra.mxu0 %v2790_v10  ;;  %v2838_v0 = vor.u32 %v3323_v61, %v2835_v63  ;;  %v3286_v10 = vld [vmem:[%s4141_s0 + $0x74] sm:$0xf0]  ;;  %v3290_v63 = vld [vmem:[%s4141_s0 + $0x9c] sm:$0xf]  ;;  %v4470_v2 = vor.u32 %v3289_v59, %v2707_v60  ;;  %v3429_v24 = vld [vmem:[%s4143_s16 + $0x3f4] sm:$0xf] }
 0x148   : > { %2127 = vmatpush.bf16.msra.mxu1 %v2854_v18  ;;  %v4438_v18 = vor.u32 %v3282_v11, %v2683_v12  ;;  %v2713_v61 = vld [vmem:[%s4141_s0 + $0x98] sm:$0xf]  ;;  %v3381_v11 = vld [vmem:[%s4143_s16 + $0x274] sm:$0xf]  ;;  %v3067_v21 = vld [vmem:[%s4143_s16 + $0x278] sm:$0xf0] }
 0x149   : > { %2156 = vmatpush.bf16.msra.mxu2 %v2918_v9  ;;  %v2681_v9 = vld [vmem:[%s4141_s0 + $0x58] sm:$0xf]  ;;  %v3259_v27 = vld [vmem:[%s4143_s16 + $0x3f8] sm:$0xf0]  ;;  %v2737_v30 = vld [vmem:[%s4141_s0 + $0xd0] sm:$0xf] }
 0x14a   : > { %1886 = vmatmul.bf16.gmra.mxu0 %v4360_v49  ;;  %2185 = vmatpush.bf16.msra.mxu3 %v2982_v15  ;;  %v4434_v15 = vor.u32 %v3281_v3, %v2675_v4  ;;  %v4436_v16 = vor.u32 %v3286_v10, %v2681_v9  ;;  %v3413_v9 = vld [vmem:[%s4143_s16 + $0x374] sm:$0xf]  ;;  %v3195_v10 = vld [vmem:[%s4143_s16 + $0x378] sm:$0xf0]  ;;  %v3262_v29 = vor.u32 %v3429_v24, %v3259_v27  ;;  %v3301_v31 = vld [vmem:[%s4141_s0 + $0xec] sm:$0xf0] }
 0x14b   : > { %1915 = vmatmul.bf16.gmra.mxu1 %v4362_v50  ;;  %2099 = vmatpush.bf16.msra.mxu0 %v2782_v44  ;;  %v2755_v44 = vld [vmem:[%s4143_s16 + $0x8] sm:$0xf0]  ;;  %v3198_v12 = vor.u32 %v3413_v9, %v3195_v10  ;;  %v3411_v38 = vld [vmem:[%s4143_s16 + $0x364] sm:$0xf]  ;;  %v2739_v48 = vld [vmem:[%s4141_s0 + $0xf0] sm:$0xf0] }
 0x14c   : > { %1944 = vmatmul.bf16.gmra.mxu2 %v4364_v51  ;;  %2128 = vmatpush.bf16.msra.mxu1 %v2846_v53  ;;  %v2758_v46 = vor.u32 %v3303_v43, %v2755_v44  ;;  %v3319_v53 = vld [vmem:[%s4143_s16 + $0x84] sm:$0xf]  ;;  %v3297_v43 = vld [vmem:[%s4141_s0 + $0xd4] sm:$0xf]  ;;  %v3251_v47 = vld [vmem:[%s4143_s16 + $0x3e8] sm:$0xf0] }
 0x14d   : > { %1973 = vmatmul.bf16.gmra.mxu3 %v4366_v52  ;;  %2157 = vmatpush.bf16.msra.mxu2 %v2910_v40  ;;  %v3335_v40 = vld [vmem:[%s4143_s16 + $0x104] sm:$0xf]  ;;  %v2822_v56 = vor.u32 %v3319_v53, %v2819_v55  ;;  %v2745_v53 = vld [vmem:[%s4141_s0 + $0xd8] sm:$0xf]  ;;  %v4504_v59 = vor.u32 %v3297_v43, %v2739_v48  ;;  %v3409_v9 = vld [vmem:[%s4143_s16 + $0x354] sm:$0xf] }
 0x14e   : > { %2186 = vmatpush.bf16.msra.mxu3 %v2974_v45  ;;  %v2886_v45 = vor.u32 %v3335_v40, %v2883_v42  ;;  %v3187_v40 = vld [vmem:[%s4143_s16 + $0x368] sm:$0xf0]  ;;  %v3179_v10 = vld [vmem:[%s4143_s16 + $0x358] sm:$0xf0]  ;;  %v3425_v24 = vld [vmem:[%s4143_s16 + $0x3d4] sm:$0xf] }
 0x14f   : > { %2100 = vmatpush.bf16.msra.mxu0 %v2774_v58  ;;  %v3293_v58 = vld [vmem:[%s4141_s0 + $0xac] sm:$0xf0]  ;;  %v3059_v42 = vld [vmem:[%s4143_s16 + $0x268] sm:$0xf0]  ;;  %v3190_v44 = vor.u32 %v3411_v38, %v3187_v40  ;;  %v3243_v27 = vld [vmem:[%s4143_s16 + $0x3d8] sm:$0xf0] }
 0x150   : > { %2129 = vmatpush.bf16.msra.mxu1 %v2838_v0  ;;  %v2715_v0 = vld [vmem:[%s4141_s0 + $0xb8] sm:$0xf0]  ;;  %v3171_v38 = vld [vmem:[%s4143_s16 + $0x348] sm:$0xf0]  ;;  %v3423_v43 = vld [vmem:[%s4143_s16 + $0x3c4] sm:$0xf] }
 0x151   : > { %2158 = vmatpush.bf16.msra.mxu2 %v2902_v57  ;;  %v2705_v57 = vld [vmem:[%s4141_s0 + $0x90] sm:$0xf]  ;;  %v4474_v4 = vor.u32 %v3290_v63, %v2715_v0  ;;  %v3123_v63 = vld [vmem:[%s4143_s16 + $0x2e8] sm:$0xf0]  ;;  %v3391_v48 = vld [vmem:[%s4143_s16 + $0x2c4] sm:$0xf] }
 0x152   : > { %2187 = vmatpush.bf16.msra.mxu3 %v2966_v62  ;;  %v3294_v62 = vld [vmem:[%s4141_s0 + $0xb4] sm:$0xf0]  ;;  %v4468_v1 = vor.u32 %v3293_v58, %v2705_v57  ;;  %v2747_v57 = vld [vmem:[%s4141_s0 + $0xf8] sm:$0xf0]  ;;  %v4502_v58 = vor.u32 %v3301_v31, %v2737_v30  ;;  %v3393_v30 = vld [vmem:[%s4143_s16 + $0x2d4] sm:$0xf] }
 0x153   : > { %2101 = vmatpush.bf16.msra.mxu0 %v2766_v32  ;;  %v4472_v3 = vor.u32 %v3294_v62, %v2713_v61  ;;  %v3397_v32 = vld [vmem:[%s4143_s16 + $0x2f4] sm:$0xf]  ;;  %v3395_v62 = vld [vmem:[%s4143_s16 + $0x2e4] sm:$0xf]  ;;  %v3115_v31 = vld [vmem:[%s4143_s16 + $0x2d8] sm:$0xf0] }
 0x154   : > { %2130 = vmatpush.bf16.msra.mxu1 %v2830_v41  ;;  %v3379_v41 = vld [vmem:[%s4143_s16 + $0x264] sm:$0xf]  ;;  %v3126_v0 = vor.u32 %v3395_v62, %v3123_v63  ;;  %v3043_v40 = vld [vmem:[%s4143_s16 + $0x248] sm:$0xf0]  ;;  %v3035_v63 = vld [vmem:[%s4143_s16 + $0x238] sm:$0xf0] }
 0x155   : > { %2159 = vmatpush.bf16.msra.mxu2 %v2894_v28  ;;  %v3070_v28 = vor.u32 %v3381_v11, %v3067_v21  ;;  %v3377_v11 = vld [vmem:[%s4143_s16 + $0x254] sm:$0xf]  ;;  %v3051_v21 = vld [vmem:[%s4143_s16 + $0x258] sm:$0xf0]  ;;  %p3263_p6 = scmp.ne.s32.totalorder %s3617_s18, 6 }
 0x156   : > { %2188 = vmatpush.bf16.msra.mxu3 %v2958_v37  ;;  %v3131_v37 = vld [vmem:[%s4143_s16 + $0x2f8] sm:$0xf0] }
 0x157   : > { %2102 = vmatpush.bf16.msra.mxu0 %v2758_v46  ;;  %v3134_v39 = vor.u32 %v3397_v32, %v3131_v37  ;;  %v3427_v46 = vld [vmem:[%s4143_s16 + $0x3e4] sm:$0xf]  ;;  %v3118_v37 = vor.u32 %v3393_v30, %v3115_v31  ;;  %v3027_v30 = vld [vmem:[%s4143_s16 + $0x228] sm:$0xf0] }
 0x158   : > { %2131 = vmatpush.bf16.msra.mxu1 %v2822_v56  ;;  %v3254_v55 = vor.u32 %v3427_v46, %v3251_v47  ;;  %v3298_v56 = vld [vmem:[%s4141_s0 + $0xdc] sm:$0xf]  ;;  %v3407_v32 = vld [vmem:[%s4143_s16 + $0x344] sm:$0xf] }
 0x159   : > { %2160 = vmatpush.bf16.msra.mxu2 %v2886_v45  ;;  %v3062_v45 = vor.u32 %v3379_v41, %v3059_v42  ;;  %v4508_v61 = vor.u32 %v3298_v56, %v2747_v57  ;;  %v3174_v41 = vor.u32 %v3407_v32, %v3171_v38  ;;  %v3163_v56 = vld [vmem:[%s4143_s16 + $0x338] sm:$0xf0]  ;;  %v3373_v57 = vld [vmem:[%s4143_s16 + $0x234] sm:$0xf]  ;;  %v3219_v38 = vld [vmem:[%s4143_s16 + $0x3a8] sm:$0xf0] }
 0x15a   : > { %1987 = vmatmul.bf16.vlgmr.msrb.gmra.mxu0 %v4396_v33  ;;  %2189 = vmatpush.bf16.msra.mxu3 %v2950_v54  ;;  %v3302_v54 = vld [vmem:[%s4141_s0 + $0xf4] sm:$0xf0] }
 0x15b   : > { %2016 = vmatmul.bf16.vlgmr.msrb.gmra.mxu1 %v4398_v34  ;;  %2211 = vmatpush.bf16.msrb.mxu0 %v3070_v28  ;;  %v4506_v60 = vor.u32 %v3302_v54, %v2745_v53  ;;  %v3054_v28 = vor.u32 %v3377_v11, %v3051_v21  ;;  %v3107_v53 = vld [vmem:[%s4143_s16 + $0x2c8] sm:$0xf0]  ;;  %v3099_v21 = vld [vmem:[%s4143_s16 + $0x2b8] sm:$0xf0] }
 0x15c   : > { %2045 = vmatmul.bf16.vlgmr.msrb.gmra.mxu2 %v4400_v35  ;;  %2240 = vmatpush.bf16.msrb.mxu1 %v3134_v39  ;;  %v3375_v39 = vld [vmem:[%s4143_s16 + $0x244] sm:$0xf]  ;;  %v3110_v54 = vor.u32 %v3391_v48, %v3107_v53  ;;  %v3401_v53 = vld [vmem:[%s4143_s16 + $0x314] sm:$0xf] }
 0x15d   : > { %2074 = vmatmul.bf16.vlgmr.msrb.gmra.mxu3 %v4402_v36  ;;  %2269 = vmatpush.bf16.msrb.mxu2 %v3198_v12  ;;  %v3182_v12 = vor.u32 %v3409_v9, %v3179_v10  ;;  %v3046_v42 = vor.u32 %v3375_v39, %v3043_v40 }
 0x15e   : > { %2298 = vmatpush.bf16.msrb.mxu3 %v3262_v29  ;;  %v3246_v29 = vor.u32 %v3425_v24, %v3243_v27  ;;  %v3403_v24 = vld [vmem:[%s4143_s16 + $0x324] sm:$0xf] }
 0x15f   : > { %2212 = vmatpush.bf16.msrb.mxu0 %v3062_v45 }
 0x160   : > { %2241 = vmatpush.bf16.msrb.mxu1 %v3126_v0  ;;  %v3421_v0 = vld [vmem:[%s4143_s16 + $0x3b4] sm:$0xf] }
 0x161   : > { %2270 = vmatpush.bf16.msrb.mxu2 %v3190_v44  ;;  %v3235_v44 = vld [vmem:[%s4143_s16 + $0x3c8] sm:$0xf0] }
 0x162   : > { %2299 = vmatpush.bf16.msrb.mxu3 %v3254_v55  ;;  %v3238_v45 = vor.u32 %v3423_v43, %v3235_v44  ;;  %v3405_v55 = vld [vmem:[%s4143_s16 + $0x334] sm:$0xf]  ;;  %v3387_v44 = vld [vmem:[%s4143_s16 + $0x2a4] sm:$0xf] }
 0x163   : > { %2213 = vmatpush.bf16.msrb.mxu0 %v3054_v28  ;;  %v3166_v62 = vor.u32 %v3405_v55, %v3163_v56  ;;  %v3155_v28 = vld [vmem:[%s4143_s16 + $0x328] sm:$0xf0]  ;;  %v3369_v55 = vld [vmem:[%s4143_s16 + $0x214] sm:$0xf] }
 0x164   : > { %2242 = vmatpush.bf16.msrb.mxu1 %v3118_v37  ;;  %v3158_v31 = vor.u32 %v3403_v24, %v3155_v28  ;;  %v3419_v37 = vld [vmem:[%s4143_s16 + $0x3a4] sm:$0xf]  ;;  %v3139_v24 = vld [vmem:[%s4143_s16 + $0x308] sm:$0xf0] }
 0x165   : > { %2271 = vmatpush.bf16.msrb.mxu2 %v3182_v12  ;;  %v3389_v12 = vld [vmem:[%s4143_s16 + $0x2b4] sm:$0xf]  ;;  %v3222_v39 = vor.u32 %v3419_v37, %v3219_v38  ;;  %v3011_v28 = vld [vmem:[%s4143_s16 + $0x208] sm:$0xf0] }
 0x166   : > { %2300 = vmatpush.bf16.msrb.mxu3 %v3246_v29  ;;  %v3102_v27 = vor.u32 %v3389_v12, %v3099_v21  ;;  %v3371_v29 = vld [vmem:[%s4143_s16 + $0x224] sm:$0xf] }
 0x167   : > { %2214 = vmatpush.bf16.msrb.mxu0 %v3046_v42  ;;  %v3030_v32 = vor.u32 %v3371_v29, %v3027_v30  ;;  %v3399_v12 = vld [vmem:[%s4143_s16 + $0x304] sm:$0xf] }
 0x168   : > { %2243 = vmatpush.bf16.msrb.mxu1 %v3110_v54  ;;  %v3147_v54 = vld [vmem:[%s4143_s16 + $0x318] sm:$0xf0]  ;;  %v3142_v29 = vor.u32 %v3399_v12, %v3139_v24 }
 0x169   : > { %2272 = vmatpush.bf16.msrb.mxu2 %v3174_v41  ;;  %v3150_v56 = vor.u32 %v3401_v53, %v3147_v54 }
 0x16a   : > { %1992 = vmatmul.bf16.gmra.mxu0 %v4432_v14  ;;  %2301 = vmatpush.bf16.msrb.mxu3 %v3238_v45  ;;  %v3091_v45 = vld [vmem:[%s4143_s16 + $0x2a8] sm:$0xf0] }
 0x16b   : > { %2021 = vmatmul.bf16.gmra.mxu1 %v4434_v15  ;;  %v3094_v48 = vor.u32 %v3387_v44, %v3091_v45  ;;  %v3075_v44 = vld [vmem:[%s4143_s16 + $0x288] sm:$0xf0] }
 0x16c   : > { %2050 = vmatmul.bf16.gmra.mxu2 %v4436_v16  ;;  %2244 = vmatpush.bf16.msrb.mxu1 %v3102_v27  ;;  %v3367_v27 = vld [vmem:[%s4143_s16 + $0x204] sm:$0xf] }
 0x16d   : > { %2079 = vmatmul.bf16.gmra.mxu3 %v4438_v18  ;;  %2273 = vmatpush.bf16.msrb.mxu2 %v3166_v62  ;;  %v3417_v62 = vld [vmem:[%s4143_s16 + $0x394] sm:$0xf]  ;;  %v3014_v30 = vor.u32 %v3367_v27, %v3011_v28 }
 0x170   : > { %2245 = vmatpush.bf16.msrb.mxu1 %v3094_v48 }
 0x171   : > { %2274 = vmatpush.bf16.msrb.mxu2 %v3158_v31  ;;  %v3415_v31 = vld [vmem:[%s4143_s16 + $0x384] sm:$0xf] }
 0x175   : > { %2275 = vmatpush.bf16.msrb.mxu2 %v3150_v56 }
 0x179   : > { %2276 = vmatpush.bf16.msrb.mxu2 %v3142_v29 }
 0x17a   : > { %1997 = vmatmul.bf16.gmra.mxu0 %v4468_v1 }
 0x17b   : > { %2026 = vmatmul.bf16.gmra.mxu1 %v4470_v2 }
 0x17c   : > { %2055 = vmatmul.bf16.gmra.mxu2 %v4472_v3 }
 0x17d   : > { %2084 = vmatmul.bf16.gmra.mxu3 %v4474_v4 }
 0x18a   : > { %2002 = vmatmul.bf16.gmra.mxu0 %v4502_v58 }
 0x18b   : > { %2031 = vmatmul.bf16.gmra.mxu1 %v4504_v59 }
 0x18c   : > { %2060 = vmatmul.bf16.gmra.mxu2 %v4506_v60 }
 0x18d   : > { %2089 = vmatmul.bf16.gmra.mxu3 %v4508_v61 }
 0x197   : > { %v4530_v46 = vpop.f32.mrf.mxu0 }
 0x198   : > { %v4532_v47 = vpop.f32.mrf.mxu1 }
 0x19a   : > { %2103 = vmatmul.bf16.vlgmr.msra.gmra.mxu0 %v4227_v17  ;;  %v3227_v17 = vld [vmem:[%s4143_s16 + $0x3b8] sm:$0xf0] }
 0x19b   : > { %2132 = vmatmul.bf16.vlgmr.msra.gmra.mxu1 %v4232_v22  ;;  %v3038_v22 = vor.u32 %v3373_v57, %v3035_v63  ;;  %v3019_v57 = vld [vmem:[%s4143_s16 + $0x218] sm:$0xf0] }
 0x19c   : > { %2161 = vmatmul.bf16.vlgmr.msra.gmra.mxu2 %v4234_v23  ;;  %v3230_v23 = vor.u32 %v3421_v0, %v3227_v17 }
 0x19d   : > { %2190 = vmatmul.bf16.vlgmr.msra.gmra.mxu3 %v4238_v26  ;;  %2215 = vmatpush.bf16.msrb.mxu0 %v3038_v22  ;;  %v3385_v22 = vld [vmem:[%s4143_s16 + $0x294] sm:$0xf] }
 0x19e   : > { %2302 = vmatpush.bf16.msrb.mxu3 %v3230_v23  ;;  %v3083_v23 = vld [vmem:[%s4143_s16 + $0x298] sm:$0xf0] }
 0x19f   : > { %v4546_v9 = vpop.f32.mrf.mxu2  ;;  %v4550_v10 = vpop.f32.mrf.mxu0  ;;  %v3086_v21 = vor.u32 %v3385_v22, %v3083_v23  ;;  %v1902_v23 = vadd.f32 %v4532_v47, %v4530_v46 }
 0x1a0   : > { %v4548_v26 = vpop.f32.mrf.mxu3  ;;  %v4552_v11 = vpop.f32.mrf.mxu1 }
 0x1a1   : > { %2216 = vmatpush.bf16.msrb.mxu0 %v3030_v32  ;;  %v3203_v32 = vld [vmem:[%s4143_s16 + $0x388] sm:$0xf0]  ;;  %2246 = vmatpush.bf16.msrb.mxu1 %v3086_v21  ;;  %v1931_v12 = vadd.f32 %v4546_v9, %v1902_v23  ;;  %v1904_v24 = vadd.f32 %v4552_v11, %v4550_v10 }
 0x1a2   : > { %2303 = vmatpush.bf16.msrb.mxu3 %v3222_v39  ;;  %v3206_v37 = vor.u32 %v3415_v31, %v3203_v32  ;;  %v3383_v39 = vld [vmem:[%s4143_s16 + $0x284] sm:$0xf]  ;;  %v887_v31 = vld [vmem:[#allocation2 + $0x30] sm:$0xff] }
 0x1a3   : > { %v3078_v53 = vor.u32 %v3383_v39, %v3075_v44 }
 0x1a5   : > { %2247 = vmatpush.bf16.msrb.mxu1 %v3078_v53  ;;  %v889_v53 = vld [vmem:[#allocation2 + $0x58] sm:$0xff] }
 0x1a7   : > { %v4562_v40 = vpop.f32.mrf.mxu2  ;;  %v4566_v42 = vpop.f32.mrf.mxu0 }
 0x1a8   : > { %v4564_v41 = vpop.f32.mrf.mxu3  ;;  %v4568_v43 = vpop.f32.mrf.mxu1  ;;  %v1933_v28 = vadd.f32 %v4562_v40, %v1904_v24 }
 0x1aa   : > { %2108 = vmatmul.bf16.gmra.mxu0 %v4279_v13  ;;  %v3211_v13 = vld [vmem:[%s4143_s16 + $0x398] sm:$0xf0]  ;;  %v1962_v9 = vadd.f32 %v4564_v41, %v1933_v28 }
 0x1ab   : > { %2137 = vmatmul.bf16.gmra.mxu1 %v4284_v19  ;;  %v3022_v19 = vor.u32 %v3369_v55, %v3019_v57 }
 0x1ac   : > { %2166 = vmatmul.bf16.gmra.mxu2 %v4286_v20  ;;  %v3214_v20 = vor.u32 %v3417_v62, %v3211_v13 }
 0x1ad   : > { %2195 = vmatmul.bf16.gmra.mxu3 %v4290_v25  ;;  %2217 = vmatpush.bf16.msrb.mxu0 %v3022_v19 }
 0x1ae   : > { %2304 = vmatpush.bf16.msrb.mxu3 %v3214_v20 }
 0x1af   : > { %v4582_v63 = vpop.f32.mrf.mxu2  ;;  %v4586_v0 = vpop.f32.mrf.mxu0 }
 0x1b0   : > { %v4584_v25 = vpop.f32.mrf.mxu3  ;;  %v4588_v17 = vpop.f32.mrf.mxu1 }
 0x1b1   : > { %2218 = vmatpush.bf16.msrb.mxu0 %v3014_v30 }
 0x1b2   : > { %2305 = vmatpush.bf16.msrb.mxu3 %v3206_v37 }
 0x1b7   : > { %v4598_v38 = vpop.f32.mrf.mxu2  ;;  %v4604_v48 = vpop.f32.mrf.mxu0 }
 0x1b8   : > { %v4602_v45 = vpop.f32.mrf.mxu3  ;;  %v4606_v54 = vpop.f32.mrf.mxu1 }
 0x1ba   : > { %2113 = vmatmul.bf16.gmra.mxu0 %v4324_v5 }
 0x1bb   : > { %2142 = vmatmul.bf16.gmra.mxu1 %v4326_v6 }
 0x1bc   : > { %2171 = vmatmul.bf16.gmra.mxu2 %v4328_v7 }
 0x1bd   : > { %2200 = vmatmul.bf16.gmra.mxu3 %v4330_v8 }
 0x1bf   : > { %v4612_v55 = vpop.f32.mrf.mxu2  ;;  %v4616_v57 = vpop.f32.mrf.mxu0 }
 0x1c0   : > { %v4614_v56 = vpop.f32.mrf.mxu3  ;;  %v4618_v62 = vpop.f32.mrf.mxu1 }
 0x1c7   : > { %v4620_v13 = vpop.f32.mrf.mxu2  ;;  %v4624_v20 = vpop.f32.mrf.mxu0 }
 0x1c8   : > { %v4622_v19 = vpop.f32.mrf.mxu3  ;;  %v4626_v5 = vpop.f32.mrf.mxu1 }
 0x1ca   : > { %2118 = vmatmul.bf16.gmra.mxu0 %v4360_v49 }
 0x1cb   : > { %2147 = vmatmul.bf16.gmra.mxu1 %v4362_v50  ;;  %v1960_v50 = vadd.f32 %v4548_v26, %v1931_v12  ;;  %v1909_v12 = vadd.f32 %v4588_v17, %v4586_v0 }
 0x1cc   : > { %2176 = vmatmul.bf16.gmra.mxu2 %v4364_v51 }
 0x1cd   : > { %2205 = vmatmul.bf16.gmra.mxu3 %v4366_v52 }
 0x1cf   : > { %v4632_v6 = vpop.f32.mrf.mxu2  ;;  %v4636_v8 = vpop.f32.mrf.mxu0 }
 0x1d0   : > { %v4634_v7 = vpop.f32.mrf.mxu3  ;;  %v4638_v22 = vpop.f32.mrf.mxu1 }
 0x1d7   : > { %v4643_v49 = vpop.f32.mrf.mxu2  ;;  %v1988_v52 = vpop.f32.mrf.mxu0 }
 0x1d8   : > { %v4646_v51 = vpop.f32.mrf.mxu3  ;;  %v2017_v21 = vpop.f32.mrf.mxu1  ;;  %v1989_v27 = vadd.f32 %v1988_v52, %v1960_v50 }
 0x1da   : > { %2219 = vmatmul.bf16.vlgmr.msrb.gmra.mxu0 %v4396_v33  ;;  %v2018_v46 = vadd.f32 %v2017_v21, %v1989_v27  ;;  %v1907_v33 = vadd.f32 %v4568_v43, %v4566_v42  ;;  %v1938_v43 = vadd.f32 %v4598_v38, %v1909_v12  ;;  %v891_v27 = vld [vmem:[#allocation2 + $0x50] sm:$0xff]  ;;  %v1919_v12 = vadd.f32 %v4638_v22, %v4636_v8 }
 0x1db   : > { %2248 = vmatmul.bf16.vlgmr.msrb.gmra.mxu1 %v4398_v34 }
 0x1dc   : > { %2277 = vmatmul.bf16.vlgmr.msrb.gmra.mxu2 %v4400_v35  ;;  %v1936_v34 = vadd.f32 %v4582_v63, %v1907_v33  ;;  %v1967_v21 = vadd.f32 %v4602_v45, %v1938_v43 }
 0x1dd   : > { %2306 = vmatmul.bf16.vlgmr.msrb.gmra.mxu3 %v4402_v36 }
 0x1de   : > { %v1965_v37 = vadd.f32 %v4584_v25, %v1936_v34 }
 0x1df   : > { %v2046_v47 = vpop.f32.mrf.mxu2  ;;  %v1990_v30 = vpop.f32.mrf.mxu0 }
 0x1e0   : > { %v2047_v26 = vadd.f32 %v2046_v47, %v2018_v46  ;;  %v2075_v29 = vpop.f32.mrf.mxu3  ;;  %v2019_v10 = vpop.f32.mrf.mxu1  ;;  %v1991_v40 = vadd.f32 %v1990_v30, %v1962_v9  ;;  %v893_v30 = vld [vmem:[#allocation2 + $0x8] sm:$0xff] }
 0x1e2   : > { %v2076_v11 = vadd.f32 %v2075_v29, %v2047_v26  ;;  %v2020_v35 = vadd.f32 %v2019_v10, %v1991_v40  ;;  %v1914_v10 = vadd.f32 %v4618_v62, %v4616_v57 }
 0x1e4   : > { %v2327_v32 = vadd.f32 %v2076_v11, %v887_v31 }
 0x1e6   : > { %2343 = vst [vmem:[#allocation2 + $0x30] sm:$0xff] %v2327_v32  ;;  %v895_v32 = vld [vmem:[#allocation2 + $0x40] sm:$0xff] }
 0x1e7   : > { %v2048_v36 = vpop.f32.mrf.mxu2  ;;  %v1993_v44 = vpop.f32.mrf.mxu0 }
 0x1e8   : > { %v2049_v39 = vadd.f32 %v2048_v36, %v2020_v35  ;;  %v2077_v41 = vpop.f32.mrf.mxu3  ;;  %v2022_v23 = vpop.f32.mrf.mxu1  ;;  %v1994_v42 = vadd.f32 %v1993_v44, %v1965_v37 }
 0x1ea   : > { %v2078_v50 = vadd.f32 %v2077_v41, %v2049_v39  ;;  %2224 = vmatmul.bf16.gmra.mxu0 %v4432_v14  ;;  %v2023_v25 = vadd.f32 %v2022_v23, %v1994_v42  ;;  %v1912_v14 = vadd.f32 %v4606_v54, %v4604_v48  ;;  %v1943_v54 = vadd.f32 %v4620_v13, %v1914_v10 }
 0x1eb   : > { %2253 = vmatmul.bf16.gmra.mxu1 %v4434_v15 }
 0x1ec   : > { %v2329_v63 = vadd.f32 %v2078_v50, %v889_v53  ;;  %2282 = vmatmul.bf16.gmra.mxu2 %v4436_v16  ;;  %v1941_v15 = vadd.f32 %v4612_v55, %v1912_v14  ;;  %v1972_v40 = vadd.f32 %v4622_v19, %v1943_v54  ;;  %v897_v53 = vld [vmem:[#allocation2 + $0x10] sm:$0xff] }
 0x1ed   : > { %2311 = vmatmul.bf16.gmra.mxu3 %v4438_v18 }
 0x1ee   : > { %2345 = vst [vmem:[#allocation2 + $0x58] sm:$0xff] %v2329_v63  ;;  %v1970_v9 = vadd.f32 %v4614_v56, %v1941_v15 }
 0x1ef   : > { %v2051_v52 = vpop.f32.mrf.mxu2  ;;  %v1995_v17 = vpop.f32.mrf.mxu0 }
 0x1f0   : > { %v2052_v24 = vadd.f32 %v2051_v52, %v2023_v25  ;;  %v2080_v0 = vpop.f32.mrf.mxu3  ;;  %v2024_v28 = vpop.f32.mrf.mxu1  ;;  %v1996_v46 = vadd.f32 %v1995_v17, %v1967_v21  ;;  %v899_v25 = vld [vmem:[#allocation2 + $0x60] sm:$0xff] }
 0x1f2   : > { %v2081_v38 = vadd.f32 %v2080_v0, %v2052_v24  ;;  %v2025_v18 = vadd.f32 %v2024_v28, %v1996_v46 }
 0x1f4   : > { %v2331_v16 = vadd.f32 %v2081_v38, %v891_v27 }
 0x1f6   : > { %2347 = vst [vmem:[#allocation2 + $0x50] sm:$0xff] %v2331_v16 }
 0x1f7   : > { %v2053_v47 = vpop.f32.mrf.mxu2  ;;  %v1998_v29 = vpop.f32.mrf.mxu0 }
 0x1f8   : > { %v2054_v26 = vadd.f32 %v2053_v47, %v2025_v18  ;;  %v2082_v45 = vpop.f32.mrf.mxu3  ;;  %v2027_v31 = vpop.f32.mrf.mxu1  ;;  %v1999_v48 = vadd.f32 %v1998_v29, %v1970_v9 }
 0x1fa   : > { %v2083_v33 = vadd.f32 %v2082_v45, %v2054_v26  ;;  %2229 = vmatmul.bf16.gmra.mxu0 %v4468_v1  ;;  %v2028_v56 = vadd.f32 %v2027_v31, %v1999_v48  ;;  %v1917_v1 = vadd.f32 %v4626_v5, %v4624_v20  ;;  %v1948_v5 = vadd.f32 %v4643_v49, %v1919_v12 }
 0x1fb   : > { %2258 = vmatmul.bf16.gmra.mxu1 %v4470_v2 }
 0x1fc   : > { %v2333_v55 = vadd.f32 %v2083_v33, %v893_v30  ;;  %2287 = vmatmul.bf16.gmra.mxu2 %v4472_v3  ;;  %v1946_v2 = vadd.f32 %v4632_v6, %v1917_v1  ;;  %v1977_v43 = vadd.f32 %v4646_v51, %v1948_v5 }
 0x1fd   : > { %2316 = vmatmul.bf16.gmra.mxu3 %v4474_v4 }
 0x1fe   : > { %2349 = vst [vmem:[#allocation2 + $0x8] sm:$0xff] %v2333_v55  ;;  %v1975_v39 = vadd.f32 %v4634_v7, %v1946_v2 }
 0x1ff   : > { %v2056_v11 = vpop.f32.mrf.mxu2  ;;  %v2000_v62 = vpop.f32.mrf.mxu0 }
 0x200   : > { %v2057_v34 = vadd.f32 %v2056_v11, %v2028_v56  ;;  %v2085_v57 = vpop.f32.mrf.mxu3  ;;  %v2029_v35 = vpop.f32.mrf.mxu1  ;;  %v2001_v36 = vadd.f32 %v2000_v62, %v1972_v40 }
 0x202   : > { %v2086_v13 = vadd.f32 %v2085_v57, %v2057_v34  ;;  %v2030_v4 = vadd.f32 %v2029_v35, %v2001_v36 }
 0x204   : > { %v2335_v3 = vadd.f32 %v2086_v13, %v895_v32 }
 0x206   : > { %2351 = vst [vmem:[#allocation2 + $0x40] sm:$0xff] %v2335_v3 }
 0x207   : > { %v2058_v37 = vpop.f32.mrf.mxu2  ;;  %v2003_v44 = vpop.f32.mrf.mxu0 }
 0x208   : > { %v2059_v41 = vadd.f32 %v2058_v37, %v2030_v4  ;;  %v2087_v19 = vpop.f32.mrf.mxu3  ;;  %v2032_v23 = vpop.f32.mrf.mxu1  ;;  %v2004_v20 = vadd.f32 %v2003_v44, %v1975_v39 }
 0x20a   : > { %v2088_v50 = vadd.f32 %v2087_v19, %v2059_v41  ;;  %2234 = vmatmul.bf16.gmra.mxu0 %v4502_v58  ;;  %v2033_v7 = vadd.f32 %v2032_v23, %v2004_v20 }
 0x20b   : > { %2263 = vmatmul.bf16.gmra.mxu1 %v4504_v59 }
 0x20c   : > { %v2337_v6 = vadd.f32 %v2088_v50, %v897_v53  ;;  %2292 = vmatmul.bf16.gmra.mxu2 %v4506_v60 }
 0x20d   : > { %2321 = vmatmul.bf16.gmra.mxu3 %v4508_v61  ;;  %v901_v61 = vld [vmem:[#allocation2 + $0x78] sm:$0xff] }
 0x20e   : > { %2353 = vst [vmem:[#allocation2 + $0x10] sm:$0xff] %v2337_v6 }
 0x20f   : > { %v2061_v42 = vpop.f32.mrf.mxu2  ;;  %v2005_v22 = vpop.f32.mrf.mxu0 }
 0x210   : > { %v2062_v63 = vadd.f32 %v2061_v42, %v2033_v7  ;;  %v2090_v8 = vpop.f32.mrf.mxu3  ;;  %v2034_v52 = vpop.f32.mrf.mxu1  ;;  %v2006_v21 = vadd.f32 %v2005_v22, %v1977_v43  ;;  %v888_v7 = vld [vmem:[#allocation2] sm:$0xff] }
 0x212   : > { %v2091_v58 = vadd.f32 %v2090_v8, %v2062_v63  ;;  %v2035_v24 = vadd.f32 %v2034_v52, %v2006_v21 }
 0x214   : > { %v2339_v49 = vadd.f32 %v2091_v58, %v899_v25 }
 0x216   : > { %2355 = vst [vmem:[#allocation2 + $0x60] sm:$0xff] %v2339_v49 }
 0x217   : > { %v2063_v59 = vpop.f32.mrf.mxu2  ;;  %v2104_v17 = vpop.f32.mrf.mxu0 }
 0x218   : > { %v2064_v0 = vadd.f32 %v2063_v59, %v2035_v24  ;;  %v2092_v60 = vpop.f32.mrf.mxu3  ;;  %v2133_v27 = vpop.f32.mrf.mxu1 }
 0x219   : > { %v2134_v36 = vadd.f32 %v2133_v27, %v2104_v17 }
 0x21a   : > { %v2093_v28 = vadd.f32 %v2092_v60, %v2064_v0  ;;  %v890_v0 = vld [vmem:[#allocation2 + $0x18] sm:$0xff] }
 0x21c   : > { %v2341_v14 = vadd.f32 %v2093_v28, %v901_v61 }
 0x21e   : > { %2357 = vst [vmem:[#allocation2 + $0x78] sm:$0xff] %v2341_v14 }
 0x21f   : > { %v2162_v51 = vpop.f32.mrf.mxu2  ;;  %v2106_v46 = vpop.f32.mrf.mxu0 }
 0x220   : > { %v2191_v38 = vpop.f32.mrf.mxu3  ;;  %v2135_v15 = vpop.f32.mrf.mxu1  ;;  %v2163_v2 = vadd.f32 %v2162_v51, %v2134_v36 }
 0x221   : > { %v2136_v19 = vadd.f32 %v2135_v15, %v2106_v46 }
 0x222   : > { %v2192_v4 = vadd.f32 %v2191_v38, %v2163_v2 }
 0x227   : > { %v2164_v16 = vpop.f32.mrf.mxu2  ;;  %v2109_v47 = vpop.f32.mrf.mxu0 }
 0x228   : > { %v2193_v18 = vpop.f32.mrf.mxu3  ;;  %v2138_v9 = vpop.f32.mrf.mxu1  ;;  %v2165_v53 = vadd.f32 %v2164_v16, %v2136_v19 }
 0x229   : > { %v2139_v43 = vadd.f32 %v2138_v9, %v2109_v47  ;;  %v892_v47 = vld [vmem:[#allocation2 + $0x68] sm:$0xff] }
 0x22a   : > { %v2194_v50 = vadd.f32 %v2193_v18, %v2165_v53 }
 0x22f   : > { %v2167_v26 = vpop.f32.mrf.mxu2  ;;  %v2111_v29 = vpop.f32.mrf.mxu0 }
 0x230   : > { %v2196_v45 = vpop.f32.mrf.mxu3  ;;  %v2140_v30 = vpop.f32.mrf.mxu1  ;;  %v2168_v22 = vadd.f32 %v2167_v26, %v2139_v43 }
 0x231   : > { %v2141_v17 = vadd.f32 %v2140_v30, %v2111_v29 }
 0x232   : > { %v2197_v21 = vadd.f32 %v2196_v45, %v2168_v22 }
 0x237   : > { %v2169_v31 = vpop.f32.mrf.mxu2  ;;  %v2114_v33 = vpop.f32.mrf.mxu0 }
 0x238   : > { %v2198_v10 = vpop.f32.mrf.mxu3  ;;  %v2143_v48 = vpop.f32.mrf.mxu1  ;;  %v2170_v28 = vadd.f32 %v2169_v31, %v2141_v17 }
 0x239   : > { %v2144_v26 = vadd.f32 %v2143_v48, %v2114_v33 }
 0x23a   : > { %v2199_v46 = vadd.f32 %v2198_v10, %v2170_v28  ;;  %v900_v28 = vld [vmem:[#allocation2 + $0x70] sm:$0xff] }
 0x23f   : > { %v2172_v54 = vpop.f32.mrf.mxu2  ;;  %v4694_v56 = vpop.f32.mrf.mxu0 }
 0x240   : > { %v4692_v55 = vpop.f32.mrf.mxu3  ;;  %v4696_v11 = vpop.f32.mrf.mxu1  ;;  %v2173_v2 = vadd.f32 %v2172_v54, %v2144_v26 }
 0x241   : > { %v2146_v53 = vadd.f32 %v4696_v11, %v4694_v56 }
 0x242   : > { %v2202_v31 = vadd.f32 %v4692_v55, %v2173_v2 }
 0x247   : > { %v4698_v40 = vpop.f32.mrf.mxu2  ;;  %v4702_v57 = vpop.f32.mrf.mxu0 }
 0x248   : > { %v4700_v34 = vpop.f32.mrf.mxu3  ;;  %v4704_v62 = vpop.f32.mrf.mxu1  ;;  %v2175_v33 = vadd.f32 %v4698_v40, %v2146_v53 }
 0x249   : > { %v2149_v43 = vadd.f32 %v4704_v62, %v4702_v57 }
 0x24f   : > { %v4706_v32 = vpop.f32.mrf.mxu2  ;;  %v4710_v1 = vpop.f32.mrf.mxu0 }
 0x250   : > { %v4708_v35 = vpop.f32.mrf.mxu3  ;;  %v4712_v13 = vpop.f32.mrf.mxu1  ;;  %v2178_v11 = vadd.f32 %v4706_v32, %v2149_v43 }
 0x257   : > { %v4714_v3 = vpop.f32.mrf.mxu2  ;;  %v2220_v39 = vpop.f32.mrf.mxu0 }
 0x258   : > { %v4716_v37 = vpop.f32.mrf.mxu3  ;;  %v2249_v41 = vpop.f32.mrf.mxu1  ;;  %v2221_v44 = vadd.f32 %v2220_v39, %v2192_v4 }
 0x25a   : > { %v2250_v23 = vadd.f32 %v2249_v41, %v2221_v44  ;;  %v894_v44 = vld [vmem:[#allocation2 + $0x48] sm:$0xff] }
 0x25f   : > { %v2278_v12 = vpop.f32.mrf.mxu2  ;;  %v2222_v6 = vpop.f32.mrf.mxu0 }
 0x260   : > { %v2279_v20 = vadd.f32 %v2278_v12, %v2250_v23  ;;  %v2307_v5 = vpop.f32.mrf.mxu3  ;;  %v2251_v42 = vpop.f32.mrf.mxu1  ;;  %v2223_v8 = vadd.f32 %v2222_v6, %v2194_v50 }
 0x262   : > { %v2308_v63 = vadd.f32 %v2307_v5, %v2279_v20  ;;  %v2252_v52 = vadd.f32 %v2251_v42, %v2223_v8  ;;  %v2204_v20 = vadd.f32 %v4700_v34, %v2175_v33 }
 0x264   : > { %v2328_v25 = vadd.f32 %v2308_v63, %v888_v7  ;;  %v896_v7 = vld [vmem:[#allocation2 + $0x20] sm:$0xff] }
 0x266   : > { %2344 = vst [vmem:[#allocation2] sm:$0xff] %v2328_v25  ;;  %v2207_v25 = vadd.f32 %v4708_v35, %v2178_v11 }
 0x267   : > { %v2280_v58 = vpop.f32.mrf.mxu2  ;;  %v2225_v59 = vpop.f32.mrf.mxu0 }
 0x268   : > { %v2281_v49 = vadd.f32 %v2280_v58, %v2252_v52  ;;  %v2309_v24 = vpop.f32.mrf.mxu3  ;;  %v2254_v60 = vpop.f32.mrf.mxu1  ;;  %v2226_v27 = vadd.f32 %v2225_v59, %v2197_v21  ;;  %v898_v21 = vld [vmem:[#allocation2 + $0x38] sm:$0xff] }
 0x26a   : > { %v2310_v61 = vadd.f32 %v2309_v24, %v2281_v49  ;;  %v2255_v51 = vadd.f32 %v2254_v60, %v2226_v27  ;;  %v2151_v49 = vadd.f32 %v4712_v13, %v4710_v1 }
 0x26c   : > { %v2330_v14 = vadd.f32 %v2310_v61, %v890_v0  ;;  %v2180_v62 = vadd.f32 %v4714_v3, %v2151_v49 }
 0x26e   : > { %2346 = vst [vmem:[#allocation2 + $0x18] sm:$0xff] %v2330_v14  ;;  %v2209_v17 = vadd.f32 %v4716_v37, %v2180_v62 }
 0x26f   : > { %v2283_v38 = vpop.f32.mrf.mxu2  ;;  %v2227_v18 = vpop.f32.mrf.mxu0 }
 0x270   : > { %v2284_v15 = vadd.f32 %v2283_v38, %v2255_v51  ;;  %v2312_v16 = vpop.f32.mrf.mxu3  ;;  %v2256_v9 = vpop.f32.mrf.mxu1  ;;  %v2228_v36 = vadd.f32 %v2227_v18, %v2199_v46 }
 0x272   : > { %v2313_v45 = vadd.f32 %v2312_v16, %v2284_v15  ;;  %v2257_v29 = vadd.f32 %v2256_v9, %v2228_v36  ;;  %v902_v16 = vld [vmem:[#allocation2 + $0x28] sm:$0xff] }
 0x274   : > { %v2332_v4 = vadd.f32 %v2313_v45, %v892_v47 }
 0x276   : > { %2348 = vst [vmem:[#allocation2 + $0x68] sm:$0xff] %v2332_v4 }
 0x277   : > { %v2285_v30 = vpop.f32.mrf.mxu2  ;;  %v2230_v19 = vpop.f32.mrf.mxu0 }
 0x278   : > { %v2286_v39 = vadd.f32 %v2285_v30, %v2257_v29  ;;  %v2314_v41 = vpop.f32.mrf.mxu3  ;;  %v2259_v10 = vpop.f32.mrf.mxu1  ;;  %v2231_v12 = vadd.f32 %v2230_v19, %v2202_v31 }
 0x27a   : > { %v2315_v23 = vadd.f32 %v2314_v41, %v2286_v39  ;;  %v2260_v54 = vadd.f32 %v2259_v10, %v2231_v12 }
 0x27c   : > { %v2334_v48 = vadd.f32 %v2315_v23, %v894_v44 }
 0x27e   : > { %2350 = vst [vmem:[#allocation2 + $0x48] sm:$0xff] %v2334_v48 }
 0x27f   : > { %v2288_v50 = vpop.f32.mrf.mxu2  ;;  %v2232_v6 = vpop.f32.mrf.mxu0 }
 0x280   : > { %v2289_v5 = vadd.f32 %v2288_v50, %v2260_v54  ;;  %v2317_v55 = vpop.f32.mrf.mxu3  ;;  %v2261_v42 = vpop.f32.mrf.mxu1  ;;  %v2233_v56 = vadd.f32 %v2232_v6, %v2204_v20 }
 0x282   : > { %v2318_v63 = vadd.f32 %v2317_v55, %v2289_v5  ;;  %v2262_v40 = vadd.f32 %v2261_v42, %v2233_v56 }
 0x284   : > { %v2336_v8 = vadd.f32 %v2318_v63, %v896_v7 }
 0x286   : > { %2352 = vst [vmem:[#allocation2 + $0x20] sm:$0xff] %v2336_v8 }
 0x287   : > { %v2290_v22 = vpop.f32.mrf.mxu2  ;;  %v2235_v58 = vpop.f32.mrf.mxu0 }
 0x288   : > { %v2291_v52 = vadd.f32 %v2290_v22, %v2262_v40  ;;  %v2319_v34 = vpop.f32.mrf.mxu3  ;;  %v2236_v59 = vadd.f32 %v2235_v58, %v2207_v25  ;;  %v2264_v57 = vpop.f32.mrf.mxu1 }
 0x28a   : > { %v2320_v24 = vadd.f32 %v2319_v34, %v2291_v52  ;;  %v2265_v32 = vadd.f32 %v2264_v57, %v2236_v59 }
 0x28c   : > { %v2338_v0 = vadd.f32 %v2320_v24, %v898_v21 }
 0x28e   : > { %2354 = vst [vmem:[#allocation2 + $0x38] sm:$0xff] %v2338_v0 }
 0x28f   : > { %v2293_v60 = vpop.f32.mrf.mxu2  ;;  %v2237_v27 = vpop.f32.mrf.mxu0 }
 0x290   : > { %v2294_v61 = vadd.f32 %v2293_v60, %v2265_v32  ;;  %v2322_v35 = vpop.f32.mrf.mxu3  ;;  %v2238_v51 = vadd.f32 %v2237_v27, %v2209_v17  ;;  %v2266_v46 = vpop.f32.mrf.mxu1 }
 0x292   : > { %v2323_v14 = vadd.f32 %v2322_v35, %v2294_v61  ;;  %v2267_v1 = vadd.f32 %v2266_v46, %v2238_v51 }
 0x294   : > { %v2340_v38 = vadd.f32 %v2323_v14, %v900_v28 }
 0x296   : > { %2356 = vst [vmem:[#allocation2 + $0x70] sm:$0xff] %v2340_v38 }
 0x297   : > { %v2295_v13 = vpop.f32.mrf.mxu2 }
 0x298   : > { %v2296_v15 = vadd.f32 %v2295_v13, %v2267_v1  ;;  %v2324_v3 = vpop.f32.mrf.mxu3 }
 0x29a   : > { %v2325_v18 = vadd.f32 %v2324_v3, %v2296_v15  ;;  %2362 = sbr.rel (%p3263_p6) target bundleno = 694 (0x2b6), region = 101 }
 0x29c   : > { %v2342_v47 = vadd.f32 %v2325_v18, %v902_v16 }
 0x29e   : > { %2358 = vst [vmem:[#allocation2 + $0x28] sm:$0xff] %v2342_v47 }
 0x29f   : > { %v2363_v37 = vld [vmem:[#allocation2 + $0x30] sm:$0xff]  ;;  %v2379_v9 = vld [vmem:[%s863_s8] sm:$0x3]  ;;  %v2365_v2 = vld [vmem:[#allocation2 + $0x58] sm:$0xff] }
 0x2a0   : > { %v2364_v26 = vld [vmem:[#allocation2] sm:$0xff]  ;;  %v2381_v45 = vperm.slane %v2379_v9, 0  ;;  %v2382_v36 = vperm.slane %v2379_v9, 1  ;;  %v2366_v4 = vld [vmem:[#allocation2 + $0x18] sm:$0xff]  ;;  %v2367_v29 = vld [vmem:[#allocation2 + $0x50] sm:$0xff] }
 0x2a1   : > { %v2368_v30 = vld [vmem:[#allocation2 + $0x68] sm:$0xff]  ;;  %v2371_v12 = vld [vmem:[#allocation2 + $0x40] sm:$0xff]  ;;  %v2373_v6 = vld [vmem:[#allocation2 + $0x10] sm:$0xff] }
 0x2a2   : > { %v2369_v31 = vld [vmem:[#allocation2 + $0x8] sm:$0xff]  ;;  %v2385_v39 = vadd.f32 %v2381_v45, %v2363_v37  ;;  %v2386_v41 = vadd.f32 %v2382_v36, %v2364_v26  ;;  %v2387_v19 = vadd.f32 %v2381_v45, %v2365_v2  ;;  %v2388_v44 = vadd.f32 %v2382_v36, %v2366_v4  ;;  %v2372_v20 = vld [vmem:[#allocation2 + $0x20] sm:$0xff]  ;;  %v2374_v43 = vld [vmem:[#allocation2 + $0x38] sm:$0xff] }
 0x2a3   : > { %v2370_v10 = vld [vmem:[#allocation2 + $0x48] sm:$0xff]  ;;  %v2389_v53 = vadd.f32 %v2381_v45, %v2367_v29  ;;  %v2390_v23 = vadd.f32 %v2382_v36, %v2368_v30  ;;  %v2391_v50 = vadd.f32 %v2381_v45, %v2369_v31  ;;  %v2393_v42 = vadd.f32 %v2381_v45, %v2371_v12  ;;  %v2375_v11 = vld [vmem:[#allocation2 + $0x60] sm:$0xff]  ;;  %v2376_v22 = vld [vmem:[#allocation2 + $0x70] sm:$0xff] }
 0x2a4   : > { %v2401_v33 = vmax.f32 %v2385_v39, 0.0  ;;  %v2402_v48 = vmax.f32 %v2386_v41, 0.0  ;;  %v2403_v54 = vmax.f32 %v2387_v19, 0.0  ;;  %v2404_v5 = vmax.f32 %v2388_v44, 0.0  ;;  %v2377_v34 = vld [vmem:[#allocation2 + $0x78] sm:$0xff] }
 0x2a5   : > { %v2392_v55 = vadd.f32 %v2382_v36, %v2370_v10  ;;  %v2405_v7 = vmax.f32 %v2389_v53, 0.0  ;;  %v2406_v63 = vmax.f32 %v2390_v23, 0.0  ;;  %v2394_v56 = vadd.f32 %v2382_v36, %v2372_v20  ;;  %v2378_v49 = vld [vmem:[#allocation2 + $0x28] sm:$0xff] }
 0x2a6   : > { %2417 = vst [vmem:[%s4145_s14] sm:$0xff] %v2401_v33  ;;  %v2407_v8 = vmax.f32 %v2391_v50, 0.0  ;;  %v2395_v40 = vadd.f32 %v2381_v45, %v2373_v6  ;;  %v2396_v52 = vadd.f32 %v2382_v36, %v2374_v43  ;;  %v2409_v58 = vmax.f32 %v2393_v42, 0.0 }
 0x2a7   : > { %2418 = vst [vmem:[%s4145_s14 + $0x8] sm:$0xff] %v2402_v48  ;;  %v2408_v25 = vmax.f32 %v2392_v55, 0.0  ;;  %v2397_v21 = vadd.f32 %v2381_v45, %v2375_v11  ;;  %v2410_v24 = vmax.f32 %v2394_v56, 0.0  ;;  %v2398_v59 = vadd.f32 %v2382_v36, %v2376_v22 }
 0x2a8   : > { %2419 = vst [vmem:[%s4145_s14 + $0x10] sm:$0xff] %v2403_v54  ;;  %v2411_v57 = vmax.f32 %v2395_v40, 0.0  ;;  %v2399_v62 = vadd.f32 %v2381_v45, %v2377_v34  ;;  %v2412_v0 = vmax.f32 %v2396_v52, 0.0  ;;  %v2400_v32 = vadd.f32 %v2382_v36, %v2378_v49 }
 0x2a9   : > { %2420 = vst [vmem:[%s4145_s14 + $0x18] sm:$0xff] %v2404_v5  ;;  %v2413_v60 = vmax.f32 %v2397_v21, 0.0  ;;  %v2414_v17 = vmax.f32 %v2398_v59, 0.0 }
 0x2aa   : > { %2421 = vst [vmem:[%s4145_s14 + $0x20] sm:$0xff] %v2405_v7  ;;  %v2415_v61 = vmax.f32 %v2399_v62, 0.0  ;;  %v2416_v35 = vmax.f32 %v2400_v32, 0.0 }
 0x2ab   : > { %2422 = vst [vmem:[%s4145_s14 + $0x28] sm:$0xff] %v2406_v63 }
 0x2ac   : > { %2423 = vst [vmem:[%s4145_s14 + $0x30] sm:$0xff] %v2407_v8 }
 0x2ad   : > { %2424 = vst [vmem:[%s4145_s14 + $0x38] sm:$0xff] %v2408_v25 }
 0x2ae   : > { %2425 = vst [vmem:[%s4145_s14 + $0x40] sm:$0xff] %v2409_v58 }
 0x2af   : > { %2426 = vst [vmem:[%s4145_s14 + $0x48] sm:$0xff] %v2410_v24 }
 0x2b0   : > { %2427 = vst [vmem:[%s4145_s14 + $0x50] sm:$0xff] %v2411_v57 }
 0x2b1   : > { %2428 = vst [vmem:[%s4145_s14 + $0x58] sm:$0xff] %v2412_v0 }
 0x2b2   : > { %2429 = vst [vmem:[%s4145_s14 + $0x60] sm:$0xff] %v2413_v60 }
 0x2b3   : > { %2430 = vst [vmem:[%s4145_s14 + $0x68] sm:$0xff] %v2414_v17 }
 0x2b4   : > { %2431 = vst [vmem:[%s4145_s14 + $0x70] sm:$0xff] %v2415_v61 }
 0x2b5   : > { %2432 = vst [vmem:[%s4145_s14 + $0x78] sm:$0xff] %v2416_v35 }
 0x2b6 PF: > { %2439 = sbr.rel (!%p3776_p13) target bundleno = 721 (0x2d1), region = 105  ;;  %s4837_s18 = sld [smem:[#allocation6_spill]] (%p3776_p13)  ;;  %v2458_v27 = vld [vmem:[%s4145_s14] sm:$0xff] (%p3776_p13)  ;;  %v2460_v28 = vld [vmem:[%s4145_s14 + $0x8] sm:$0xff] (%p3776_p13)  ;;  %v2462_v14 = vld [vmem:[%s4145_s14 + $0x10] sm:$0xff] (%p3776_p13) }
 0x2b7   : > { %s4838_s20 = sld [smem:[#allocation10_spill]] (%p3776_p13)  ;;  %v2464_v51 = vld [vmem:[%s4145_s14 + $0x18] sm:$0xff] (%p3776_p13)  ;;  %v2466_v38 = vld [vmem:[%s4145_s14 + $0x20] sm:$0xff] (%p3776_p13)  ;;  %v2468_v46 = vld [vmem:[%s4145_s14 + $0x28] sm:$0xff] (%p3776_p13) }
 0x2b8   : > { %v2470_v1 = vld [vmem:[%s4145_s14 + $0x30] sm:$0xff] (%p3776_p13)  ;;  %v2472_v13 = vld [vmem:[%s4145_s14 + $0x38] sm:$0xff] (%p3776_p13)  ;;  %v2474_v15 = vld [vmem:[%s4145_s14 + $0x40] sm:$0xff] (%p3776_p13) }
 0x2b9   : > { %v2476_v16 = vld [vmem:[%s4145_s14 + $0x48] sm:$0xff] (%p3776_p13)  ;;  %v2478_v3 = vld [vmem:[%s4145_s14 + $0x50] sm:$0xff] (%p3776_p13)  ;;  %v2480_v18 = vld [vmem:[%s4145_s14 + $0x58] sm:$0xff] (%p3776_p13) }
 0x2ba   : > { %v2482_v47 = vld [vmem:[%s4145_s14 + $0x60] sm:$0xff] (%p3776_p13)  ;;  %v2484_v37 = vld [vmem:[%s4145_s14 + $0x68] sm:$0xff] (%p3776_p13) }
 0x2bb   : > { %v2486_v9 = vld [vmem:[%s4145_s14 + $0x70] sm:$0xff] }
 0x2bc   : > { %s3433_s19 = smul.u32 48, %s4837_s18  ;;  %v2488_v26 = vld [vmem:[%s4145_s14 + $0x78] sm:$0xff] }
 0x2be   : > { %s2443_s5 = sadd.s32 %s3433_s19, %s4131_s30 }
 0x2bf   : > { %s3268_s25 = sshll.u32 %s2443_s5, 3 }
 0x2c0   : > { %s2445_s29 = scalar_lea.vmem %s4838_s20, %s3268_s25 }
 0x2c1   : > { %2459 = vst [vmem:[%s2445_s29] sm:$0xff] %v2458_v27 }
 0x2c2   : > { %2461 = vst [vmem:[%s2445_s29 + $0x8] sm:$0xff] %v2460_v28 }
 0x2c3   : > { %2463 = vst [vmem:[%s2445_s29 + $0x30] sm:$0xff] %v2462_v14 }
 0x2c4   : > { %2465 = vst [vmem:[%s2445_s29 + $0x38] sm:$0xff] %v2464_v51 }
 0x2c5   : > { %2467 = vst [vmem:[%s2445_s29 + $0x60] sm:$0xff] %v2466_v38 }
 0x2c6   : > { %2469 = vst [vmem:[%s2445_s29 + $0x68] sm:$0xff] %v2468_v46 }
 0x2c7   : > { %2471 = vst [vmem:[%s2445_s29 + $0x90] sm:$0xff] %v2470_v1 }
 0x2c8   : > { %2473 = vst [vmem:[%s2445_s29 + $0x98] sm:$0xff] %v2472_v13 }
 0x2c9   : > { %2475 = vst [vmem:[%s2445_s29 + $0xc0] sm:$0xff] %v2474_v15 }
 0x2ca   : > { %2477 = vst [vmem:[%s2445_s29 + $0xc8] sm:$0xff] %v2476_v16 }
 0x2cb   : > { %2479 = vst [vmem:[%s2445_s29 + $0xf0] sm:$0xff] %v2478_v3 }
 0x2cc   : > { %2481 = vst [vmem:[%s2445_s29 + $0xf8] sm:$0xff] %v2480_v18 }
 0x2cd   : > { %2483 = vst [vmem:[%s2445_s29 + $0x120] sm:$0xff] %v2482_v47 }
 0x2ce   : > { %2485 = vst [vmem:[%s2445_s29 + $0x128] sm:$0xff] %v2484_v37 }
 0x2cf   : > { %2487 = vst [vmem:[%s2445_s29 + $0x150] sm:$0xff] %v2486_v9 }
 0x2d0   : > { %2489 = vst [vmem:[%s2445_s29 + $0x158] sm:$0xff] %v2488_v26 }
 0x2d1 PF: > { %s13_s24 = sadd.s32 1, %s3641_s24   ;;  %s4840_s4 = sld [smem:[#allocation7_spill]] }
 0x2d2   : > { %p4777_p7 = scmp.ge.s32.totalorder %s13_s24, 44   ;;  %s4841_s6 = sld [smem:[#allocation8_spill]] }
 0x2d3   : > { %s4842_s12 = smov %s3597_s13  ;;  %s4843_s13 = smov %s3774_s7 }
 0x2d4   : > { %s4844_s14 = smov %s3605_s15  ;;  %s4845_s15 = smov %s3761_s9 }
 0x2d5   : > { %s4846_s16 = smov %s3613_s17  ;;  %s4847_s17 = smov %s3771_s3 }
 0x2d6   : > { %s4848_s18 = smov %s3629_s21  ;;  %s4849_s19 = smov %s3633_s22 }
 0x2d7   : > { %s4850_s20 = smov %s3637_s23  ;;  %s4851_s21 = smov %s4840_s4 }
 0x2d8   : > { %s4852_s22 = smov %s4841_s6  ;;  %s4853_s23 = smov %s4863_s28 }
 0x2d9   :  { %12 = sbr.rel (!%p4777_p7) target bundleno = 10 (0xa), region = 170 }

</bundles_post_ra>
